<compile_context>
chip_gen: v7x
topology: tpu7x:2x2x1
jax: 0.10.0
libtpu: 0.0.40
codegen_flags: <defaults>
</compile_context>

<pallas_src>
import jax
import jax.numpy as jnp
from jax import lax
from jax.experimental import pallas as pl
from jax.experimental.pallas import tpu as pltpu


_EPS = 1e-5
_LOGIT_PAD = 128                      # lane-dense padding for the 10 logits
_VMEM_LIMIT = 48 * 1024 * 1024        # <= v7x physical (64 MiB), fine on v5e/v6e


# ----------------------------------------------------------------------------
# Wrapper-side im2col: 3x3, pad=1 patches, tap-major / channel-minor ordering.
# ----------------------------------------------------------------------------
def _im2col_3x3(x):
    """x: (N,H,W,C) -> (N*H*W, 9*C); column block t=dy*3+dx = x_pad[y+dy, x+dx, :]."""
    N, H, W, C = x.shape
    xp = jnp.pad(x, ((0, 0), (1, 1), (1, 1), (0, 0)))
    taps = [xp[:, dy:dy + H, dx:dx + W, :] for dy in range(3) for dx in range(3)]
    return jnp.concatenate(taps, axis=-1).reshape(N * H * W, 9 * C)


def _pick_block_n(n):
    """Images per grid step: largest divisor of n in {8,4,2} that keeps grid >= 2."""
    for b in (8, 4, 2):
        if n % b == 0 and n // b >= 2:
            return b
    return 1


# ----------------------------------------------------------------------------
# Fused Conv3x3 (BN folded) + ReLU + MaxPool2x2: single im2col matmul kernel
# ----------------------------------------------------------------------------
def _conv_pool_kernel(x_ref, w_ref, shift_ref, o_ref, acc_ref):
    # x_ref:     (B*H*W, 9*Cin)     bf16   im2col patches for B whole images
    # w_ref:     (9*Cin, Cout)      bf16   BN scale folded into the weights
    # shift_ref: (1, Cout)          f32    BN shift (+ conv bias)
    # o_ref:     (B, H//2, W//2, Cout) bf16 pooled output
    # acc_ref:   (B*H*W, Cout)      f32    conv output scratch (written once)
    B, Hh, Wh, _ = o_ref.shape
    W = 2 * Wh
    HW = 4 * Hh * Wh

    # One MXU matmul for the whole block: every tap packed along K, so no
    # contraction lanes are wasted on padded channels.
    acc_ref[...] = jnp.dot(x_ref[...], w_ref[...],
                           preferred_element_type=jnp.float32)

    # Fused 2x2/2 max-pool + shift + ReLU.  Row r of acc is conv output pixel
    # (y = r // W, x = r % W) of image r // HW.  relu(max(.)+s) == max(relu(.+s)).
    shift = shift_ref[...]                                     # (1, Cout)
    for n in range(B):
        base = n * HW
        for i in range(Hh):
            r0 = base + (2 * i) * W
            r1 = base + (2 * i + 1) * W
            m = jnp.maximum(
                jnp.maximum(acc_ref[pl.ds(r0, Wh, stride=2), :],
                            acc_ref[pl.ds(r0 + 1, Wh, stride=2), :]),
                jnp.maximum(acc_ref[pl.ds(r1, Wh, stride=2), :],
                            acc_ref[pl.ds(r1 + 1, Wh, stride=2), :]),
            )                                                  # (Wh, Cout)
            o_ref[n, i] = jnp.maximum(m + shift, 0.0).astype(o_ref.dtype)


def conv_bn_relu_pool(x_nhwc, wmat, shift, block_n):
    """x_nhwc: (N,H,W,Cin) bf16; wmat: (9*Cin,Cout) bf16; shift: (1,Cout) f32."""
    N, H, W, Cin = x_nhwc.shape
    K = 9 * Cin
    Cout = wmat.shape[1]
    Hh, Wh = H // 2, W // 2
    HW = H * W
    B = min(block_n, N)
    patches = _im2col_3x3(x_nhwc)                              # (N*HW, K)
    return pl.pallas_call(
        _conv_pool_kernel,
        out_shape=jax.ShapeDtypeStruct((N, Hh, Wh, Cout), jnp.bfloat16),
        grid_spec=pltpu.PrefetchScalarGridSpec(
            num_scalar_prefetch=0,
            grid=(pl.cdiv(N, B),),
            in_specs=[
                pl.BlockSpec((B * HW, K), lambda n: (n, 0)),
                pl.BlockSpec((K, Cout), lambda n: (0, 0)),
                pl.BlockSpec((1, Cout), lambda n: (0, 0)),
            ],
            out_specs=pl.BlockSpec((B, Hh, Wh, Cout), lambda n: (n, 0, 0, 0)),
            scratch_shapes=[pltpu.VMEM((B * HW, Cout), jnp.float32)],
        ),
        compiler_params=pltpu.CompilerParams(
            dimension_semantics=("parallel",),
            vmem_limit_bytes=_VMEM_LIMIT),
    )(patches, wmat, shift)


# ----------------------------------------------------------------------------
# Fused FC1 + ReLU + FC2 kernel (Dropout is identity at inference)
# ----------------------------------------------------------------------------
def _fc_fused_kernel(x_ref, w1_ref, b1_ref, w2_ref, b2_ref, o_ref):
    h = jnp.dot(x_ref[...], w1_ref[...], preferred_element_type=jnp.float32)
    h = jnp.maximum(h + b1_ref[...], 0.0)                      # f32 epilogue
    o = jnp.dot(h.astype(jnp.bfloat16), w2_ref[...],
                preferred_element_type=jnp.float32)
    o_ref[...] = (o + b2_ref[...]).astype(o_ref.dtype)


def fc_fused(x, w1, b1, w2, b2):
    """x: (M,K) bf16; w1: (K,N1) bf16; w2: (N1,N2) bf16; biases f32 (1,.)."""
    M, K = x.shape
    N1 = w1.shape[1]
    N2 = w2.shape[1]
    if M >= 16:
        tm = min(256, ((M // 2) + 7) // 8 * 8)   # >= 2 M-tiles -> both v7x cores
    else:
        tm = M                                    # tiny batch: single full tile
    return pl.pallas_call(
        _fc_fused_kernel,
        out_shape=jax.ShapeDtypeStruct((M, N2), jnp.float32),
        grid_spec=pltpu.PrefetchScalarGridSpec(
            num_scalar_prefetch=0,
            grid=(pl.cdiv(M, tm),),
            in_specs=[
                pl.BlockSpec((tm, K), lambda i: (i, 0)),
                pl.BlockSpec((K, N1), lambda i: (0, 0)),
                pl.BlockSpec((1, N1), lambda i: (0, 0)),
                pl.BlockSpec((N1, N2), lambda i: (0, 0)),
                pl.BlockSpec((1, N2), lambda i: (0, 0)),
            ],
            out_specs=pl.BlockSpec((tm, N2), lambda i: (i, 0)),
        ),
        compiler_params=pltpu.CompilerParams(
            dimension_semantics=("parallel",),
            vmem_limit_bytes=_VMEM_LIMIT),
    )(x, w1, b1, w2, b2)


# ----------------------------------------------------------------------------
# Parameters (mirror CIFAR10CNN.initialize_weights(), eval mode)
# ----------------------------------------------------------------------------
def make_params(key):
    ks = jax.random.split(key, 5)
    p = {}
    for idx, (cin, cout) in enumerate([(3, 32), (32, 64), (64, 128)], start=1):
        std = (2.0 / (cout * 9)) ** 0.5                 # kaiming fan_out, relu
        p[f"conv{idx}"] = dict(
            w=jax.random.normal(ks[idx - 1], (3, 3, cin, cout), jnp.float32) * std,
            b=jnp.zeros((cout,), jnp.float32),
            gamma=jnp.ones((cout,), jnp.float32),
            beta=jnp.zeros((cout,), jnp.float32),
            mean=jnp.zeros((cout,), jnp.float32),       # eval-mode running stats
            var=jnp.ones((cout,), jnp.float32),
        )
    p["fc1"] = dict(
        w=jax.random.normal(ks[3], (128 * 4 * 4, 512), jnp.float32) * (2.0 / 512) ** 0.5,
        b=jnp.zeros((512,), jnp.float32))
    p["fc2"] = dict(
        w=jax.random.normal(ks[4], (512, 10), jnp.float32) * (2.0 / 10) ** 0.5,
        b=jnp.zeros((10,), jnp.float32))
    return p


def prepare_pallas_params(p):
    """Fold BN into conv weights, reshape to (9*Cin,Cout), permute FC1 rows, cast bf16."""
    out = {}
    for idx in (1, 2, 3):
        c = p[f"conv{idx}"]
        cin, cout = c["w"].shape[2], c["w"].shape[3]
        scale = c["gamma"] / jnp.sqrt(c["var"] + _EPS)
        w = c["w"] * scale                               # fold BN scale into weights
        shift = (c["b"] - c["mean"]) * scale + c["beta"]
        out[f"conv{idx}"] = dict(
            w=w.reshape(9 * cin, cout).astype(jnp.bfloat16),   # (dy,dx,cin) order
            shift=shift.reshape(1, cout).astype(jnp.float32))
    # FC1: PyTorch flattens NCHW (c,h,w); our activations flatten NHWC (h,w,c).
    w1 = p["fc1"]["w"].reshape(128, 4, 4, 512).transpose(1, 2, 0, 3).reshape(2048, 512)
    out["fc1"] = dict(w=w1.astype(jnp.bfloat16),
                      b=p["fc1"]["b"].reshape(1, 512).astype(jnp.float32))
    w2 = jnp.pad(p["fc2"]["w"], ((0, 0), (0, _LOGIT_PAD - 10)))
    b2 = jnp.pad(p["fc2"]["b"], (0, _LOGIT_PAD - 10))
    out["fc2"] = dict(w=w2.astype(jnp.bfloat16),
                      b=b2.reshape(1, _LOGIT_PAD).astype(jnp.float32))
    return out


# ----------------------------------------------------------------------------
# Forward pass (Pallas) and pure-JAX f32 reference
# ----------------------------------------------------------------------------
def forward_pallas(x_nchw, pp):
    N = x_nchw.shape[0]
    block_n = _pick_block_n(N)
    x = jnp.transpose(x_nchw, (0, 2, 3, 1)).astype(jnp.bfloat16)   # NCHW -> NHWC
    for idx in (1, 2, 3):
        c = pp[f"conv{idx}"]
        x = conv_bn_relu_pool(x, c["w"], c["shift"], block_n)
    flat = x.reshape(N, -1)                  # NHWC flatten; fc1.w rows pre-permuted
    out = fc_fused(flat, pp["fc1"]["w"], pp["fc1"]["b"],
                   pp["fc2"]["w"], pp["fc2"]["b"])
    return out[:, :10]                       # drop zero-padded logit lanes


def forward_reference(x_nchw, p):
    x = jnp.transpose(x_nchw, (0, 2, 3, 1))
    for idx in (1, 2, 3):
        c = p[f"conv{idx}"]
        y = lax.conv_general_dilated(x, c["w"], (1, 1), "SAME",
                                     dimension_numbers=("NHWC", "HWIO", "NHWC"))
        y = y + c["b"]
        y = (y - c["mean"]) / jnp.sqrt(c["var"] + _EPS) * c["gamma"] + c["beta"]
        y = jnp.maximum(y, 0.0)
        x = lax.reduce_window(y, -jnp.inf, lax.max,
                              (1, 2, 2, 1), (1, 2, 2, 1), "VALID")
    N = x.shape[0]
    flat = jnp.transpose(x, (0, 3, 1, 2)).reshape(N, -1)   # PyTorch NCHW flatten
    h = jnp.maximum(flat @ p["fc1"]["w"] + p["fc1"]["b"], 0.0)
    return h @ p["fc2"]["w"] + p["fc2"]["b"]


if __name__ == "__main__":
    key = jax.random.PRNGKey(0)
    k_x, k_p = jax.random.split(key)
    # CIFAR-10 geometry is required by the 128*4*4 FC input: (N=4, C=3, 32, 32).
    x = jax.random.normal(k_x, (4, 3, 32, 32), jnp.float32)
    params = make_params(k_p)
    pparams = prepare_pallas_params(params)

    fwd = jax.jit(lambda xx: forward_pallas(xx, pparams))
    out = jax.block_until_ready(fwd(x))
    assert out.shape == (4, 10) and out.dtype == jnp.float32

    ref = jax.block_until_ready(forward_reference(x, params))
    err = jnp.max(jnp.abs(out - ref))
    # bf16 MXU operands (f32 accumulation) -> loosened tolerance vs f32 reference.
    assert jnp.allclose(out, ref, rtol=5e-2, atol=1e-1), f"mismatch: max abs err {err}"

    print("KERNEL_OK")
</pallas_src>

<mosaic_0001>
module attributes {stable_mosaic.version = 11 : i64} {
  func.func @_conv_pool_kernel(%arg0: i32, %arg1: memref<2048x27xbf16, #tpu.memory_space<vmem>>, %arg2: memref<27x32xbf16, #tpu.memory_space<vmem>>, %arg3: memref<1x32xf32, #tpu.memory_space<vmem>>, %arg4: memref<2x16x16x32xbf16, #tpu.memory_space<vmem>>, %arg5: memref<2048x32xf32, #tpu.memory_space<vmem>>) attributes {dimension_semantics = [#tpu.dimension_semantics<parallel>], iteration_bounds = array<i64: 2>, scalar_prefetch = 0 : i64, scratch_operands = 1 : i64, tpu.core_type = #tpu.core_type<tc>, window_params = [{transform_indices = @transform_0, window_bounds = array<i64: 2048, 27>}, {pipeline_mode = #tpu.pipeline_mode<synchronous>, transform_indices = @transform_1, window_bounds = array<i64: 27, 32>}, {pipeline_mode = #tpu.pipeline_mode<synchronous>, transform_indices = @transform_2, window_bounds = array<i64: 1, 32>}, {transform_indices = @transform_3, window_bounds = array<i64: 2, 16, 16, 32>}]} {
    %c0 = arith.constant 0 : index
    %c0_0 = arith.constant 0 : index
    %0 = vector.load %arg1[%c0, %c0_0] : memref<2048x27xbf16, #tpu.memory_space<vmem>>, vector<2048x27xbf16>
    %c0_1 = arith.constant 0 : index
    %c0_2 = arith.constant 0 : index
    %1 = vector.load %arg2[%c0_1, %c0_2] : memref<27x32xbf16, #tpu.memory_space<vmem>>, vector<27x32xbf16>
    %cst = arith.constant dense<0.000000e+00> : vector<2048x32xf32>
    %2 = tpu.matmul %0, %1, %cst {dimension_numbers = #tpu.dot_dimension_numbers<[1], [0], [0], [1], [0, 0, 1, 1], [], []>} : vector<2048x27xbf16>, vector<27x32xbf16>, vector<2048x32xf32> -> vector<2048x32xf32>
    %c0_3 = arith.constant 0 : index
    %c0_4 = arith.constant 0 : index
    %3 = vector.load %arg5[%c0_3, %c0_4] : memref<2048x32xf32, #tpu.memory_space<vmem>>, vector<2048x32xf32>
    tpu.vector_store %arg5[%c0_3, %c0_4], %2 {strides = array<i32>} : memref<2048x32xf32, #tpu.memory_space<vmem>>, vector<2048x32xf32>,
    %c0_5 = arith.constant 0 : index
    %c0_6 = arith.constant 0 : index
    %4 = vector.load %arg3[%c0_5, %c0_6] : memref<1x32xf32, #tpu.memory_space<vmem>>, vector<1x32xf32>
    %c0_7 = arith.constant 0 : index
    %c0_8 = arith.constant 0 : index
    %5 = tpu.strided_load %arg5[%c0_7, %c0_8] {strides = array<i32: 2, 1>} : memref<2048x32xf32, #tpu.memory_space<vmem>>, vector<16x32xf32>
    %c1 = arith.constant 1 : index
    %c0_9 = arith.constant 0 : index
    %6 = tpu.strided_load %arg5[%c1, %c0_9] {strides = array<i32: 2, 1>} : memref<2048x32xf32, #tpu.memory_space<vmem>>, vector<16x32xf32>
    %7 = arith.maximumf %5, %6 : vector<16x32xf32>
    %c32 = arith.constant 32 : index
    %c0_10 = arith.constant 0 : index
    %8 = tpu.strided_load %arg5[%c32, %c0_10] {strides = array<i32: 2, 1>} : memref<2048x32xf32, #tpu.memory_space<vmem>>, vector<16x32xf32>
    %c33 = arith.constant 33 : index
    %c0_11 = arith.constant 0 : index
    %9 = tpu.strided_load %arg5[%c33, %c0_11] {strides = array<i32: 2, 1>} : memref<2048x32xf32, #tpu.memory_space<vmem>>, vector<16x32xf32>
    %10 = arith.maximumf %8, %9 : vector<16x32xf32>
    %11 = arith.maximumf %7, %10 : vector<16x32xf32>
    %12 = vector.broadcast %4 : vector<1x32xf32> to vector<16x32xf32>
    %13 = arith.addf %11, %12 : vector<16x32xf32>
    %cst_12 = arith.constant 0.000000e+00 : f32
    %14 = vector.broadcast %cst_12 : f32 to vector<16x32xf32>
    %15 = arith.maximumf %13, %14 : vector<16x32xf32>
    %16 = arith.truncf %15 : vector<16x32xf32> to vector<16x32xbf16>
    %c0_13 = arith.constant 0 : index
    %c0_14 = arith.constant 0 : index
    %c0_15 = arith.constant 0 : index
    %c0_16 = arith.constant 0 : index
    %17 = vector.load %arg4[%c0_13, %c0_14, %c0_15, %c0_16] : memref<2x16x16x32xbf16, #tpu.memory_space<vmem>>, vector<1x1x16x32xbf16>
    %18 = vector.shape_cast %17 : vector<1x1x16x32xbf16> to vector<16x32xbf16>
    %19 = vector.shape_cast %16 : vector<16x32xbf16> to vector<1x1x16x32xbf16>
    tpu.vector_store %arg4[%c0_13, %c0_14, %c0_15, %c0_16], %19 {strides = array<i32>} : memref<2x16x16x32xbf16, #tpu.memory_space<vmem>>, vector<1x1x16x32xbf16>,
    %c64 = arith.constant 64 : index
    %c0_17 = arith.constant 0 : index
    %20 = tpu.strided_load %arg5[%c64, %c0_17] {strides = array<i32: 2, 1>} : memref<2048x32xf32, #tpu.memory_space<vmem>>, vector<16x32xf32>
    %c65 = arith.constant 65 : index
    %c0_18 = arith.constant 0 : index
    %21 = tpu.strided_load %arg5[%c65, %c0_18] {strides = array<i32: 2, 1>} : memref<2048x32xf32, #tpu.memory_space<vmem>>, vector<16x32xf32>
    %22 = arith.maximumf %20, %21 : vector<16x32xf32>
    %c96 = arith.constant 96 : index
    %c0_19 = arith.constant 0 : index
    %23 = tpu.strided_load %arg5[%c96, %c0_19] {strides = array<i32: 2, 1>} : memref<2048x32xf32, #tpu.memory_space<vmem>>, vector<16x32xf32>
    %c97 = arith.constant 97 : index
    %c0_20 = arith.constant 0 : index
    %24 = tpu.strided_load %arg5[%c97, %c0_20] {strides = array<i32: 2, 1>} : memref<2048x32xf32, #tpu.memory_space<vmem>>, vector<16x32xf32>
    %25 = arith.maximumf %23, %24 : vector<16x32xf32>
    %26 = arith.maximumf %22, %25 : vector<16x32xf32>
    %27 = vector.broadcast %4 : vector<1x32xf32> to vector<16x32xf32>
    %28 = arith.addf %26, %27 : vector<16x32xf32>
    %cst_21 = arith.constant 0.000000e+00 : f32
    %29 = vector.broadcast %cst_21 : f32 to vector<16x32xf32>
    %30 = arith.maximumf %28, %29 : vector<16x32xf32>
    %31 = arith.truncf %30 : vector<16x32xf32> to vector<16x32xbf16>
    %c0_22 = arith.constant 0 : index
    %c1_23 = arith.constant 1 : index
    %c0_24 = arith.constant 0 : index
    %c0_25 = arith.constant 0 : index
    %32 = vector.load %arg4[%c0_22, %c1_23, %c0_24, %c0_25] : memref<2x16x16x32xbf16, #tpu.memory_space<vmem>>, vector<1x1x16x32xbf16>
    %33 = vector.shape_cast %32 : vector<1x1x16x32xbf16> to vector<16x32xbf16>
    %34 = vector.shape_cast %31 : vector<16x32xbf16> to vector<1x1x16x32xbf16>
    tpu.vector_store %arg4[%c0_22, %c1_23, %c0_24, %c0_25], %34 {strides = array<i32>} : memref<2x16x16x32xbf16, #tpu.memory_space<vmem>>, vector<1x1x16x32xbf16>,
    %c128 = arith.constant 128 : index
    %c0_26 = arith.constant 0 : index
    %35 = tpu.strided_load %arg5[%c128, %c0_26] {strides = array<i32: 2, 1>} : memref<2048x32xf32, #tpu.memory_space<vmem>>, vector<16x32xf32>
    %c129 = arith.constant 129 : index
    %c0_27 = arith.constant 0 : index
    %36 = tpu.strided_load %arg5[%c129, %c0_27] {strides = array<i32: 2, 1>} : memref<2048x32xf32, #tpu.memory_space<vmem>>, vector<16x32xf32>
    %37 = arith.maximumf %35, %36 : vector<16x32xf32>
    %c160 = arith.constant 160 : index
    %c0_28 = arith.constant 0 : index
    %38 = tpu.strided_load %arg5[%c160, %c0_28] {strides = array<i32: 2, 1>} : memref<2048x32xf32, #tpu.memory_space<vmem>>, vector<16x32xf32>
    %c161 = arith.constant 161 : index
    %c0_29 = arith.constant 0 : index
    %39 = tpu.strided_load %arg5[%c161, %c0_29] {strides = array<i32: 2, 1>} : memref<2048x32xf32, #tpu.memory_space<vmem>>, vector<16x32xf32>
    %40 = arith.maximumf %38, %39 : vector<16x32xf32>
    %41 = arith.maximumf %37, %40 : vector<16x32xf32>
    %42 = vector.broadcast %4 : vector<1x32xf32> to vector<16x32xf32>
    %43 = arith.addf %41, %42 : vector<16x32xf32>
    %cst_30 = arith.constant 0.000000e+00 : f32
    %44 = vector.broadcast %cst_30 : f32 to vector<16x32xf32>
    %45 = arith.maximumf %43, %44 : vector<16x32xf32>
    %46 = arith.truncf %45 : vector<16x32xf32> to vector<16x32xbf16>
    %c0_31 = arith.constant 0 : index
    %c2 = arith.constant 2 : index
    %c0_32 = arith.constant 0 : index
    %c0_33 = arith.constant 0 : index
    %47 = vector.load %arg4[%c0_31, %c2, %c0_32, %c0_33] : memref<2x16x16x32xbf16, #tpu.memory_space<vmem>>, vector<1x1x16x32xbf16>
    %48 = vector.shape_cast %47 : vector<1x1x16x32xbf16> to vector<16x32xbf16>
    %49 = vector.shape_cast %46 : vector<16x32xbf16> to vector<1x1x16x32xbf16>
    tpu.vector_store %arg4[%c0_31, %c2, %c0_32, %c0_33], %49 {strides = array<i32>} : memref<2x16x16x32xbf16, #tpu.memory_space<vmem>>, vector<1x1x16x32xbf16>,
    %c192 = arith.constant 192 : index
    %c0_34 = arith.constant 0 : index
    %50 = tpu.strided_load %arg5[%c192, %c0_34] {strides = array<i32: 2, 1>} : memref<2048x32xf32, #tpu.memory_space<vmem>>, vector<16x32xf32>
    %c193 = arith.constant 193 : index
    %c0_35 = arith.constant 0 : index
    %51 = tpu.strided_load %arg5[%c193, %c0_35] {strides = array<i32: 2, 1>} : memref<2048x32xf32, #tpu.memory_space<vmem>>, vector<16x32xf32>
    %52 = arith.maximumf %50, %51 : vector<16x32xf32>
    %c224 = arith.constant 224 : index
    %c0_36 = arith.constant 0 : index
    %53 = tpu.strided_load %arg5[%c224, %c0_36] {strides = array<i32: 2, 1>} : memref<2048x32xf32, #tpu.memory_space<vmem>>, vector<16x32xf32>
    %c225 = arith.constant 225 : index
    %c0_37 = arith.constant 0 : index
    %54 = tpu.strided_load %arg5[%c225, %c0_37] {strides = array<i32: 2, 1>} : memref<2048x32xf32, #tpu.memory_space<vmem>>, vector<16x32xf32>
    %55 = arith.maximumf %53, %54 : vector<16x32xf32>
    %56 = arith.maximumf %52, %55 : vector<16x32xf32>
    %57 = vector.broadcast %4 : vector<1x32xf32> to vector<16x32xf32>
    %58 = arith.addf %56, %57 : vector<16x32xf32>
    %cst_38 = arith.constant 0.000000e+00 : f32
    %59 = vector.broadcast %cst_38 : f32 to vector<16x32xf32>
    %60 = arith.maximumf %58, %59 : vector<16x32xf32>
    %61 = arith.truncf %60 : vector<16x32xf32> to vector<16x32xbf16>
    %c0_39 = arith.constant 0 : index
    %c3 = arith.constant 3 : index
    %c0_40 = arith.constant 0 : index
    %c0_41 = arith.constant 0 : index
    %62 = vector.load %arg4[%c0_39, %c3, %c0_40, %c0_41] : memref<2x16x16x32xbf16, #tpu.memory_space<vmem>>, vector<1x1x16x32xbf16>
    %63 = vector.shape_cast %62 : vector<1x1x16x32xbf16> to vector<16x32xbf16>
    %64 = vector.shape_cast %61 : vector<16x32xbf16> to vector<1x1x16x32xbf16>
    tpu.vector_store %arg4[%c0_39, %c3, %c0_40, %c0_41], %64 {strides = array<i32>} : memref<2x16x16x32xbf16, #tpu.memory_space<vmem>>, vector<1x1x16x32xbf16>,
    %c256 = arith.constant 256 : index
    %c0_42 = arith.constant 0 : index
    %65 = tpu.strided_load %arg5[%c256, %c0_42] {strides = array<i32: 2, 1>} : memref<2048x32xf32, #tpu.memory_space<vmem>>, vector<16x32xf32>
    %c257 = arith.constant 257 : index
    %c0_43 = arith.constant 0 : index
    %66 = tpu.strided_load %arg5[%c257, %c0_43] {strides = array<i32: 2, 1>} : memref<2048x32xf32, #tpu.memory_space<vmem>>, vector<16x32xf32>
    %67 = arith.maximumf %65, %66 : vector<16x32xf32>
    %c288 = arith.constant 288 : index
    %c0_44 = arith.constant 0 : index
    %68 = tpu.strided_load %arg5[%c288, %c0_44] {strides = array<i32: 2, 1>} : memref<2048x32xf32, #tpu.memory_space<vmem>>, vector<16x32xf32>
    %c289 = arith.constant 289 : index
    %c0_45 = arith.constant 0 : index
    %69 = tpu.strided_load %arg5[%c289, %c0_45] {strides = array<i32: 2, 1>} : memref<2048x32xf32, #tpu.memory_space<vmem>>, vector<16x32xf32>
    %70 = arith.maximumf %68, %69 : vector<16x32xf32>
    %71 = arith.maximumf %67, %70 : vector<16x32xf32>
    %72 = vector.broadcast %4 : vector<1x32xf32> to vector<16x32xf32>
    %73 = arith.addf %71, %72 : vector<16x32xf32>
    %cst_46 = arith.constant 0.000000e+00 : f32
    %74 = vector.broadcast %cst_46 : f32 to vector<16x32xf32>
    %75 = arith.maximumf %73, %74 : vector<16x32xf32>
    %76 = arith.truncf %75 : vector<16x32xf32> to vector<16x32xbf16>
    %c0_47 = arith.constant 0 : index
    %c4 = arith.constant 4 : index
    %c0_48 = arith.constant 0 : index
    %c0_49 = arith.constant 0 : index
    %77 = vector.load %arg4[%c0_47, %c4, %c0_48, %c0_49] : memref<2x16x16x32xbf16, #tpu.memory_space<vmem>>, vector<1x1x16x32xbf16>
    %78 = vector.shape_cast %77 : vector<1x1x16x32xbf16> to vector<16x32xbf16>
    %79 = vector.shape_cast %76 : vector<16x32xbf16> to vector<1x1x16x32xbf16>
    tpu.vector_store %arg4[%c0_47, %c4, %c0_48, %c0_49], %79 {strides = array<i32>} : memref<2x16x16x32xbf16, #tpu.memory_space<vmem>>, vector<1x1x16x32xbf16>,
    %c320 = arith.constant 320 : index
    %c0_50 = arith.constant 0 : index
    %80 = tpu.strided_load %arg5[%c320, %c0_50] {strides = array<i32: 2, 1>} : memref<2048x32xf32, #tpu.memory_space<vmem>>, vector<16x32xf32>
    %c321 = arith.constant 321 : index
    %c0_51 = arith.constant 0 : index
    %81 = tpu.strided_load %arg5[%c321, %c0_51] {strides = array<i32: 2, 1>} : memref<2048x32xf32, #tpu.memory_space<vmem>>, vector<16x32xf32>
    %82 = arith.maximumf %80, %81 : vector<16x32xf32>
    %c352 = arith.constant 352 : index
    %c0_52 = arith.constant 0 : index
    %83 = tpu.strided_load %arg5[%c352, %c0_52] {strides = array<i32: 2, 1>} : memref<2048x32xf32, #tpu.memory_space<vmem>>, vector<16x32xf32>
    %c353 = arith.constant 353 : index
    %c0_53 = arith.constant 0 : index
    %84 = tpu.strided_load %arg5[%c353, %c0_53] {strides = array<i32: 2, 1>} : memref<2048x32xf32, #tpu.memory_space<vmem>>, vector<16x32xf32>
    %85 = arith.maximumf %83, %84 : vector<16x32xf32>
    %86 = arith.maximumf %82, %85 : vector<16x32xf32>
    %87 = vector.broadcast %4 : vector<1x32xf32> to vector<16x32xf32>
    %88 = arith.addf %86, %87 : vector<16x32xf32>
    %cst_54 = arith.constant 0.000000e+00 : f32
    %89 = vector.broadcast %cst_54 : f32 to vector<16x32xf32>
    %90 = arith.maximumf %88, %89 : vector<16x32xf32>
    %91 = arith.truncf %90 : vector<16x32xf32> to vector<16x32xbf16>
    %c0_55 = arith.constant 0 : index
    %c5 = arith.constant 5 : index
    %c0_56 = arith.constant 0 : index
    %c0_57 = arith.constant 0 : index
    %92 = vector.load %arg4[%c0_55, %c5, %c0_56, %c0_57] : memref<2x16x16x32xbf16, #tpu.memory_space<vmem>>, vector<1x1x16x32xbf16>
    %93 = vector.shape_cast %92 : vector<1x1x16x32xbf16> to vector<16x32xbf16>
    %94 = vector.shape_cast %91 : vector<16x32xbf16> to vector<1x1x16x32xbf16>
    tpu.vector_store %arg4[%c0_55, %c5, %c0_56, %c0_57], %94 {strides = array<i32>} : memref<2x16x16x32xbf16, #tpu.memory_space<vmem>>, vector<1x1x16x32xbf16>,
    %c384 = arith.constant 384 : index
    %c0_58 = arith.constant 0 : index
    %95 = tpu.strided_load %arg5[%c384, %c0_58] {strides = array<i32: 2, 1>} : memref<2048x32xf32, #tpu.memory_space<vmem>>, vector<16x32xf32>
    %c385 = arith.constant 385 : index
    %c0_59 = arith.constant 0 : index
    %96 = tpu.strided_load %arg5[%c385, %c0_59] {strides = array<i32: 2, 1>} : memref<2048x32xf32, #tpu.memory_space<vmem>>, vector<16x32xf32>
    %97 = arith.maximumf %95, %96 : vector<16x32xf32>
    %c416 = arith.constant 416 : index
    %c0_60 = arith.constant 0 : index
    %98 = tpu.strided_load %arg5[%c416, %c0_60] {strides = array<i32: 2, 1>} : memref<2048x32xf32, #tpu.memory_space<vmem>>, vector<16x32xf32>
    %c417 = arith.constant 417 : index
    %c0_61 = arith.constant 0 : index
    %99 = tpu.strided_load %arg5[%c417, %c0_61] {strides = array<i32: 2, 1>} : memref<2048x32xf32, #tpu.memory_space<vmem>>, vector<16x32xf32>
    %100 = arith.maximumf %98, %99 : vector<16x32xf32>
    %101 = arith.maximumf %97, %100 : vector<16x32xf32>
    %102 = vector.broadcast %4 : vector<1x32xf32> to vector<16x32xf32>
    %103 = arith.addf %101, %102 : vector<16x32xf32>
    %cst_62 = arith.constant 0.000000e+00 : f32
    %104 = vector.broadcast %cst_62 : f32 to vector<16x32xf32>
    %105 = arith.maximumf %103, %104 : vector<16x32xf32>
    %106 = arith.truncf %105 : vector<16x32xf32> to vector<16x32xbf16>
    %c0_63 = arith.constant 0 : index
    %c6 = arith.constant 6 : index
    %c0_64 = arith.constant 0 : index
    %c0_65 = arith.constant 0 : index
    %107 = vector.load %arg4[%c0_63, %c6, %c0_64, %c0_65] : memref<2x16x16x32xbf16, #tpu.memory_space<vmem>>, vector<1x1x16x32xbf16>
    %108 = vector.shape_cast %107 : vector<1x1x16x32xbf16> to vector<16x32xbf16>
    %109 = vector.shape_cast %106 : vector<16x32xbf16> to vector<1x1x16x32xbf16>
    tpu.vector_store %arg4[%c0_63, %c6, %c0_64, %c0_65], %109 {strides = array<i32>} : memref<2x16x16x32xbf16, #tpu.memory_space<vmem>>, vector<1x1x16x32xbf16>,
    %c448 = arith.constant 448 : index
    %c0_66 = arith.constant 0 : index
    %110 = tpu.strided_load %arg5[%c448, %c0_66] {strides = array<i32: 2, 1>} : memref<2048x32xf32, #tpu.memory_space<vmem>>, vector<16x32xf32>
    %c449 = arith.constant 449 : index
    %c0_67 = arith.constant 0 : index
    %111 = tpu.strided_load %arg5[%c449, %c0_67] {strides = array<i32: 2, 1>} : memref<2048x32xf32, #tpu.memory_space<vmem>>, vector<16x32xf32>
    %112 = arith.maximumf %110, %111 : vector<16x32xf32>
    %c480 = arith.constant 480 : index
    %c0_68 = arith.constant 0 : index
    %113 = tpu.strided_load %arg5[%c480, %c0_68] {strides = array<i32: 2, 1>} : memref<2048x32xf32, #tpu.memory_space<vmem>>, vector<16x32xf32>
    %c481 = arith.constant 481 : index
    %c0_69 = arith.constant 0 : index
    %114 = tpu.strided_load %arg5[%c481, %c0_69] {strides = array<i32: 2, 1>} : memref<2048x32xf32, #tpu.memory_space<vmem>>, vector<16x32xf32>
    %115 = arith.maximumf %113, %114 : vector<16x32xf32>
    %116 = arith.maximumf %112, %115 : vector<16x32xf32>
    %117 = vector.broadcast %4 : vector<1x32xf32> to vector<16x32xf32>
    %118 = arith.addf %116, %117 : vector<16x32xf32>
    %cst_70 = arith.constant 0.000000e+00 : f32
    %119 = vector.broadcast %cst_70 : f32 to vector<16x32xf32>
    %120 = arith.maximumf %118, %119 : vector<16x32xf32>
    %121 = arith.truncf %120 : vector<16x32xf32> to vector<16x32xbf16>
    %c0_71 = arith.constant 0 : index
    %c7 = arith.constant 7 : index
    %c0_72 = arith.constant 0 : index
    %c0_73 = arith.constant 0 : index
    %122 = vector.load %arg4[%c0_71, %c7, %c0_72, %c0_73] : memref<2x16x16x32xbf16, #tpu.memory_space<vmem>>, vector<1x1x16x32xbf16>
    %123 = vector.shape_cast %122 : vector<1x1x16x32xbf16> to vector<16x32xbf16>
    %124 = vector.shape_cast %121 : vector<16x32xbf16> to vector<1x1x16x32xbf16>
    tpu.vector_store %arg4[%c0_71, %c7, %c0_72, %c0_73], %124 {strides = array<i32>} : memref<2x16x16x32xbf16, #tpu.memory_space<vmem>>, vector<1x1x16x32xbf16>,
    %c512 = arith.constant 512 : index
    %c0_74 = arith.constant 0 : index
    %125 = tpu.strided_load %arg5[%c512, %c0_74] {strides = array<i32: 2, 1>} : memref<2048x32xf32, #tpu.memory_space<vmem>>, vector<16x32xf32>
    %c513 = arith.constant 513 : index
    %c0_75 = arith.constant 0 : index
    %126 = tpu.strided_load %arg5[%c513, %c0_75] {strides = array<i32: 2, 1>} : memref<2048x32xf32, #tpu.memory_space<vmem>>, vector<16x32xf32>
    %127 = arith.maximumf %125, %126 : vector<16x32xf32>
    %c544 = arith.constant 544 : index
    %c0_76 = arith.constant 0 : index
    %128 = tpu.strided_load %arg5[%c544, %c0_76] {strides = array<i32: 2, 1>} : memref<2048x32xf32, #tpu.memory_space<vmem>>, vector<16x32xf32>
    %c545 = arith.constant 545 : index
    %c0_77 = arith.constant 0 : index
    %129 = tpu.strided_load %arg5[%c545, %c0_77] {strides = array<i32: 2, 1>} : memref<2048x32xf32, #tpu.memory_space<vmem>>, vector<16x32xf32>
    %130 = arith.maximumf %128, %129 : vector<16x32xf32>
    %131 = arith.maximumf %127, %130 : vector<16x32xf32>
    %132 = vector.broadcast %4 : vector<1x32xf32> to vector<16x32xf32>
    %133 = arith.addf %131, %132 : vector<16x32xf32>
    %cst_78 = arith.constant 0.000000e+00 : f32
    %134 = vector.broadcast %cst_78 : f32 to vector<16x32xf32>
    %135 = arith.maximumf %133, %134 : vector<16x32xf32>
    %136 = arith.truncf %135 : vector<16x32xf32> to vector<16x32xbf16>
    %c0_79 = arith.constant 0 : index
    %c8 = arith.constant 8 : index
    %c0_80 = arith.constant 0 : index
    %c0_81 = arith.constant 0 : index
    %137 = vector.load %arg4[%c0_79, %c8, %c0_80, %c0_81] : memref<2x16x16x32xbf16, #tpu.memory_space<vmem>>, vector<1x1x16x32xbf16>
    %138 = vector.shape_cast %137 : vector<1x1x16x32xbf16> to vector<16x32xbf16>
    %139 = vector.shape_cast %136 : vector<16x32xbf16> to vector<1x1x16x32xbf16>
    tpu.vector_store %arg4[%c0_79, %c8, %c0_80, %c0_81], %139 {strides = array<i32>} : memref<2x16x16x32xbf16, #tpu.memory_space<vmem>>, vector<1x1x16x32xbf16>,
    %c576 = arith.constant 576 : index
    %c0_82 = arith.constant 0 : index
    %140 = tpu.strided_load %arg5[%c576, %c0_82] {strides = array<i32: 2, 1>} : memref<2048x32xf32, #tpu.memory_space<vmem>>, vector<16x32xf32>
    %c577 = arith.constant 577 : index
    %c0_83 = arith.constant 0 : index
    %141 = tpu.strided_load %arg5[%c577, %c0_83] {strides = array<i32: 2, 1>} : memref<2048x32xf32, #tpu.memory_space<vmem>>, vector<16x32xf32>
    %142 = arith.maximumf %140, %141 : vector<16x32xf32>
    %c608 = arith.constant 608 : index
    %c0_84 = arith.constant 0 : index
    %143 = tpu.strided_load %arg5[%c608, %c0_84] {strides = array<i32: 2, 1>} : memref<2048x32xf32, #tpu.memory_space<vmem>>, vector<16x32xf32>
    %c609 = arith.constant 609 : index
    %c0_85 = arith.constant 0 : index
    %144 = tpu.strided_load %arg5[%c609, %c0_85] {strides = array<i32: 2, 1>} : memref<2048x32xf32, #tpu.memory_space<vmem>>, vector<16x32xf32>
    %145 = arith.maximumf %143, %144 : vector<16x32xf32>
    %146 = arith.maximumf %142, %145 : vector<16x32xf32>
    %147 = vector.broadcast %4 : vector<1x32xf32> to vector<16x32xf32>
    %148 = arith.addf %146, %147 : vector<16x32xf32>
    %cst_86 = arith.constant 0.000000e+00 : f32
    %149 = vector.broadcast %cst_86 : f32 to vector<16x32xf32>
    %150 = arith.maximumf %148, %149 : vector<16x32xf32>
    %151 = arith.truncf %150 : vector<16x32xf32> to vector<16x32xbf16>
    %c0_87 = arith.constant 0 : index
    %c9 = arith.constant 9 : index
    %c0_88 = arith.constant 0 : index
    %c0_89 = arith.constant 0 : index
    %152 = vector.load %arg4[%c0_87, %c9, %c0_88, %c0_89] : memref<2x16x16x32xbf16, #tpu.memory_space<vmem>>, vector<1x1x16x32xbf16>
    %153 = vector.shape_cast %152 : vector<1x1x16x32xbf16> to vector<16x32xbf16>
    %154 = vector.shape_cast %151 : vector<16x32xbf16> to vector<1x1x16x32xbf16>
    tpu.vector_store %arg4[%c0_87, %c9, %c0_88, %c0_89], %154 {strides = array<i32>} : memref<2x16x16x32xbf16, #tpu.memory_space<vmem>>, vector<1x1x16x32xbf16>,
    %c640 = arith.constant 640 : index
    %c0_90 = arith.constant 0 : index
    %155 = tpu.strided_load %arg5[%c640, %c0_90] {strides = array<i32: 2, 1>} : memref<2048x32xf32, #tpu.memory_space<vmem>>, vector<16x32xf32>
    %c641 = arith.constant 641 : index
    %c0_91 = arith.constant 0 : index
    %156 = tpu.strided_load %arg5[%c641, %c0_91] {strides = array<i32: 2, 1>} : memref<2048x32xf32, #tpu.memory_space<vmem>>, vector<16x32xf32>
    %157 = arith.maximumf %155, %156 : vector<16x32xf32>
    %c672 = arith.constant 672 : index
    %c0_92 = arith.constant 0 : index
    %158 = tpu.strided_load %arg5[%c672, %c0_92] {strides = array<i32: 2, 1>} : memref<2048x32xf32, #tpu.memory_space<vmem>>, vector<16x32xf32>
    %c673 = arith.constant 673 : index
    %c0_93 = arith.constant 0 : index
    %159 = tpu.strided_load %arg5[%c673, %c0_93] {strides = array<i32: 2, 1>} : memref<2048x32xf32, #tpu.memory_space<vmem>>, vector<16x32xf32>
    %160 = arith.maximumf %158, %159 : vector<16x32xf32>
    %161 = arith.maximumf %157, %160 : vector<16x32xf32>
    %162 = vector.broadcast %4 : vector<1x32xf32> to vector<16x32xf32>
    %163 = arith.addf %161, %162 : vector<16x32xf32>
    %cst_94 = arith.constant 0.000000e+00 : f32
    %164 = vector.broadcast %cst_94 : f32 to vector<16x32xf32>
    %165 = arith.maximumf %163, %164 : vector<16x32xf32>
    %166 = arith.truncf %165 : vector<16x32xf32> to vector<16x32xbf16>
    %c0_95 = arith.constant 0 : index
    %c10 = arith.constant 10 : index
    %c0_96 = arith.constant 0 : index
    %c0_97 = arith.constant 0 : index
    %167 = vector.load %arg4[%c0_95, %c10, %c0_96, %c0_97] : memref<2x16x16x32xbf16, #tpu.memory_space<vmem>>, vector<1x1x16x32xbf16>
    %168 = vector.shape_cast %167 : vector<1x1x16x32xbf16> to vector<16x32xbf16>
    %169 = vector.shape_cast %166 : vector<16x32xbf16> to vector<1x1x16x32xbf16>
    tpu.vector_store %arg4[%c0_95, %c10, %c0_96, %c0_97], %169 {strides = array<i32>} : memref<2x16x16x32xbf16, #tpu.memory_space<vmem>>, vector<1x1x16x32xbf16>,
    %c704 = arith.constant 704 : index
    %c0_98 = arith.constant 0 : index
    %170 = tpu.strided_load %arg5[%c704, %c0_98] {strides = array<i32: 2, 1>} : memref<2048x32xf32, #tpu.memory_space<vmem>>, vector<16x32xf32>
    %c705 = arith.constant 705 : index
    %c0_99 = arith.constant 0 : index
    %171 = tpu.strided_load %arg5[%c705, %c0_99] {strides = array<i32: 2, 1>} : memref<2048x32xf32, #tpu.memory_space<vmem>>, vector<16x32xf32>
    %172 = arith.maximumf %170, %171 : vector<16x32xf32>
    %c736 = arith.constant 736 : index
    %c0_100 = arith.constant 0 : index
    %173 = tpu.strided_load %arg5[%c736, %c0_100] {strides = array<i32: 2, 1>} : memref<2048x32xf32, #tpu.memory_space<vmem>>, vector<16x32xf32>
    %c737 = arith.constant 737 : index
    %c0_101 = arith.constant 0 : index
    %174 = tpu.strided_load %arg5[%c737, %c0_101] {strides = array<i32: 2, 1>} : memref<2048x32xf32, #tpu.memory_space<vmem>>, vector<16x32xf32>
    %175 = arith.maximumf %173, %174 : vector<16x32xf32>
    %176 = arith.maximumf %172, %175 : vector<16x32xf32>
    %177 = vector.broadcast %4 : vector<1x32xf32> to vector<16x32xf32>
    %178 = arith.addf %176, %177 : vector<16x32xf32>
    %cst_102 = arith.constant 0.000000e+00 : f32
    %179 = vector.broadcast %cst_102 : f32 to vector<16x32xf32>
    %180 = arith.maximumf %178, %179 : vector<16x32xf32>
    %181 = arith.truncf %180 : vector<16x32xf32> to vector<16x32xbf16>
    %c0_103 = arith.constant 0 : index
    %c11 = arith.constant 11 : index
    %c0_104 = arith.constant 0 : index
    %c0_105 = arith.constant 0 : index
    %182 = vector.load %arg4[%c0_103, %c11, %c0_104, %c0_105] : memref<2x16x16x32xbf16, #tpu.memory_space<vmem>>, vector<1x1x16x32xbf16>
    %183 = vector.shape_cast %182 : vector<1x1x16x32xbf16> to vector<16x32xbf16>
    %184 = vector.shape_cast %181 : vector<16x32xbf16> to vector<1x1x16x32xbf16>
    tpu.vector_store %arg4[%c0_103, %c11, %c0_104, %c0_105], %184 {strides = array<i32>} : memref<2x16x16x32xbf16, #tpu.memory_space<vmem>>, vector<1x1x16x32xbf16>,
    %c768 = arith.constant 768 : index
    %c0_106 = arith.constant 0 : index
    %185 = tpu.strided_load %arg5[%c768, %c0_106] {strides = array<i32: 2, 1>} : memref<2048x32xf32, #tpu.memory_space<vmem>>, vector<16x32xf32>
    %c769 = arith.constant 769 : index
    %c0_107 = arith.constant 0 : index
    %186 = tpu.strided_load %arg5[%c769, %c0_107] {strides = array<i32: 2, 1>} : memref<2048x32xf32, #tpu.memory_space<vmem>>, vector<16x32xf32>
    %187 = arith.maximumf %185, %186 : vector<16x32xf32>
    %c800 = arith.constant 800 : index
    %c0_108 = arith.constant 0 : index
    %188 = tpu.strided_load %arg5[%c800, %c0_108] {strides = array<i32: 2, 1>} : memref<2048x32xf32, #tpu.memory_space<vmem>>, vector<16x32xf32>
    %c801 = arith.constant 801 : index
    %c0_109 = arith.constant 0 : index
    %189 = tpu.strided_load %arg5[%c801, %c0_109] {strides = array<i32: 2, 1>} : memref<2048x32xf32, #tpu.memory_space<vmem>>, vector<16x32xf32>
    %190 = arith.maximumf %188, %189 : vector<16x32xf32>
    %191 = arith.maximumf %187, %190 : vector<16x32xf32>
    %192 = vector.broadcast %4 : vector<1x32xf32> to vector<16x32xf32>
    %193 = arith.addf %191, %192 : vector<16x32xf32>
    %cst_110 = arith.constant 0.000000e+00 : f32
    %194 = vector.broadcast %cst_110 : f32 to vector<16x32xf32>
    %195 = arith.maximumf %193, %194 : vector<16x32xf32>
    %196 = arith.truncf %195 : vector<16x32xf32> to vector<16x32xbf16>
    %c0_111 = arith.constant 0 : index
    %c12 = arith.constant 12 : index
    %c0_112 = arith.constant 0 : index
    %c0_113 = arith.constant 0 : index
    %197 = vector.load %arg4[%c0_111, %c12, %c0_112, %c0_113] : memref<2x16x16x32xbf16, #tpu.memory_space<vmem>>, vector<1x1x16x32xbf16>
    %198 = vector.shape_cast %197 : vector<1x1x16x32xbf16> to vector<16x32xbf16>
    %199 = vector.shape_cast %196 : vector<16x32xbf16> to vector<1x1x16x32xbf16>
    tpu.vector_store %arg4[%c0_111, %c12, %c0_112, %c0_113], %199 {strides = array<i32>} : memref<2x16x16x32xbf16, #tpu.memory_space<vmem>>, vector<1x1x16x32xbf16>,
    %c832 = arith.constant 832 : index
    %c0_114 = arith.constant 0 : index
    %200 = tpu.strided_load %arg5[%c832, %c0_114] {strides = array<i32: 2, 1>} : memref<2048x32xf32, #tpu.memory_space<vmem>>, vector<16x32xf32>
    %c833 = arith.constant 833 : index
    %c0_115 = arith.constant 0 : index
    %201 = tpu.strided_load %arg5[%c833, %c0_115] {strides = array<i32: 2, 1>} : memref<2048x32xf32, #tpu.memory_space<vmem>>, vector<16x32xf32>
    %202 = arith.maximumf %200, %201 : vector<16x32xf32>
    %c864 = arith.constant 864 : index
    %c0_116 = arith.constant 0 : index
    %203 = tpu.strided_load %arg5[%c864, %c0_116] {strides = array<i32: 2, 1>} : memref<2048x32xf32, #tpu.memory_space<vmem>>, vector<16x32xf32>
    %c865 = arith.constant 865 : index
    %c0_117 = arith.constant 0 : index
    %204 = tpu.strided_load %arg5[%c865, %c0_117] {strides = array<i32: 2, 1>} : memref<2048x32xf32, #tpu.memory_space<vmem>>, vector<16x32xf32>
    %205 = arith.maximumf %203, %204 : vector<16x32xf32>
    %206 = arith.maximumf %202, %205 : vector<16x32xf32>
    %207 = vector.broadcast %4 : vector<1x32xf32> to vector<16x32xf32>
    %208 = arith.addf %206, %207 : vector<16x32xf32>
    %cst_118 = arith.constant 0.000000e+00 : f32
    %209 = vector.broadcast %cst_118 : f32 to vector<16x32xf32>
    %210 = arith.maximumf %208, %209 : vector<16x32xf32>
    %211 = arith.truncf %210 : vector<16x32xf32> to vector<16x32xbf16>
    %c0_119 = arith.constant 0 : index
    %c13 = arith.constant 13 : index
    %c0_120 = arith.constant 0 : index
    %c0_121 = arith.constant 0 : index
    %212 = vector.load %arg4[%c0_119, %c13, %c0_120, %c0_121] : memref<2x16x16x32xbf16, #tpu.memory_space<vmem>>, vector<1x1x16x32xbf16>
    %213 = vector.shape_cast %212 : vector<1x1x16x32xbf16> to vector<16x32xbf16>
    %214 = vector.shape_cast %211 : vector<16x32xbf16> to vector<1x1x16x32xbf16>
    tpu.vector_store %arg4[%c0_119, %c13, %c0_120, %c0_121], %214 {strides = array<i32>} : memref<2x16x16x32xbf16, #tpu.memory_space<vmem>>, vector<1x1x16x32xbf16>,
    %c896 = arith.constant 896 : index
    %c0_122 = arith.constant 0 : index
    %215 = tpu.strided_load %arg5[%c896, %c0_122] {strides = array<i32: 2, 1>} : memref<2048x32xf32, #tpu.memory_space<vmem>>, vector<16x32xf32>
    %c897 = arith.constant 897 : index
    %c0_123 = arith.constant 0 : index
    %216 = tpu.strided_load %arg5[%c897, %c0_123] {strides = array<i32: 2, 1>} : memref<2048x32xf32, #tpu.memory_space<vmem>>, vector<16x32xf32>
    %217 = arith.maximumf %215, %216 : vector<16x32xf32>
    %c928 = arith.constant 928 : index
    %c0_124 = arith.constant 0 : index
    %218 = tpu.strided_load %arg5[%c928, %c0_124] {strides = array<i32: 2, 1>} : memref<2048x32xf32, #tpu.memory_space<vmem>>, vector<16x32xf32>
    %c929 = arith.constant 929 : index
    %c0_125 = arith.constant 0 : index
    %219 = tpu.strided_load %arg5[%c929, %c0_125] {strides = array<i32: 2, 1>} : memref<2048x32xf32, #tpu.memory_space<vmem>>, vector<16x32xf32>
    %220 = arith.maximumf %218, %219 : vector<16x32xf32>
    %221 = arith.maximumf %217, %220 : vector<16x32xf32>
    %222 = vector.broadcast %4 : vector<1x32xf32> to vector<16x32xf32>
    %223 = arith.addf %221, %222 : vector<16x32xf32>
    %cst_126 = arith.constant 0.000000e+00 : f32
    %224 = vector.broadcast %cst_126 : f32 to vector<16x32xf32>
    %225 = arith.maximumf %223, %224 : vector<16x32xf32>
    %226 = arith.truncf %225 : vector<16x32xf32> to vector<16x32xbf16>
    %c0_127 = arith.constant 0 : index
    %c14 = arith.constant 14 : index
    %c0_128 = arith.constant 0 : index
    %c0_129 = arith.constant 0 : index
    %227 = vector.load %arg4[%c0_127, %c14, %c0_128, %c0_129] : memref<2x16x16x32xbf16, #tpu.memory_space<vmem>>, vector<1x1x16x32xbf16>
    %228 = vector.shape_cast %227 : vector<1x1x16x32xbf16> to vector<16x32xbf16>
    %229 = vector.shape_cast %226 : vector<16x32xbf16> to vector<1x1x16x32xbf16>
    tpu.vector_store %arg4[%c0_127, %c14, %c0_128, %c0_129], %229 {strides = array<i32>} : memref<2x16x16x32xbf16, #tpu.memory_space<vmem>>, vector<1x1x16x32xbf16>,
    %c960 = arith.constant 960 : index
    %c0_130 = arith.constant 0 : index
    %230 = tpu.strided_load %arg5[%c960, %c0_130] {strides = array<i32: 2, 1>} : memref<2048x32xf32, #tpu.memory_space<vmem>>, vector<16x32xf32>
    %c961 = arith.constant 961 : index
    %c0_131 = arith.constant 0 : index
    %231 = tpu.strided_load %arg5[%c961, %c0_131] {strides = array<i32: 2, 1>} : memref<2048x32xf32, #tpu.memory_space<vmem>>, vector<16x32xf32>
    %232 = arith.maximumf %230, %231 : vector<16x32xf32>
    %c992 = arith.constant 992 : index
    %c0_132 = arith.constant 0 : index
    %233 = tpu.strided_load %arg5[%c992, %c0_132] {strides = array<i32: 2, 1>} : memref<2048x32xf32, #tpu.memory_space<vmem>>, vector<16x32xf32>
    %c993 = arith.constant 993 : index
    %c0_133 = arith.constant 0 : index
    %234 = tpu.strided_load %arg5[%c993, %c0_133] {strides = array<i32: 2, 1>} : memref<2048x32xf32, #tpu.memory_space<vmem>>, vector<16x32xf32>
    %235 = arith.maximumf %233, %234 : vector<16x32xf32>
    %236 = arith.maximumf %232, %235 : vector<16x32xf32>
    %237 = vector.broadcast %4 : vector<1x32xf32> to vector<16x32xf32>
    %238 = arith.addf %236, %237 : vector<16x32xf32>
    %cst_134 = arith.constant 0.000000e+00 : f32
    %239 = vector.broadcast %cst_134 : f32 to vector<16x32xf32>
    %240 = arith.maximumf %238, %239 : vector<16x32xf32>
    %241 = arith.truncf %240 : vector<16x32xf32> to vector<16x32xbf16>
    %c0_135 = arith.constant 0 : index
    %c15 = arith.constant 15 : index
    %c0_136 = arith.constant 0 : index
    %c0_137 = arith.constant 0 : index
    %242 = vector.load %arg4[%c0_135, %c15, %c0_136, %c0_137] : memref<2x16x16x32xbf16, #tpu.memory_space<vmem>>, vector<1x1x16x32xbf16>
    %243 = vector.shape_cast %242 : vector<1x1x16x32xbf16> to vector<16x32xbf16>
    %244 = vector.shape_cast %241 : vector<16x32xbf16> to vector<1x1x16x32xbf16>
    tpu.vector_store %arg4[%c0_135, %c15, %c0_136, %c0_137], %244 {strides = array<i32>} : memref<2x16x16x32xbf16, #tpu.memory_space<vmem>>, vector<1x1x16x32xbf16>,
    %c1024 = arith.constant 1024 : index
    %c0_138 = arith.constant 0 : index
    %245 = tpu.strided_load %arg5[%c1024, %c0_138] {strides = array<i32: 2, 1>} : memref<2048x32xf32, #tpu.memory_space<vmem>>, vector<16x32xf32>
    %c1025 = arith.constant 1025 : index
    %c0_139 = arith.constant 0 : index
    %246 = tpu.strided_load %arg5[%c1025, %c0_139] {strides = array<i32: 2, 1>} : memref<2048x32xf32, #tpu.memory_space<vmem>>, vector<16x32xf32>
    %247 = arith.maximumf %245, %246 : vector<16x32xf32>
    %c1056 = arith.constant 1056 : index
    %c0_140 = arith.constant 0 : index
    %248 = tpu.strided_load %arg5[%c1056, %c0_140] {strides = array<i32: 2, 1>} : memref<2048x32xf32, #tpu.memory_space<vmem>>, vector<16x32xf32>
    %c1057 = arith.constant 1057 : index
    %c0_141 = arith.constant 0 : index
    %249 = tpu.strided_load %arg5[%c1057, %c0_141] {strides = array<i32: 2, 1>} : memref<2048x32xf32, #tpu.memory_space<vmem>>, vector<16x32xf32>
    %250 = arith.maximumf %248, %249 : vector<16x32xf32>
    %251 = arith.maximumf %247, %250 : vector<16x32xf32>
    %252 = vector.broadcast %4 : vector<1x32xf32> to vector<16x32xf32>
    %253 = arith.addf %251, %252 : vector<16x32xf32>
    %cst_142 = arith.constant 0.000000e+00 : f32
    %254 = vector.broadcast %cst_142 : f32 to vector<16x32xf32>
    %255 = arith.maximumf %253, %254 : vector<16x32xf32>
    %256 = arith.truncf %255 : vector<16x32xf32> to vector<16x32xbf16>
    %c1_143 = arith.constant 1 : index
    %c0_144 = arith.constant 0 : index
    %c0_145 = arith.constant 0 : index
    %c0_146 = arith.constant 0 : index
    %257 = vector.load %arg4[%c1_143, %c0_144, %c0_145, %c0_146] : memref<2x16x16x32xbf16, #tpu.memory_space<vmem>>, vector<1x1x16x32xbf16>
    %258 = vector.shape_cast %257 : vector<1x1x16x32xbf16> to vector<16x32xbf16>
    %259 = vector.shape_cast %256 : vector<16x32xbf16> to vector<1x1x16x32xbf16>
    tpu.vector_store %arg4[%c1_143, %c0_144, %c0_145, %c0_146], %259 {strides = array<i32>} : memref<2x16x16x32xbf16, #tpu.memory_space<vmem>>, vector<1x1x16x32xbf16>,
    %c1088 = arith.constant 1088 : index
    %c0_147 = arith.constant 0 : index
    %260 = tpu.strided_load %arg5[%c1088, %c0_147] {strides = array<i32: 2, 1>} : memref<2048x32xf32, #tpu.memory_space<vmem>>, vector<16x32xf32>
    %c1089 = arith.constant 1089 : index
    %c0_148 = arith.constant 0 : index
    %261 = tpu.strided_load %arg5[%c1089, %c0_148] {strides = array<i32: 2, 1>} : memref<2048x32xf32, #tpu.memory_space<vmem>>, vector<16x32xf32>
    %262 = arith.maximumf %260, %261 : vector<16x32xf32>
    %c1120 = arith.constant 1120 : index
    %c0_149 = arith.constant 0 : index
    %263 = tpu.strided_load %arg5[%c1120, %c0_149] {strides = array<i32: 2, 1>} : memref<2048x32xf32, #tpu.memory_space<vmem>>, vector<16x32xf32>
    %c1121 = arith.constant 1121 : index
    %c0_150 = arith.constant 0 : index
    %264 = tpu.strided_load %arg5[%c1121, %c0_150] {strides = array<i32: 2, 1>} : memref<2048x32xf32, #tpu.memory_space<vmem>>, vector<16x32xf32>
    %265 = arith.maximumf %263, %264 : vector<16x32xf32>
    %266 = arith.maximumf %262, %265 : vector<16x32xf32>
    %267 = vector.broadcast %4 : vector<1x32xf32> to vector<16x32xf32>
    %268 = arith.addf %266, %267 : vector<16x32xf32>
    %cst_151 = arith.constant 0.000000e+00 : f32
    %269 = vector.broadcast %cst_151 : f32 to vector<16x32xf32>
    %270 = arith.maximumf %268, %269 : vector<16x32xf32>
    %271 = arith.truncf %270 : vector<16x32xf32> to vector<16x32xbf16>
    %c1_152 = arith.constant 1 : index
    %c1_153 = arith.constant 1 : index
    %c0_154 = arith.constant 0 : index
    %c0_155 = arith.constant 0 : index
    %272 = vector.load %arg4[%c1_152, %c1_153, %c0_154, %c0_155] : memref<2x16x16x32xbf16, #tpu.memory_space<vmem>>, vector<1x1x16x32xbf16>
    %273 = vector.shape_cast %272 : vector<1x1x16x32xbf16> to vector<16x32xbf16>
    %274 = vector.shape_cast %271 : vector<16x32xbf16> to vector<1x1x16x32xbf16>
    tpu.vector_store %arg4[%c1_152, %c1_153, %c0_154, %c0_155], %274 {strides = array<i32>} : memref<2x16x16x32xbf16, #tpu.memory_space<vmem>>, vector<1x1x16x32xbf16>,
    %c1152 = arith.constant 1152 : index
    %c0_156 = arith.constant 0 : index
    %275 = tpu.strided_load %arg5[%c1152, %c0_156] {strides = array<i32: 2, 1>} : memref<2048x32xf32, #tpu.memory_space<vmem>>, vector<16x32xf32>
    %c1153 = arith.constant 1153 : index
    %c0_157 = arith.constant 0 : index
    %276 = tpu.strided_load %arg5[%c1153, %c0_157] {strides = array<i32: 2, 1>} : memref<2048x32xf32, #tpu.memory_space<vmem>>, vector<16x32xf32>
    %277 = arith.maximumf %275, %276 : vector<16x32xf32>
    %c1184 = arith.constant 1184 : index
    %c0_158 = arith.constant 0 : index
    %278 = tpu.strided_load %arg5[%c1184, %c0_158] {strides = array<i32: 2, 1>} : memref<2048x32xf32, #tpu.memory_space<vmem>>, vector<16x32xf32>
    %c1185 = arith.constant 1185 : index
    %c0_159 = arith.constant 0 : index
    %279 = tpu.strided_load %arg5[%c1185, %c0_159] {strides = array<i32: 2, 1>} : memref<2048x32xf32, #tpu.memory_space<vmem>>, vector<16x32xf32>
    %280 = arith.maximumf %278, %279 : vector<16x32xf32>
    %281 = arith.maximumf %277, %280 : vector<16x32xf32>
    %282 = vector.broadcast %4 : vector<1x32xf32> to vector<16x32xf32>
    %283 = arith.addf %281, %282 : vector<16x32xf32>
    %cst_160 = arith.constant 0.000000e+00 : f32
    %284 = vector.broadcast %cst_160 : f32 to vector<16x32xf32>
    %285 = arith.maximumf %283, %284 : vector<16x32xf32>
    %286 = arith.truncf %285 : vector<16x32xf32> to vector<16x32xbf16>
    %c1_161 = arith.constant 1 : index
    %c2_162 = arith.constant 2 : index
    %c0_163 = arith.constant 0 : index
    %c0_164 = arith.constant 0 : index
    %287 = vector.load %arg4[%c1_161, %c2_162, %c0_163, %c0_164] : memref<2x16x16x32xbf16, #tpu.memory_space<vmem>>, vector<1x1x16x32xbf16>
    %288 = vector.shape_cast %287 : vector<1x1x16x32xbf16> to vector<16x32xbf16>
    %289 = vector.shape_cast %286 : vector<16x32xbf16> to vector<1x1x16x32xbf16>
    tpu.vector_store %arg4[%c1_161, %c2_162, %c0_163, %c0_164], %289 {strides = array<i32>} : memref<2x16x16x32xbf16, #tpu.memory_space<vmem>>, vector<1x1x16x32xbf16>,
    %c1216 = arith.constant 1216 : index
    %c0_165 = arith.constant 0 : index
    %290 = tpu.strided_load %arg5[%c1216, %c0_165] {strides = array<i32: 2, 1>} : memref<2048x32xf32, #tpu.memory_space<vmem>>, vector<16x32xf32>
    %c1217 = arith.constant 1217 : index
    %c0_166 = arith.constant 0 : index
    %291 = tpu.strided_load %arg5[%c1217, %c0_166] {strides = array<i32: 2, 1>} : memref<2048x32xf32, #tpu.memory_space<vmem>>, vector<16x32xf32>
    %292 = arith.maximumf %290, %291 : vector<16x32xf32>
    %c1248 = arith.constant 1248 : index
    %c0_167 = arith.constant 0 : index
    %293 = tpu.strided_load %arg5[%c1248, %c0_167] {strides = array<i32: 2, 1>} : memref<2048x32xf32, #tpu.memory_space<vmem>>, vector<16x32xf32>
    %c1249 = arith.constant 1249 : index
    %c0_168 = arith.constant 0 : index
    %294 = tpu.strided_load %arg5[%c1249, %c0_168] {strides = array<i32: 2, 1>} : memref<2048x32xf32, #tpu.memory_space<vmem>>, vector<16x32xf32>
    %295 = arith.maximumf %293, %294 : vector<16x32xf32>
    %296 = arith.maximumf %292, %295 : vector<16x32xf32>
    %297 = vector.broadcast %4 : vector<1x32xf32> to vector<16x32xf32>
    %298 = arith.addf %296, %297 : vector<16x32xf32>
    %cst_169 = arith.constant 0.000000e+00 : f32
    %299 = vector.broadcast %cst_169 : f32 to vector<16x32xf32>
    %300 = arith.maximumf %298, %299 : vector<16x32xf32>
    %301 = arith.truncf %300 : vector<16x32xf32> to vector<16x32xbf16>
    %c1_170 = arith.constant 1 : index
    %c3_171 = arith.constant 3 : index
    %c0_172 = arith.constant 0 : index
    %c0_173 = arith.constant 0 : index
    %302 = vector.load %arg4[%c1_170, %c3_171, %c0_172, %c0_173] : memref<2x16x16x32xbf16, #tpu.memory_space<vmem>>, vector<1x1x16x32xbf16>
    %303 = vector.shape_cast %302 : vector<1x1x16x32xbf16> to vector<16x32xbf16>
    %304 = vector.shape_cast %301 : vector<16x32xbf16> to vector<1x1x16x32xbf16>
    tpu.vector_store %arg4[%c1_170, %c3_171, %c0_172, %c0_173], %304 {strides = array<i32>} : memref<2x16x16x32xbf16, #tpu.memory_space<vmem>>, vector<1x1x16x32xbf16>,
    %c1280 = arith.constant 1280 : index
    %c0_174 = arith.constant 0 : index
    %305 = tpu.strided_load %arg5[%c1280, %c0_174] {strides = array<i32: 2, 1>} : memref<2048x32xf32, #tpu.memory_space<vmem>>, vector<16x32xf32>
    %c1281 = arith.constant 1281 : index
    %c0_175 = arith.constant 0 : index
    %306 = tpu.strided_load %arg5[%c1281, %c0_175] {strides = array<i32: 2, 1>} : memref<2048x32xf32, #tpu.memory_space<vmem>>, vector<16x32xf32>
    %307 = arith.maximumf %305, %306 : vector<16x32xf32>
    %c1312 = arith.constant 1312 : index
    %c0_176 = arith.constant 0 : index
    %308 = tpu.strided_load %arg5[%c1312, %c0_176] {strides = array<i32: 2, 1>} : memref<2048x32xf32, #tpu.memory_space<vmem>>, vector<16x32xf32>
    %c1313 = arith.constant 1313 : index
    %c0_177 = arith.constant 0 : index
    %309 = tpu.strided_load %arg5[%c1313, %c0_177] {strides = array<i32: 2, 1>} : memref<2048x32xf32, #tpu.memory_space<vmem>>, vector<16x32xf32>
    %310 = arith.maximumf %308, %309 : vector<16x32xf32>
    %311 = arith.maximumf %307, %310 : vector<16x32xf32>
    %312 = vector.broadcast %4 : vector<1x32xf32> to vector<16x32xf32>
    %313 = arith.addf %311, %312 : vector<16x32xf32>
    %cst_178 = arith.constant 0.000000e+00 : f32
    %314 = vector.broadcast %cst_178 : f32 to vector<16x32xf32>
    %315 = arith.maximumf %313, %314 : vector<16x32xf32>
    %316 = arith.truncf %315 : vector<16x32xf32> to vector<16x32xbf16>
    %c1_179 = arith.constant 1 : index
    %c4_180 = arith.constant 4 : index
    %c0_181 = arith.constant 0 : index
    %c0_182 = arith.constant 0 : index
    %317 = vector.load %arg4[%c1_179, %c4_180, %c0_181, %c0_182] : memref<2x16x16x32xbf16, #tpu.memory_space<vmem>>, vector<1x1x16x32xbf16>
    %318 = vector.shape_cast %317 : vector<1x1x16x32xbf16> to vector<16x32xbf16>
    %319 = vector.shape_cast %316 : vector<16x32xbf16> to vector<1x1x16x32xbf16>
    tpu.vector_store %arg4[%c1_179, %c4_180, %c0_181, %c0_182], %319 {strides = array<i32>} : memref<2x16x16x32xbf16, #tpu.memory_space<vmem>>, vector<1x1x16x32xbf16>,
    %c1344 = arith.constant 1344 : index
    %c0_183 = arith.constant 0 : index
    %320 = tpu.strided_load %arg5[%c1344, %c0_183] {strides = array<i32: 2, 1>} : memref<2048x32xf32, #tpu.memory_space<vmem>>, vector<16x32xf32>
    %c1345 = arith.constant 1345 : index
    %c0_184 = arith.constant 0 : index
    %321 = tpu.strided_load %arg5[%c1345, %c0_184] {strides = array<i32: 2, 1>} : memref<2048x32xf32, #tpu.memory_space<vmem>>, vector<16x32xf32>
    %322 = arith.maximumf %320, %321 : vector<16x32xf32>
    %c1376 = arith.constant 1376 : index
    %c0_185 = arith.constant 0 : index
    %323 = tpu.strided_load %arg5[%c1376, %c0_185] {strides = array<i32: 2, 1>} : memref<2048x32xf32, #tpu.memory_space<vmem>>, vector<16x32xf32>
    %c1377 = arith.constant 1377 : index
    %c0_186 = arith.constant 0 : index
    %324 = tpu.strided_load %arg5[%c1377, %c0_186] {strides = array<i32: 2, 1>} : memref<2048x32xf32, #tpu.memory_space<vmem>>, vector<16x32xf32>
    %325 = arith.maximumf %323, %324 : vector<16x32xf32>
    %326 = arith.maximumf %322, %325 : vector<16x32xf32>
    %327 = vector.broadcast %4 : vector<1x32xf32> to vector<16x32xf32>
    %328 = arith.addf %326, %327 : vector<16x32xf32>
    %cst_187 = arith.constant 0.000000e+00 : f32
    %329 = vector.broadcast %cst_187 : f32 to vector<16x32xf32>
    %330 = arith.maximumf %328, %329 : vector<16x32xf32>
    %331 = arith.truncf %330 : vector<16x32xf32> to vector<16x32xbf16>
    %c1_188 = arith.constant 1 : index
    %c5_189 = arith.constant 5 : index
    %c0_190 = arith.constant 0 : index
    %c0_191 = arith.constant 0 : index
    %332 = vector.load %arg4[%c1_188, %c5_189, %c0_190, %c0_191] : memref<2x16x16x32xbf16, #tpu.memory_space<vmem>>, vector<1x1x16x32xbf16>
    %333 = vector.shape_cast %332 : vector<1x1x16x32xbf16> to vector<16x32xbf16>
    %334 = vector.shape_cast %331 : vector<16x32xbf16> to vector<1x1x16x32xbf16>
    tpu.vector_store %arg4[%c1_188, %c5_189, %c0_190, %c0_191], %334 {strides = array<i32>} : memref<2x16x16x32xbf16, #tpu.memory_space<vmem>>, vector<1x1x16x32xbf16>,
    %c1408 = arith.constant 1408 : index
    %c0_192 = arith.constant 0 : index
    %335 = tpu.strided_load %arg5[%c1408, %c0_192] {strides = array<i32: 2, 1>} : memref<2048x32xf32, #tpu.memory_space<vmem>>, vector<16x32xf32>
    %c1409 = arith.constant 1409 : index
    %c0_193 = arith.constant 0 : index
    %336 = tpu.strided_load %arg5[%c1409, %c0_193] {strides = array<i32: 2, 1>} : memref<2048x32xf32, #tpu.memory_space<vmem>>, vector<16x32xf32>
    %337 = arith.maximumf %335, %336 : vector<16x32xf32>
    %c1440 = arith.constant 1440 : index
    %c0_194 = arith.constant 0 : index
    %338 = tpu.strided_load %arg5[%c1440, %c0_194] {strides = array<i32: 2, 1>} : memref<2048x32xf32, #tpu.memory_space<vmem>>, vector<16x32xf32>
    %c1441 = arith.constant 1441 : index
    %c0_195 = arith.constant 0 : index
    %339 = tpu.strided_load %arg5[%c1441, %c0_195] {strides = array<i32: 2, 1>} : memref<2048x32xf32, #tpu.memory_space<vmem>>, vector<16x32xf32>
    %340 = arith.maximumf %338, %339 : vector<16x32xf32>
    %341 = arith.maximumf %337, %340 : vector<16x32xf32>
    %342 = vector.broadcast %4 : vector<1x32xf32> to vector<16x32xf32>
    %343 = arith.addf %341, %342 : vector<16x32xf32>
    %cst_196 = arith.constant 0.000000e+00 : f32
    %344 = vector.broadcast %cst_196 : f32 to vector<16x32xf32>
    %345 = arith.maximumf %343, %344 : vector<16x32xf32>
    %346 = arith.truncf %345 : vector<16x32xf32> to vector<16x32xbf16>
    %c1_197 = arith.constant 1 : index
    %c6_198 = arith.constant 6 : index
    %c0_199 = arith.constant 0 : index
    %c0_200 = arith.constant 0 : index
    %347 = vector.load %arg4[%c1_197, %c6_198, %c0_199, %c0_200] : memref<2x16x16x32xbf16, #tpu.memory_space<vmem>>, vector<1x1x16x32xbf16>
    %348 = vector.shape_cast %347 : vector<1x1x16x32xbf16> to vector<16x32xbf16>
    %349 = vector.shape_cast %346 : vector<16x32xbf16> to vector<1x1x16x32xbf16>
    tpu.vector_store %arg4[%c1_197, %c6_198, %c0_199, %c0_200], %349 {strides = array<i32>} : memref<2x16x16x32xbf16, #tpu.memory_space<vmem>>, vector<1x1x16x32xbf16>,
    %c1472 = arith.constant 1472 : index
    %c0_201 = arith.constant 0 : index
    %350 = tpu.strided_load %arg5[%c1472, %c0_201] {strides = array<i32: 2, 1>} : memref<2048x32xf32, #tpu.memory_space<vmem>>, vector<16x32xf32>
    %c1473 = arith.constant 1473 : index
    %c0_202 = arith.constant 0 : index
    %351 = tpu.strided_load %arg5[%c1473, %c0_202] {strides = array<i32: 2, 1>} : memref<2048x32xf32, #tpu.memory_space<vmem>>, vector<16x32xf32>
    %352 = arith.maximumf %350, %351 : vector<16x32xf32>
    %c1504 = arith.constant 1504 : index
    %c0_203 = arith.constant 0 : index
    %353 = tpu.strided_load %arg5[%c1504, %c0_203] {strides = array<i32: 2, 1>} : memref<2048x32xf32, #tpu.memory_space<vmem>>, vector<16x32xf32>
    %c1505 = arith.constant 1505 : index
    %c0_204 = arith.constant 0 : index
    %354 = tpu.strided_load %arg5[%c1505, %c0_204] {strides = array<i32: 2, 1>} : memref<2048x32xf32, #tpu.memory_space<vmem>>, vector<16x32xf32>
    %355 = arith.maximumf %353, %354 : vector<16x32xf32>
    %356 = arith.maximumf %352, %355 : vector<16x32xf32>
    %357 = vector.broadcast %4 : vector<1x32xf32> to vector<16x32xf32>
    %358 = arith.addf %356, %357 : vector<16x32xf32>
    %cst_205 = arith.constant 0.000000e+00 : f32
    %359 = vector.broadcast %cst_205 : f32 to vector<16x32xf32>
    %360 = arith.maximumf %358, %359 : vector<16x32xf32>
    %361 = arith.truncf %360 : vector<16x32xf32> to vector<16x32xbf16>
    %c1_206 = arith.constant 1 : index
    %c7_207 = arith.constant 7 : index
    %c0_208 = arith.constant 0 : index
    %c0_209 = arith.constant 0 : index
    %362 = vector.load %arg4[%c1_206, %c7_207, %c0_208, %c0_209] : memref<2x16x16x32xbf16, #tpu.memory_space<vmem>>, vector<1x1x16x32xbf16>
    %363 = vector.shape_cast %362 : vector<1x1x16x32xbf16> to vector<16x32xbf16>
    %364 = vector.shape_cast %361 : vector<16x32xbf16> to vector<1x1x16x32xbf16>
    tpu.vector_store %arg4[%c1_206, %c7_207, %c0_208, %c0_209], %364 {strides = array<i32>} : memref<2x16x16x32xbf16, #tpu.memory_space<vmem>>, vector<1x1x16x32xbf16>,
    %c1536 = arith.constant 1536 : index
    %c0_210 = arith.constant 0 : index
    %365 = tpu.strided_load %arg5[%c1536, %c0_210] {strides = array<i32: 2, 1>} : memref<2048x32xf32, #tpu.memory_space<vmem>>, vector<16x32xf32>
    %c1537 = arith.constant 1537 : index
    %c0_211 = arith.constant 0 : index
    %366 = tpu.strided_load %arg5[%c1537, %c0_211] {strides = array<i32: 2, 1>} : memref<2048x32xf32, #tpu.memory_space<vmem>>, vector<16x32xf32>
    %367 = arith.maximumf %365, %366 : vector<16x32xf32>
    %c1568 = arith.constant 1568 : index
    %c0_212 = arith.constant 0 : index
    %368 = tpu.strided_load %arg5[%c1568, %c0_212] {strides = array<i32: 2, 1>} : memref<2048x32xf32, #tpu.memory_space<vmem>>, vector<16x32xf32>
    %c1569 = arith.constant 1569 : index
    %c0_213 = arith.constant 0 : index
    %369 = tpu.strided_load %arg5[%c1569, %c0_213] {strides = array<i32: 2, 1>} : memref<2048x32xf32, #tpu.memory_space<vmem>>, vector<16x32xf32>
    %370 = arith.maximumf %368, %369 : vector<16x32xf32>
    %371 = arith.maximumf %367, %370 : vector<16x32xf32>
    %372 = vector.broadcast %4 : vector<1x32xf32> to vector<16x32xf32>
    %373 = arith.addf %371, %372 : vector<16x32xf32>
    %cst_214 = arith.constant 0.000000e+00 : f32
    %374 = vector.broadcast %cst_214 : f32 to vector<16x32xf32>
    %375 = arith.maximumf %373, %374 : vector<16x32xf32>
    %376 = arith.truncf %375 : vector<16x32xf32> to vector<16x32xbf16>
    %c1_215 = arith.constant 1 : index
    %c8_216 = arith.constant 8 : index
    %c0_217 = arith.constant 0 : index
    %c0_218 = arith.constant 0 : index
    %377 = vector.load %arg4[%c1_215, %c8_216, %c0_217, %c0_218] : memref<2x16x16x32xbf16, #tpu.memory_space<vmem>>, vector<1x1x16x32xbf16>
    %378 = vector.shape_cast %377 : vector<1x1x16x32xbf16> to vector<16x32xbf16>
    %379 = vector.shape_cast %376 : vector<16x32xbf16> to vector<1x1x16x32xbf16>
    tpu.vector_store %arg4[%c1_215, %c8_216, %c0_217, %c0_218], %379 {strides = array<i32>} : memref<2x16x16x32xbf16, #tpu.memory_space<vmem>>, vector<1x1x16x32xbf16>,
    %c1600 = arith.constant 1600 : index
    %c0_219 = arith.constant 0 : index
    %380 = tpu.strided_load %arg5[%c1600, %c0_219] {strides = array<i32: 2, 1>} : memref<2048x32xf32, #tpu.memory_space<vmem>>, vector<16x32xf32>
    %c1601 = arith.constant 1601 : index
    %c0_220 = arith.constant 0 : index
    %381 = tpu.strided_load %arg5[%c1601, %c0_220] {strides = array<i32: 2, 1>} : memref<2048x32xf32, #tpu.memory_space<vmem>>, vector<16x32xf32>
    %382 = arith.maximumf %380, %381 : vector<16x32xf32>
    %c1632 = arith.constant 1632 : index
    %c0_221 = arith.constant 0 : index
    %383 = tpu.strided_load %arg5[%c1632, %c0_221] {strides = array<i32: 2, 1>} : memref<2048x32xf32, #tpu.memory_space<vmem>>, vector<16x32xf32>
    %c1633 = arith.constant 1633 : index
    %c0_222 = arith.constant 0 : index
    %384 = tpu.strided_load %arg5[%c1633, %c0_222] {strides = array<i32: 2, 1>} : memref<2048x32xf32, #tpu.memory_space<vmem>>, vector<16x32xf32>
    %385 = arith.maximumf %383, %384 : vector<16x32xf32>
    %386 = arith.maximumf %382, %385 : vector<16x32xf32>
    %387 = vector.broadcast %4 : vector<1x32xf32> to vector<16x32xf32>
    %388 = arith.addf %386, %387 : vector<16x32xf32>
    %cst_223 = arith.constant 0.000000e+00 : f32
    %389 = vector.broadcast %cst_223 : f32 to vector<16x32xf32>
    %390 = arith.maximumf %388, %389 : vector<16x32xf32>
    %391 = arith.truncf %390 : vector<16x32xf32> to vector<16x32xbf16>
    %c1_224 = arith.constant 1 : index
    %c9_225 = arith.constant 9 : index
    %c0_226 = arith.constant 0 : index
    %c0_227 = arith.constant 0 : index
    %392 = vector.load %arg4[%c1_224, %c9_225, %c0_226, %c0_227] : memref<2x16x16x32xbf16, #tpu.memory_space<vmem>>, vector<1x1x16x32xbf16>
    %393 = vector.shape_cast %392 : vector<1x1x16x32xbf16> to vector<16x32xbf16>
    %394 = vector.shape_cast %391 : vector<16x32xbf16> to vector<1x1x16x32xbf16>
    tpu.vector_store %arg4[%c1_224, %c9_225, %c0_226, %c0_227], %394 {strides = array<i32>} : memref<2x16x16x32xbf16, #tpu.memory_space<vmem>>, vector<1x1x16x32xbf16>,
    %c1664 = arith.constant 1664 : index
    %c0_228 = arith.constant 0 : index
    %395 = tpu.strided_load %arg5[%c1664, %c0_228] {strides = array<i32: 2, 1>} : memref<2048x32xf32, #tpu.memory_space<vmem>>, vector<16x32xf32>
    %c1665 = arith.constant 1665 : index
    %c0_229 = arith.constant 0 : index
    %396 = tpu.strided_load %arg5[%c1665, %c0_229] {strides = array<i32: 2, 1>} : memref<2048x32xf32, #tpu.memory_space<vmem>>, vector<16x32xf32>
    %397 = arith.maximumf %395, %396 : vector<16x32xf32>
    %c1696 = arith.constant 1696 : index
    %c0_230 = arith.constant 0 : index
    %398 = tpu.strided_load %arg5[%c1696, %c0_230] {strides = array<i32: 2, 1>} : memref<2048x32xf32, #tpu.memory_space<vmem>>, vector<16x32xf32>
    %c1697 = arith.constant 1697 : index
    %c0_231 = arith.constant 0 : index
    %399 = tpu.strided_load %arg5[%c1697, %c0_231] {strides = array<i32: 2, 1>} : memref<2048x32xf32, #tpu.memory_space<vmem>>, vector<16x32xf32>
    %400 = arith.maximumf %398, %399 : vector<16x32xf32>
    %401 = arith.maximumf %397, %400 : vector<16x32xf32>
    %402 = vector.broadcast %4 : vector<1x32xf32> to vector<16x32xf32>
    %403 = arith.addf %401, %402 : vector<16x32xf32>
    %cst_232 = arith.constant 0.000000e+00 : f32
    %404 = vector.broadcast %cst_232 : f32 to vector<16x32xf32>
    %405 = arith.maximumf %403, %404 : vector<16x32xf32>
    %406 = arith.truncf %405 : vector<16x32xf32> to vector<16x32xbf16>
    %c1_233 = arith.constant 1 : index
    %c10_234 = arith.constant 10 : index
    %c0_235 = arith.constant 0 : index
    %c0_236 = arith.constant 0 : index
    %407 = vector.load %arg4[%c1_233, %c10_234, %c0_235, %c0_236] : memref<2x16x16x32xbf16, #tpu.memory_space<vmem>>, vector<1x1x16x32xbf16>
    %408 = vector.shape_cast %407 : vector<1x1x16x32xbf16> to vector<16x32xbf16>
    %409 = vector.shape_cast %406 : vector<16x32xbf16> to vector<1x1x16x32xbf16>
    tpu.vector_store %arg4[%c1_233, %c10_234, %c0_235, %c0_236], %409 {strides = array<i32>} : memref<2x16x16x32xbf16, #tpu.memory_space<vmem>>, vector<1x1x16x32xbf16>,
    %c1728 = arith.constant 1728 : index
    %c0_237 = arith.constant 0 : index
    %410 = tpu.strided_load %arg5[%c1728, %c0_237] {strides = array<i32: 2, 1>} : memref<2048x32xf32, #tpu.memory_space<vmem>>, vector<16x32xf32>
    %c1729 = arith.constant 1729 : index
    %c0_238 = arith.constant 0 : index
    %411 = tpu.strided_load %arg5[%c1729, %c0_238] {strides = array<i32: 2, 1>} : memref<2048x32xf32, #tpu.memory_space<vmem>>, vector<16x32xf32>
    %412 = arith.maximumf %410, %411 : vector<16x32xf32>
    %c1760 = arith.constant 1760 : index
    %c0_239 = arith.constant 0 : index
    %413 = tpu.strided_load %arg5[%c1760, %c0_239] {strides = array<i32: 2, 1>} : memref<2048x32xf32, #tpu.memory_space<vmem>>, vector<16x32xf32>
    %c1761 = arith.constant 1761 : index
    %c0_240 = arith.constant 0 : index
    %414 = tpu.strided_load %arg5[%c1761, %c0_240] {strides = array<i32: 2, 1>} : memref<2048x32xf32, #tpu.memory_space<vmem>>, vector<16x32xf32>
    %415 = arith.maximumf %413, %414 : vector<16x32xf32>
    %416 = arith.maximumf %412, %415 : vector<16x32xf32>
    %417 = vector.broadcast %4 : vector<1x32xf32> to vector<16x32xf32>
    %418 = arith.addf %416, %417 : vector<16x32xf32>
    %cst_241 = arith.constant 0.000000e+00 : f32
    %419 = vector.broadcast %cst_241 : f32 to vector<16x32xf32>
    %420 = arith.maximumf %418, %419 : vector<16x32xf32>
    %421 = arith.truncf %420 : vector<16x32xf32> to vector<16x32xbf16>
    %c1_242 = arith.constant 1 : index
    %c11_243 = arith.constant 11 : index
    %c0_244 = arith.constant 0 : index
    %c0_245 = arith.constant 0 : index
    %422 = vector.load %arg4[%c1_242, %c11_243, %c0_244, %c0_245] : memref<2x16x16x32xbf16, #tpu.memory_space<vmem>>, vector<1x1x16x32xbf16>
    %423 = vector.shape_cast %422 : vector<1x1x16x32xbf16> to vector<16x32xbf16>
    %424 = vector.shape_cast %421 : vector<16x32xbf16> to vector<1x1x16x32xbf16>
    tpu.vector_store %arg4[%c1_242, %c11_243, %c0_244, %c0_245], %424 {strides = array<i32>} : memref<2x16x16x32xbf16, #tpu.memory_space<vmem>>, vector<1x1x16x32xbf16>,
    %c1792 = arith.constant 1792 : index
    %c0_246 = arith.constant 0 : index
    %425 = tpu.strided_load %arg5[%c1792, %c0_246] {strides = array<i32: 2, 1>} : memref<2048x32xf32, #tpu.memory_space<vmem>>, vector<16x32xf32>
    %c1793 = arith.constant 1793 : index
    %c0_247 = arith.constant 0 : index
    %426 = tpu.strided_load %arg5[%c1793, %c0_247] {strides = array<i32: 2, 1>} : memref<2048x32xf32, #tpu.memory_space<vmem>>, vector<16x32xf32>
    %427 = arith.maximumf %425, %426 : vector<16x32xf32>
    %c1824 = arith.constant 1824 : index
    %c0_248 = arith.constant 0 : index
    %428 = tpu.strided_load %arg5[%c1824, %c0_248] {strides = array<i32: 2, 1>} : memref<2048x32xf32, #tpu.memory_space<vmem>>, vector<16x32xf32>
    %c1825 = arith.constant 1825 : index
    %c0_249 = arith.constant 0 : index
    %429 = tpu.strided_load %arg5[%c1825, %c0_249] {strides = array<i32: 2, 1>} : memref<2048x32xf32, #tpu.memory_space<vmem>>, vector<16x32xf32>
    %430 = arith.maximumf %428, %429 : vector<16x32xf32>
    %431 = arith.maximumf %427, %430 : vector<16x32xf32>
    %432 = vector.broadcast %4 : vector<1x32xf32> to vector<16x32xf32>
    %433 = arith.addf %431, %432 : vector<16x32xf32>
    %cst_250 = arith.constant 0.000000e+00 : f32
    %434 = vector.broadcast %cst_250 : f32 to vector<16x32xf32>
    %435 = arith.maximumf %433, %434 : vector<16x32xf32>
    %436 = arith.truncf %435 : vector<16x32xf32> to vector<16x32xbf16>
    %c1_251 = arith.constant 1 : index
    %c12_252 = arith.constant 12 : index
    %c0_253 = arith.constant 0 : index
    %c0_254 = arith.constant 0 : index
    %437 = vector.load %arg4[%c1_251, %c12_252, %c0_253, %c0_254] : memref<2x16x16x32xbf16, #tpu.memory_space<vmem>>, vector<1x1x16x32xbf16>
    %438 = vector.shape_cast %437 : vector<1x1x16x32xbf16> to vector<16x32xbf16>
    %439 = vector.shape_cast %436 : vector<16x32xbf16> to vector<1x1x16x32xbf16>
    tpu.vector_store %arg4[%c1_251, %c12_252, %c0_253, %c0_254], %439 {strides = array<i32>} : memref<2x16x16x32xbf16, #tpu.memory_space<vmem>>, vector<1x1x16x32xbf16>,
    %c1856 = arith.constant 1856 : index
    %c0_255 = arith.constant 0 : index
    %440 = tpu.strided_load %arg5[%c1856, %c0_255] {strides = array<i32: 2, 1>} : memref<2048x32xf32, #tpu.memory_space<vmem>>, vector<16x32xf32>
    %c1857 = arith.constant 1857 : index
    %c0_256 = arith.constant 0 : index
    %441 = tpu.strided_load %arg5[%c1857, %c0_256] {strides = array<i32: 2, 1>} : memref<2048x32xf32, #tpu.memory_space<vmem>>, vector<16x32xf32>
    %442 = arith.maximumf %440, %441 : vector<16x32xf32>
    %c1888 = arith.constant 1888 : index
    %c0_257 = arith.constant 0 : index
    %443 = tpu.strided_load %arg5[%c1888, %c0_257] {strides = array<i32: 2, 1>} : memref<2048x32xf32, #tpu.memory_space<vmem>>, vector<16x32xf32>
    %c1889 = arith.constant 1889 : index
    %c0_258 = arith.constant 0 : index
    %444 = tpu.strided_load %arg5[%c1889, %c0_258] {strides = array<i32: 2, 1>} : memref<2048x32xf32, #tpu.memory_space<vmem>>, vector<16x32xf32>
    %445 = arith.maximumf %443, %444 : vector<16x32xf32>
    %446 = arith.maximumf %442, %445 : vector<16x32xf32>
    %447 = vector.broadcast %4 : vector<1x32xf32> to vector<16x32xf32>
    %448 = arith.addf %446, %447 : vector<16x32xf32>
    %cst_259 = arith.constant 0.000000e+00 : f32
    %449 = vector.broadcast %cst_259 : f32 to vector<16x32xf32>
    %450 = arith.maximumf %448, %449 : vector<16x32xf32>
    %451 = arith.truncf %450 : vector<16x32xf32> to vector<16x32xbf16>
    %c1_260 = arith.constant 1 : index
    %c13_261 = arith.constant 13 : index
    %c0_262 = arith.constant 0 : index
    %c0_263 = arith.constant 0 : index
    %452 = vector.load %arg4[%c1_260, %c13_261, %c0_262, %c0_263] : memref<2x16x16x32xbf16, #tpu.memory_space<vmem>>, vector<1x1x16x32xbf16>
    %453 = vector.shape_cast %452 : vector<1x1x16x32xbf16> to vector<16x32xbf16>
    %454 = vector.shape_cast %451 : vector<16x32xbf16> to vector<1x1x16x32xbf16>
    tpu.vector_store %arg4[%c1_260, %c13_261, %c0_262, %c0_263], %454 {strides = array<i32>} : memref<2x16x16x32xbf16, #tpu.memory_space<vmem>>, vector<1x1x16x32xbf16>,
    %c1920 = arith.constant 1920 : index
    %c0_264 = arith.constant 0 : index
    %455 = tpu.strided_load %arg5[%c1920, %c0_264] {strides = array<i32: 2, 1>} : memref<2048x32xf32, #tpu.memory_space<vmem>>, vector<16x32xf32>
    %c1921 = arith.constant 1921 : index
    %c0_265 = arith.constant 0 : index
    %456 = tpu.strided_load %arg5[%c1921, %c0_265] {strides = array<i32: 2, 1>} : memref<2048x32xf32, #tpu.memory_space<vmem>>, vector<16x32xf32>
    %457 = arith.maximumf %455, %456 : vector<16x32xf32>
    %c1952 = arith.constant 1952 : index
    %c0_266 = arith.constant 0 : index
    %458 = tpu.strided_load %arg5[%c1952, %c0_266] {strides = array<i32: 2, 1>} : memref<2048x32xf32, #tpu.memory_space<vmem>>, vector<16x32xf32>
    %c1953 = arith.constant 1953 : index
    %c0_267 = arith.constant 0 : index
    %459 = tpu.strided_load %arg5[%c1953, %c0_267] {strides = array<i32: 2, 1>} : memref<2048x32xf32, #tpu.memory_space<vmem>>, vector<16x32xf32>
    %460 = arith.maximumf %458, %459 : vector<16x32xf32>
    %461 = arith.maximumf %457, %460 : vector<16x32xf32>
    %462 = vector.broadcast %4 : vector<1x32xf32> to vector<16x32xf32>
    %463 = arith.addf %461, %462 : vector<16x32xf32>
    %cst_268 = arith.constant 0.000000e+00 : f32
    %464 = vector.broadcast %cst_268 : f32 to vector<16x32xf32>
    %465 = arith.maximumf %463, %464 : vector<16x32xf32>
    %466 = arith.truncf %465 : vector<16x32xf32> to vector<16x32xbf16>
    %c1_269 = arith.constant 1 : index
    %c14_270 = arith.constant 14 : index
    %c0_271 = arith.constant 0 : index
    %c0_272 = arith.constant 0 : index
    %467 = vector.load %arg4[%c1_269, %c14_270, %c0_271, %c0_272] : memref<2x16x16x32xbf16, #tpu.memory_space<vmem>>, vector<1x1x16x32xbf16>
    %468 = vector.shape_cast %467 : vector<1x1x16x32xbf16> to vector<16x32xbf16>
    %469 = vector.shape_cast %466 : vector<16x32xbf16> to vector<1x1x16x32xbf16>
    tpu.vector_store %arg4[%c1_269, %c14_270, %c0_271, %c0_272], %469 {strides = array<i32>} : memref<2x16x16x32xbf16, #tpu.memory_space<vmem>>, vector<1x1x16x32xbf16>,
    %c1984 = arith.constant 1984 : index
    %c0_273 = arith.constant 0 : index
    %470 = tpu.strided_load %arg5[%c1984, %c0_273] {strides = array<i32: 2, 1>} : memref<2048x32xf32, #tpu.memory_space<vmem>>, vector<16x32xf32>
    %c1985 = arith.constant 1985 : index
    %c0_274 = arith.constant 0 : index
    %471 = tpu.strided_load %arg5[%c1985, %c0_274] {strides = array<i32: 2, 1>} : memref<2048x32xf32, #tpu.memory_space<vmem>>, vector<16x32xf32>
    %472 = arith.maximumf %470, %471 : vector<16x32xf32>
    %c2016 = arith.constant 2016 : index
    %c0_275 = arith.constant 0 : index
    %473 = tpu.strided_load %arg5[%c2016, %c0_275] {strides = array<i32: 2, 1>} : memref<2048x32xf32, #tpu.memory_space<vmem>>, vector<16x32xf32>
    %c2017 = arith.constant 2017 : index
    %c0_276 = arith.constant 0 : index
    %474 = tpu.strided_load %arg5[%c2017, %c0_276] {strides = array<i32: 2, 1>} : memref<2048x32xf32, #tpu.memory_space<vmem>>, vector<16x32xf32>
    %475 = arith.maximumf %473, %474 : vector<16x32xf32>
    %476 = arith.maximumf %472, %475 : vector<16x32xf32>
    %477 = vector.broadcast %4 : vector<1x32xf32> to vector<16x32xf32>
    %478 = arith.addf %476, %477 : vector<16x32xf32>
    %cst_277 = arith.constant 0.000000e+00 : f32
    %479 = vector.broadcast %cst_277 : f32 to vector<16x32xf32>
    %480 = arith.maximumf %478, %479 : vector<16x32xf32>
    %481 = arith.truncf %480 : vector<16x32xf32> to vector<16x32xbf16>
    %c1_278 = arith.constant 1 : index
    %c15_279 = arith.constant 15 : index
    %c0_280 = arith.constant 0 : index
    %c0_281 = arith.constant 0 : index
    %482 = vector.load %arg4[%c1_278, %c15_279, %c0_280, %c0_281] : memref<2x16x16x32xbf16, #tpu.memory_space<vmem>>, vector<1x1x16x32xbf16>
    %483 = vector.shape_cast %482 : vector<1x1x16x32xbf16> to vector<16x32xbf16>
    %484 = vector.shape_cast %481 : vector<16x32xbf16> to vector<1x1x16x32xbf16>
    tpu.vector_store %arg4[%c1_278, %c15_279, %c0_280, %c0_281], %484 {strides = array<i32>} : memref<2x16x16x32xbf16, #tpu.memory_space<vmem>>, vector<1x1x16x32xbf16>,
    return
  }
  func.func @transform_0(%arg0: i32) -> (i32, i32) {
    %c0_i32 = arith.constant 0 : i32
    %c0_i32_0 = arith.constant 0 : i32
    return %arg0, %c0_i32 : i32, i32
  }
  func.func @transform_1(%arg0: i32) -> (i32, i32) {
    %c0_i32 = arith.constant 0 : i32
    %c0_i32_0 = arith.constant 0 : i32
    %c0_i32_1 = arith.constant 0 : i32
    return %c0_i32, %c0_i32_0 : i32, i32
  }
  func.func @transform_2(%arg0: i32) -> (i32, i32) {
    %c0_i32 = arith.constant 0 : i32
    %c0_i32_0 = arith.constant 0 : i32
    %c0_i32_1 = arith.constant 0 : i32
    return %c0_i32, %c0_i32_0 : i32, i32
  }
  func.func @transform_3(%arg0: i32) -> (i32, i32, i32, i32) {
    %c0_i32 = arith.constant 0 : i32
    %c0_i32_0 = arith.constant 0 : i32
    %c0_i32_1 = arith.constant 0 : i32
    %c0_i32_2 = arith.constant 0 : i32
    return %arg0, %c0_i32, %c0_i32_0, %c0_i32_1 : i32, i32, i32, i32
  }
}

module attributes {stable_mosaic.version = 11 : i64} {
  func.func @_conv_pool_kernel(%arg0: i32, %arg1: memref<512x288xbf16, #tpu.memory_space<vmem>>, %arg2: memref<288x64xbf16, #tpu.memory_space<vmem>>, %arg3: memref<1x64xf32, #tpu.memory_space<vmem>>, %arg4: memref<2x8x8x64xbf16, #tpu.memory_space<vmem>>, %arg5: memref<512x64xf32, #tpu.memory_space<vmem>>) attributes {dimension_semantics = [#tpu.dimension_semantics<parallel>], iteration_bounds = array<i64: 2>, scalar_prefetch = 0 : i64, scratch_operands = 1 : i64, tpu.core_type = #tpu.core_type<tc>, window_params = [{transform_indices = @transform_0, window_bounds = array<i64: 512, 288>}, {pipeline_mode = #tpu.pipeline_mode<synchronous>, transform_indices = @transform_1, window_bounds = array<i64: 288, 64>}, {pipeline_mode = #tpu.pipeline_mode<synchronous>, transform_indices = @transform_2, window_bounds = array<i64: 1, 64>}, {transform_indices = @transform_3, window_bounds = array<i64: 2, 8, 8, 64>}]} {
    %c0 = arith.constant 0 : index
    %c0_0 = arith.constant 0 : index
    %0 = vector.load %arg1[%c0, %c0_0] : memref<512x288xbf16, #tpu.memory_space<vmem>>, vector<512x288xbf16>
    %c0_1 = arith.constant 0 : index
    %c0_2 = arith.constant 0 : index
    %1 = vector.load %arg2[%c0_1, %c0_2] : memref<288x64xbf16, #tpu.memory_space<vmem>>, vector<288x64xbf16>
    %cst = arith.constant dense<0.000000e+00> : vector<512x64xf32>
    %2 = tpu.matmul %0, %1, %cst {dimension_numbers = #tpu.dot_dimension_numbers<[1], [0], [0], [1], [0, 0, 1, 1], [], []>} : vector<512x288xbf16>, vector<288x64xbf16>, vector<512x64xf32> -> vector<512x64xf32>
    %c0_3 = arith.constant 0 : index
    %c0_4 = arith.constant 0 : index
    %3 = vector.load %arg5[%c0_3, %c0_4] : memref<512x64xf32, #tpu.memory_space<vmem>>, vector<512x64xf32>
    tpu.vector_store %arg5[%c0_3, %c0_4], %2 {strides = array<i32>} : memref<512x64xf32, #tpu.memory_space<vmem>>, vector<512x64xf32>,
    %c0_5 = arith.constant 0 : index
    %c0_6 = arith.constant 0 : index
    %4 = vector.load %arg3[%c0_5, %c0_6] : memref<1x64xf32, #tpu.memory_space<vmem>>, vector<1x64xf32>
    %c0_7 = arith.constant 0 : index
    %c0_8 = arith.constant 0 : index
    %5 = tpu.strided_load %arg5[%c0_7, %c0_8] {strides = array<i32: 2, 1>} : memref<512x64xf32, #tpu.memory_space<vmem>>, vector<8x64xf32>
    %c1 = arith.constant 1 : index
    %c0_9 = arith.constant 0 : index
    %6 = tpu.strided_load %arg5[%c1, %c0_9] {strides = array<i32: 2, 1>} : memref<512x64xf32, #tpu.memory_space<vmem>>, vector<8x64xf32>
    %7 = arith.maximumf %5, %6 : vector<8x64xf32>
    %c16 = arith.constant 16 : index
    %c0_10 = arith.constant 0 : index
    %8 = tpu.strided_load %arg5[%c16, %c0_10] {strides = array<i32: 2, 1>} : memref<512x64xf32, #tpu.memory_space<vmem>>, vector<8x64xf32>
    %c17 = arith.constant 17 : index
    %c0_11 = arith.constant 0 : index
    %9 = tpu.strided_load %arg5[%c17, %c0_11] {strides = array<i32: 2, 1>} : memref<512x64xf32, #tpu.memory_space<vmem>>, vector<8x64xf32>
    %10 = arith.maximumf %8, %9 : vector<8x64xf32>
    %11 = arith.maximumf %7, %10 : vector<8x64xf32>
    %12 = vector.broadcast %4 : vector<1x64xf32> to vector<8x64xf32>
    %13 = arith.addf %11, %12 : vector<8x64xf32>
    %cst_12 = arith.constant 0.000000e+00 : f32
    %14 = vector.broadcast %cst_12 : f32 to vector<8x64xf32>
    %15 = arith.maximumf %13, %14 : vector<8x64xf32>
    %16 = arith.truncf %15 : vector<8x64xf32> to vector<8x64xbf16>
    %c0_13 = arith.constant 0 : index
    %c0_14 = arith.constant 0 : index
    %c0_15 = arith.constant 0 : index
    %c0_16 = arith.constant 0 : index
    %17 = vector.load %arg4[%c0_13, %c0_14, %c0_15, %c0_16] : memref<2x8x8x64xbf16, #tpu.memory_space<vmem>>, vector<1x1x8x64xbf16>
    %18 = vector.shape_cast %17 : vector<1x1x8x64xbf16> to vector<8x64xbf16>
    %19 = vector.shape_cast %16 : vector<8x64xbf16> to vector<1x1x8x64xbf16>
    tpu.vector_store %arg4[%c0_13, %c0_14, %c0_15, %c0_16], %19 {strides = array<i32>} : memref<2x8x8x64xbf16, #tpu.memory_space<vmem>>, vector<1x1x8x64xbf16>,
    %c32 = arith.constant 32 : index
    %c0_17 = arith.constant 0 : index
    %20 = tpu.strided_load %arg5[%c32, %c0_17] {strides = array<i32: 2, 1>} : memref<512x64xf32, #tpu.memory_space<vmem>>, vector<8x64xf32>
    %c33 = arith.constant 33 : index
    %c0_18 = arith.constant 0 : index
    %21 = tpu.strided_load %arg5[%c33, %c0_18] {strides = array<i32: 2, 1>} : memref<512x64xf32, #tpu.memory_space<vmem>>, vector<8x64xf32>
    %22 = arith.maximumf %20, %21 : vector<8x64xf32>
    %c48 = arith.constant 48 : index
    %c0_19 = arith.constant 0 : index
    %23 = tpu.strided_load %arg5[%c48, %c0_19] {strides = array<i32: 2, 1>} : memref<512x64xf32, #tpu.memory_space<vmem>>, vector<8x64xf32>
    %c49 = arith.constant 49 : index
    %c0_20 = arith.constant 0 : index
    %24 = tpu.strided_load %arg5[%c49, %c0_20] {strides = array<i32: 2, 1>} : memref<512x64xf32, #tpu.memory_space<vmem>>, vector<8x64xf32>
    %25 = arith.maximumf %23, %24 : vector<8x64xf32>
    %26 = arith.maximumf %22, %25 : vector<8x64xf32>
    %27 = vector.broadcast %4 : vector<1x64xf32> to vector<8x64xf32>
    %28 = arith.addf %26, %27 : vector<8x64xf32>
    %cst_21 = arith.constant 0.000000e+00 : f32
    %29 = vector.broadcast %cst_21 : f32 to vector<8x64xf32>
    %30 = arith.maximumf %28, %29 : vector<8x64xf32>
    %31 = arith.truncf %30 : vector<8x64xf32> to vector<8x64xbf16>
    %c0_22 = arith.constant 0 : index
    %c1_23 = arith.constant 1 : index
    %c0_24 = arith.constant 0 : index
    %c0_25 = arith.constant 0 : index
    %32 = vector.load %arg4[%c0_22, %c1_23, %c0_24, %c0_25] : memref<2x8x8x64xbf16, #tpu.memory_space<vmem>>, vector<1x1x8x64xbf16>
    %33 = vector.shape_cast %32 : vector<1x1x8x64xbf16> to vector<8x64xbf16>
    %34 = vector.shape_cast %31 : vector<8x64xbf16> to vector<1x1x8x64xbf16>
    tpu.vector_store %arg4[%c0_22, %c1_23, %c0_24, %c0_25], %34 {strides = array<i32>} : memref<2x8x8x64xbf16, #tpu.memory_space<vmem>>, vector<1x1x8x64xbf16>,
    %c64 = arith.constant 64 : index
    %c0_26 = arith.constant 0 : index
    %35 = tpu.strided_load %arg5[%c64, %c0_26] {strides = array<i32: 2, 1>} : memref<512x64xf32, #tpu.memory_space<vmem>>, vector<8x64xf32>
    %c65 = arith.constant 65 : index
    %c0_27 = arith.constant 0 : index
    %36 = tpu.strided_load %arg5[%c65, %c0_27] {strides = array<i32: 2, 1>} : memref<512x64xf32, #tpu.memory_space<vmem>>, vector<8x64xf32>
    %37 = arith.maximumf %35, %36 : vector<8x64xf32>
    %c80 = arith.constant 80 : index
    %c0_28 = arith.constant 0 : index
    %38 = tpu.strided_load %arg5[%c80, %c0_28] {strides = array<i32: 2, 1>} : memref<512x64xf32, #tpu.memory_space<vmem>>, vector<8x64xf32>
    %c81 = arith.constant 81 : index
    %c0_29 = arith.constant 0 : index
    %39 = tpu.strided_load %arg5[%c81, %c0_29] {strides = array<i32: 2, 1>} : memref<512x64xf32, #tpu.memory_space<vmem>>, vector<8x64xf32>
    %40 = arith.maximumf %38, %39 : vector<8x64xf32>
    %41 = arith.maximumf %37, %40 : vector<8x64xf32>
    %42 = vector.broadcast %4 : vector<1x64xf32> to vector<8x64xf32>
    %43 = arith.addf %41, %42 : vector<8x64xf32>
    %cst_30 = arith.constant 0.000000e+00 : f32
    %44 = vector.broadcast %cst_30 : f32 to vector<8x64xf32>
    %45 = arith.maximumf %43, %44 : vector<8x64xf32>
    %46 = arith.truncf %45 : vector<8x64xf32> to vector<8x64xbf16>
    %c0_31 = arith.constant 0 : index
    %c2 = arith.constant 2 : index
    %c0_32 = arith.constant 0 : index
    %c0_33 = arith.constant 0 : index
    %47 = vector.load %arg4[%c0_31, %c2, %c0_32, %c0_33] : memref<2x8x8x64xbf16, #tpu.memory_space<vmem>>, vector<1x1x8x64xbf16>
    %48 = vector.shape_cast %47 : vector<1x1x8x64xbf16> to vector<8x64xbf16>
    %49 = vector.shape_cast %46 : vector<8x64xbf16> to vector<1x1x8x64xbf16>
    tpu.vector_store %arg4[%c0_31, %c2, %c0_32, %c0_33], %49 {strides = array<i32>} : memref<2x8x8x64xbf16, #tpu.memory_space<vmem>>, vector<1x1x8x64xbf16>,
    %c96 = arith.constant 96 : index
    %c0_34 = arith.constant 0 : index
    %50 = tpu.strided_load %arg5[%c96, %c0_34] {strides = array<i32: 2, 1>} : memref<512x64xf32, #tpu.memory_space<vmem>>, vector<8x64xf32>
    %c97 = arith.constant 97 : index
    %c0_35 = arith.constant 0 : index
    %51 = tpu.strided_load %arg5[%c97, %c0_35] {strides = array<i32: 2, 1>} : memref<512x64xf32, #tpu.memory_space<vmem>>, vector<8x64xf32>
    %52 = arith.maximumf %50, %51 : vector<8x64xf32>
    %c112 = arith.constant 112 : index
    %c0_36 = arith.constant 0 : index
    %53 = tpu.strided_load %arg5[%c112, %c0_36] {strides = array<i32: 2, 1>} : memref<512x64xf32, #tpu.memory_space<vmem>>, vector<8x64xf32>
    %c113 = arith.constant 113 : index
    %c0_37 = arith.constant 0 : index
    %54 = tpu.strided_load %arg5[%c113, %c0_37] {strides = array<i32: 2, 1>} : memref<512x64xf32, #tpu.memory_space<vmem>>, vector<8x64xf32>
    %55 = arith.maximumf %53, %54 : vector<8x64xf32>
    %56 = arith.maximumf %52, %55 : vector<8x64xf32>
    %57 = vector.broadcast %4 : vector<1x64xf32> to vector<8x64xf32>
    %58 = arith.addf %56, %57 : vector<8x64xf32>
    %cst_38 = arith.constant 0.000000e+00 : f32
    %59 = vector.broadcast %cst_38 : f32 to vector<8x64xf32>
    %60 = arith.maximumf %58, %59 : vector<8x64xf32>
    %61 = arith.truncf %60 : vector<8x64xf32> to vector<8x64xbf16>
    %c0_39 = arith.constant 0 : index
    %c3 = arith.constant 3 : index
    %c0_40 = arith.constant 0 : index
    %c0_41 = arith.constant 0 : index
    %62 = vector.load %arg4[%c0_39, %c3, %c0_40, %c0_41] : memref<2x8x8x64xbf16, #tpu.memory_space<vmem>>, vector<1x1x8x64xbf16>
    %63 = vector.shape_cast %62 : vector<1x1x8x64xbf16> to vector<8x64xbf16>
    %64 = vector.shape_cast %61 : vector<8x64xbf16> to vector<1x1x8x64xbf16>
    tpu.vector_store %arg4[%c0_39, %c3, %c0_40, %c0_41], %64 {strides = array<i32>} : memref<2x8x8x64xbf16, #tpu.memory_space<vmem>>, vector<1x1x8x64xbf16>,
    %c128 = arith.constant 128 : index
    %c0_42 = arith.constant 0 : index
    %65 = tpu.strided_load %arg5[%c128, %c0_42] {strides = array<i32: 2, 1>} : memref<512x64xf32, #tpu.memory_space<vmem>>, vector<8x64xf32>
    %c129 = arith.constant 129 : index
    %c0_43 = arith.constant 0 : index
    %66 = tpu.strided_load %arg5[%c129, %c0_43] {strides = array<i32: 2, 1>} : memref<512x64xf32, #tpu.memory_space<vmem>>, vector<8x64xf32>
    %67 = arith.maximumf %65, %66 : vector<8x64xf32>
    %c144 = arith.constant 144 : index
    %c0_44 = arith.constant 0 : index
    %68 = tpu.strided_load %arg5[%c144, %c0_44] {strides = array<i32: 2, 1>} : memref<512x64xf32, #tpu.memory_space<vmem>>, vector<8x64xf32>
    %c145 = arith.constant 145 : index
    %c0_45 = arith.constant 0 : index
    %69 = tpu.strided_load %arg5[%c145, %c0_45] {strides = array<i32: 2, 1>} : memref<512x64xf32, #tpu.memory_space<vmem>>, vector<8x64xf32>
    %70 = arith.maximumf %68, %69 : vector<8x64xf32>
    %71 = arith.maximumf %67, %70 : vector<8x64xf32>
    %72 = vector.broadcast %4 : vector<1x64xf32> to vector<8x64xf32>
    %73 = arith.addf %71, %72 : vector<8x64xf32>
    %cst_46 = arith.constant 0.000000e+00 : f32
    %74 = vector.broadcast %cst_46 : f32 to vector<8x64xf32>
    %75 = arith.maximumf %73, %74 : vector<8x64xf32>
    %76 = arith.truncf %75 : vector<8x64xf32> to vector<8x64xbf16>
    %c0_47 = arith.constant 0 : index
    %c4 = arith.constant 4 : index
    %c0_48 = arith.constant 0 : index
    %c0_49 = arith.constant 0 : index
    %77 = vector.load %arg4[%c0_47, %c4, %c0_48, %c0_49] : memref<2x8x8x64xbf16, #tpu.memory_space<vmem>>, vector<1x1x8x64xbf16>
    %78 = vector.shape_cast %77 : vector<1x1x8x64xbf16> to vector<8x64xbf16>
    %79 = vector.shape_cast %76 : vector<8x64xbf16> to vector<1x1x8x64xbf16>
    tpu.vector_store %arg4[%c0_47, %c4, %c0_48, %c0_49], %79 {strides = array<i32>} : memref<2x8x8x64xbf16, #tpu.memory_space<vmem>>, vector<1x1x8x64xbf16>,
    %c160 = arith.constant 160 : index
    %c0_50 = arith.constant 0 : index
    %80 = tpu.strided_load %arg5[%c160, %c0_50] {strides = array<i32: 2, 1>} : memref<512x64xf32, #tpu.memory_space<vmem>>, vector<8x64xf32>
    %c161 = arith.constant 161 : index
    %c0_51 = arith.constant 0 : index
    %81 = tpu.strided_load %arg5[%c161, %c0_51] {strides = array<i32: 2, 1>} : memref<512x64xf32, #tpu.memory_space<vmem>>, vector<8x64xf32>
    %82 = arith.maximumf %80, %81 : vector<8x64xf32>
    %c176 = arith.constant 176 : index
    %c0_52 = arith.constant 0 : index
    %83 = tpu.strided_load %arg5[%c176, %c0_52] {strides = array<i32: 2, 1>} : memref<512x64xf32, #tpu.memory_space<vmem>>, vector<8x64xf32>
    %c177 = arith.constant 177 : index
    %c0_53 = arith.constant 0 : index
    %84 = tpu.strided_load %arg5[%c177, %c0_53] {strides = array<i32: 2, 1>} : memref<512x64xf32, #tpu.memory_space<vmem>>, vector<8x64xf32>
    %85 = arith.maximumf %83, %84 : vector<8x64xf32>
    %86 = arith.maximumf %82, %85 : vector<8x64xf32>
    %87 = vector.broadcast %4 : vector<1x64xf32> to vector<8x64xf32>
    %88 = arith.addf %86, %87 : vector<8x64xf32>
    %cst_54 = arith.constant 0.000000e+00 : f32
    %89 = vector.broadcast %cst_54 : f32 to vector<8x64xf32>
    %90 = arith.maximumf %88, %89 : vector<8x64xf32>
    %91 = arith.truncf %90 : vector<8x64xf32> to vector<8x64xbf16>
    %c0_55 = arith.constant 0 : index
    %c5 = arith.constant 5 : index
    %c0_56 = arith.constant 0 : index
    %c0_57 = arith.constant 0 : index
    %92 = vector.load %arg4[%c0_55, %c5, %c0_56, %c0_57] : memref<2x8x8x64xbf16, #tpu.memory_space<vmem>>, vector<1x1x8x64xbf16>
    %93 = vector.shape_cast %92 : vector<1x1x8x64xbf16> to vector<8x64xbf16>
    %94 = vector.shape_cast %91 : vector<8x64xbf16> to vector<1x1x8x64xbf16>
    tpu.vector_store %arg4[%c0_55, %c5, %c0_56, %c0_57], %94 {strides = array<i32>} : memref<2x8x8x64xbf16, #tpu.memory_space<vmem>>, vector<1x1x8x64xbf16>,
    %c192 = arith.constant 192 : index
    %c0_58 = arith.constant 0 : index
    %95 = tpu.strided_load %arg5[%c192, %c0_58] {strides = array<i32: 2, 1>} : memref<512x64xf32, #tpu.memory_space<vmem>>, vector<8x64xf32>
    %c193 = arith.constant 193 : index
    %c0_59 = arith.constant 0 : index
    %96 = tpu.strided_load %arg5[%c193, %c0_59] {strides = array<i32: 2, 1>} : memref<512x64xf32, #tpu.memory_space<vmem>>, vector<8x64xf32>
    %97 = arith.maximumf %95, %96 : vector<8x64xf32>
    %c208 = arith.constant 208 : index
    %c0_60 = arith.constant 0 : index
    %98 = tpu.strided_load %arg5[%c208, %c0_60] {strides = array<i32: 2, 1>} : memref<512x64xf32, #tpu.memory_space<vmem>>, vector<8x64xf32>
    %c209 = arith.constant 209 : index
    %c0_61 = arith.constant 0 : index
    %99 = tpu.strided_load %arg5[%c209, %c0_61] {strides = array<i32: 2, 1>} : memref<512x64xf32, #tpu.memory_space<vmem>>, vector<8x64xf32>
    %100 = arith.maximumf %98, %99 : vector<8x64xf32>
    %101 = arith.maximumf %97, %100 : vector<8x64xf32>
    %102 = vector.broadcast %4 : vector<1x64xf32> to vector<8x64xf32>
    %103 = arith.addf %101, %102 : vector<8x64xf32>
    %cst_62 = arith.constant 0.000000e+00 : f32
    %104 = vector.broadcast %cst_62 : f32 to vector<8x64xf32>
    %105 = arith.maximumf %103, %104 : vector<8x64xf32>
    %106 = arith.truncf %105 : vector<8x64xf32> to vector<8x64xbf16>
    %c0_63 = arith.constant 0 : index
    %c6 = arith.constant 6 : index
    %c0_64 = arith.constant 0 : index
    %c0_65 = arith.constant 0 : index
    %107 = vector.load %arg4[%c0_63, %c6, %c0_64, %c0_65] : memref<2x8x8x64xbf16, #tpu.memory_space<vmem>>, vector<1x1x8x64xbf16>
    %108 = vector.shape_cast %107 : vector<1x1x8x64xbf16> to vector<8x64xbf16>
    %109 = vector.shape_cast %106 : vector<8x64xbf16> to vector<1x1x8x64xbf16>
    tpu.vector_store %arg4[%c0_63, %c6, %c0_64, %c0_65], %109 {strides = array<i32>} : memref<2x8x8x64xbf16, #tpu.memory_space<vmem>>, vector<1x1x8x64xbf16>,
    %c224 = arith.constant 224 : index
    %c0_66 = arith.constant 0 : index
    %110 = tpu.strided_load %arg5[%c224, %c0_66] {strides = array<i32: 2, 1>} : memref<512x64xf32, #tpu.memory_space<vmem>>, vector<8x64xf32>
    %c225 = arith.constant 225 : index
    %c0_67 = arith.constant 0 : index
    %111 = tpu.strided_load %arg5[%c225, %c0_67] {strides = array<i32: 2, 1>} : memref<512x64xf32, #tpu.memory_space<vmem>>, vector<8x64xf32>
    %112 = arith.maximumf %110, %111 : vector<8x64xf32>
    %c240 = arith.constant 240 : index
    %c0_68 = arith.constant 0 : index
    %113 = tpu.strided_load %arg5[%c240, %c0_68] {strides = array<i32: 2, 1>} : memref<512x64xf32, #tpu.memory_space<vmem>>, vector<8x64xf32>
    %c241 = arith.constant 241 : index
    %c0_69 = arith.constant 0 : index
    %114 = tpu.strided_load %arg5[%c241, %c0_69] {strides = array<i32: 2, 1>} : memref<512x64xf32, #tpu.memory_space<vmem>>, vector<8x64xf32>
    %115 = arith.maximumf %113, %114 : vector<8x64xf32>
    %116 = arith.maximumf %112, %115 : vector<8x64xf32>
    %117 = vector.broadcast %4 : vector<1x64xf32> to vector<8x64xf32>
    %118 = arith.addf %116, %117 : vector<8x64xf32>
    %cst_70 = arith.constant 0.000000e+00 : f32
    %119 = vector.broadcast %cst_70 : f32 to vector<8x64xf32>
    %120 = arith.maximumf %118, %119 : vector<8x64xf32>
    %121 = arith.truncf %120 : vector<8x64xf32> to vector<8x64xbf16>
    %c0_71 = arith.constant 0 : index
    %c7 = arith.constant 7 : index
    %c0_72 = arith.constant 0 : index
    %c0_73 = arith.constant 0 : index
    %122 = vector.load %arg4[%c0_71, %c7, %c0_72, %c0_73] : memref<2x8x8x64xbf16, #tpu.memory_space<vmem>>, vector<1x1x8x64xbf16>
    %123 = vector.shape_cast %122 : vector<1x1x8x64xbf16> to vector<8x64xbf16>
    %124 = vector.shape_cast %121 : vector<8x64xbf16> to vector<1x1x8x64xbf16>
    tpu.vector_store %arg4[%c0_71, %c7, %c0_72, %c0_73], %124 {strides = array<i32>} : memref<2x8x8x64xbf16, #tpu.memory_space<vmem>>, vector<1x1x8x64xbf16>,
    %c256 = arith.constant 256 : index
    %c0_74 = arith.constant 0 : index
    %125 = tpu.strided_load %arg5[%c256, %c0_74] {strides = array<i32: 2, 1>} : memref<512x64xf32, #tpu.memory_space<vmem>>, vector<8x64xf32>
    %c257 = arith.constant 257 : index
    %c0_75 = arith.constant 0 : index
    %126 = tpu.strided_load %arg5[%c257, %c0_75] {strides = array<i32: 2, 1>} : memref<512x64xf32, #tpu.memory_space<vmem>>, vector<8x64xf32>
    %127 = arith.maximumf %125, %126 : vector<8x64xf32>
    %c272 = arith.constant 272 : index
    %c0_76 = arith.constant 0 : index
    %128 = tpu.strided_load %arg5[%c272, %c0_76] {strides = array<i32: 2, 1>} : memref<512x64xf32, #tpu.memory_space<vmem>>, vector<8x64xf32>
    %c273 = arith.constant 273 : index
    %c0_77 = arith.constant 0 : index
    %129 = tpu.strided_load %arg5[%c273, %c0_77] {strides = array<i32: 2, 1>} : memref<512x64xf32, #tpu.memory_space<vmem>>, vector<8x64xf32>
    %130 = arith.maximumf %128, %129 : vector<8x64xf32>
    %131 = arith.maximumf %127, %130 : vector<8x64xf32>
    %132 = vector.broadcast %4 : vector<1x64xf32> to vector<8x64xf32>
    %133 = arith.addf %131, %132 : vector<8x64xf32>
    %cst_78 = arith.constant 0.000000e+00 : f32
    %134 = vector.broadcast %cst_78 : f32 to vector<8x64xf32>
    %135 = arith.maximumf %133, %134 : vector<8x64xf32>
    %136 = arith.truncf %135 : vector<8x64xf32> to vector<8x64xbf16>
    %c1_79 = arith.constant 1 : index
    %c0_80 = arith.constant 0 : index
    %c0_81 = arith.constant 0 : index
    %c0_82 = arith.constant 0 : index
    %137 = vector.load %arg4[%c1_79, %c0_80, %c0_81, %c0_82] : memref<2x8x8x64xbf16, #tpu.memory_space<vmem>>, vector<1x1x8x64xbf16>
    %138 = vector.shape_cast %137 : vector<1x1x8x64xbf16> to vector<8x64xbf16>
    %139 = vector.shape_cast %136 : vector<8x64xbf16> to vector<1x1x8x64xbf16>
    tpu.vector_store %arg4[%c1_79, %c0_80, %c0_81, %c0_82], %139 {strides = array<i32>} : memref<2x8x8x64xbf16, #tpu.memory_space<vmem>>, vector<1x1x8x64xbf16>,
    %c288 = arith.constant 288 : index
    %c0_83 = arith.constant 0 : index
    %140 = tpu.strided_load %arg5[%c288, %c0_83] {strides = array<i32: 2, 1>} : memref<512x64xf32, #tpu.memory_space<vmem>>, vector<8x64xf32>
    %c289 = arith.constant 289 : index
    %c0_84 = arith.constant 0 : index
    %141 = tpu.strided_load %arg5[%c289, %c0_84] {strides = array<i32: 2, 1>} : memref<512x64xf32, #tpu.memory_space<vmem>>, vector<8x64xf32>
    %142 = arith.maximumf %140, %141 : vector<8x64xf32>
    %c304 = arith.constant 304 : index
    %c0_85 = arith.constant 0 : index
    %143 = tpu.strided_load %arg5[%c304, %c0_85] {strides = array<i32: 2, 1>} : memref<512x64xf32, #tpu.memory_space<vmem>>, vector<8x64xf32>
    %c305 = arith.constant 305 : index
    %c0_86 = arith.constant 0 : index
    %144 = tpu.strided_load %arg5[%c305, %c0_86] {strides = array<i32: 2, 1>} : memref<512x64xf32, #tpu.memory_space<vmem>>, vector<8x64xf32>
    %145 = arith.maximumf %143, %144 : vector<8x64xf32>
    %146 = arith.maximumf %142, %145 : vector<8x64xf32>
    %147 = vector.broadcast %4 : vector<1x64xf32> to vector<8x64xf32>
    %148 = arith.addf %146, %147 : vector<8x64xf32>
    %cst_87 = arith.constant 0.000000e+00 : f32
    %149 = vector.broadcast %cst_87 : f32 to vector<8x64xf32>
    %150 = arith.maximumf %148, %149 : vector<8x64xf32>
    %151 = arith.truncf %150 : vector<8x64xf32> to vector<8x64xbf16>
    %c1_88 = arith.constant 1 : index
    %c1_89 = arith.constant 1 : index
    %c0_90 = arith.constant 0 : index
    %c0_91 = arith.constant 0 : index
    %152 = vector.load %arg4[%c1_88, %c1_89, %c0_90, %c0_91] : memref<2x8x8x64xbf16, #tpu.memory_space<vmem>>, vector<1x1x8x64xbf16>
    %153 = vector.shape_cast %152 : vector<1x1x8x64xbf16> to vector<8x64xbf16>
    %154 = vector.shape_cast %151 : vector<8x64xbf16> to vector<1x1x8x64xbf16>
    tpu.vector_store %arg4[%c1_88, %c1_89, %c0_90, %c0_91], %154 {strides = array<i32>} : memref<2x8x8x64xbf16, #tpu.memory_space<vmem>>, vector<1x1x8x64xbf16>,
    %c320 = arith.constant 320 : index
    %c0_92 = arith.constant 0 : index
    %155 = tpu.strided_load %arg5[%c320, %c0_92] {strides = array<i32: 2, 1>} : memref<512x64xf32, #tpu.memory_space<vmem>>, vector<8x64xf32>
    %c321 = arith.constant 321 : index
    %c0_93 = arith.constant 0 : index
    %156 = tpu.strided_load %arg5[%c321, %c0_93] {strides = array<i32: 2, 1>} : memref<512x64xf32, #tpu.memory_space<vmem>>, vector<8x64xf32>
    %157 = arith.maximumf %155, %156 : vector<8x64xf32>
    %c336 = arith.constant 336 : index
    %c0_94 = arith.constant 0 : index
    %158 = tpu.strided_load %arg5[%c336, %c0_94] {strides = array<i32: 2, 1>} : memref<512x64xf32, #tpu.memory_space<vmem>>, vector<8x64xf32>
    %c337 = arith.constant 337 : index
    %c0_95 = arith.constant 0 : index
    %159 = tpu.strided_load %arg5[%c337, %c0_95] {strides = array<i32: 2, 1>} : memref<512x64xf32, #tpu.memory_space<vmem>>, vector<8x64xf32>
    %160 = arith.maximumf %158, %159 : vector<8x64xf32>
    %161 = arith.maximumf %157, %160 : vector<8x64xf32>
    %162 = vector.broadcast %4 : vector<1x64xf32> to vector<8x64xf32>
    %163 = arith.addf %161, %162 : vector<8x64xf32>
    %cst_96 = arith.constant 0.000000e+00 : f32
    %164 = vector.broadcast %cst_96 : f32 to vector<8x64xf32>
    %165 = arith.maximumf %163, %164 : vector<8x64xf32>
    %166 = arith.truncf %165 : vector<8x64xf32> to vector<8x64xbf16>
    %c1_97 = arith.constant 1 : index
    %c2_98 = arith.constant 2 : index
    %c0_99 = arith.constant 0 : index
    %c0_100 = arith.constant 0 : index
    %167 = vector.load %arg4[%c1_97, %c2_98, %c0_99, %c0_100] : memref<2x8x8x64xbf16, #tpu.memory_space<vmem>>, vector<1x1x8x64xbf16>
    %168 = vector.shape_cast %167 : vector<1x1x8x64xbf16> to vector<8x64xbf16>
    %169 = vector.shape_cast %166 : vector<8x64xbf16> to vector<1x1x8x64xbf16>
    tpu.vector_store %arg4[%c1_97, %c2_98, %c0_99, %c0_100], %169 {strides = array<i32>} : memref<2x8x8x64xbf16, #tpu.memory_space<vmem>>, vector<1x1x8x64xbf16>,
    %c352 = arith.constant 352 : index
    %c0_101 = arith.constant 0 : index
    %170 = tpu.strided_load %arg5[%c352, %c0_101] {strides = array<i32: 2, 1>} : memref<512x64xf32, #tpu.memory_space<vmem>>, vector<8x64xf32>
    %c353 = arith.constant 353 : index
    %c0_102 = arith.constant 0 : index
    %171 = tpu.strided_load %arg5[%c353, %c0_102] {strides = array<i32: 2, 1>} : memref<512x64xf32, #tpu.memory_space<vmem>>, vector<8x64xf32>
    %172 = arith.maximumf %170, %171 : vector<8x64xf32>
    %c368 = arith.constant 368 : index
    %c0_103 = arith.constant 0 : index
    %173 = tpu.strided_load %arg5[%c368, %c0_103] {strides = array<i32: 2, 1>} : memref<512x64xf32, #tpu.memory_space<vmem>>, vector<8x64xf32>
    %c369 = arith.constant 369 : index
    %c0_104 = arith.constant 0 : index
    %174 = tpu.strided_load %arg5[%c369, %c0_104] {strides = array<i32: 2, 1>} : memref<512x64xf32, #tpu.memory_space<vmem>>, vector<8x64xf32>
    %175 = arith.maximumf %173, %174 : vector<8x64xf32>
    %176 = arith.maximumf %172, %175 : vector<8x64xf32>
    %177 = vector.broadcast %4 : vector<1x64xf32> to vector<8x64xf32>
    %178 = arith.addf %176, %177 : vector<8x64xf32>
    %cst_105 = arith.constant 0.000000e+00 : f32
    %179 = vector.broadcast %cst_105 : f32 to vector<8x64xf32>
    %180 = arith.maximumf %178, %179 : vector<8x64xf32>
    %181 = arith.truncf %180 : vector<8x64xf32> to vector<8x64xbf16>
    %c1_106 = arith.constant 1 : index
    %c3_107 = arith.constant 3 : index
    %c0_108 = arith.constant 0 : index
    %c0_109 = arith.constant 0 : index
    %182 = vector.load %arg4[%c1_106, %c3_107, %c0_108, %c0_109] : memref<2x8x8x64xbf16, #tpu.memory_space<vmem>>, vector<1x1x8x64xbf16>
    %183 = vector.shape_cast %182 : vector<1x1x8x64xbf16> to vector<8x64xbf16>
    %184 = vector.shape_cast %181 : vector<8x64xbf16> to vector<1x1x8x64xbf16>
    tpu.vector_store %arg4[%c1_106, %c3_107, %c0_108, %c0_109], %184 {strides = array<i32>} : memref<2x8x8x64xbf16, #tpu.memory_space<vmem>>, vector<1x1x8x64xbf16>,
    %c384 = arith.constant 384 : index
    %c0_110 = arith.constant 0 : index
    %185 = tpu.strided_load %arg5[%c384, %c0_110] {strides = array<i32: 2, 1>} : memref<512x64xf32, #tpu.memory_space<vmem>>, vector<8x64xf32>
    %c385 = arith.constant 385 : index
    %c0_111 = arith.constant 0 : index
    %186 = tpu.strided_load %arg5[%c385, %c0_111] {strides = array<i32: 2, 1>} : memref<512x64xf32, #tpu.memory_space<vmem>>, vector<8x64xf32>
    %187 = arith.maximumf %185, %186 : vector<8x64xf32>
    %c400 = arith.constant 400 : index
    %c0_112 = arith.constant 0 : index
    %188 = tpu.strided_load %arg5[%c400, %c0_112] {strides = array<i32: 2, 1>} : memref<512x64xf32, #tpu.memory_space<vmem>>, vector<8x64xf32>
    %c401 = arith.constant 401 : index
    %c0_113 = arith.constant 0 : index
    %189 = tpu.strided_load %arg5[%c401, %c0_113] {strides = array<i32: 2, 1>} : memref<512x64xf32, #tpu.memory_space<vmem>>, vector<8x64xf32>
    %190 = arith.maximumf %188, %189 : vector<8x64xf32>
    %191 = arith.maximumf %187, %190 : vector<8x64xf32>
    %192 = vector.broadcast %4 : vector<1x64xf32> to vector<8x64xf32>
    %193 = arith.addf %191, %192 : vector<8x64xf32>
    %cst_114 = arith.constant 0.000000e+00 : f32
    %194 = vector.broadcast %cst_114 : f32 to vector<8x64xf32>
    %195 = arith.maximumf %193, %194 : vector<8x64xf32>
    %196 = arith.truncf %195 : vector<8x64xf32> to vector<8x64xbf16>
    %c1_115 = arith.constant 1 : index
    %c4_116 = arith.constant 4 : index
    %c0_117 = arith.constant 0 : index
    %c0_118 = arith.constant 0 : index
    %197 = vector.load %arg4[%c1_115, %c4_116, %c0_117, %c0_118] : memref<2x8x8x64xbf16, #tpu.memory_space<vmem>>, vector<1x1x8x64xbf16>
    %198 = vector.shape_cast %197 : vector<1x1x8x64xbf16> to vector<8x64xbf16>
    %199 = vector.shape_cast %196 : vector<8x64xbf16> to vector<1x1x8x64xbf16>
    tpu.vector_store %arg4[%c1_115, %c4_116, %c0_117, %c0_118], %199 {strides = array<i32>} : memref<2x8x8x64xbf16, #tpu.memory_space<vmem>>, vector<1x1x8x64xbf16>,
    %c416 = arith.constant 416 : index
    %c0_119 = arith.constant 0 : index
    %200 = tpu.strided_load %arg5[%c416, %c0_119] {strides = array<i32: 2, 1>} : memref<512x64xf32, #tpu.memory_space<vmem>>, vector<8x64xf32>
    %c417 = arith.constant 417 : index
    %c0_120 = arith.constant 0 : index
    %201 = tpu.strided_load %arg5[%c417, %c0_120] {strides = array<i32: 2, 1>} : memref<512x64xf32, #tpu.memory_space<vmem>>, vector<8x64xf32>
    %202 = arith.maximumf %200, %201 : vector<8x64xf32>
    %c432 = arith.constant 432 : index
    %c0_121 = arith.constant 0 : index
    %203 = tpu.strided_load %arg5[%c432, %c0_121] {strides = array<i32: 2, 1>} : memref<512x64xf32, #tpu.memory_space<vmem>>, vector<8x64xf32>
    %c433 = arith.constant 433 : index
    %c0_122 = arith.constant 0 : index
    %204 = tpu.strided_load %arg5[%c433, %c0_122] {strides = array<i32: 2, 1>} : memref<512x64xf32, #tpu.memory_space<vmem>>, vector<8x64xf32>
    %205 = arith.maximumf %203, %204 : vector<8x64xf32>
    %206 = arith.maximumf %202, %205 : vector<8x64xf32>
    %207 = vector.broadcast %4 : vector<1x64xf32> to vector<8x64xf32>
    %208 = arith.addf %206, %207 : vector<8x64xf32>
    %cst_123 = arith.constant 0.000000e+00 : f32
    %209 = vector.broadcast %cst_123 : f32 to vector<8x64xf32>
    %210 = arith.maximumf %208, %209 : vector<8x64xf32>
    %211 = arith.truncf %210 : vector<8x64xf32> to vector<8x64xbf16>
    %c1_124 = arith.constant 1 : index
    %c5_125 = arith.constant 5 : index
    %c0_126 = arith.constant 0 : index
    %c0_127 = arith.constant 0 : index
    %212 = vector.load %arg4[%c1_124, %c5_125, %c0_126, %c0_127] : memref<2x8x8x64xbf16, #tpu.memory_space<vmem>>, vector<1x1x8x64xbf16>
    %213 = vector.shape_cast %212 : vector<1x1x8x64xbf16> to vector<8x64xbf16>
    %214 = vector.shape_cast %211 : vector<8x64xbf16> to vector<1x1x8x64xbf16>
    tpu.vector_store %arg4[%c1_124, %c5_125, %c0_126, %c0_127], %214 {strides = array<i32>} : memref<2x8x8x64xbf16, #tpu.memory_space<vmem>>, vector<1x1x8x64xbf16>,
    %c448 = arith.constant 448 : index
    %c0_128 = arith.constant 0 : index
    %215 = tpu.strided_load %arg5[%c448, %c0_128] {strides = array<i32: 2, 1>} : memref<512x64xf32, #tpu.memory_space<vmem>>, vector<8x64xf32>
    %c449 = arith.constant 449 : index
    %c0_129 = arith.constant 0 : index
    %216 = tpu.strided_load %arg5[%c449, %c0_129] {strides = array<i32: 2, 1>} : memref<512x64xf32, #tpu.memory_space<vmem>>, vector<8x64xf32>
    %217 = arith.maximumf %215, %216 : vector<8x64xf32>
    %c464 = arith.constant 464 : index
    %c0_130 = arith.constant 0 : index
    %218 = tpu.strided_load %arg5[%c464, %c0_130] {strides = array<i32: 2, 1>} : memref<512x64xf32, #tpu.memory_space<vmem>>, vector<8x64xf32>
    %c465 = arith.constant 465 : index
    %c0_131 = arith.constant 0 : index
    %219 = tpu.strided_load %arg5[%c465, %c0_131] {strides = array<i32: 2, 1>} : memref<512x64xf32, #tpu.memory_space<vmem>>, vector<8x64xf32>
    %220 = arith.maximumf %218, %219 : vector<8x64xf32>
    %221 = arith.maximumf %217, %220 : vector<8x64xf32>
    %222 = vector.broadcast %4 : vector<1x64xf32> to vector<8x64xf32>
    %223 = arith.addf %221, %222 : vector<8x64xf32>
    %cst_132 = arith.constant 0.000000e+00 : f32
    %224 = vector.broadcast %cst_132 : f32 to vector<8x64xf32>
    %225 = arith.maximumf %223, %224 : vector<8x64xf32>
    %226 = arith.truncf %225 : vector<8x64xf32> to vector<8x64xbf16>
    %c1_133 = arith.constant 1 : index
    %c6_134 = arith.constant 6 : index
    %c0_135 = arith.constant 0 : index
    %c0_136 = arith.constant 0 : index
    %227 = vector.load %arg4[%c1_133, %c6_134, %c0_135, %c0_136] : memref<2x8x8x64xbf16, #tpu.memory_space<vmem>>, vector<1x1x8x64xbf16>
    %228 = vector.shape_cast %227 : vector<1x1x8x64xbf16> to vector<8x64xbf16>
    %229 = vector.shape_cast %226 : vector<8x64xbf16> to vector<1x1x8x64xbf16>
    tpu.vector_store %arg4[%c1_133, %c6_134, %c0_135, %c0_136], %229 {strides = array<i32>} : memref<2x8x8x64xbf16, #tpu.memory_space<vmem>>, vector<1x1x8x64xbf16>,
    %c480 = arith.constant 480 : index
    %c0_137 = arith.constant 0 : index
    %230 = tpu.strided_load %arg5[%c480, %c0_137] {strides = array<i32: 2, 1>} : memref<512x64xf32, #tpu.memory_space<vmem>>, vector<8x64xf32>
    %c481 = arith.constant 481 : index
    %c0_138 = arith.constant 0 : index
    %231 = tpu.strided_load %arg5[%c481, %c0_138] {strides = array<i32: 2, 1>} : memref<512x64xf32, #tpu.memory_space<vmem>>, vector<8x64xf32>
    %232 = arith.maximumf %230, %231 : vector<8x64xf32>
    %c496 = arith.constant 496 : index
    %c0_139 = arith.constant 0 : index
    %233 = tpu.strided_load %arg5[%c496, %c0_139] {strides = array<i32: 2, 1>} : memref<512x64xf32, #tpu.memory_space<vmem>>, vector<8x64xf32>
    %c497 = arith.constant 497 : index
    %c0_140 = arith.constant 0 : index
    %234 = tpu.strided_load %arg5[%c497, %c0_140] {strides = array<i32: 2, 1>} : memref<512x64xf32, #tpu.memory_space<vmem>>, vector<8x64xf32>
    %235 = arith.maximumf %233, %234 : vector<8x64xf32>
    %236 = arith.maximumf %232, %235 : vector<8x64xf32>
    %237 = vector.broadcast %4 : vector<1x64xf32> to vector<8x64xf32>
    %238 = arith.addf %236, %237 : vector<8x64xf32>
    %cst_141 = arith.constant 0.000000e+00 : f32
    %239 = vector.broadcast %cst_141 : f32 to vector<8x64xf32>
    %240 = arith.maximumf %238, %239 : vector<8x64xf32>
    %241 = arith.truncf %240 : vector<8x64xf32> to vector<8x64xbf16>
    %c1_142 = arith.constant 1 : index
    %c7_143 = arith.constant 7 : index
    %c0_144 = arith.constant 0 : index
    %c0_145 = arith.constant 0 : index
    %242 = vector.load %arg4[%c1_142, %c7_143, %c0_144, %c0_145] : memref<2x8x8x64xbf16, #tpu.memory_space<vmem>>, vector<1x1x8x64xbf16>
    %243 = vector.shape_cast %242 : vector<1x1x8x64xbf16> to vector<8x64xbf16>
    %244 = vector.shape_cast %241 : vector<8x64xbf16> to vector<1x1x8x64xbf16>
    tpu.vector_store %arg4[%c1_142, %c7_143, %c0_144, %c0_145], %244 {strides = array<i32>} : memref<2x8x8x64xbf16, #tpu.memory_space<vmem>>, vector<1x1x8x64xbf16>,
    return
  }
  func.func @transform_0(%arg0: i32) -> (i32, i32) {
    %c0_i32 = arith.constant 0 : i32
    %c0_i32_0 = arith.constant 0 : i32
    return %arg0, %c0_i32 : i32, i32
  }
  func.func @transform_1(%arg0: i32) -> (i32, i32) {
    %c0_i32 = arith.constant 0 : i32
    %c0_i32_0 = arith.constant 0 : i32
    %c0_i32_1 = arith.constant 0 : i32
    return %c0_i32, %c0_i32_0 : i32, i32
  }
  func.func @transform_2(%arg0: i32) -> (i32, i32) {
    %c0_i32 = arith.constant 0 : i32
    %c0_i32_0 = arith.constant 0 : i32
    %c0_i32_1 = arith.constant 0 : i32
    return %c0_i32, %c0_i32_0 : i32, i32
  }
  func.func @transform_3(%arg0: i32) -> (i32, i32, i32, i32) {
    %c0_i32 = arith.constant 0 : i32
    %c0_i32_0 = arith.constant 0 : i32
    %c0_i32_1 = arith.constant 0 : i32
    %c0_i32_2 = arith.constant 0 : i32
    return %arg0, %c0_i32, %c0_i32_0, %c0_i32_1 : i32, i32, i32, i32
  }
}

module attributes {stable_mosaic.version = 11 : i64} {
  func.func @_conv_pool_kernel(%arg0: i32, %arg1: memref<128x576xbf16, #tpu.memory_space<vmem>>, %arg2: memref<576x128xbf16, #tpu.memory_space<vmem>>, %arg3: memref<1x128xf32, #tpu.memory_space<vmem>>, %arg4: memref<2x4x4x128xbf16, #tpu.memory_space<vmem>>, %arg5: memref<128x128xf32, #tpu.memory_space<vmem>>) attributes {dimension_semantics = [#tpu.dimension_semantics<parallel>], iteration_bounds = array<i64: 2>, scalar_prefetch = 0 : i64, scratch_operands = 1 : i64, tpu.core_type = #tpu.core_type<tc>, window_params = [{transform_indices = @transform_0, window_bounds = array<i64: 128, 576>}, {pipeline_mode = #tpu.pipeline_mode<synchronous>, transform_indices = @transform_1, window_bounds = array<i64: 576, 128>}, {pipeline_mode = #tpu.pipeline_mode<synchronous>, transform_indices = @transform_2, window_bounds = array<i64: 1, 128>}, {transform_indices = @transform_3, window_bounds = array<i64: 2, 4, 4, 128>}]} {
    %c0 = arith.constant 0 : index
    %c0_0 = arith.constant 0 : index
    %0 = vector.load %arg1[%c0, %c0_0] : memref<128x576xbf16, #tpu.memory_space<vmem>>, vector<128x576xbf16>
    %c0_1 = arith.constant 0 : index
    %c0_2 = arith.constant 0 : index
    %1 = vector.load %arg2[%c0_1, %c0_2] : memref<576x128xbf16, #tpu.memory_space<vmem>>, vector<576x128xbf16>
    %cst = arith.constant dense<0.000000e+00> : vector<128x128xf32>
    %2 = tpu.matmul %0, %1, %cst {dimension_numbers = #tpu.dot_dimension_numbers<[1], [0], [0], [1], [0, 0, 1, 1], [], []>} : vector<128x576xbf16>, vector<576x128xbf16>, vector<128x128xf32> -> vector<128x128xf32>
    %c0_3 = arith.constant 0 : index
    %c0_4 = arith.constant 0 : index
    %3 = vector.load %arg5[%c0_3, %c0_4] : memref<128x128xf32, #tpu.memory_space<vmem>>, vector<128x128xf32>
    tpu.vector_store %arg5[%c0_3, %c0_4], %2 {strides = array<i32>} : memref<128x128xf32, #tpu.memory_space<vmem>>, vector<128x128xf32>,
    %c0_5 = arith.constant 0 : index
    %c0_6 = arith.constant 0 : index
    %4 = vector.load %arg3[%c0_5, %c0_6] : memref<1x128xf32, #tpu.memory_space<vmem>>, vector<1x128xf32>
    %c0_7 = arith.constant 0 : index
    %c0_8 = arith.constant 0 : index
    %5 = tpu.strided_load %arg5[%c0_7, %c0_8] {strides = array<i32: 2, 1>} : memref<128x128xf32, #tpu.memory_space<vmem>>, vector<4x128xf32>
    %c1 = arith.constant 1 : index
    %c0_9 = arith.constant 0 : index
    %6 = tpu.strided_load %arg5[%c1, %c0_9] {strides = array<i32: 2, 1>} : memref<128x128xf32, #tpu.memory_space<vmem>>, vector<4x128xf32>
    %7 = arith.maximumf %5, %6 : vector<4x128xf32>
    %c8 = arith.constant 8 : index
    %c0_10 = arith.constant 0 : index
    %8 = tpu.strided_load %arg5[%c8, %c0_10] {strides = array<i32: 2, 1>} : memref<128x128xf32, #tpu.memory_space<vmem>>, vector<4x128xf32>
    %c9 = arith.constant 9 : index
    %c0_11 = arith.constant 0 : index
    %9 = tpu.strided_load %arg5[%c9, %c0_11] {strides = array<i32: 2, 1>} : memref<128x128xf32, #tpu.memory_space<vmem>>, vector<4x128xf32>
    %10 = arith.maximumf %8, %9 : vector<4x128xf32>
    %11 = arith.maximumf %7, %10 : vector<4x128xf32>
    %12 = vector.broadcast %4 : vector<1x128xf32> to vector<4x128xf32>
    %13 = arith.addf %11, %12 : vector<4x128xf32>
    %cst_12 = arith.constant 0.000000e+00 : f32
    %14 = vector.broadcast %cst_12 : f32 to vector<4x128xf32>
    %15 = arith.maximumf %13, %14 : vector<4x128xf32>
    %16 = arith.truncf %15 : vector<4x128xf32> to vector<4x128xbf16>
    %c0_13 = arith.constant 0 : index
    %c0_14 = arith.constant 0 : index
    %c0_15 = arith.constant 0 : index
    %c0_16 = arith.constant 0 : index
    %17 = vector.load %arg4[%c0_13, %c0_14, %c0_15, %c0_16] : memref<2x4x4x128xbf16, #tpu.memory_space<vmem>>, vector<1x1x4x128xbf16>
    %18 = vector.shape_cast %17 : vector<1x1x4x128xbf16> to vector<4x128xbf16>
    %19 = vector.shape_cast %16 : vector<4x128xbf16> to vector<1x1x4x128xbf16>
    tpu.vector_store %arg4[%c0_13, %c0_14, %c0_15, %c0_16], %19 {strides = array<i32>} : memref<2x4x4x128xbf16, #tpu.memory_space<vmem>>, vector<1x1x4x128xbf16>,
    %c16 = arith.constant 16 : index
    %c0_17 = arith.constant 0 : index
    %20 = tpu.strided_load %arg5[%c16, %c0_17] {strides = array<i32: 2, 1>} : memref<128x128xf32, #tpu.memory_space<vmem>>, vector<4x128xf32>
    %c17 = arith.constant 17 : index
    %c0_18 = arith.constant 0 : index
    %21 = tpu.strided_load %arg5[%c17, %c0_18] {strides = array<i32: 2, 1>} : memref<128x128xf32, #tpu.memory_space<vmem>>, vector<4x128xf32>
    %22 = arith.maximumf %20, %21 : vector<4x128xf32>
    %c24 = arith.constant 24 : index
    %c0_19 = arith.constant 0 : index
    %23 = tpu.strided_load %arg5[%c24, %c0_19] {strides = array<i32: 2, 1>} : memref<128x128xf32, #tpu.memory_space<vmem>>, vector<4x128xf32>
    %c25 = arith.constant 25 : index
    %c0_20 = arith.constant 0 : index
    %24 = tpu.strided_load %arg5[%c25, %c0_20] {strides = array<i32: 2, 1>} : memref<128x128xf32, #tpu.memory_space<vmem>>, vector<4x128xf32>
    %25 = arith.maximumf %23, %24 : vector<4x128xf32>
    %26 = arith.maximumf %22, %25 : vector<4x128xf32>
    %27 = vector.broadcast %4 : vector<1x128xf32> to vector<4x128xf32>
    %28 = arith.addf %26, %27 : vector<4x128xf32>
    %cst_21 = arith.constant 0.000000e+00 : f32
    %29 = vector.broadcast %cst_21 : f32 to vector<4x128xf32>
    %30 = arith.maximumf %28, %29 : vector<4x128xf32>
    %31 = arith.truncf %30 : vector<4x128xf32> to vector<4x128xbf16>
    %c0_22 = arith.constant 0 : index
    %c1_23 = arith.constant 1 : index
    %c0_24 = arith.constant 0 : index
    %c0_25 = arith.constant 0 : index
    %32 = vector.load %arg4[%c0_22, %c1_23, %c0_24, %c0_25] : memref<2x4x4x128xbf16, #tpu.memory_space<vmem>>, vector<1x1x4x128xbf16>
    %33 = vector.shape_cast %32 : vector<1x1x4x128xbf16> to vector<4x128xbf16>
    %34 = vector.shape_cast %31 : vector<4x128xbf16> to vector<1x1x4x128xbf16>
    tpu.vector_store %arg4[%c0_22, %c1_23, %c0_24, %c0_25], %34 {strides = array<i32>} : memref<2x4x4x128xbf16, #tpu.memory_space<vmem>>, vector<1x1x4x128xbf16>,
    %c32 = arith.constant 32 : index
    %c0_26 = arith.constant 0 : index
    %35 = tpu.strided_load %arg5[%c32, %c0_26] {strides = array<i32: 2, 1>} : memref<128x128xf32, #tpu.memory_space<vmem>>, vector<4x128xf32>
    %c33 = arith.constant 33 : index
    %c0_27 = arith.constant 0 : index
    %36 = tpu.strided_load %arg5[%c33, %c0_27] {strides = array<i32: 2, 1>} : memref<128x128xf32, #tpu.memory_space<vmem>>, vector<4x128xf32>
    %37 = arith.maximumf %35, %36 : vector<4x128xf32>
    %c40 = arith.constant 40 : index
    %c0_28 = arith.constant 0 : index
    %38 = tpu.strided_load %arg5[%c40, %c0_28] {strides = array<i32: 2, 1>} : memref<128x128xf32, #tpu.memory_space<vmem>>, vector<4x128xf32>
    %c41 = arith.constant 41 : index
    %c0_29 = arith.constant 0 : index
    %39 = tpu.strided_load %arg5[%c41, %c0_29] {strides = array<i32: 2, 1>} : memref<128x128xf32, #tpu.memory_space<vmem>>, vector<4x128xf32>
    %40 = arith.maximumf %38, %39 : vector<4x128xf32>
    %41 = arith.maximumf %37, %40 : vector<4x128xf32>
    %42 = vector.broadcast %4 : vector<1x128xf32> to vector<4x128xf32>
    %43 = arith.addf %41, %42 : vector<4x128xf32>
    %cst_30 = arith.constant 0.000000e+00 : f32
    %44 = vector.broadcast %cst_30 : f32 to vector<4x128xf32>
    %45 = arith.maximumf %43, %44 : vector<4x128xf32>
    %46 = arith.truncf %45 : vector<4x128xf32> to vector<4x128xbf16>
    %c0_31 = arith.constant 0 : index
    %c2 = arith.constant 2 : index
    %c0_32 = arith.constant 0 : index
    %c0_33 = arith.constant 0 : index
    %47 = vector.load %arg4[%c0_31, %c2, %c0_32, %c0_33] : memref<2x4x4x128xbf16, #tpu.memory_space<vmem>>, vector<1x1x4x128xbf16>
    %48 = vector.shape_cast %47 : vector<1x1x4x128xbf16> to vector<4x128xbf16>
    %49 = vector.shape_cast %46 : vector<4x128xbf16> to vector<1x1x4x128xbf16>
    tpu.vector_store %arg4[%c0_31, %c2, %c0_32, %c0_33], %49 {strides = array<i32>} : memref<2x4x4x128xbf16, #tpu.memory_space<vmem>>, vector<1x1x4x128xbf16>,
    %c48 = arith.constant 48 : index
    %c0_34 = arith.constant 0 : index
    %50 = tpu.strided_load %arg5[%c48, %c0_34] {strides = array<i32: 2, 1>} : memref<128x128xf32, #tpu.memory_space<vmem>>, vector<4x128xf32>
    %c49 = arith.constant 49 : index
    %c0_35 = arith.constant 0 : index
    %51 = tpu.strided_load %arg5[%c49, %c0_35] {strides = array<i32: 2, 1>} : memref<128x128xf32, #tpu.memory_space<vmem>>, vector<4x128xf32>
    %52 = arith.maximumf %50, %51 : vector<4x128xf32>
    %c56 = arith.constant 56 : index
    %c0_36 = arith.constant 0 : index
    %53 = tpu.strided_load %arg5[%c56, %c0_36] {strides = array<i32: 2, 1>} : memref<128x128xf32, #tpu.memory_space<vmem>>, vector<4x128xf32>
    %c57 = arith.constant 57 : index
    %c0_37 = arith.constant 0 : index
    %54 = tpu.strided_load %arg5[%c57, %c0_37] {strides = array<i32: 2, 1>} : memref<128x128xf32, #tpu.memory_space<vmem>>, vector<4x128xf32>
    %55 = arith.maximumf %53, %54 : vector<4x128xf32>
    %56 = arith.maximumf %52, %55 : vector<4x128xf32>
    %57 = vector.broadcast %4 : vector<1x128xf32> to vector<4x128xf32>
    %58 = arith.addf %56, %57 : vector<4x128xf32>
    %cst_38 = arith.constant 0.000000e+00 : f32
    %59 = vector.broadcast %cst_38 : f32 to vector<4x128xf32>
    %60 = arith.maximumf %58, %59 : vector<4x128xf32>
    %61 = arith.truncf %60 : vector<4x128xf32> to vector<4x128xbf16>
    %c0_39 = arith.constant 0 : index
    %c3 = arith.constant 3 : index
    %c0_40 = arith.constant 0 : index
    %c0_41 = arith.constant 0 : index
    %62 = vector.load %arg4[%c0_39, %c3, %c0_40, %c0_41] : memref<2x4x4x128xbf16, #tpu.memory_space<vmem>>, vector<1x1x4x128xbf16>
    %63 = vector.shape_cast %62 : vector<1x1x4x128xbf16> to vector<4x128xbf16>
    %64 = vector.shape_cast %61 : vector<4x128xbf16> to vector<1x1x4x128xbf16>
    tpu.vector_store %arg4[%c0_39, %c3, %c0_40, %c0_41], %64 {strides = array<i32>} : memref<2x4x4x128xbf16, #tpu.memory_space<vmem>>, vector<1x1x4x128xbf16>,
    %c64 = arith.constant 64 : index
    %c0_42 = arith.constant 0 : index
    %65 = tpu.strided_load %arg5[%c64, %c0_42] {strides = array<i32: 2, 1>} : memref<128x128xf32, #tpu.memory_space<vmem>>, vector<4x128xf32>
    %c65 = arith.constant 65 : index
    %c0_43 = arith.constant 0 : index
    %66 = tpu.strided_load %arg5[%c65, %c0_43] {strides = array<i32: 2, 1>} : memref<128x128xf32, #tpu.memory_space<vmem>>, vector<4x128xf32>
    %67 = arith.maximumf %65, %66 : vector<4x128xf32>
    %c72 = arith.constant 72 : index
    %c0_44 = arith.constant 0 : index
    %68 = tpu.strided_load %arg5[%c72, %c0_44] {strides = array<i32: 2, 1>} : memref<128x128xf32, #tpu.memory_space<vmem>>, vector<4x128xf32>
    %c73 = arith.constant 73 : index
    %c0_45 = arith.constant 0 : index
    %69 = tpu.strided_load %arg5[%c73, %c0_45] {strides = array<i32: 2, 1>} : memref<128x128xf32, #tpu.memory_space<vmem>>, vector<4x128xf32>
    %70 = arith.maximumf %68, %69 : vector<4x128xf32>
    %71 = arith.maximumf %67, %70 : vector<4x128xf32>
    %72 = vector.broadcast %4 : vector<1x128xf32> to vector<4x128xf32>
    %73 = arith.addf %71, %72 : vector<4x128xf32>
    %cst_46 = arith.constant 0.000000e+00 : f32
    %74 = vector.broadcast %cst_46 : f32 to vector<4x128xf32>
    %75 = arith.maximumf %73, %74 : vector<4x128xf32>
    %76 = arith.truncf %75 : vector<4x128xf32> to vector<4x128xbf16>
    %c1_47 = arith.constant 1 : index
    %c0_48 = arith.constant 0 : index
    %c0_49 = arith.constant 0 : index
    %c0_50 = arith.constant 0 : index
    %77 = vector.load %arg4[%c1_47, %c0_48, %c0_49, %c0_50] : memref<2x4x4x128xbf16, #tpu.memory_space<vmem>>, vector<1x1x4x128xbf16>
    %78 = vector.shape_cast %77 : vector<1x1x4x128xbf16> to vector<4x128xbf16>
    %79 = vector.shape_cast %76 : vector<4x128xbf16> to vector<1x1x4x128xbf16>
    tpu.vector_store %arg4[%c1_47, %c0_48, %c0_49, %c0_50], %79 {strides = array<i32>} : memref<2x4x4x128xbf16, #tpu.memory_space<vmem>>, vector<1x1x4x128xbf16>,
    %c80 = arith.constant 80 : index
    %c0_51 = arith.constant 0 : index
    %80 = tpu.strided_load %arg5[%c80, %c0_51] {strides = array<i32: 2, 1>} : memref<128x128xf32, #tpu.memory_space<vmem>>, vector<4x128xf32>
    %c81 = arith.constant 81 : index
    %c0_52 = arith.constant 0 : index
    %81 = tpu.strided_load %arg5[%c81, %c0_52] {strides = array<i32: 2, 1>} : memref<128x128xf32, #tpu.memory_space<vmem>>, vector<4x128xf32>
    %82 = arith.maximumf %80, %81 : vector<4x128xf32>
    %c88 = arith.constant 88 : index
    %c0_53 = arith.constant 0 : index
    %83 = tpu.strided_load %arg5[%c88, %c0_53] {strides = array<i32: 2, 1>} : memref<128x128xf32, #tpu.memory_space<vmem>>, vector<4x128xf32>
    %c89 = arith.constant 89 : index
    %c0_54 = arith.constant 0 : index
    %84 = tpu.strided_load %arg5[%c89, %c0_54] {strides = array<i32: 2, 1>} : memref<128x128xf32, #tpu.memory_space<vmem>>, vector<4x128xf32>
    %85 = arith.maximumf %83, %84 : vector<4x128xf32>
    %86 = arith.maximumf %82, %85 : vector<4x128xf32>
    %87 = vector.broadcast %4 : vector<1x128xf32> to vector<4x128xf32>
    %88 = arith.addf %86, %87 : vector<4x128xf32>
    %cst_55 = arith.constant 0.000000e+00 : f32
    %89 = vector.broadcast %cst_55 : f32 to vector<4x128xf32>
    %90 = arith.maximumf %88, %89 : vector<4x128xf32>
    %91 = arith.truncf %90 : vector<4x128xf32> to vector<4x128xbf16>
    %c1_56 = arith.constant 1 : index
    %c1_57 = arith.constant 1 : index
    %c0_58 = arith.constant 0 : index
    %c0_59 = arith.constant 0 : index
    %92 = vector.load %arg4[%c1_56, %c1_57, %c0_58, %c0_59] : memref<2x4x4x128xbf16, #tpu.memory_space<vmem>>, vector<1x1x4x128xbf16>
    %93 = vector.shape_cast %92 : vector<1x1x4x128xbf16> to vector<4x128xbf16>
    %94 = vector.shape_cast %91 : vector<4x128xbf16> to vector<1x1x4x128xbf16>
    tpu.vector_store %arg4[%c1_56, %c1_57, %c0_58, %c0_59], %94 {strides = array<i32>} : memref<2x4x4x128xbf16, #tpu.memory_space<vmem>>, vector<1x1x4x128xbf16>,
    %c96 = arith.constant 96 : index
    %c0_60 = arith.constant 0 : index
    %95 = tpu.strided_load %arg5[%c96, %c0_60] {strides = array<i32: 2, 1>} : memref<128x128xf32, #tpu.memory_space<vmem>>, vector<4x128xf32>
    %c97 = arith.constant 97 : index
    %c0_61 = arith.constant 0 : index
    %96 = tpu.strided_load %arg5[%c97, %c0_61] {strides = array<i32: 2, 1>} : memref<128x128xf32, #tpu.memory_space<vmem>>, vector<4x128xf32>
    %97 = arith.maximumf %95, %96 : vector<4x128xf32>
    %c104 = arith.constant 104 : index
    %c0_62 = arith.constant 0 : index
    %98 = tpu.strided_load %arg5[%c104, %c0_62] {strides = array<i32: 2, 1>} : memref<128x128xf32, #tpu.memory_space<vmem>>, vector<4x128xf32>
    %c105 = arith.constant 105 : index
    %c0_63 = arith.constant 0 : index
    %99 = tpu.strided_load %arg5[%c105, %c0_63] {strides = array<i32: 2, 1>} : memref<128x128xf32, #tpu.memory_space<vmem>>, vector<4x128xf32>
    %100 = arith.maximumf %98, %99 : vector<4x128xf32>
    %101 = arith.maximumf %97, %100 : vector<4x128xf32>
    %102 = vector.broadcast %4 : vector<1x128xf32> to vector<4x128xf32>
    %103 = arith.addf %101, %102 : vector<4x128xf32>
    %cst_64 = arith.constant 0.000000e+00 : f32
    %104 = vector.broadcast %cst_64 : f32 to vector<4x128xf32>
    %105 = arith.maximumf %103, %104 : vector<4x128xf32>
    %106 = arith.truncf %105 : vector<4x128xf32> to vector<4x128xbf16>
    %c1_65 = arith.constant 1 : index
    %c2_66 = arith.constant 2 : index
    %c0_67 = arith.constant 0 : index
    %c0_68 = arith.constant 0 : index
    %107 = vector.load %arg4[%c1_65, %c2_66, %c0_67, %c0_68] : memref<2x4x4x128xbf16, #tpu.memory_space<vmem>>, vector<1x1x4x128xbf16>
    %108 = vector.shape_cast %107 : vector<1x1x4x128xbf16> to vector<4x128xbf16>
    %109 = vector.shape_cast %106 : vector<4x128xbf16> to vector<1x1x4x128xbf16>
    tpu.vector_store %arg4[%c1_65, %c2_66, %c0_67, %c0_68], %109 {strides = array<i32>} : memref<2x4x4x128xbf16, #tpu.memory_space<vmem>>, vector<1x1x4x128xbf16>,
    %c112 = arith.constant 112 : index
    %c0_69 = arith.constant 0 : index
    %110 = tpu.strided_load %arg5[%c112, %c0_69] {strides = array<i32: 2, 1>} : memref<128x128xf32, #tpu.memory_space<vmem>>, vector<4x128xf32>
    %c113 = arith.constant 113 : index
    %c0_70 = arith.constant 0 : index
    %111 = tpu.strided_load %arg5[%c113, %c0_70] {strides = array<i32: 2, 1>} : memref<128x128xf32, #tpu.memory_space<vmem>>, vector<4x128xf32>
    %112 = arith.maximumf %110, %111 : vector<4x128xf32>
    %c120 = arith.constant 120 : index
    %c0_71 = arith.constant 0 : index
    %113 = tpu.strided_load %arg5[%c120, %c0_71] {strides = array<i32: 2, 1>} : memref<128x128xf32, #tpu.memory_space<vmem>>, vector<4x128xf32>
    %c121 = arith.constant 121 : index
    %c0_72 = arith.constant 0 : index
    %114 = tpu.strided_load %arg5[%c121, %c0_72] {strides = array<i32: 2, 1>} : memref<128x128xf32, #tpu.memory_space<vmem>>, vector<4x128xf32>
    %115 = arith.maximumf %113, %114 : vector<4x128xf32>
    %116 = arith.maximumf %112, %115 : vector<4x128xf32>
    %117 = vector.broadcast %4 : vector<1x128xf32> to vector<4x128xf32>
    %118 = arith.addf %116, %117 : vector<4x128xf32>
    %cst_73 = arith.constant 0.000000e+00 : f32
    %119 = vector.broadcast %cst_73 : f32 to vector<4x128xf32>
    %120 = arith.maximumf %118, %119 : vector<4x128xf32>
    %121 = arith.truncf %120 : vector<4x128xf32> to vector<4x128xbf16>
    %c1_74 = arith.constant 1 : index
    %c3_75 = arith.constant 3 : index
    %c0_76 = arith.constant 0 : index
    %c0_77 = arith.constant 0 : index
    %122 = vector.load %arg4[%c1_74, %c3_75, %c0_76, %c0_77] : memref<2x4x4x128xbf16, #tpu.memory_space<vmem>>, vector<1x1x4x128xbf16>
    %123 = vector.shape_cast %122 : vector<1x1x4x128xbf16> to vector<4x128xbf16>
    %124 = vector.shape_cast %121 : vector<4x128xbf16> to vector<1x1x4x128xbf16>
    tpu.vector_store %arg4[%c1_74, %c3_75, %c0_76, %c0_77], %124 {strides = array<i32>} : memref<2x4x4x128xbf16, #tpu.memory_space<vmem>>, vector<1x1x4x128xbf16>,
    return
  }
  func.func @transform_0(%arg0: i32) -> (i32, i32) {
    %c0_i32 = arith.constant 0 : i32
    %c0_i32_0 = arith.constant 0 : i32
    return %arg0, %c0_i32 : i32, i32
  }
  func.func @transform_1(%arg0: i32) -> (i32, i32) {
    %c0_i32 = arith.constant 0 : i32
    %c0_i32_0 = arith.constant 0 : i32
    %c0_i32_1 = arith.constant 0 : i32
    return %c0_i32, %c0_i32_0 : i32, i32
  }
  func.func @transform_2(%arg0: i32) -> (i32, i32) {
    %c0_i32 = arith.constant 0 : i32
    %c0_i32_0 = arith.constant 0 : i32
    %c0_i32_1 = arith.constant 0 : i32
    return %c0_i32, %c0_i32_0 : i32, i32
  }
  func.func @transform_3(%arg0: i32) -> (i32, i32, i32, i32) {
    %c0_i32 = arith.constant 0 : i32
    %c0_i32_0 = arith.constant 0 : i32
    %c0_i32_1 = arith.constant 0 : i32
    %c0_i32_2 = arith.constant 0 : i32
    return %arg0, %c0_i32, %c0_i32_0, %c0_i32_1 : i32, i32, i32, i32
  }
}

module attributes {stable_mosaic.version = 11 : i64} {
  func.func @_fc_fused_kernel(%arg0: i32, %arg1: memref<4x2048xbf16, #tpu.memory_space<vmem>>, %arg2: memref<2048x512xbf16, #tpu.memory_space<vmem>>, %arg3: memref<1x512xf32, #tpu.memory_space<vmem>>, %arg4: memref<512x128xbf16, #tpu.memory_space<vmem>>, %arg5: memref<1x128xf32, #tpu.memory_space<vmem>>, %arg6: memref<4x128xf32, #tpu.memory_space<vmem>>) attributes {dimension_semantics = [#tpu.dimension_semantics<parallel>], iteration_bounds = array<i64: 1>, scalar_prefetch = 0 : i64, scratch_operands = 0 : i64, tpu.core_type = #tpu.core_type<tc>, window_params = [{transform_indices = @transform_0, window_bounds = array<i64: 4, 2048>}, {pipeline_mode = #tpu.pipeline_mode<synchronous>, transform_indices = @transform_1, window_bounds = array<i64: 2048, 512>}, {pipeline_mode = #tpu.pipeline_mode<synchronous>, transform_indices = @transform_2, window_bounds = array<i64: 1, 512>}, {pipeline_mode = #tpu.pipeline_mode<synchronous>, transform_indices = @transform_3, window_bounds = array<i64: 512, 128>}, {pipeline_mode = #tpu.pipeline_mode<synchronous>, transform_indices = @transform_4, window_bounds = array<i64: 1, 128>}, {transform_indices = @transform_5, window_bounds = array<i64: 4, 128>}]} {
    %c0 = arith.constant 0 : index
    %c0_0 = arith.constant 0 : index
    %0 = vector.load %arg1[%c0, %c0_0] : memref<4x2048xbf16, #tpu.memory_space<vmem>>, vector<4x2048xbf16>
    %c0_1 = arith.constant 0 : index
    %c0_2 = arith.constant 0 : index
    %1 = vector.load %arg2[%c0_1, %c0_2] : memref<2048x512xbf16, #tpu.memory_space<vmem>>, vector<2048x512xbf16>
    %cst = arith.constant dense<0.000000e+00> : vector<4x512xf32>
    %2 = tpu.matmul %0, %1, %cst {dimension_numbers = #tpu.dot_dimension_numbers<[1], [0], [0], [1], [0, 0, 1, 1], [], []>} : vector<4x2048xbf16>, vector<2048x512xbf16>, vector<4x512xf32> -> vector<4x512xf32>
    %c0_3 = arith.constant 0 : index
    %c0_4 = arith.constant 0 : index
    %3 = vector.load %arg3[%c0_3, %c0_4] : memref<1x512xf32, #tpu.memory_space<vmem>>, vector<1x512xf32>
    %4 = vector.broadcast %3 : vector<1x512xf32> to vector<4x512xf32>
    %5 = arith.addf %2, %4 : vector<4x512xf32>
    %cst_5 = arith.constant 0.000000e+00 : f32
    %6 = vector.broadcast %cst_5 : f32 to vector<4x512xf32>
    %7 = arith.maximumf %5, %6 : vector<4x512xf32>
    %8 = arith.truncf %7 : vector<4x512xf32> to vector<4x512xbf16>
    %c0_6 = arith.constant 0 : index
    %c0_7 = arith.constant 0 : index
    %9 = vector.load %arg4[%c0_6, %c0_7] : memref<512x128xbf16, #tpu.memory_space<vmem>>, vector<512x128xbf16>
    %cst_8 = arith.constant dense<0.000000e+00> : vector<4x128xf32>
    %10 = tpu.matmul %8, %9, %cst_8 {dimension_numbers = #tpu.dot_dimension_numbers<[1], [0], [0], [1], [0, 0, 1, 1], [], []>} : vector<4x512xbf16>, vector<512x128xbf16>, vector<4x128xf32> -> vector<4x128xf32>
    %c0_9 = arith.constant 0 : index
    %c0_10 = arith.constant 0 : index
    %11 = vector.load %arg5[%c0_9, %c0_10] : memref<1x128xf32, #tpu.memory_space<vmem>>, vector<1x128xf32>
    %12 = vector.broadcast %11 : vector<1x128xf32> to vector<4x128xf32>
    %13 = arith.addf %10, %12 : vector<4x128xf32>
    %c0_11 = arith.constant 0 : index
    %c0_12 = arith.constant 0 : index
    %14 = vector.load %arg6[%c0_11, %c0_12] : memref<4x128xf32, #tpu.memory_space<vmem>>, vector<4x128xf32>
    tpu.vector_store %arg6[%c0_11, %c0_12], %13 {strides = array<i32>} : memref<4x128xf32, #tpu.memory_space<vmem>>, vector<4x128xf32>,
    return
  }
  func.func @transform_0(%arg0: i32) -> (i32, i32) {
    %c0_i32 = arith.constant 0 : i32
    %c0_i32_0 = arith.constant 0 : i32
    return %arg0, %c0_i32 : i32, i32
  }
  func.func @transform_1(%arg0: i32) -> (i32, i32) {
    %c0_i32 = arith.constant 0 : i32
    %c0_i32_0 = arith.constant 0 : i32
    %c0_i32_1 = arith.constant 0 : i32
    return %c0_i32, %c0_i32_0 : i32, i32
  }
  func.func @transform_2(%arg0: i32) -> (i32, i32) {
    %c0_i32 = arith.constant 0 : i32
    %c0_i32_0 = arith.constant 0 : i32
    %c0_i32_1 = arith.constant 0 : i32
    return %c0_i32, %c0_i32_0 : i32, i32
  }
  func.func @transform_3(%arg0: i32) -> (i32, i32) {
    %c0_i32 = arith.constant 0 : i32
    %c0_i32_0 = arith.constant 0 : i32
    %c0_i32_1 = arith.constant 0 : i32
    return %c0_i32, %c0_i32_0 : i32, i32
  }
  func.func @transform_4(%arg0: i32) -> (i32, i32) {
    %c0_i32 = arith.constant 0 : i32
    %c0_i32_0 = arith.constant 0 : i32
    %c0_i32_1 = arith.constant 0 : i32
    return %c0_i32, %c0_i32_0 : i32, i32
  }
  func.func @transform_5(%arg0: i32) -> (i32, i32) {
    %c0_i32 = arith.constant 0 : i32
    %c0_i32_0 = arith.constant 0 : i32
    return %arg0, %c0_i32 : i32, i32
  }
}

</mosaic_0001>

<bundles_post_ra>
// kernel: _lambda_.5
= control target key start
LH: loop header
LB: loop body
LE: loop exit
PB: predicated region body
PF: predicated region fallthrough
CT: control target
= control target key end

     0   :  { %s2486_s12 = smov 0   ;;  %s2969_s0 = inlined_call_operand.vmem [shape: bf16[1024,288], index: 0, kind: input, shape index: {}]   ;;  %s2970_s1 = inlined_call_operand.vmem [shape: bf16[288,64], index: 1, kind: input, shape index: {}]   ;;  %s2971_s2 = inlined_call_operand.vmem [shape: f32[1,64], index: 2, kind: input, shape index: {}]   ;;  %s2972_s3 = inlined_call_operand.vmem [shape: bf16[4,8,8,64], index: 3, kind: output, shape index: {}]  }
   0x1 LB: > { %s1992_s13 = sadd.s32 4294967295, %s2463_s12   ;;  %p1996_p0 = scmp.ge.s32.totalorder %s2463_s12, 1  ;;  %s2463_s12 = sphi %s2486_s12, %s13_s12  }
   0x2   : > { %p139_p1 = scmp.lt.s32.totalorder %s2463_s12, 3 }
   0x4   : > { %p140_p2 = pnand %p1996_p0, %p139_p1 }
   0x5   : > { %v2311_v0 = vld [vmem:[%s2970_s1] sm:$0xff] (!%p140_p2)   ;;  %v2465_v1 = vmov (!%p140_p2), 0   ;;  %s1997_s16 = sshll.u32 (!%p140_p2), %s1992_s13, 6  ;;  %v2312_v2 = vld [vmem:[%s2970_s1 + $0x8] sm:$0xff] (!%p140_p2)   ;;  %v2313_v3 = vld [vmem:[%s2970_s1 + $0x10] sm:$0xff] (!%p140_p2)   ;;  %vm932_vm0 = vcmask (!%p140_p2), 261120  }
   0x6   : > { %143 = sbr.rel (%p140_p2) target bundleno = 491 (0x1eb), region = 32  ;;  %1029 = vmatprep.subr.bf16.mxu0 (!%p140_p2), %v2465_v1  ;;  %2269 = vmatprep.subr.bf16.mxu1 (!%p140_p2), %v2465_v1  ;;  %p166_p3 = scmp.lt.s32.totalorder (!%p140_p2), %s1997_s16, 127  ;;  %v2314_v4 = vld [vmem:[%s2970_s1 + $0x18] sm:$0xff] (!%p140_p2)   ;;  %v2315_v5 = vld [vmem:[%s2970_s1 + $0x20] sm:$0xff] (!%p140_p2)   ;;  %v2316_v7 = vld [vmem:[%s2970_s1 + $0x28] sm:$0xff] (!%p140_p2)   ;;  %vm1607_vm1 = vcmask (!%p140_p2), 523264  }
   0x7   : > { %1030 = vmatpush1.bf16.msra.mxu0 (!%p140_p2), %v2311_v0  ;;  %2285 = vmatpush1.bf16.msra.mxu1 (!%p140_p2), %v2311_v0  ;;  %v2317_v9 = vld [vmem:[%s2970_s1 + $0x30] sm:$0xff] (!%p140_p2)   ;;  %v2318_v10 = vld [vmem:[%s2970_s1 + $0x38] sm:$0xff] (!%p140_p2)   ;;  %v2319_v11 = vld [vmem:[%s2970_s1 + $0x40] sm:$0xff] (!%p140_p2)   ;;  %vm1692_vm2 = vcmask (!%p140_p2), 519168  }
   0x8   : > { %1031 = vmatprep.subr.bf16.mxu0 (!%p140_p2), %v2465_v1  ;;  %2270 = vmatprep.subr.bf16.mxu1 (!%p140_p2), %v2465_v1  ;;  %v2320_v12 = vld [vmem:[%s2970_s1 + $0x48] sm:$0xff] (!%p140_p2)   ;;  %v2321_v13 = vld [vmem:[%s2970_s1 + $0x50] sm:$0xff] (!%p140_p2)   ;;  %v2322_v14 = vld [vmem:[%s2970_s1 + $0x58] sm:$0xff] (!%p140_p2)  }
   0x9   : > { %v2323_v15 = vld [vmem:[%s2970_s1 + $0x60] sm:$0xff] (!%p140_p2)   ;;  %v2324_v16 = vld [vmem:[%s2970_s1 + $0x68] sm:$0xff] (!%p140_p2)   ;;  %v2325_v17 = vld [vmem:[%s2970_s1 + $0x70] sm:$0xff] (!%p140_p2)  }
   0xa   : > { %v2326_v18 = vld [vmem:[%s2970_s1 + $0x78] sm:$0xff] (!%p140_p2)   ;;  %v2333_v19 = vld [vmem:[%s2970_s1 + $0x80] sm:$0xff] (!%p140_p2)   ;;  %v2358_v24 = vld [vmem:[%s2970_s1 + $0x88] sm:$0xff] (!%p140_p2)  }
   0xb   : > { %1032 = vmatpush1.bf16.msra.mxu0 (!%p140_p2), %v2312_v2  ;;  %2286 = vmatpush1.bf16.msra.mxu1 (!%p140_p2), %v2312_v2 }
   0xc   : > { %1033 = vmatprep.subr.bf16.mxu0 (!%p140_p2), %v2465_v1  ;;  %2271 = vmatprep.subr.bf16.mxu1 (!%p140_p2), %v2465_v1 }
   0xd   : > { %s2974_s16 = smov (!%p166_p3, %s1997_s16), 127 }
   0xe   : > { %s2301_s23 = smul.u32 12, %s2974_s16 }
   0xf   : > { %1034 = vmatpush1.bf16.msra.mxu0 %v2313_v3  ;;  %2287 = vmatpush1.bf16.msra.mxu1 %v2313_v3 }
  0x10   : > { %1035 = vmatprep.subr.bf16.mxu0 %v2465_v1  ;;  %2272 = vmatprep.subr.bf16.mxu1 %v2465_v1  ;;  %s2522_s28 = scalar_lea.vmem %s2969_s0, %s2301_s23 }
  0x11   : > { %v2329_v6 = vld [vmem:[%s2522_s28 + $0x4] ss:$12 sps:$4 sm:$0xff]   ;;  %v2327_v20 = vld [vmem:[%s2522_s28] ss:$12 sps:$4 sm:$0xff]   ;;  %v2334_v22 = vld [vmem:[%s2522_s28 + $0x1c] ss:$12 sps:$4 sm:$0xff]  }
  0x12   : > { %v2332_v8 = vld [vmem:[%s2522_s28 + $0x244] ss:$12 sps:$4 sm:$0xff]   ;;  %1061 = vmatprep.mubr.bf16.mxu0 %v2329_v6  ;;  %v2330_v21 = vld [vmem:[%s2522_s28 + $0x240] ss:$12 sps:$4 sm:$0xff]   ;;  %v2336_v23 = vld [vmem:[%s2522_s28 + $0x25c] ss:$12 sps:$4 sm:$0xff]  }
  0x13   : > { %1036 = vmatpush1.bf16.msra.mxu0 %v2314_v4  ;;  %2288 = vmatpush1.bf16.msra.mxu1 %v2314_v4  ;;  %v2338_v25 = vld [vmem:[%s2522_s28 + $0x18] ss:$12 sps:$4 sm:$0xff]   ;;  %v2340_v27 = vld [vmem:[%s2522_s28 + $0x34] ss:$12 sps:$4 sm:$0xff]   ;;  %v2344_v29 = vld [vmem:[%s2522_s28 + $0x30] ss:$12 sps:$4 sm:$0xff]  }
  0x14   : > { %1037 = vmatprep.subr.bf16.mxu0 %v2465_v1  ;;  %2273 = vmatprep.subr.bf16.mxu1 %v2465_v1  ;;  %v2339_v26 = vld [vmem:[%s2522_s28 + $0x258] ss:$12 sps:$4 sm:$0xff]   ;;  %v2342_v28 = vld [vmem:[%s2522_s28 + $0x274] ss:$12 sps:$4 sm:$0xff]   ;;  %v2345_v30 = vld [vmem:[%s2522_s28 + $0x270] ss:$12 sps:$4 sm:$0xff]  }
  0x15   : > { %1253 = vmatprep.mubr.bf16.mxu1 %v2332_v8  ;;  %v2346_v31 = vld [vmem:[%s2522_s28 + $0x4c] ss:$12 sps:$4 sm:$0xff]   ;;  %v2350_v33 = vld [vmem:[%s2522_s28 + $0x48] ss:$12 sps:$4 sm:$0xff]   ;;  %v2352_v35 = vld [vmem:[%s2522_s28 + $0x64] ss:$12 sps:$4 sm:$0xff]  }
  0x16   : > { %v2348_v32 = vld [vmem:[%s2522_s28 + $0x28c] ss:$12 sps:$4 sm:$0xff]   ;;  %v2351_v34 = vld [vmem:[%s2522_s28 + $0x288] ss:$12 sps:$4 sm:$0xff]   ;;  %v2354_v36 = vld [vmem:[%s2522_s28 + $0x2a4] ss:$12 sps:$4 sm:$0xff]  }
  0x17   : > { %1038 = vmatpush1.bf16.msra.mxu0 %v2315_v5  ;;  %2289 = vmatpush1.bf16.msra.mxu1 %v2315_v5  ;;  %v2356_v37 = vld [vmem:[%s2522_s28 + $0x60] ss:$12 sps:$4 sm:$0xff]   ;;  %v2359_v39 = vld [vmem:[%s2522_s28 + $0x7c] ss:$12 sps:$4 sm:$0xff]   ;;  %v2363_v41 = vld [vmem:[%s2522_s28 + $0x78] ss:$12 sps:$4 sm:$0xff]  }
  0x18   : > { %1039 = vmatprep.subr.bf16.mxu0 %v2465_v1  ;;  %2274 = vmatprep.subr.bf16.mxu1 %v2465_v1  ;;  %v2357_v38 = vld [vmem:[%s2522_s28 + $0x2a0] ss:$12 sps:$4 sm:$0xff]   ;;  %v2361_v40 = vld [vmem:[%s2522_s28 + $0x2bc] ss:$12 sps:$4 sm:$0xff]   ;;  %v2364_v42 = vld [vmem:[%s2522_s28 + $0x2b8] ss:$12 sps:$4 sm:$0xff]  }
  0x19   : > { %v2365_v43 = vld [vmem:[%s2522_s28 + $0x94] ss:$12 sps:$4 sm:$0xff]   ;;  %v2369_v45 = vld [vmem:[%s2522_s28 + $0x90] ss:$12 sps:$4 sm:$0xff]   ;;  %v2371_v47 = vld [vmem:[%s2522_s28 + $0xac] ss:$12 sps:$4 sm:$0xff]  }
  0x1a   : > { %v2367_v44 = vld [vmem:[%s2522_s28 + $0x2d4] ss:$12 sps:$4 sm:$0xff]   ;;  %v2370_v46 = vld [vmem:[%s2522_s28 + $0x2d0] ss:$12 sps:$4 sm:$0xff]   ;;  %v2373_v48 = vld [vmem:[%s2522_s28 + $0x2ec] ss:$12 sps:$4 sm:$0xff]  }
  0x1b   : > { %1040 = vmatpush1.bf16.msra.mxu0 %v2316_v7  ;;  %2290 = vmatpush1.bf16.msra.mxu1 %v2316_v7  ;;  %v2375_v49 = vld [vmem:[%s2522_s28 + $0xa8] ss:$12 sps:$4 sm:$0xff]   ;;  %v2377_v51 = vld [vmem:[%s2522_s28 + $0xc4] ss:$12 sps:$4 sm:$0xff]   ;;  %v2380_v53 = vld [vmem:[%s2522_s28 + $0xc0] ss:$12 sps:$4 sm:$0xff]  }
  0x1c   : > { %1041 = vmatprep.subr.bf16.mxu0 %v2465_v1  ;;  %2275 = vmatprep.subr.bf16.mxu1 %v2465_v1  ;;  %v2376_v50 = vld [vmem:[%s2522_s28 + $0x2e8] ss:$12 sps:$4 sm:$0xff]   ;;  %v2381_v54 = vld [vmem:[%s2522_s28 + $0x20] ss:$12 sps:$4 sm:$0xff]   ;;  %v2384_v56 = vld [vmem:[%s2522_s28 + $0x38] ss:$12 sps:$4 sm:$0xff]  }
  0x1d   : > { %v2379_v52 = vld [vmem:[%s2522_s28 + $0x8] ss:$12 sps:$4 sm:$0xff]   ;;  %v2385_v57 = vld [vmem:[%s2522_s28 + $0xd8] ss:$12 sps:$4 sm:$0xff]   ;;  %v2386_v58 = vld [vmem:[%s2522_s28 + $0x50] ss:$12 sps:$4 sm:$0xff]  }
  0x1e   : > { %v2382_v55 = vld [vmem:[%s2522_s28 + $0xdc] ss:$12 sps:$4 sm:$0xff]   ;;  %v2387_v59 = vld [vmem:[%s2522_s28 + $0xf4] ss:$12 sps:$4 sm:$0xff]   ;;  %v2392_v63 = vld [vmem:[%s2522_s28 + $0x10c] ss:$12 sps:$4 sm:$0xff]  }
  0x1f   : > { %1042 = vmatpush1.bf16.msra.mxu0 %v2317_v9  ;;  %2291 = vmatpush1.bf16.msra.mxu1 %v2317_v9  ;;  %v2389_v60 = vld [vmem:[%s2522_s28 + $0x68] ss:$12 sps:$4 sm:$0xff]   ;;  %v2390_v61 = vld [vmem:[%s2522_s28 + $0xf0] ss:$12 sps:$4 sm:$0xff]   ;;  %v2391_v62 = vld [vmem:[%s2522_s28 + $0x80] ss:$12 sps:$4 sm:$0xff]  }
  0x20   : > { %1043 = vmatprep.subr.bf16.mxu0 %v2465_v1  ;;  %2276 = vmatprep.subr.bf16.mxu1 %v2465_v1  ;;  %v2394_v0 = vld [vmem:[%s2522_s28 + $0x98] ss:$12 sps:$4 sm:$0xff]   ;;  %v2396_v2 = vld [vmem:[%s2522_s28 + $0xb0] ss:$12 sps:$4 sm:$0xff]   ;;  %v2399_v4 = vld [vmem:[%s2522_s28 + $0xc8] ss:$12 sps:$4 sm:$0xff]  }
  0x21   : > { %v2397_v3 = vld [vmem:[%s2522_s28 + $0x124] ss:$12 sps:$4 sm:$0xff]   ;;  %v2400_v5 = vld [vmem:[%s2522_s28 + $0x120] ss:$12 sps:$4 sm:$0xff]   ;;  %v2402_v7 = vld [vmem:[%s2522_s28 + $0x13c] ss:$12 sps:$4 sm:$0xff]  }
  0x22   : > { %v2401_v6 = vld [vmem:[%s2522_s28 + $0xe0] ss:$12 sps:$4 sm:$0xff]   ;;  %v2404_v8 = vld [vmem:[%s2522_s28 + $0xf8] ss:$12 sps:$4 sm:$0xff]  }
  0x23   : > { %1044 = vmatpush1.bf16.msra.mxu0 %v2318_v10  ;;  %2292 = vmatpush1.bf16.msra.mxu1 %v2318_v10  ;;  %v2405_v9 = vld [vmem:[%s2522_s28 + $0x138] ss:$12 sps:$4 sm:$0xff]   ;;  %v2406_v10 = vld [vmem:[%s2522_s28 + $0x110] ss:$12 sps:$4 sm:$0xff]  }
  0x24   : > { %1045 = vmatprep.subr.bf16.mxu0 %v2465_v1  ;;  %2277 = vmatprep.subr.bf16.mxu1 %v2465_v1 }
  0x27   : > { %1046 = vmatpush1.bf16.msra.mxu0 %v2319_v11  ;;  %2293 = vmatpush1.bf16.msra.mxu1 %v2319_v11  ;;  %v2407_v11 = vld [vmem:[%s2522_s28 + $0x154] ss:$12 sps:$4 sm:$0xff]  }
  0x28   : > { %1047 = vmatprep.subr.bf16.mxu0 %v2465_v1  ;;  %2278 = vmatprep.subr.bf16.mxu1 %v2465_v1 }
  0x2b   : > { %1048 = vmatpush1.bf16.msra.mxu0 %v2320_v12  ;;  %2294 = vmatpush1.bf16.msra.mxu1 %v2320_v12  ;;  %v2409_v12 = vld [vmem:[%s2522_s28 + $0x128] ss:$12 sps:$4 sm:$0xff]  }
  0x2c   : > { %1049 = vmatprep.subr.bf16.mxu0 %v2465_v1  ;;  %2279 = vmatprep.subr.bf16.mxu1 %v2465_v1 }
  0x2f   : > { %1050 = vmatpush1.bf16.msra.mxu0 %v2321_v13  ;;  %2295 = vmatpush1.bf16.msra.mxu1 %v2321_v13  ;;  %v2410_v13 = vld [vmem:[%s2522_s28 + $0x150] ss:$12 sps:$4 sm:$0xff]  }
  0x30   : > { %1051 = vmatprep.subr.bf16.mxu0 %v2465_v1  ;;  %2280 = vmatprep.subr.bf16.mxu1 %v2465_v1 }
  0x33   : > { %1052 = vmatpush1.bf16.msra.mxu0 %v2322_v14  ;;  %2296 = vmatpush1.bf16.msra.mxu1 %v2322_v14  ;;  %v2411_v14 = vld [vmem:[%s2522_s28 + $0x140] ss:$12 sps:$4 sm:$0xff]  }
  0x34   : > { %1053 = vmatprep.subr.bf16.mxu0 %v2465_v1  ;;  %2281 = vmatprep.subr.bf16.mxu1 %v2465_v1 }
  0x37   : > { %1054 = vmatpush1.bf16.msra.mxu0 %v2323_v15  ;;  %2297 = vmatpush1.bf16.msra.mxu1 %v2323_v15  ;;  %v2412_v15 = vld [vmem:[%s2522_s28 + $0x16c] ss:$12 sps:$4 sm:$0xff]  }
  0x38   : > { %1055 = vmatprep.subr.bf16.mxu0 %v2465_v1  ;;  %2282 = vmatprep.subr.bf16.mxu1 %v2465_v1 }
  0x3b   : > { %1056 = vmatpush1.bf16.msra.mxu0 %v2324_v16  ;;  %2298 = vmatpush1.bf16.msra.mxu1 %v2324_v16  ;;  %v2414_v16 = vld [vmem:[%s2522_s28 + $0x158] ss:$12 sps:$4 sm:$0xff]  }
  0x3c   : > { %1057 = vmatprep.subr.bf16.mxu0 %v2465_v1  ;;  %2283 = vmatprep.subr.bf16.mxu1 %v2465_v1 }
  0x3f   : > { %1058 = vmatpush1.bf16.msra.mxu0 %v2325_v17  ;;  %2299 = vmatpush1.bf16.msra.mxu1 %v2325_v17  ;;  %v2415_v17 = vld [vmem:[%s2522_s28 + $0x168] ss:$12 sps:$4 sm:$0xff]  }
  0x40   : > { %1059 = vmatprep.subr.bf16.mxu0 %v2465_v1  ;;  %2284 = vmatprep.subr.bf16.mxu1 %v2465_v1  ;;  %v2395_v1 = vld [vmem:[%s2522_s28 + $0x108] ss:$12 sps:$4 sm:$0xff]  }
  0x43   : > { %1060 = vmatpush1.bf16.msra.mxu0 %v2326_v18  ;;  %2300 = vmatpush1.bf16.msra.mxu1 %v2326_v18  ;;  %v2416_v18 = vld [vmem:[%s2522_s28 + $0x170] ss:$12 sps:$4 sm:$0xff]  }
  0x44   : > { %2201 = vmatprep.subr.bf16.mxu1 %v2333_v19 }
  0x46   : > { %1062 = vmatmul.mubr.bf16.vlgmr.msra.gmra.mrb[0].mxu0 %v2327_v20  ;;  %1254 = vmatmul.mubr.bf16.vlgmr.msra.gmra.mrb[0].mxu1 %v2330_v21  ;;  %v2419_v20 = vld [vmem:[%s2522_s28 + $0x188] ss:$12 sps:$4 sm:$0xff]   ;;  %v2420_v21 = vld [vmem:[%s2522_s28 + $0x180] ss:$12 sps:$4 sm:$0xff]  }
  0x47   : > { %2202 = vmatpush3.bf16.msra.mxu1 %v2333_v19  ;;  %1069 = vmatprep.mubr.bf16.mxu0 %v2334_v22  ;;  %v2417_v19 = vld [vmem:[%s2522_s28 + $0x184] ss:$12 sps:$4 sm:$0xff]   ;;  %v2421_v22 = vld [vmem:[%s2522_s28 + $0x1a0] ss:$12 sps:$4 sm:$0xff]  }
  0x48   : > { %1261 = vmatprep.mubr.bf16.mxu1 %v2336_v23  ;;  %2203 = vmatprep.subr.bf16.mxu1 %v2358_v24  ;;  %v2422_v23 = vld [vmem:[%s2522_s28 + $0x19c] ss:$12 sps:$4 sm:$0xff]  }
  0x4b   : > { %2204 = vmatpush3.bf16.msra.mxu1 %v2358_v24  ;;  %v2424_v24 = vld [vmem:[%s2522_s28 + $0x1b8] ss:$12 sps:$4 sm:$0xff]  }
  0x4e   : > { %1070 = vmatmul.mubr.bf16.gmra.mrb[4].mxu0 %v2338_v25  ;;  %1262 = vmatmul.mubr.bf16.gmra.mrb[4].mxu1 %v2339_v26  ;;  %v2425_v25 = vld [vmem:[%s2522_s28 + $0x198] ss:$12 sps:$4 sm:$0xff]   ;;  %v2426_v26 = vld [vmem:[%s2522_s28 + $0x1d0] ss:$12 sps:$4 sm:$0xff]  }
  0x4f   : > { %1077 = vmatprep.mubr.bf16.mxu0 %v2340_v27  ;;  %1269 = vmatprep.mubr.bf16.mxu1 %v2342_v28  ;;  %v2427_v27 = vld [vmem:[%s2522_s28 + $0x1b4] ss:$12 sps:$4 sm:$0xff]  }
  0x50   : > { %v2429_v28 = vld [vmem:[%s2522_s28 + $0x1e8] ss:$12 sps:$4 sm:$0xff]  }
  0x56   : > { %1078 = vmatmul.mubr.bf16.gmra.mrb[8].mxu0 %v2344_v29  ;;  %1270 = vmatmul.mubr.bf16.gmra.mrb[8].mxu1 %v2345_v30  ;;  %v2430_v29 = vld [vmem:[%s2522_s28 + $0x1b0] ss:$12 sps:$4 sm:$0xff]   ;;  %v2431_v30 = vld [vmem:[%s2522_s28 + $0x200] ss:$12 sps:$4 sm:$0xff]  }
  0x57   : > { %1085 = vmatprep.mubr.bf16.mxu0 %v2346_v31  ;;  %1277 = vmatprep.mubr.bf16.mxu1 %v2348_v32  ;;  %v2432_v31 = vld [vmem:[%s2522_s28 + $0x1cc] ss:$12 sps:$4 sm:$0xff]  }
  0x58   : > { %v2434_v32 = vld [vmem:[%s2522_s28 + $0x218] ss:$12 sps:$4 sm:$0xff]  }
  0x5e   : > { %1086 = vmatmul.mubr.bf16.gmra.mrb[12].mxu0 %v2350_v33  ;;  %1278 = vmatmul.mubr.bf16.gmra.mrb[12].mxu1 %v2351_v34  ;;  %v2435_v33 = vld [vmem:[%s2522_s28 + $0x1c8] ss:$12 sps:$4 sm:$0xff]   ;;  %v2436_v34 = vld [vmem:[%s2522_s28 + $0x230] ss:$12 sps:$4 sm:$0xff]  }
  0x5f   : > { %1093 = vmatprep.mubr.bf16.mxu0 %v2352_v35  ;;  %1285 = vmatprep.mubr.bf16.mxu1 %v2354_v36  ;;  %v2437_v35 = vld [vmem:[%s2522_s28 + $0x1e4] ss:$12 sps:$4 sm:$0xff]   ;;  %v2439_v36 = vld [vmem:[%s2522_s28 + $0x248] ss:$12 sps:$4 sm:$0xff]  }
  0x66   : > { %1094 = vmatmul.mubr.bf16.gmra.mrb[16].mxu0 %v2356_v37  ;;  %1286 = vmatmul.mubr.bf16.gmra.mrb[16].mxu1 %v2357_v38  ;;  %v2440_v37 = vld [vmem:[%s2522_s28 + $0x1e0] ss:$12 sps:$4 sm:$0xff]  }
  0x67   : > { %1101 = vmatprep.mubr.bf16.mxu0 %v2359_v39  ;;  %1293 = vmatprep.mubr.bf16.mxu1 %v2361_v40  ;;  %v2441_v38 = vld [vmem:[%s2522_s28 + $0x260] ss:$12 sps:$4 sm:$0xff]   ;;  %v2442_v39 = vld [vmem:[%s2522_s28 + $0x1fc] ss:$12 sps:$4 sm:$0xff]   ;;  %v2444_v40 = vld [vmem:[%s2522_s28 + $0x278] ss:$12 sps:$4 sm:$0xff]  }
  0x6e   : > { %1102 = vmatmul.mubr.bf16.gmra.mrb[20].mxu0 %v2363_v41  ;;  %1294 = vmatmul.mubr.bf16.gmra.mrb[20].mxu1 %v2364_v42  ;;  %v2445_v41 = vld [vmem:[%s2522_s28 + $0x1f8] ss:$12 sps:$4 sm:$0xff]   ;;  %v2446_v42 = vld [vmem:[%s2522_s28 + $0x290] ss:$12 sps:$4 sm:$0xff]  }
  0x6f   : > { %1109 = vmatprep.mubr.bf16.mxu0 %v2365_v43  ;;  %1301 = vmatprep.mubr.bf16.mxu1 %v2367_v44  ;;  %v2447_v43 = vld [vmem:[%s2522_s28 + $0x214] ss:$12 sps:$4 sm:$0xff]  }
  0x70   : > { %v2449_v44 = vld [vmem:[%s2522_s28 + $0x2a8] ss:$12 sps:$4 sm:$0xff]  }
  0x76   : > { %1110 = vmatmul.mubr.bf16.gmra.mrb[24].mxu0 %v2369_v45  ;;  %1302 = vmatmul.mubr.bf16.gmra.mrb[24].mxu1 %v2370_v46  ;;  %v2450_v45 = vld [vmem:[%s2522_s28 + $0x210] ss:$12 sps:$4 sm:$0xff]   ;;  %v2451_v46 = vld [vmem:[%s2522_s28 + $0x2c0] ss:$12 sps:$4 sm:$0xff]  }
  0x77   : > { %1117 = vmatprep.mubr.bf16.mxu0 %v2371_v47  ;;  %1309 = vmatprep.mubr.bf16.mxu1 %v2373_v48  ;;  %v2452_v47 = vld [vmem:[%s2522_s28 + $0x22c] ss:$12 sps:$4 sm:$0xff]  }
  0x78   : > { %v2454_v48 = vld [vmem:[%s2522_s28 + $0x2d8] ss:$12 sps:$4 sm:$0xff]  }
  0x7e   : > { %1118 = vmatmul.mubr.bf16.gmra.mrb[28].mxu0 %v2375_v49  ;;  %1310 = vmatmul.mubr.bf16.gmra.mrb[28].mxu1 %v2376_v50  ;;  %v2455_v49 = vld [vmem:[%s2522_s28 + $0x228] ss:$12 sps:$4 sm:$0xff]   ;;  %v2456_v50 = vld [vmem:[%s2522_s28 + $0x2f0] ss:$12 sps:$4 sm:$0xff]   ;;  %s1999_s28 = sshll.u32 %s1992_s13, 1 }
  0x7f   : > { %1125 = vmatprep.mubr.bf16.mxu0 %v2377_v51  ;;  %2205 = vmatprep.mubr.msk.bf16.mxu1 %vm932_vm0, %v2379_v52  ;;  %p173_p4 = scmp.lt.s32.totalorder %s1999_s28, 3 }
  0x81   : > { %s2976_s28 = smov (!%p173_p4, %s1999_s28), 3 }
  0x82   : > { %s2166_s5 = sshll.u32 %s2976_s28, 5 }
  0x83   : > { %s2816_s8 = scalar_lea.vmem %s2972_s3, %s2166_s5 }
  0x86   : > { %1126 = vmatmul.mubr.bf16.gmra.mrb[32].mxu0 %v2380_v53  ;;  %2206 = vmatmul.mubr.msk.bf16.vlgmr.msra.gmra.mrb[32].mxu1 %vm932_vm0, %v2381_v54 }
  0x87   : > { %1133 = vmatprep.mubr.bf16.mxu0 %v2382_v55  ;;  %2209 = vmatprep.mubr.msk.bf16.mxu1 %vm932_vm0, %v2384_v56 }
  0x8e   : > { %1134 = vmatmul.mubr.bf16.gmra.mrb[36].mxu0 %v2385_v57  ;;  %2210 = vmatmul.mubr.msk.bf16.gmra.mrb[36].mxu1 %vm932_vm0, %v2386_v58 }
  0x8f   : > { %1141 = vmatprep.mubr.bf16.mxu0 %v2387_v59  ;;  %2213 = vmatprep.mubr.msk.bf16.mxu1 %vm932_vm0, %v2389_v60 }
  0x96   : > { %1142 = vmatmul.mubr.bf16.gmra.mrb[40].mxu0 %v2390_v61  ;;  %2214 = vmatmul.mubr.msk.bf16.gmra.mrb[40].mxu1 %vm932_vm0, %v2391_v62 }
  0x97   : > { %1149 = vmatprep.mubr.bf16.mxu0 %v2392_v63  ;;  %2217 = vmatprep.mubr.msk.bf16.mxu1 %vm932_vm0, %v2394_v0 }
  0x9e   : > { %1150 = vmatmul.mubr.bf16.gmra.mrb[44].mxu0 %v2395_v1  ;;  %2218 = vmatmul.mubr.msk.bf16.gmra.mrb[44].mxu1 %vm932_vm0, %v2396_v2 }
  0x9f   : > { %1157 = vmatprep.mubr.bf16.mxu0 %v2397_v3  ;;  %2221 = vmatprep.mubr.msk.bf16.mxu1 %vm932_vm0, %v2399_v4 }
  0xa6   : > { %1158 = vmatmul.mubr.bf16.gmra.mrb[48].mxu0 %v2400_v5  ;;  %2222 = vmatmul.mubr.msk.bf16.gmra.mrb[48].mxu1 %vm932_vm0, %v2401_v6 }
  0xa7   : > { %1165 = vmatprep.mubr.bf16.mxu0 %v2402_v7  ;;  %2225 = vmatprep.mubr.msk.bf16.mxu1 %vm932_vm0, %v2404_v8 }
  0xae   : > { %1166 = vmatmul.mubr.bf16.gmra.mrb[52].mxu0 %v2405_v9  ;;  %2226 = vmatmul.mubr.msk.bf16.gmra.mrb[52].mxu1 %vm932_vm0, %v2406_v10 }
  0xaf   : > { %1173 = vmatprep.mubr.bf16.mxu0 %v2407_v11  ;;  %2229 = vmatprep.mubr.msk.bf16.mxu1 %vm932_vm0, %v2409_v12 }
  0xb6   : > { %1174 = vmatmul.mubr.bf16.gmra.mrb[56].mxu0 %v2410_v13  ;;  %2230 = vmatmul.mubr.msk.bf16.gmra.mrb[56].mxu1 %vm932_vm0, %v2411_v14 }
  0xb7   : > { %1181 = vmatprep.mubr.bf16.mxu0 %v2412_v15  ;;  %2233 = vmatprep.mubr.msk.bf16.mxu1 %vm932_vm0, %v2414_v16 }
  0xbe   : > { %1182 = vmatmul.mubr.bf16.gmra.mrb[60].mxu0 %v2415_v17  ;;  %2234 = vmatmul.mubr.msk.bf16.gmra.mrb[60].mxu1 %vm932_vm0, %v2416_v18 }
  0xbf   : > { %1189 = vmatprep.mubr.bf16.mxu0 %v2417_v19  ;;  %2237 = vmatprep.mubr.msk.bf16.mxu1 %vm932_vm0, %v2419_v20 }
  0xc6   : > { %1190 = vmatmul.mubr.bf16.gmra.mrb[64].mxu0 %v2420_v21  ;;  %2238 = vmatmul.mubr.msk.bf16.gmra.mrb[64].mxu1 %vm932_vm0, %v2421_v22 }
  0xc7   : > { %1197 = vmatprep.mubr.bf16.mxu0 %v2422_v23  ;;  %2241 = vmatprep.mubr.msk.bf16.mxu1 %vm932_vm0, %v2424_v24 }
  0xce   : > { %1198 = vmatmul.mubr.bf16.gmra.mrb[68].mxu0 %v2425_v25  ;;  %2242 = vmatmul.mubr.msk.bf16.gmra.mrb[68].mxu1 %vm932_vm0, %v2426_v26 }
  0xcf   : > { %1205 = vmatprep.mubr.bf16.mxu0 %v2427_v27  ;;  %2245 = vmatprep.mubr.msk.bf16.mxu1 %vm932_vm0, %v2429_v28 }
  0xd6   : > { %1206 = vmatmul.mubr.bf16.gmra.mrb[72].mxu0 %v2430_v29  ;;  %2246 = vmatmul.mubr.msk.bf16.gmra.mrb[72].mxu1 %vm932_vm0, %v2431_v30 }
  0xd7   : > { %1213 = vmatprep.mubr.bf16.mxu0 %v2432_v31  ;;  %2249 = vmatprep.mubr.msk.bf16.mxu1 %vm932_vm0, %v2434_v32 }
  0xde   : > { %1214 = vmatmul.mubr.bf16.gmra.mrb[76].mxu0 %v2435_v33  ;;  %2250 = vmatmul.mubr.msk.bf16.gmra.mrb[76].mxu1 %vm932_vm0, %v2436_v34 }
  0xdf   : > { %1221 = vmatprep.mubr.bf16.mxu0 %v2437_v35  ;;  %2253 = vmatprep.mubr.msk.bf16.mxu1 %vm932_vm0, %v2439_v36 }
  0xe6   : > { %1222 = vmatmul.mubr.bf16.gmra.mrb[80].mxu0 %v2440_v37  ;;  %2254 = vmatmul.mubr.msk.bf16.gmra.mrb[80].mxu1 %vm932_vm0, %v2441_v38 }
  0xe7   : > { %1229 = vmatprep.mubr.bf16.mxu0 %v2442_v39  ;;  %2257 = vmatprep.mubr.msk.bf16.mxu1 %vm932_vm0, %v2444_v40 }
  0xee   : > { %1230 = vmatmul.mubr.bf16.gmra.mrb[84].mxu0 %v2445_v41  ;;  %2258 = vmatmul.mubr.msk.bf16.gmra.mrb[84].mxu1 %vm932_vm0, %v2446_v42 }
  0xef   : > { %1237 = vmatprep.mubr.bf16.mxu0 %v2447_v43  ;;  %2261 = vmatprep.mubr.msk.bf16.mxu1 %vm932_vm0, %v2449_v44 }
  0xf6   : > { %1238 = vmatmul.mubr.bf16.gmra.mrb[88].mxu0 %v2450_v45  ;;  %2262 = vmatmul.mubr.msk.bf16.gmra.mrb[88].mxu1 %vm932_vm0, %v2451_v46 }
  0xf7   : > { %1245 = vmatprep.mubr.bf16.mxu0 %v2452_v47  ;;  %2265 = vmatprep.mubr.msk.bf16.mxu1 %vm932_vm0, %v2454_v48 }
  0xfe   : > { %1246 = vmatmul.mubr.bf16.gmra.mrb[92].mxu0 %v2455_v49  ;;  %2266 = vmatmul.mubr.msk.bf16.gmra.mrb[92].mxu1 %vm932_vm0, %v2456_v50 }
 0x119   : > { %v2715_v51 = vpop.f32.mrb[0].mxu0  ;;  %v2717_v52 = vpop.f32.mrb[0].mxu1 }
 0x11a   : > { %v1065_v53 = vpop.f32.mrb[1].mxu0  ;;  %v1257_v54 = vpop.f32.mrb[1].mxu1 }
 0x11b   : > { %v2719_v55 = vpop.f32.mrb[2].mxu0  ;;  %v2721_v56 = vpop.f32.mrb[2].mxu1 }
 0x11c   : > { %v1068_v57 = vpop.f32.mrb[3].mxu0  ;;  %v1260_v58 = vpop.f32.mrb[3].mxu1 }
 0x121   : > { %v1071_v59 = vpop.f32.mrb[4].mxu0  ;;  %v2723_v60 = vpop.f32.mrb[4].mxu1 }
 0x122   : > { %v1073_v61 = vpop.f32.mrb[5].mxu0  ;;  %v1265_v62 = vpop.f32.mrb[5].mxu1 }
 0x123   : > { %v1074_v63 = vpop.f32.mrb[6].mxu0  ;;  %v2725_v0 = vpop.f32.mrb[6].mxu1 }
 0x124   : > { %v1076_v1 = vpop.f32.mrb[7].mxu0  ;;  %v1268_v2 = vpop.f32.mrb[7].mxu1 }
 0x129   : > { %v2727_v3 = vpop.f32.mrb[8].mxu0  ;;  %v2729_v4 = vpop.f32.mrb[8].mxu1 }
 0x12a   : > { %v1081_v5 = vpop.f32.mrb[9].mxu0  ;;  %v1273_v6 = vpop.f32.mrb[9].mxu1 }
 0x12b   : > { %v2731_v7 = vpop.f32.mrb[10].mxu0  ;;  %v2733_v8 = vpop.f32.mrb[10].mxu1 }
 0x12c   : > { %v1084_v9 = vpop.f32.mrb[11].mxu0  ;;  %v1276_v10 = vpop.f32.mrb[11].mxu1 }
 0x131   : > { %v1087_v11 = vpop.f32.mrb[12].mxu0  ;;  %v2735_v12 = vpop.f32.mrb[12].mxu1 }
 0x132   : > { %v1089_v13 = vpop.f32.mrb[13].mxu0  ;;  %v1281_v14 = vpop.f32.mrb[13].mxu1 }
 0x133   : > { %v2737_v15 = vpop.f32.mrb[14].mxu0  ;;  %v2739_v16 = vpop.f32.mrb[14].mxu1 }
 0x134   : > { %v1092_v17 = vpop.f32.mrb[15].mxu0  ;;  %v1284_v18 = vpop.f32.mrb[15].mxu1 }
 0x139   : > { %v2741_v19 = vpop.f32.mrb[16].mxu0  ;;  %v2743_v20 = vpop.f32.mrb[16].mxu1 }
 0x13a   : > { %v1097_v21 = vpop.f32.mrb[17].mxu0  ;;  %v1289_v22 = vpop.f32.mrb[17].mxu1 }
 0x13b   : > { %v2745_v23 = vpop.f32.mrb[18].mxu0  ;;  %v2747_v24 = vpop.f32.mrb[18].mxu1 }
 0x13c   : > { %v1100_v25 = vpop.f32.mrb[19].mxu0  ;;  %v1292_v26 = vpop.f32.mrb[19].mxu1 }
 0x141   : > { %v2749_v27 = vpop.f32.mrb[20].mxu0  ;;  %v2751_v28 = vpop.f32.mrb[20].mxu1 }
 0x142   : > { %v1105_v29 = vpop.f32.mrb[21].mxu0  ;;  %v1297_v30 = vpop.f32.mrb[21].mxu1 }
 0x143   : > { %v2753_v31 = vpop.f32.mrb[22].mxu0  ;;  %v2755_v32 = vpop.f32.mrb[22].mxu1 }
 0x144   : > { %v1108_v33 = vpop.f32.mrb[23].mxu0  ;;  %v1300_v34 = vpop.f32.mrb[23].mxu1 }
 0x149   : > { %v2757_v35 = vpop.f32.mrb[24].mxu0  ;;  %v2759_v36 = vpop.f32.mrb[24].mxu1 }
 0x14a   : > { %v1113_v37 = vpop.f32.mrb[25].mxu0  ;;  %v1305_v38 = vpop.f32.mrb[25].mxu1 }
 0x14b   : > { %v2761_v39 = vpop.f32.mrb[26].mxu0  ;;  %v2763_v40 = vpop.f32.mrb[26].mxu1 }
 0x14c   : > { %v1116_v41 = vpop.f32.mrb[27].mxu0  ;;  %v1308_v42 = vpop.f32.mrb[27].mxu1 }
 0x151   : > { %v2765_v43 = vpop.f32.mrb[28].mxu0  ;;  %v2767_v44 = vpop.f32.mrb[28].mxu1 }
 0x152   : > { %v1121_v45 = vpop.f32.mrb[29].mxu0  ;;  %v1313_v46 = vpop.f32.mrb[29].mxu1 }
 0x153   : > { %v2769_v47 = vpop.f32.mrb[30].mxu0  ;;  %v2771_v48 = vpop.f32.mrb[30].mxu1 }
 0x154   : > { %v1124_v49 = vpop.f32.mrb[31].mxu0  ;;  %v1316_v50 = vpop.f32.mrb[31].mxu1 }
 0x159   : > { %v2773_v53 = vpop.f32.mrb[32].mxu0  ;;  %v2207_v54 = vpop.f32.mrb[32].mxu1 }
 0x15a   : > { %v1361_v57 = vadd.f32 %v2207_v54, %v1071_v59  ;;  %v1129_v58 = vpop.f32.mrb[33].mxu0  ;;  %v1352_v61 = vpop.f32.mrb[33].mxu1 }
 0x15b   : > { %v1353_v62 = vadd.f32 %v1352_v61, %v2715_v51  ;;  %v2776_v1 = vpop.f32.mrb[34].mxu0  ;;  %v2208_v2 = vpop.f32.mrb[34].mxu1 }
 0x15c   : > { %1610 = vst.msk [vmem:[#allocation2 + $0x10] sm:$0xff] %vm1607_vm1, %v1361_v57  ;;  %v1364_v5 = vadd.f32 %v2208_v2, %v1074_v63  ;;  %v1132_v6 = vpop.f32.mrb[35].mxu0  ;;  %v1355_v9 = vpop.f32.mrb[35].mxu1 }
 0x15d   : > { %1608 = vst.msk [vmem:[#allocation2] sm:$0xff] %vm1607_vm1, %v1353_v62  ;;  %v1356_v10 = vadd.f32 %v1355_v9, %v2719_v55 }
 0x15e   : > { %1611 = vst.msk [vmem:[#allocation2 + $0x18] sm:$0xff] %vm1607_vm1, %v1364_v5 }
 0x15f   : > { %1609 = vst.msk [vmem:[#allocation2 + $0x8] sm:$0xff] %vm1607_vm1, %v1356_v10 }
 0x161   : > { %v2785_v59 = vpop.f32.mrb[36].mxu0  ;;  %v2211_v51 = vpop.f32.mrb[36].mxu1 }
 0x162   : > { %v1377_v13 = vadd.f32 %v2211_v51, %v1087_v11  ;;  %v1137_v14 = vpop.f32.mrb[37].mxu0  ;;  %v1368_v17 = vpop.f32.mrb[37].mxu1 }
 0x163   : > { %v1369_v63 = vadd.f32 %v1368_v17, %v2727_v3  ;;  %v2788_v18 = vpop.f32.mrb[38].mxu0  ;;  %v2212_v21 = vpop.f32.mrb[38].mxu1 }
 0x164   : > { %1614 = vst.msk [vmem:[#allocation2 + $0x30] sm:$0xff] %vm1607_vm1, %v1377_v13  ;;  %v1380_v55 = vadd.f32 %v2212_v21, %v2737_v15  ;;  %v1140_v22 = vpop.f32.mrb[39].mxu0  ;;  %v1371_v25 = vpop.f32.mrb[39].mxu1  ;;  %v2800_v15 = vld [vmem:[%s2971_s2] ss:$0 sm:$0xff] }
 0x165   : > { %v1678_v26 = vld [vmem:[#allocation2 + $0x10] ss:$2 sm:$0xff]  ;;  %v1680_v29 = vld [vmem:[#allocation2 + $0x11] ss:$2 sm:$0xff]  ;;  %1612 = vst.msk [vmem:[#allocation2 + $0x20] sm:$0xff] %vm1607_vm1, %v1369_v63  ;;  %v1372_v11 = vadd.f32 %v1371_v25, %v2731_v7 }
 0x166   : > { %v1681_v30 = vmax.f32 %v1678_v26, %v1680_v29  ;;  %v1673_v33 = vld [vmem:[#allocation2] ss:$2 sm:$0xff]  ;;  %v1675_v34 = vld [vmem:[#allocation2 + $0x1] ss:$2 sm:$0xff]  ;;  %1615 = vst.msk [vmem:[#allocation2 + $0x38] sm:$0xff] %vm1607_vm1, %v1380_v55 }
 0x167   : > { %v1676_v3 = vmax.f32 %v1673_v33, %v1675_v34  ;;  %1613 = vst.msk [vmem:[#allocation2 + $0x28] sm:$0xff] %vm1607_vm1, %v1372_v11 }
 0x169   : > { %v1682_v37 = vmax.f32 %v1676_v3, %v1681_v30  ;;  %v2802_v38 = vpop.f32.mrb[40].mxu0  ;;  %v2215_v41 = vpop.f32.mrb[40].mxu1 }
 0x16a   : > { %v1393_v7 = vadd.f32 %v2215_v41, %v2749_v27  ;;  %v1145_v42 = vpop.f32.mrb[41].mxu0  ;;  %v1384_v45 = vpop.f32.mrb[41].mxu1 }
 0x16b   : > { %v1689_v46 = vadd.f32 %v2800_v15, %v1682_v37  ;;  %v1385_v49 = vadd.f32 %v1384_v45, %v2741_v19  ;;  %v2807_v50 = vpop.f32.mrb[42].mxu0  ;;  %v2216_v54 = vpop.f32.mrb[42].mxu1 }
 0x16c   : > { %1618 = vst.msk [vmem:[#allocation2 + $0x50] sm:$0xff] %vm1607_vm1, %v1393_v7  ;;  %v1396_v57 = vadd.f32 %v2216_v54, %v2753_v31  ;;  %v1148_v58 = vpop.f32.mrb[43].mxu0  ;;  %v1387_v61 = vpop.f32.mrb[43].mxu1 }
 0x16d   : > { %v1690_v62 = vmax.f32 %v1689_v46, 0.0  ;;  %v1700_v2 = vld [vmem:[#allocation2 + $0x30] ss:$2 sm:$0xff]  ;;  %v1702_v5 = vld [vmem:[#allocation2 + $0x31] ss:$2 sm:$0xff]  ;;  %1616 = vst.msk [vmem:[#allocation2 + $0x40] sm:$0xff] %vm1607_vm1, %v1385_v49  ;;  %v1388_v27 = vadd.f32 %v1387_v61, %v2745_v23 }
 0x16e   : > { %v1703_v19 = vmax.f32 %v1700_v2, %v1702_v5  ;;  %v1695_v6 = vld [vmem:[#allocation2 + $0x20] ss:$2 sm:$0xff]  ;;  %v1697_v9 = vld [vmem:[#allocation2 + $0x21] ss:$2 sm:$0xff]  ;;  %1619 = vst.msk [vmem:[#allocation2 + $0x58] sm:$0xff] %vm1607_vm1, %v1396_v57 }
 0x16f   : > { %v1691_v31 = vpack.c.bf16 %v1690_v62, %v1690_v62  ;;  %v1698_v10 = vmax.f32 %v1695_v6, %v1697_v9  ;;  %1617 = vst.msk [vmem:[#allocation2 + $0x48] sm:$0xff] %vm1607_vm1, %v1388_v27 }
 0x171   : > { %1693 = vst.msk [vmem:[%s2816_s8] sm:$0xf] %vm1692_vm2, %v1691_v31  ;;  %v1704_v51 = vmax.f32 %v1698_v10, %v1703_v19  ;;  %v1151_v23 = vpop.f32.mrb[44].mxu0  ;;  %v2219_v13 = vpop.f32.mrb[44].mxu1 }
 0x172   : > { %v1409_v14 = vadd.f32 %v2219_v13, %v2765_v43  ;;  %v1153_v17 = vpop.f32.mrb[45].mxu0  ;;  %v1400_v63 = vpop.f32.mrb[45].mxu1 }
 0x173   : > { %v1705_v21 = vadd.f32 %v2800_v15, %v1704_v51  ;;  %v1401_v55 = vadd.f32 %v1400_v63, %v2757_v35  ;;  %v1154_v22 = vpop.f32.mrb[46].mxu0  ;;  %v2220_v25 = vpop.f32.mrb[46].mxu1 }
 0x174   : > { %1622 = vst.msk [vmem:[#allocation2 + $0x70] sm:$0xff] %vm1607_vm1, %v1409_v14  ;;  %v1412_v26 = vadd.f32 %v2220_v25, %v2769_v47  ;;  %v1156_v29 = vpop.f32.mrb[47].mxu0  ;;  %v1403_v11 = vpop.f32.mrb[47].mxu1 }
 0x175   : > { %v1706_v30 = vmax.f32 %v1705_v21, 0.0  ;;  %v1716_v33 = vld [vmem:[#allocation2 + $0x50] ss:$2 sm:$0xff]  ;;  %v1718_v34 = vld [vmem:[#allocation2 + $0x51] ss:$2 sm:$0xff]  ;;  %1620 = vst.msk [vmem:[#allocation2 + $0x60] sm:$0xff] %vm1607_vm1, %v1401_v55  ;;  %v1404_v43 = vadd.f32 %v1403_v11, %v2761_v39 }
 0x176   : > { %v1719_v3 = vmax.f32 %v1716_v33, %v1718_v34  ;;  %v1711_v37 = vld [vmem:[#allocation2 + $0x40] ss:$2 sm:$0xff]  ;;  %v1713_v41 = vld [vmem:[#allocation2 + $0x41] ss:$2 sm:$0xff]  ;;  %1623 = vst.msk [vmem:[#allocation2 + $0x78] sm:$0xff] %vm1607_vm1, %v1412_v26 }
 0x177   : > { %v1707_v35 = vpack.c.bf16 %v1706_v30, %v1706_v30  ;;  %v1714_v7 = vmax.f32 %v1711_v37, %v1713_v41  ;;  %1621 = vst.msk [vmem:[#allocation2 + $0x68] sm:$0xff] %vm1607_vm1, %v1404_v43 }
 0x179   : > { %2149 = vst.msk [vmem:[%s2816_s8 + $0x4] sm:$0xf] %vm1692_vm2, %v1707_v35  ;;  %v1720_v47 = vmax.f32 %v1714_v7, %v1719_v3  ;;  %v1159_v42 = vpop.f32.mrb[48].mxu0  ;;  %v2223_v45 = vpop.f32.mrb[48].mxu1 }
 0x17a   : > { %v1425_v46 = vadd.f32 %v2223_v45, %v2785_v59  ;;  %v1161_v49 = vpop.f32.mrb[49].mxu0  ;;  %v1416_v54 = vpop.f32.mrb[49].mxu1 }
 0x17b   : > { %v1721_v39 = vadd.f32 %v2800_v15, %v1720_v47  ;;  %v1417_v57 = vadd.f32 %v1416_v54, %v2773_v53  ;;  %v2836_v58 = vpop.f32.mrb[50].mxu0  ;;  %v2224_v61 = vpop.f32.mrb[50].mxu1 }
 0x17c   : > { %1626 = vst.msk [vmem:[#allocation2 + $0x90] sm:$0xff] %vm1607_vm1, %v1425_v46  ;;  %v1428_v62 = vadd.f32 %v2224_v61, %v2788_v18  ;;  %v1164_v2 = vpop.f32.mrb[51].mxu0  ;;  %v1419_v5 = vpop.f32.mrb[51].mxu1 }
 0x17d   : > { %v1722_v27 = vmax.f32 %v1721_v39, 0.0  ;;  %v1732_v19 = vld [vmem:[#allocation2 + $0x70] ss:$2 sm:$0xff]  ;;  %v1734_v6 = vld [vmem:[#allocation2 + $0x71] ss:$2 sm:$0xff]  ;;  %1624 = vst.msk [vmem:[#allocation2 + $0x80] sm:$0xff] %vm1607_vm1, %v1417_v57  ;;  %v1420_v59 = vadd.f32 %v1419_v5, %v2776_v1 }
 0x17e   : > { %v1735_v9 = vmax.f32 %v1732_v19, %v1734_v6  ;;  %v1727_v31 = vld [vmem:[#allocation2 + $0x60] ss:$2 sm:$0xff]  ;;  %v1729_v53 = vld [vmem:[#allocation2 + $0x61] ss:$2 sm:$0xff]  ;;  %1627 = vst.msk [vmem:[#allocation2 + $0x98] sm:$0xff] %vm1607_vm1, %v1428_v62 }
 0x17f   : > { %v1723_v10 = vpack.c.bf16 %v1722_v27, %v1722_v27  ;;  %v1730_v51 = vmax.f32 %v1727_v31, %v1729_v53  ;;  %1625 = vst.msk [vmem:[#allocation2 + $0x88] sm:$0xff] %vm1607_vm1, %v1420_v59 }
 0x181   : > { %2150 = vst.msk [vmem:[%s2816_s8 + $0x8] sm:$0xf] %vm1692_vm2, %v1723_v10  ;;  %v1736_v18 = vmax.f32 %v1730_v51, %v1735_v9  ;;  %v1167_v13 = vpop.f32.mrb[52].mxu0  ;;  %v2227_v14 = vpop.f32.mrb[52].mxu1 }
 0x182   : > { %v1441_v17 = vadd.f32 %v2227_v14, %v1151_v23  ;;  %v1169_v63 = vpop.f32.mrb[53].mxu0  ;;  %v1432_v21 = vpop.f32.mrb[53].mxu1 }
 0x183   : > { %v1737_v55 = vadd.f32 %v2800_v15, %v1736_v18  ;;  %v1433_v1 = vadd.f32 %v1432_v21, %v2802_v38  ;;  %v1170_v25 = vpop.f32.mrb[54].mxu0  ;;  %v2228_v26 = vpop.f32.mrb[54].mxu1 }
 0x184   : > { %1630 = vst.msk [vmem:[#allocation2 + $0xb0] sm:$0xff] %vm1607_vm1, %v1441_v17  ;;  %v1444_v29 = vadd.f32 %v2228_v26, %v1154_v22  ;;  %v1172_v11 = vpop.f32.mrb[55].mxu0  ;;  %v1435_v30 = vpop.f32.mrb[55].mxu1 }
 0x185   : > { %v1738_v33 = vmax.f32 %v1737_v55, 0.0  ;;  %v1748_v34 = vld [vmem:[#allocation2 + $0x90] ss:$2 sm:$0xff]  ;;  %v1750_v43 = vld [vmem:[#allocation2 + $0x91] ss:$2 sm:$0xff]  ;;  %1628 = vst.msk [vmem:[#allocation2 + $0xa0] sm:$0xff] %vm1607_vm1, %v1433_v1  ;;  %v1436_v23 = vadd.f32 %v1435_v30, %v2807_v50 }
 0x186   : > { %v1751_v3 = vmax.f32 %v1748_v34, %v1750_v43  ;;  %v1743_v37 = vld [vmem:[#allocation2 + $0x80] ss:$2 sm:$0xff]  ;;  %v1745_v41 = vld [vmem:[#allocation2 + $0x81] ss:$2 sm:$0xff]  ;;  %1631 = vst.msk [vmem:[#allocation2 + $0xb8] sm:$0xff] %vm1607_vm1, %v1444_v29 }
 0x187   : > { %v1739_v38 = vpack.c.bf16 %v1738_v33, %v1738_v33  ;;  %v1746_v35 = vmax.f32 %v1743_v37, %v1745_v41  ;;  %1629 = vst.msk [vmem:[#allocation2 + $0xa8] sm:$0xff] %vm1607_vm1, %v1436_v23 }
 0x189   : > { %2151 = vst.msk [vmem:[%s2816_s8 + $0xc] sm:$0xf] %vm1692_vm2, %v1739_v38  ;;  %v1752_v22 = vmax.f32 %v1746_v35, %v1751_v3  ;;  %v1175_v7 = vpop.f32.mrb[56].mxu0  ;;  %v2231_v47 = vpop.f32.mrb[56].mxu1 }
 0x18a   : > { %v1457_v45 = vadd.f32 %v2231_v47, %v1167_v13  ;;  %v1177_v46 = vpop.f32.mrb[57].mxu0  ;;  %v1448_v49 = vpop.f32.mrb[57].mxu1 }
 0x18b   : > { %v1753_v54 = vadd.f32 %v2800_v15, %v1752_v22  ;;  %v1449_v50 = vadd.f32 %v1448_v49, %v1159_v42  ;;  %v1178_v39 = vpop.f32.mrb[58].mxu0  ;;  %v2232_v57 = vpop.f32.mrb[58].mxu1 }
 0x18c   : > { %1634 = vst.msk [vmem:[#allocation2 + $0xd0] sm:$0xff] %vm1607_vm1, %v1457_v45  ;;  %v1460_v61 = vadd.f32 %v2232_v57, %v1170_v25  ;;  %v1180_v62 = vpop.f32.mrb[59].mxu0  ;;  %v1451_v2 = vpop.f32.mrb[59].mxu1 }
 0x18d   : > { %v1754_v5 = vmax.f32 %v1753_v54, 0.0  ;;  %v1764_v27 = vld [vmem:[#allocation2 + $0xb0] ss:$2 sm:$0xff]  ;;  %v1766_v19 = vld [vmem:[#allocation2 + $0xb1] ss:$2 sm:$0xff]  ;;  %1632 = vst.msk [vmem:[#allocation2 + $0xc0] sm:$0xff] %vm1607_vm1, %v1449_v50  ;;  %v1452_v6 = vadd.f32 %v1451_v2, %v2836_v58 }
 0x18e   : > { %v1767_v59 = vmax.f32 %v1764_v27, %v1766_v19  ;;  %v1759_v9 = vld [vmem:[#allocation2 + $0xa0] ss:$2 sm:$0xff]  ;;  %v1761_v31 = vld [vmem:[#allocation2 + $0xa1] ss:$2 sm:$0xff]  ;;  %1635 = vst.msk [vmem:[#allocation2 + $0xd8] sm:$0xff] %vm1607_vm1, %v1460_v61 }
 0x18f   : > { %v1755_v42 = vpack.c.bf16 %v1754_v5, %v1754_v5  ;;  %v1762_v53 = vmax.f32 %v1759_v9, %v1761_v31  ;;  %1633 = vst.msk [vmem:[#allocation2 + $0xc8] sm:$0xff] %vm1607_vm1, %v1452_v6 }
 0x191   : > { %2152 = vst.msk [vmem:[%s2816_s8 + $0x10] sm:$0xf] %vm1692_vm2, %v1755_v42  ;;  %v1768_v10 = vmax.f32 %v1762_v53, %v1767_v59  ;;  %v1183_v51 = vpop.f32.mrb[60].mxu0  ;;  %v2235_v18 = vpop.f32.mrb[60].mxu1 }
 0x192   : > { %v1473_v13 = vadd.f32 %v2235_v18, %v1183_v51  ;;  %v1185_v14 = vpop.f32.mrb[61].mxu0  ;;  %v1464_v17 = vpop.f32.mrb[61].mxu1 }
 0x193   : > { %v1769_v63 = vadd.f32 %v2800_v15, %v1768_v10  ;;  %v1465_v58 = vadd.f32 %v1464_v17, %v1175_v7  ;;  %v1186_v21 = vpop.f32.mrb[62].mxu0  ;;  %v2236_v55 = vpop.f32.mrb[62].mxu1 }
 0x194   : > { %1638 = vst.msk [vmem:[#allocation2 + $0xf0] sm:$0xff] %vm1607_vm1, %v1473_v13  ;;  %v1476_v1 = vadd.f32 %v2236_v55, %v1186_v21  ;;  %v1188_v25 = vpop.f32.mrb[63].mxu0  ;;  %v1467_v26 = vpop.f32.mrb[63].mxu1 }
 0x195   : > { %v1770_v29 = vmax.f32 %v1769_v63, 0.0  ;;  %v1780_v11 = vld [vmem:[#allocation2 + $0xd0] ss:$2 sm:$0xff]  ;;  %v1782_v30 = vld [vmem:[#allocation2 + $0xd1] ss:$2 sm:$0xff]  ;;  %1636 = vst.msk [vmem:[#allocation2 + $0xe0] sm:$0xff] %vm1607_vm1, %v1465_v58  ;;  %v1468_v33 = vadd.f32 %v1467_v26, %v1178_v39 }
 0x196   : > { %v1783_v34 = vmax.f32 %v1780_v11, %v1782_v30  ;;  %v1775_v43 = vld [vmem:[#allocation2 + $0xc0] ss:$2 sm:$0xff]  ;;  %v1777_v23 = vld [vmem:[#allocation2 + $0xc1] ss:$2 sm:$0xff]  ;;  %1639 = vst.msk [vmem:[#allocation2 + $0xf8] sm:$0xff] %vm1607_vm1, %v1476_v1 }
 0x197   : > { %v1771_v3 = vpack.c.bf16 %v1770_v29, %v1770_v29  ;;  %v1778_v37 = vmax.f32 %v1775_v43, %v1777_v23  ;;  %1637 = vst.msk [vmem:[#allocation2 + $0xe8] sm:$0xff] %vm1607_vm1, %v1468_v33 }
 0x199   : > { %2153 = vst.msk [vmem:[%s2816_s8 + $0x14] sm:$0xf] %vm1692_vm2, %v1771_v3  ;;  %v1784_v41 = vmax.f32 %v1778_v37, %v1783_v34  ;;  %v1191_v38 = vpop.f32.mrb[64].mxu0  ;;  %v2239_v35 = vpop.f32.mrb[64].mxu1 }
 0x19a   : > { %v1193_v22 = vpop.f32.mrb[65].mxu0  ;;  %v1480_v7 = vpop.f32.mrb[65].mxu1 }
 0x19b   : > { %v1785_v47 = vadd.f32 %v2800_v15, %v1784_v41  ;;  %v1481_v45 = vadd.f32 %v1480_v7, %v1191_v38  ;;  %v1194_v46 = vpop.f32.mrb[66].mxu0  ;;  %v2240_v49 = vpop.f32.mrb[66].mxu1 }
 0x19c   : > { %v1196_v54 = vpop.f32.mrb[67].mxu0  ;;  %v1483_v50 = vpop.f32.mrb[67].mxu1 }
 0x19d   : > { %v1786_v39 = vmax.f32 %v1785_v47, 0.0  ;;  %v1796_v57 = vld [vmem:[#allocation2 + $0xf0] ss:$2 sm:$0xff]  ;;  %v1798_v61 = vld [vmem:[#allocation2 + $0xf1] ss:$2 sm:$0xff]  ;;  %1640 = vst.msk [vmem:[#allocation2 + $0x100] sm:$0xff] %vm1607_vm1, %v1481_v45  ;;  %v1484_v62 = vadd.f32 %v1483_v50, %v1194_v46 }
 0x19e   : > { %v1799_v2 = vmax.f32 %v1796_v57, %v1798_v61  ;;  %v1791_v5 = vld [vmem:[#allocation2 + $0xe0] ss:$2 sm:$0xff]  ;;  %v1793_v27 = vld [vmem:[#allocation2 + $0xe1] ss:$2 sm:$0xff] }
 0x19f   : > { %v1787_v19 = vpack.c.bf16 %v1786_v39, %v1786_v39  ;;  %v1794_v6 = vmax.f32 %v1791_v5, %v1793_v27  ;;  %1641 = vst.msk [vmem:[#allocation2 + $0x108] sm:$0xff] %vm1607_vm1, %v1484_v62 }
 0x1a1   : > { %2154 = vst.msk [vmem:[%s2816_s8 + $0x18] sm:$0xf] %vm1692_vm2, %v1787_v19  ;;  %v1800_v59 = vmax.f32 %v1794_v6, %v1799_v2  ;;  %v1199_v9 = vpop.f32.mrb[68].mxu0  ;;  %v2243_v31 = vpop.f32.mrb[68].mxu1 }
 0x1a2   : > { %v1489_v42 = vadd.f32 %v2239_v35, %v1199_v9  ;;  %v1201_v53 = vpop.f32.mrb[69].mxu0  ;;  %v1496_v10 = vpop.f32.mrb[69].mxu1 }
 0x1a3   : > { %v1801_v51 = vadd.f32 %v2800_v15, %v1800_v59  ;;  %v1202_v18 = vpop.f32.mrb[70].mxu0  ;;  %v2244_v13 = vpop.f32.mrb[70].mxu1 }
 0x1a4   : > { %1642 = vst.msk [vmem:[#allocation2 + $0x110] sm:$0xff] %vm1607_vm1, %v1489_v42  ;;  %v1492_v14 = vadd.f32 %v2240_v49, %v1202_v18  ;;  %v1204_v17 = vpop.f32.mrb[71].mxu0  ;;  %v1499_v63 = vpop.f32.mrb[71].mxu1 }
 0x1a5   : > { %v1802_v58 = vmax.f32 %v1801_v51, 0.0 }
 0x1a6   : > { %1643 = vst.msk [vmem:[#allocation2 + $0x118] sm:$0xff] %vm1607_vm1, %v1492_v14  ;;  %v1807_v11 = vld [vmem:[#allocation2 + $0x100] ss:$2 sm:$0xff]  ;;  %v1809_v30 = vld [vmem:[#allocation2 + $0x101] ss:$2 sm:$0xff] }
 0x1a7   : > { %v1803_v21 = vpack.c.bf16 %v1802_v58, %v1802_v58  ;;  %v1810_v38 = vmax.f32 %v1807_v11, %v1809_v30 }
 0x1a9   : > { %2155 = vst.msk [vmem:[%s2816_s8 + $0x1c] sm:$0xf] %vm1692_vm2, %v1803_v21  ;;  %v1207_v55 = vpop.f32.mrb[72].mxu0  ;;  %v2880_v1 = vpop.f32.mrb[72].mxu1 }
 0x1aa   : > { %v1497_v25 = vadd.f32 %v1496_v10, %v1207_v55  ;;  %v1209_v26 = vpop.f32.mrb[73].mxu0  ;;  %v1512_v29 = vpop.f32.mrb[73].mxu1 }
 0x1ab   : > { %v1210_v33 = vpop.f32.mrb[74].mxu0  ;;  %v2882_v34 = vpop.f32.mrb[74].mxu1 }
 0x1ac   : > { %1644 = vst.msk [vmem:[#allocation2 + $0x120] sm:$0xff] %vm1607_vm1, %v1497_v25  ;;  %v1500_v43 = vadd.f32 %v1499_v63, %v1210_v33  ;;  %v1212_v23 = vpop.f32.mrb[75].mxu0  ;;  %v1515_v3 = vpop.f32.mrb[75].mxu1 }
 0x1ad   : > { %v1812_v37 = vld [vmem:[#allocation2 + $0x110] ss:$2 sm:$0xff]  ;;  %v1814_v41 = vld [vmem:[#allocation2 + $0x111] ss:$2 sm:$0xff] }
 0x1ae   : > { %v1815_v35 = vmax.f32 %v1812_v37, %v1814_v41  ;;  %1645 = vst.msk [vmem:[#allocation2 + $0x128] sm:$0xff] %vm1607_vm1, %v1500_v43 }
 0x1b0   : > { %v1816_v22 = vmax.f32 %v1810_v38, %v1815_v35 }
 0x1b1   : > { %v1215_v7 = vpop.f32.mrb[76].mxu0  ;;  %v2886_v47 = vpop.f32.mrb[76].mxu1 }
 0x1b2   : > { %v1817_v45 = vadd.f32 %v2800_v15, %v1816_v22  ;;  %v1505_v46 = vadd.f32 %v2243_v31, %v1215_v7  ;;  %v1217_v49 = vpop.f32.mrb[77].mxu0  ;;  %v2889_v54 = vpop.f32.mrb[77].mxu1 }
 0x1b3   : > { %v1218_v50 = vpop.f32.mrb[78].mxu0  ;;  %v2891_v39 = vpop.f32.mrb[78].mxu1 }
 0x1b4   : > { %v1818_v57 = vmax.f32 %v1817_v45, 0.0  ;;  %1646 = vst.msk [vmem:[#allocation2 + $0x130] sm:$0xff] %vm1607_vm1, %v1505_v46  ;;  %v1508_v61 = vadd.f32 %v2244_v13, %v1218_v50  ;;  %v1220_v62 = vpop.f32.mrb[79].mxu0  ;;  %v2894_v2 = vpop.f32.mrb[79].mxu1 }
 0x1b5   : > { %v1823_v42 = vld [vmem:[#allocation2 + $0x120] ss:$2 sm:$0xff]  ;;  %v1825_v53 = vld [vmem:[#allocation2 + $0x121] ss:$2 sm:$0xff] }
 0x1b6   : > { %v1819_v5 = vpack.c.bf16 %v1818_v57, %v1818_v57  ;;  %1647 = vst.msk [vmem:[#allocation2 + $0x138] sm:$0xff] %vm1607_vm1, %v1508_v61  ;;  %v1826_v55 = vmax.f32 %v1823_v42, %v1825_v53 }
 0x1b8   : > { %2156 = vst.msk [vmem:[%s2816_s8 + $0x20] sm:$0xf] %vm1692_vm2, %v1819_v5 }
 0x1b9   : > { %v1223_v27 = vpop.f32.mrb[80].mxu0  ;;  %v2255_v19 = vpop.f32.mrb[80].mxu1 }
 0x1ba   : > { %v1513_v6 = vadd.f32 %v1512_v29, %v1223_v27  ;;  %v1553_v59 = vadd.f32 %v2255_v19, %v2723_v60  ;;  %v1225_v9 = vpop.f32.mrb[81].mxu0  ;;  %v1544_v31 = vpop.f32.mrb[81].mxu1 }
 0x1bb   : > { %v1545_v10 = vadd.f32 %v1544_v31, %v2717_v52  ;;  %v1226_v51 = vpop.f32.mrb[82].mxu0  ;;  %v2256_v18 = vpop.f32.mrb[82].mxu1 }
 0x1bc   : > { %1648 = vst.msk [vmem:[#allocation2 + $0x140] sm:$0xff] %vm1607_vm1, %v1513_v6  ;;  %1658 = vst.msk [vmem:[#allocation2 + $0x190] sm:$0xff] %vm1607_vm1, %v1553_v59  ;;  %v1516_v13 = vadd.f32 %v1515_v3, %v1226_v51  ;;  %v1556_v14 = vadd.f32 %v2256_v18, %v2725_v0  ;;  %v1228_v17 = vpop.f32.mrb[83].mxu0  ;;  %v1547_v63 = vpop.f32.mrb[83].mxu1 }
 0x1bd   : > { %v1828_v58 = vld [vmem:[#allocation2 + $0x130] ss:$2 sm:$0xff]  ;;  %v1830_v21 = vld [vmem:[#allocation2 + $0x131] ss:$2 sm:$0xff]  ;;  %1656 = vst.msk [vmem:[#allocation2 + $0x180] sm:$0xff] %vm1607_vm1, %v1545_v10  ;;  %v1548_v60 = vadd.f32 %v1547_v63, %v2721_v56 }
 0x1be   : > { %v1831_v25 = vmax.f32 %v1828_v58, %v1830_v21  ;;  %1649 = vst.msk [vmem:[#allocation2 + $0x148] sm:$0xff] %vm1607_vm1, %v1516_v13  ;;  %1659 = vst.msk [vmem:[#allocation2 + $0x198] sm:$0xff] %vm1607_vm1, %v1556_v14 }
 0x1bf   : > { %1657 = vst.msk [vmem:[#allocation2 + $0x188] sm:$0xff] %vm1607_vm1, %v1548_v60 }
 0x1c0   : > { %v1832_v52 = vmax.f32 %v1826_v55, %v1831_v25 }
 0x1c1   : > { %v1231_v26 = vpop.f32.mrb[84].mxu0  ;;  %v2259_v29 = vpop.f32.mrb[84].mxu1 }
 0x1c2   : > { %v1833_v0 = vadd.f32 %v2800_v15, %v1832_v52  ;;  %v1521_v11 = vadd.f32 %v2880_v1, %v1231_v26  ;;  %v1569_v30 = vadd.f32 %v2259_v29, %v2735_v12  ;;  %v1233_v33 = vpop.f32.mrb[85].mxu0  ;;  %v1560_v43 = vpop.f32.mrb[85].mxu1 }
 0x1c3   : > { %v1561_v56 = vadd.f32 %v1560_v43, %v2729_v4  ;;  %v1234_v23 = vpop.f32.mrb[86].mxu0  ;;  %v2260_v3 = vpop.f32.mrb[86].mxu1 }
 0x1c4   : > { %v1834_v37 = vmax.f32 %v1833_v0, 0.0  ;;  %1650 = vst.msk [vmem:[#allocation2 + $0x150] sm:$0xff] %vm1607_vm1, %v1521_v11  ;;  %1662 = vst.msk [vmem:[#allocation2 + $0x1b0] sm:$0xff] %vm1607_vm1, %v1569_v30  ;;  %v1524_v41 = vadd.f32 %v2882_v34, %v1234_v23  ;;  %v1572_v38 = vadd.f32 %v2260_v3, %v2739_v16  ;;  %v1236_v35 = vpop.f32.mrb[87].mxu0  ;;  %v1563_v1 = vpop.f32.mrb[87].mxu1 }
 0x1c5   : > { %v1876_v22 = vld [vmem:[#allocation2 + $0x190] ss:$2 sm:$0xff]  ;;  %1660 = vst.msk [vmem:[#allocation2 + $0x1a0] sm:$0xff] %vm1607_vm1, %v1561_v56  ;;  %v1564_v12 = vadd.f32 %v1563_v1, %v2733_v8  ;;  %v1878_v7 = vld [vmem:[#allocation2 + $0x191] ss:$2 sm:$0xff] }
 0x1c6   : > { %v1835_v4 = vpack.c.bf16 %v1834_v37, %v1834_v37  ;;  %v1871_v45 = vld [vmem:[#allocation2 + $0x180] ss:$2 sm:$0xff]  ;;  %v1873_v46 = vld [vmem:[#allocation2 + $0x181] ss:$2 sm:$0xff]  ;;  %1651 = vst.msk [vmem:[#allocation2 + $0x158] sm:$0xff] %vm1607_vm1, %v1524_v41  ;;  %1663 = vst.msk [vmem:[#allocation2 + $0x1b8] sm:$0xff] %vm1607_vm1, %v1572_v38  ;;  %v1879_v49 = vmax.f32 %v1876_v22, %v1878_v7 }
 0x1c7   : > { %v1874_v34 = vmax.f32 %v1871_v45, %v1873_v46  ;;  %1661 = vst.msk [vmem:[#allocation2 + $0x1a8] sm:$0xff] %vm1607_vm1, %v1564_v12  ;;  %v1839_v27 = vld [vmem:[#allocation2 + $0x140] ss:$2 sm:$0xff]  ;;  %v1841_v19 = vld [vmem:[#allocation2 + $0x141] ss:$2 sm:$0xff] }
 0x1c8   : > { %2157 = vst.msk [vmem:[%s2816_s8 + $0x24] sm:$0xf] %vm1692_vm2, %v1835_v4  ;;  %v1842_v13 = vmax.f32 %v1839_v27, %v1841_v19 }
 0x1c9   : > { %v1880_v16 = vmax.f32 %v1874_v34, %v1879_v49  ;;  %v1239_v50 = vpop.f32.mrb[88].mxu0  ;;  %v2263_v57 = vpop.f32.mrb[88].mxu1 }
 0x1ca   : > { %v1529_v61 = vadd.f32 %v2889_v54, %v1239_v50  ;;  %v1585_v8 = vadd.f32 %v2263_v57, %v2751_v28  ;;  %v1241_v62 = vpop.f32.mrb[89].mxu0  ;;  %v1576_v5 = vpop.f32.mrb[89].mxu1 }
 0x1cb   : > { %v1881_v6 = vadd.f32 %v2800_v15, %v1880_v16  ;;  %v1577_v59 = vadd.f32 %v1576_v5, %v2743_v20  ;;  %v1242_v9 = vpop.f32.mrb[90].mxu0  ;;  %v2264_v31 = vpop.f32.mrb[90].mxu1 }
 0x1cc   : > { %1652 = vst.msk [vmem:[#allocation2 + $0x160] sm:$0xff] %vm1607_vm1, %v1529_v61  ;;  %1666 = vst.msk [vmem:[#allocation2 + $0x1d0] sm:$0xff] %vm1607_vm1, %v1585_v8  ;;  %v1532_v42 = vadd.f32 %v2894_v2, %v1242_v9  ;;  %v1588_v54 = vadd.f32 %v2264_v31, %v2755_v32  ;;  %v1244_v53 = vpop.f32.mrb[91].mxu0  ;;  %v1579_v28 = vpop.f32.mrb[91].mxu1 }
 0x1cd   : > { %v1882_v10 = vmax.f32 %v1881_v6, 0.0  ;;  %v1844_v51 = vld [vmem:[#allocation2 + $0x150] ss:$2 sm:$0xff]  ;;  %v1846_v18 = vld [vmem:[#allocation2 + $0x151] ss:$2 sm:$0xff]  ;;  %1664 = vst.msk [vmem:[#allocation2 + $0x1c0] sm:$0xff] %vm1607_vm1, %v1577_v59  ;;  %v1580_v20 = vadd.f32 %v1579_v28, %v2747_v24 }
 0x1ce   : > { %v1847_v14 = vmax.f32 %v1844_v51, %v1846_v18  ;;  %v1892_v17 = vld [vmem:[#allocation2 + $0x1b0] ss:$2 sm:$0xff]  ;;  %v1894_v63 = vld [vmem:[#allocation2 + $0x1b1] ss:$2 sm:$0xff]  ;;  %v1887_v58 = vld [vmem:[#allocation2 + $0x1a0] ss:$2 sm:$0xff] }
 0x1cf   : > { %1653 = vst.msk [vmem:[#allocation2 + $0x168] sm:$0xff] %vm1607_vm1, %v1532_v42  ;;  %1667 = vst.msk [vmem:[#allocation2 + $0x1d8] sm:$0xff] %vm1607_vm1, %v1588_v54  ;;  %v1883_v32 = vpack.c.bf16 %v1882_v10, %v1882_v10  ;;  %v1895_v2 = vmax.f32 %v1892_v17, %v1894_v63  ;;  %v1889_v21 = vld [vmem:[#allocation2 + $0x1a1] ss:$2 sm:$0xff] }
 0x1d0   : > { %1665 = vst.msk [vmem:[#allocation2 + $0x1c8] sm:$0xff] %vm1607_vm1, %v1580_v20  ;;  %v1848_v60 = vmax.f32 %v1842_v13, %v1847_v14  ;;  %v1890_v55 = vmax.f32 %v1887_v58, %v1889_v21 }
 0x1d1   : > { %2160 = vst.msk [vmem:[%s2816_s8 + $0x30] sm:$0xf] %vm1692_vm2, %v1883_v32  ;;  %v1247_v25 = vpop.f32.mrb[92].mxu0  ;;  %v2267_v24 = vpop.f32.mrb[92].mxu1 }
 0x1d2   : > { %v1849_v52 = vadd.f32 %v2800_v15, %v1848_v60  ;;  %v1896_v26 = vmax.f32 %v1890_v55, %v1895_v2  ;;  %v1537_v29 = vadd.f32 %v2886_v47, %v1247_v25  ;;  %v1601_v0 = vadd.f32 %v2267_v24, %v2767_v44  ;;  %v1249_v11 = vpop.f32.mrb[93].mxu0  ;;  %v1592_v30 = vpop.f32.mrb[93].mxu1 }
 0x1d3   : > { %v1593_v33 = vadd.f32 %v1592_v30, %v2759_v36  ;;  %v1250_v43 = vpop.f32.mrb[94].mxu0  ;;  %v2268_v56 = vpop.f32.mrb[94].mxu1 }
 0x1d4   : > { %v1850_v23 = vmax.f32 %v1849_v52, 0.0  ;;  %v1897_v3 = vadd.f32 %v2800_v15, %v1896_v26  ;;  %1654 = vst.msk [vmem:[#allocation2 + $0x170] sm:$0xff] %vm1607_vm1, %v1537_v29  ;;  %1670 = vst.msk [vmem:[#allocation2 + $0x1f0] sm:$0xff] %vm1607_vm1, %v1601_v0  ;;  %v1540_v37 = vadd.f32 %v2891_v39, %v1250_v43  ;;  %v1604_v47 = vadd.f32 %v2268_v56, %v2771_v48  ;;  %v1252_v41 = vpop.f32.mrb[95].mxu0  ;;  %v1595_v44 = vpop.f32.mrb[95].mxu1 }
 0x1d5   : > { %1668 = vst.msk [vmem:[#allocation2 + $0x1e0] sm:$0xff] %vm1607_vm1, %v1593_v33  ;;  %v1596_v36 = vadd.f32 %v1595_v44, %v2763_v40 }
 0x1d6   : > { %v1908_v38 = vld [vmem:[#allocation2 + $0x1d0] ss:$2 sm:$0xff]  ;;  %v1851_v35 = vpack.c.bf16 %v1850_v23, %v1850_v23  ;;  %v1898_v1 = vmax.f32 %v1897_v3, 0.0  ;;  %v1910_v22 = vld [vmem:[#allocation2 + $0x1d1] ss:$2 sm:$0xff]  ;;  %1655 = vst.msk [vmem:[#allocation2 + $0x178] sm:$0xff] %vm1607_vm1, %v1540_v37 }
 0x1d7   : > { %v1903_v12 = vld [vmem:[#allocation2 + $0x1c0] ss:$2 sm:$0xff]  ;;  %1671 = vst.msk [vmem:[#allocation2 + $0x1f8] sm:$0xff] %vm1607_vm1, %v1604_v47  ;;  %v1911_v39 = vmax.f32 %v1908_v38, %v1910_v22  ;;  %v1905_v4 = vld [vmem:[#allocation2 + $0x1c1] ss:$2 sm:$0xff]  ;;  %1669 = vst.msk [vmem:[#allocation2 + $0x1e8] sm:$0xff] %vm1607_vm1, %v1596_v36 }
 0x1d8   : > { %2158 = vst.msk [vmem:[%s2816_s8 + $0x28] sm:$0xf] %vm1692_vm2, %v1851_v35  ;;  %v1899_v48 = vpack.c.bf16 %v1898_v1, %v1898_v1  ;;  %v1906_v7 = vmax.f32 %v1903_v12, %v1905_v4  ;;  %v1855_v40 = vld [vmem:[#allocation2 + $0x160] ss:$2 sm:$0xff]  ;;  %v1857_v46 = vld [vmem:[#allocation2 + $0x161] ss:$2 sm:$0xff] }
 0x1d9   : > { %v1858_v57 = vmax.f32 %v1855_v40, %v1857_v46 }
 0x1da   : > { %2161 = vst.msk [vmem:[%s2816_s8 + $0x34] sm:$0xf] %vm1692_vm2, %v1899_v48  ;;  %v1912_v45 = vmax.f32 %v1906_v7, %v1911_v39 }
 0x1dc   : > { %v1913_v49 = vadd.f32 %v2800_v15, %v1912_v45 }
 0x1dd   : > { %v1860_v34 = vld [vmem:[#allocation2 + $0x170] ss:$2 sm:$0xff]  ;;  %v1862_v16 = vld [vmem:[#allocation2 + $0x171] ss:$2 sm:$0xff] }
 0x1de   : > { %v1924_v50 = vld [vmem:[#allocation2 + $0x1f0] ss:$2 sm:$0xff]  ;;  %v1914_v61 = vmax.f32 %v1913_v49, 0.0  ;;  %v1863_v8 = vmax.f32 %v1860_v34, %v1862_v16  ;;  %v1926_v62 = vld [vmem:[#allocation2 + $0x1f1] ss:$2 sm:$0xff] }
 0x1df   : > { %v1919_v5 = vld [vmem:[#allocation2 + $0x1e0] ss:$2 sm:$0xff]  ;;  %v1927_v27 = vmax.f32 %v1924_v50, %v1926_v62  ;;  %v1921_v19 = vld [vmem:[#allocation2 + $0x1e1] ss:$2 sm:$0xff] }
 0x1e0   : > { %v1915_v6 = vpack.c.bf16 %v1914_v61, %v1914_v61  ;;  %v1864_v59 = vmax.f32 %v1858_v57, %v1863_v8  ;;  %v1922_v9 = vmax.f32 %v1919_v5, %v1921_v19 }
 0x1e2   : > { %2162 = vst.msk [vmem:[%s2816_s8 + $0x38] sm:$0xf] %vm1692_vm2, %v1915_v6  ;;  %v1865_v31 = vadd.f32 %v2800_v15, %v1864_v59  ;;  %v1928_v42 = vmax.f32 %v1922_v9, %v1927_v27 }
 0x1e4   : > { %v1866_v54 = vmax.f32 %v1865_v31, 0.0  ;;  %v1929_v53 = vadd.f32 %v2800_v15, %v1928_v42 }
 0x1e6   : > { %v1867_v28 = vpack.c.bf16 %v1866_v54, %v1866_v54  ;;  %v1930_v10 = vmax.f32 %v1929_v53, 0.0 }
 0x1e8   : > { %2159 = vst.msk [vmem:[%s2816_s8 + $0x2c] sm:$0xf] %vm1692_vm2, %v1867_v28  ;;  %v1931_v51 = vpack.c.bf16 %v1930_v10, %v1930_v10 }
 0x1ea   : > { %2163 = vst.msk [vmem:[%s2816_s8 + $0x3c] sm:$0xf] %vm1692_vm2, %v1931_v51 }
 0x1eb PF: > { %s13_s12 = sadd.s32 1, %s2463_s12  }
 0x1ec   : > { %p10_p5 = scmp.ge.s32.totalorder %s13_s12, 4  }
 0x1ee   :  { %12 = sbr.rel (!%p10_p5) target bundleno = 1 (0x1), region = 140 }

// kernel: _lambda_.4
= control target key start
LH: loop header
LB: loop body
LE: loop exit
PB: predicated region body
PF: predicated region fallthrough
CT: control target
= control target key end

     0   :  { %s5068_s12 = smov 0   ;;  %s5821_s0 = inlined_call_operand.vmem [shape: bf16[4096,27], index: 0, kind: input, shape index: {}]   ;;  %s5822_s1 = inlined_call_operand.vmem [shape: bf16[27,32], index: 1, kind: input, shape index: {}]   ;;  %s5823_s2 = inlined_call_operand.vmem [shape: f32[1,32], index: 2, kind: input, shape index: {}]   ;;  %s5824_s3 = inlined_call_operand.vmem [shape: bf16[4,16,16,32], index: 3, kind: output, shape index: {}]  }
   0x1 LB: > { %s4042_s13 = sadd.s32 4294967295, %s5045_s12   ;;  %p4046_p0 = scmp.ge.s32.totalorder %s5045_s12, 1  ;;  %s5045_s12 = sphi %s5068_s12, %s13_s12  }
   0x2   : > { %p138_p1 = scmp.lt.s32.totalorder %s5045_s12, 3 }
   0x4   : > { %p139_p2 = pnand %p4046_p0, %p138_p1 }
   0x5   : > { %v4907_v0 = vld [vmem:[%s5822_s1] sm:$0xff] (!%p139_p2)   ;;  %vm1473_vm0 = vcmask (!%p139_p2), 1044480   ;;  %v4908_v1 = vld [vmem:[%s5822_s1 + $0x8] sm:$0x3f] (!%p139_p2)   ;;  %vm1474_vm1 = vcmask (!%p139_p2), 1045504   ;;  %s4047_s18 = sshll.u32 (!%p139_p2), %s4042_s13, 8 }
   0x6   : > { %142 = sbr.rel (%p139_p2) target bundleno = 502 (0x1f6), region = 32  ;;  %4634 = vmatprep.subr.bf16.mxu0 (!%p139_p2), %v4907_v0  ;;  %4894 = vmatprep.subr.bf16.mxu1 (!%p139_p2), %v4907_v0  ;;  %v5047_v2 = vmov (!%p139_p2), 65535   ;;  %p164_p3 = scmp.lt.s32.totalorder (!%p139_p2), %s4047_s18, 511  ;;  %vm1088_vm2 = vcmask (!%p139_p2), 220160   ;;  %vm2537_vm3 = vcmask (!%p139_p2), 261120   ;;  %vm2834_vm4 = vcmask (!%p139_p2), 257024  }
   0x7   : > { %4635 = vmatpush3.bf16.msra.mxu0 (!%p139_p2), %v4907_v0  ;;  %4896 = vmatpush3.bf16.msra.mxu1 (!%p139_p2), %v4907_v0  ;;  %v1475_v3 = vsel (!%p139_p2), %vm1473_vm0, 4294967295, %v5047_v2  ;;  %s4049_s23 = sshll.u32 (!%p139_p2), %s4042_s13, 1 }
   0x8   : > { %v1476_v4 = vsel (!%p139_p2), %vm1474_vm1, %v1475_v3, 0  ;;  %p170_p4 = scmp.lt.s32.totalorder (!%p139_p2), %s4049_s23, 3 }
   0x9   : > { %v1478_v5 = vand.u32 (!%p139_p2), %v4908_v1, %v1476_v4 }
   0xb   : > { %4636 = vmatprep.subr.bf16.mxu0 (!%p139_p2), %v1478_v5  ;;  %4895 = vmatprep.subr.bf16.mxu1 (!%p139_p2), %v1478_v5 }
   0xc   : > { %4637 = vmatpush3.bf16.msra.mxu0 (!%p139_p2), %v1478_v5  ;;  %4897 = vmatpush3.bf16.msra.mxu1 (!%p139_p2), %v1478_v5 }
   0xd   : > { %s5826_s18 = smov (!%p164_p3, %s4047_s18), 511  ;;  %s5828_s23 = smov (!%p170_p4, %s4049_s23), 3 }
   0xe   : > { %s4048_s19 = sshll.u32 %s5826_s18, 2  ;;  %s4439_s26 = sshll.u32 %s5828_s23, 7 }
   0xf   : > { %s5087_s22 = scalar_lea.vmem %s5821_s0, %s4048_s19  ;;  %s5373_s29 = scalar_lea.vmem %s5824_s3, %s4439_s26 }
  0x10   : > { %v4909_v6 = vld [vmem:[%s5087_s22] sm:$0xff]   ;;  %v4911_v8 = vld [vmem:[%s5087_s22 + $0x8] sm:$0xff]   ;;  %v4913_v10 = vld [vmem:[%s5087_s22 + $0x10] sm:$0xff]  }
  0x11   : > { %v4910_v7 = vld [vmem:[%s5087_s22 + $0x200] sm:$0xff]   ;;  %4638 = vmatprep.mubr.msk.bf16.mxu0 %vm1088_vm2, %v4909_v6  ;;  %v4912_v9 = vld [vmem:[%s5087_s22 + $0x208] sm:$0xff]   ;;  %v4914_v11 = vld [vmem:[%s5087_s22 + $0x210] sm:$0xff]  }
  0x12   : > { %4766 = vmatprep.mubr.msk.bf16.mxu1 %vm1088_vm2, %v4910_v7  ;;  %4639 = vmatmul.mubr.msk.bf16.vlgmr.msra.gmra.mrb[0].mxu0 %vm1088_vm2, %v4911_v8  ;;  %v4915_v12 = vld [vmem:[%s5087_s22 + $0x18] sm:$0xff]   ;;  %v4917_v14 = vld [vmem:[%s5087_s22 + $0x20] sm:$0xff]   ;;  %v4919_v16 = vld [vmem:[%s5087_s22 + $0x28] sm:$0xff]  }
  0x13   : > { %4767 = vmatmul.mubr.msk.bf16.vlgmr.msra.gmra.mrb[0].mxu1 %vm1088_vm2, %v4912_v9  ;;  %4642 = vmatprep.mubr.msk.bf16.mxu0 %vm1088_vm2, %v4913_v10  ;;  %v4916_v13 = vld [vmem:[%s5087_s22 + $0x218] sm:$0xff]   ;;  %v4918_v15 = vld [vmem:[%s5087_s22 + $0x220] sm:$0xff]   ;;  %v4920_v17 = vld [vmem:[%s5087_s22 + $0x228] sm:$0xff]  }
  0x14   : > { %4770 = vmatprep.mubr.msk.bf16.mxu1 %vm1088_vm2, %v4914_v11  ;;  %v4921_v18 = vld [vmem:[%s5087_s22 + $0x30] sm:$0xff]   ;;  %v4923_v20 = vld [vmem:[%s5087_s22 + $0x38] sm:$0xff]   ;;  %v4925_v22 = vld [vmem:[%s5087_s22 + $0x40] sm:$0xff]  }
  0x15   : > { %v4922_v19 = vld [vmem:[%s5087_s22 + $0x230] sm:$0xff]   ;;  %v4924_v21 = vld [vmem:[%s5087_s22 + $0x238] sm:$0xff]   ;;  %v4926_v23 = vld [vmem:[%s5087_s22 + $0x240] sm:$0xff]  }
  0x16   : > { %v4927_v24 = vld [vmem:[%s5087_s22 + $0x48] sm:$0xff]   ;;  %v4929_v26 = vld [vmem:[%s5087_s22 + $0x50] sm:$0xff]   ;;  %v4931_v28 = vld [vmem:[%s5087_s22 + $0x58] sm:$0xff]  }
  0x17   : > { %v4928_v25 = vld [vmem:[%s5087_s22 + $0x248] sm:$0xff]   ;;  %v4930_v27 = vld [vmem:[%s5087_s22 + $0x250] sm:$0xff]   ;;  %v4932_v29 = vld [vmem:[%s5087_s22 + $0x258] sm:$0xff]  }
  0x18   : > { %v4933_v30 = vld [vmem:[%s5087_s22 + $0x60] sm:$0xff]   ;;  %v4935_v32 = vld [vmem:[%s5087_s22 + $0x68] sm:$0xff]   ;;  %v4937_v34 = vld [vmem:[%s5087_s22 + $0x70] sm:$0xff]  }
  0x19   : > { %v4934_v31 = vld [vmem:[%s5087_s22 + $0x260] sm:$0xff]   ;;  %v4936_v33 = vld [vmem:[%s5087_s22 + $0x268] sm:$0xff]   ;;  %v4938_v35 = vld [vmem:[%s5087_s22 + $0x270] sm:$0xff]  }
  0x1a   : > { %4643 = vmatmul.mubr.msk.bf16.gmra.mrb[4].mxu0 %vm1088_vm2, %v4915_v12  ;;  %v4939_v36 = vld [vmem:[%s5087_s22 + $0x78] sm:$0xff]   ;;  %v4941_v38 = vld [vmem:[%s5087_s22 + $0x80] sm:$0xff]   ;;  %v4943_v40 = vld [vmem:[%s5087_s22 + $0x88] sm:$0xff]  }
  0x1b   : > { %4771 = vmatmul.mubr.msk.bf16.gmra.mrb[4].mxu1 %vm1088_vm2, %v4916_v13  ;;  %4646 = vmatprep.mubr.msk.bf16.mxu0 %vm1088_vm2, %v4917_v14  ;;  %v4940_v37 = vld [vmem:[%s5087_s22 + $0x278] sm:$0xff]   ;;  %v4942_v39 = vld [vmem:[%s5087_s22 + $0x280] sm:$0xff]   ;;  %v4944_v41 = vld [vmem:[%s5087_s22 + $0x288] sm:$0xff]  }
  0x1c   : > { %4774 = vmatprep.mubr.msk.bf16.mxu1 %vm1088_vm2, %v4918_v15  ;;  %v4945_v42 = vld [vmem:[%s5087_s22 + $0x90] sm:$0xff]   ;;  %v4947_v44 = vld [vmem:[%s5087_s22 + $0x98] sm:$0xff]   ;;  %v4949_v46 = vld [vmem:[%s5087_s22 + $0xa0] sm:$0xff]  }
  0x1d   : > { %v4946_v43 = vld [vmem:[%s5087_s22 + $0x290] sm:$0xff]   ;;  %v4948_v45 = vld [vmem:[%s5087_s22 + $0x298] sm:$0xff]   ;;  %v4950_v47 = vld [vmem:[%s5087_s22 + $0x2a0] sm:$0xff]  }
  0x1e   : > { %v4951_v48 = vld [vmem:[%s5087_s22 + $0xa8] sm:$0xff]   ;;  %v4953_v50 = vld [vmem:[%s5087_s22 + $0xb0] sm:$0xff]   ;;  %v4955_v52 = vld [vmem:[%s5087_s22 + $0xb8] sm:$0xff]  }
  0x1f   : > { %v4952_v49 = vld [vmem:[%s5087_s22 + $0x2a8] sm:$0xff]   ;;  %v4954_v51 = vld [vmem:[%s5087_s22 + $0x2b0] sm:$0xff]   ;;  %v4956_v53 = vld [vmem:[%s5087_s22 + $0x2b8] sm:$0xff]  }
  0x20   : > { %v4957_v54 = vld [vmem:[%s5087_s22 + $0xc0] sm:$0xff]   ;;  %v4959_v56 = vld [vmem:[%s5087_s22 + $0xc8] sm:$0xff]   ;;  %v4961_v58 = vld [vmem:[%s5087_s22 + $0xd0] sm:$0xff]  }
  0x21   : > { %v4958_v55 = vld [vmem:[%s5087_s22 + $0x2c0] sm:$0xff]   ;;  %v4960_v57 = vld [vmem:[%s5087_s22 + $0x2c8] sm:$0xff]   ;;  %v4962_v59 = vld [vmem:[%s5087_s22 + $0x2d0] sm:$0xff]  }
  0x22   : > { %4647 = vmatmul.mubr.msk.bf16.gmra.mrb[8].mxu0 %vm1088_vm2, %v4919_v16  ;;  %v4963_v60 = vld [vmem:[%s5087_s22 + $0xd8] sm:$0xff]   ;;  %v4965_v62 = vld [vmem:[%s5087_s22 + $0xe0] sm:$0xff]   ;;  %v4967_v0 = vld [vmem:[%s5087_s22 + $0xe8] sm:$0xff]  }
  0x23   : > { %4775 = vmatmul.mubr.msk.bf16.gmra.mrb[8].mxu1 %vm1088_vm2, %v4920_v17  ;;  %4650 = vmatprep.mubr.msk.bf16.mxu0 %vm1088_vm2, %v4921_v18  ;;  %v4964_v61 = vld [vmem:[%s5087_s22 + $0x2d8] sm:$0xff]   ;;  %v4966_v63 = vld [vmem:[%s5087_s22 + $0x2e0] sm:$0xff]   ;;  %v4968_v1 = vld [vmem:[%s5087_s22 + $0x2e8] sm:$0xff]  }
  0x24   : > { %4778 = vmatprep.mubr.msk.bf16.mxu1 %vm1088_vm2, %v4922_v19  ;;  %v4969_v2 = vld [vmem:[%s5087_s22 + $0xf0] sm:$0xff]   ;;  %v4971_v4 = vld [vmem:[%s5087_s22 + $0xf8] sm:$0xff]   ;;  %v4973_v6 = vld [vmem:[%s5087_s22 + $0x100] sm:$0xff]  }
  0x25   : > { %v4970_v3 = vld [vmem:[%s5087_s22 + $0x2f0] sm:$0xff]   ;;  %v4972_v5 = vld [vmem:[%s5087_s22 + $0x2f8] sm:$0xff]   ;;  %v4974_v7 = vld [vmem:[%s5087_s22 + $0x300] sm:$0xff]  }
  0x26   : > { %v4975_v8 = vld [vmem:[%s5087_s22 + $0x108] sm:$0xff]   ;;  %v4977_v10 = vld [vmem:[%s5087_s22 + $0x110] sm:$0xff]   ;;  %v4979_v12 = vld [vmem:[%s5087_s22 + $0x118] sm:$0xff]  }
  0x27   : > { %v4976_v9 = vld [vmem:[%s5087_s22 + $0x308] sm:$0xff]   ;;  %v4978_v11 = vld [vmem:[%s5087_s22 + $0x310] sm:$0xff]   ;;  %v4980_v13 = vld [vmem:[%s5087_s22 + $0x318] sm:$0xff]  }
  0x28   : > { %v4981_v14 = vld [vmem:[%s5087_s22 + $0x120] sm:$0xff]   ;;  %v4983_v16 = vld [vmem:[%s5087_s22 + $0x128] sm:$0xff]   ;;  %v4985_v18 = vld [vmem:[%s5087_s22 + $0x130] sm:$0xff]  }
  0x29   : > { %v4982_v15 = vld [vmem:[%s5087_s22 + $0x320] sm:$0xff]   ;;  %v4984_v17 = vld [vmem:[%s5087_s22 + $0x328] sm:$0xff]   ;;  %v4986_v19 = vld [vmem:[%s5087_s22 + $0x330] sm:$0xff]  }
  0x2a   : > { %4651 = vmatmul.mubr.msk.bf16.gmra.mrb[12].mxu0 %vm1088_vm2, %v4923_v20  ;;  %v4987_v20 = vld [vmem:[%s5087_s22 + $0x138] sm:$0xff]  }
  0x2b   : > { %4779 = vmatmul.mubr.msk.bf16.gmra.mrb[12].mxu1 %vm1088_vm2, %v4924_v21  ;;  %4654 = vmatprep.mubr.msk.bf16.mxu0 %vm1088_vm2, %v4925_v22  ;;  %v4988_v21 = vld [vmem:[%s5087_s22 + $0x338] sm:$0xff]   ;;  %v4989_v22 = vld [vmem:[%s5087_s22 + $0x140] sm:$0xff]  }
  0x2c   : > { %4782 = vmatprep.mubr.msk.bf16.mxu1 %vm1088_vm2, %v4926_v23  ;;  %v4990_v23 = vld [vmem:[%s5087_s22 + $0x340] sm:$0xff]  }
  0x32   : > { %4655 = vmatmul.mubr.msk.bf16.gmra.mrb[16].mxu0 %vm1088_vm2, %v4927_v24  ;;  %v4991_v24 = vld [vmem:[%s5087_s22 + $0x148] sm:$0xff]  }
  0x33   : > { %4783 = vmatmul.mubr.msk.bf16.gmra.mrb[16].mxu1 %vm1088_vm2, %v4928_v25  ;;  %4658 = vmatprep.mubr.msk.bf16.mxu0 %vm1088_vm2, %v4929_v26  ;;  %v4992_v25 = vld [vmem:[%s5087_s22 + $0x348] sm:$0xff]   ;;  %v4993_v26 = vld [vmem:[%s5087_s22 + $0x150] sm:$0xff]  }
  0x34   : > { %4786 = vmatprep.mubr.msk.bf16.mxu1 %vm1088_vm2, %v4930_v27  ;;  %v4994_v27 = vld [vmem:[%s5087_s22 + $0x350] sm:$0xff]  }
  0x3a   : > { %4659 = vmatmul.mubr.msk.bf16.gmra.mrb[20].mxu0 %vm1088_vm2, %v4931_v28  ;;  %v4995_v28 = vld [vmem:[%s5087_s22 + $0x158] sm:$0xff]  }
  0x3b   : > { %4787 = vmatmul.mubr.msk.bf16.gmra.mrb[20].mxu1 %vm1088_vm2, %v4932_v29  ;;  %4662 = vmatprep.mubr.msk.bf16.mxu0 %vm1088_vm2, %v4933_v30  ;;  %v4996_v29 = vld [vmem:[%s5087_s22 + $0x358] sm:$0xff]   ;;  %v4997_v30 = vld [vmem:[%s5087_s22 + $0x160] sm:$0xff]  }
  0x3c   : > { %4790 = vmatprep.mubr.msk.bf16.mxu1 %vm1088_vm2, %v4934_v31  ;;  %v4998_v31 = vld [vmem:[%s5087_s22 + $0x360] sm:$0xff]  }
  0x42   : > { %4663 = vmatmul.mubr.msk.bf16.gmra.mrb[24].mxu0 %vm1088_vm2, %v4935_v32  ;;  %v4999_v32 = vld [vmem:[%s5087_s22 + $0x168] sm:$0xff]  }
  0x43   : > { %4791 = vmatmul.mubr.msk.bf16.gmra.mrb[24].mxu1 %vm1088_vm2, %v4936_v33  ;;  %4666 = vmatprep.mubr.msk.bf16.mxu0 %vm1088_vm2, %v4937_v34  ;;  %v5000_v33 = vld [vmem:[%s5087_s22 + $0x368] sm:$0xff]   ;;  %v5001_v34 = vld [vmem:[%s5087_s22 + $0x170] sm:$0xff]  }
  0x44   : > { %4794 = vmatprep.mubr.msk.bf16.mxu1 %vm1088_vm2, %v4938_v35  ;;  %v5002_v35 = vld [vmem:[%s5087_s22 + $0x370] sm:$0xff]  }
  0x4a   : > { %4667 = vmatmul.mubr.msk.bf16.gmra.mrb[28].mxu0 %vm1088_vm2, %v4939_v36  ;;  %v5003_v36 = vld [vmem:[%s5087_s22 + $0x178] sm:$0xff]  }
  0x4b   : > { %4795 = vmatmul.mubr.msk.bf16.gmra.mrb[28].mxu1 %vm1088_vm2, %v4940_v37  ;;  %4670 = vmatprep.mubr.msk.bf16.mxu0 %vm1088_vm2, %v4941_v38  ;;  %v5004_v37 = vld [vmem:[%s5087_s22 + $0x378] sm:$0xff]   ;;  %v5005_v38 = vld [vmem:[%s5087_s22 + $0x180] sm:$0xff]  }
  0x4c   : > { %4798 = vmatprep.mubr.msk.bf16.mxu1 %vm1088_vm2, %v4942_v39  ;;  %v5006_v39 = vld [vmem:[%s5087_s22 + $0x380] sm:$0xff]  }
  0x52   : > { %4671 = vmatmul.mubr.msk.bf16.gmra.mrb[32].mxu0 %vm1088_vm2, %v4943_v40  ;;  %v5007_v40 = vld [vmem:[%s5087_s22 + $0x188] sm:$0xff]  }
  0x53   : > { %4799 = vmatmul.mubr.msk.bf16.gmra.mrb[32].mxu1 %vm1088_vm2, %v4944_v41  ;;  %4674 = vmatprep.mubr.msk.bf16.mxu0 %vm1088_vm2, %v4945_v42  ;;  %v5008_v41 = vld [vmem:[%s5087_s22 + $0x388] sm:$0xff]   ;;  %v5009_v42 = vld [vmem:[%s5087_s22 + $0x190] sm:$0xff]  }
  0x54   : > { %4802 = vmatprep.mubr.msk.bf16.mxu1 %vm1088_vm2, %v4946_v43  ;;  %v5010_v43 = vld [vmem:[%s5087_s22 + $0x390] sm:$0xff]  }
  0x5a   : > { %4675 = vmatmul.mubr.msk.bf16.gmra.mrb[36].mxu0 %vm1088_vm2, %v4947_v44  ;;  %v5011_v44 = vld [vmem:[%s5087_s22 + $0x198] sm:$0xff]  }
  0x5b   : > { %4803 = vmatmul.mubr.msk.bf16.gmra.mrb[36].mxu1 %vm1088_vm2, %v4948_v45  ;;  %4678 = vmatprep.mubr.msk.bf16.mxu0 %vm1088_vm2, %v4949_v46  ;;  %v5012_v45 = vld [vmem:[%s5087_s22 + $0x398] sm:$0xff]   ;;  %v5013_v46 = vld [vmem:[%s5087_s22 + $0x1a0] sm:$0xff]  }
  0x5c   : > { %4806 = vmatprep.mubr.msk.bf16.mxu1 %vm1088_vm2, %v4950_v47  ;;  %v5014_v47 = vld [vmem:[%s5087_s22 + $0x3a0] sm:$0xff]  }
  0x62   : > { %4679 = vmatmul.mubr.msk.bf16.gmra.mrb[40].mxu0 %vm1088_vm2, %v4951_v48  ;;  %v5015_v48 = vld [vmem:[%s5087_s22 + $0x1a8] sm:$0xff]  }
  0x63   : > { %4807 = vmatmul.mubr.msk.bf16.gmra.mrb[40].mxu1 %vm1088_vm2, %v4952_v49  ;;  %4682 = vmatprep.mubr.msk.bf16.mxu0 %vm1088_vm2, %v4953_v50  ;;  %v5016_v49 = vld [vmem:[%s5087_s22 + $0x3a8] sm:$0xff]   ;;  %v5017_v50 = vld [vmem:[%s5087_s22 + $0x1b0] sm:$0xff]  }
  0x64   : > { %4810 = vmatprep.mubr.msk.bf16.mxu1 %vm1088_vm2, %v4954_v51  ;;  %v5018_v51 = vld [vmem:[%s5087_s22 + $0x3b0] sm:$0xff]  }
  0x6a   : > { %4683 = vmatmul.mubr.msk.bf16.gmra.mrb[44].mxu0 %vm1088_vm2, %v4955_v52 }
  0x6b   : > { %4811 = vmatmul.mubr.msk.bf16.gmra.mrb[44].mxu1 %vm1088_vm2, %v4956_v53  ;;  %4686 = vmatprep.mubr.msk.bf16.mxu0 %vm1088_vm2, %v4957_v54 }
  0x6c   : > { %4814 = vmatprep.mubr.msk.bf16.mxu1 %vm1088_vm2, %v4958_v55  ;;  %v5019_v55 = vld [vmem:[%s5087_s22 + $0x1b8] sm:$0xff]  }
  0x72   : > { %4687 = vmatmul.mubr.msk.bf16.gmra.mrb[48].mxu0 %vm1088_vm2, %v4959_v56 }
  0x73   : > { %4815 = vmatmul.mubr.msk.bf16.gmra.mrb[48].mxu1 %vm1088_vm2, %v4960_v57  ;;  %4690 = vmatprep.mubr.msk.bf16.mxu0 %vm1088_vm2, %v4961_v58  ;;  %v5020_v58 = vld [vmem:[%s5087_s22 + $0x3b8] sm:$0xff]  }
  0x74   : > { %4818 = vmatprep.mubr.msk.bf16.mxu1 %vm1088_vm2, %v4962_v59  ;;  %v5021_v59 = vld [vmem:[%s5087_s22 + $0x1c0] sm:$0xff]  }
  0x7a   : > { %4691 = vmatmul.mubr.msk.bf16.gmra.mrb[52].mxu0 %vm1088_vm2, %v4963_v60 }
  0x7b   : > { %4819 = vmatmul.mubr.msk.bf16.gmra.mrb[52].mxu1 %vm1088_vm2, %v4964_v61  ;;  %4694 = vmatprep.mubr.msk.bf16.mxu0 %vm1088_vm2, %v4965_v62  ;;  %v5022_v62 = vld [vmem:[%s5087_s22 + $0x3c0] sm:$0xff]  }
  0x7c   : > { %4822 = vmatprep.mubr.msk.bf16.mxu1 %vm1088_vm2, %v4966_v63 }
  0x82   : > { %4695 = vmatmul.mubr.msk.bf16.gmra.mrb[56].mxu0 %vm1088_vm2, %v4967_v0 }
  0x83   : > { %4823 = vmatmul.mubr.msk.bf16.gmra.mrb[56].mxu1 %vm1088_vm2, %v4968_v1  ;;  %4698 = vmatprep.mubr.msk.bf16.mxu0 %vm1088_vm2, %v4969_v2 }
  0x84   : > { %4826 = vmatprep.mubr.msk.bf16.mxu1 %vm1088_vm2, %v4970_v3  ;;  %v5023_v3 = vld [vmem:[%s5087_s22 + $0x1c8] sm:$0xff]  }
  0x8a   : > { %4699 = vmatmul.mubr.msk.bf16.gmra.mrb[60].mxu0 %vm1088_vm2, %v4971_v4 }
  0x8b   : > { %4827 = vmatmul.mubr.msk.bf16.gmra.mrb[60].mxu1 %vm1088_vm2, %v4972_v5  ;;  %4702 = vmatprep.mubr.msk.bf16.mxu0 %vm1088_vm2, %v4973_v6  ;;  %v5024_v6 = vld [vmem:[%s5087_s22 + $0x3c8] sm:$0xff]  }
  0x8c   : > { %4830 = vmatprep.mubr.msk.bf16.mxu1 %vm1088_vm2, %v4974_v7  ;;  %v5025_v7 = vld [vmem:[%s5087_s22 + $0x1d0] sm:$0xff]  }
  0x92   : > { %4703 = vmatmul.mubr.msk.bf16.gmra.mrb[64].mxu0 %vm1088_vm2, %v4975_v8  ;;  %v5026_v8 = vld [vmem:[%s5087_s22 + $0x3d0] sm:$0xff]  }
  0x93   : > { %4831 = vmatmul.mubr.msk.bf16.gmra.mrb[64].mxu1 %vm1088_vm2, %v4976_v9  ;;  %4706 = vmatprep.mubr.msk.bf16.mxu0 %vm1088_vm2, %v4977_v10 }
  0x94   : > { %4834 = vmatprep.mubr.msk.bf16.mxu1 %vm1088_vm2, %v4978_v11 }
  0x9a   : > { %4707 = vmatmul.mubr.msk.bf16.gmra.mrb[68].mxu0 %vm1088_vm2, %v4979_v12  ;;  %v5027_v12 = vld [vmem:[%s5087_s22 + $0x1d8] sm:$0xff]  }
  0x9b   : > { %4835 = vmatmul.mubr.msk.bf16.gmra.mrb[68].mxu1 %vm1088_vm2, %v4980_v13  ;;  %4710 = vmatprep.mubr.msk.bf16.mxu0 %vm1088_vm2, %v4981_v14 }
  0x9c   : > { %4838 = vmatprep.mubr.msk.bf16.mxu1 %vm1088_vm2, %v4982_v15 }
  0xa2   : > { %4711 = vmatmul.mubr.msk.bf16.gmra.mrb[72].mxu0 %vm1088_vm2, %v4983_v16  ;;  %v5028_v16 = vld [vmem:[%s5087_s22 + $0x3d8] sm:$0xff]  }
  0xa3   : > { %4839 = vmatmul.mubr.msk.bf16.gmra.mrb[72].mxu1 %vm1088_vm2, %v4984_v17  ;;  %4714 = vmatprep.mubr.msk.bf16.mxu0 %vm1088_vm2, %v4985_v18  ;;  %v5029_v17 = vld [vmem:[%s5087_s22 + $0x1e0] sm:$0xff]  }
  0xa4   : > { %4842 = vmatprep.mubr.msk.bf16.mxu1 %vm1088_vm2, %v4986_v19 }
  0xaa   : > { %4715 = vmatmul.mubr.msk.bf16.gmra.mrb[76].mxu0 %vm1088_vm2, %v4987_v20 }
  0xab   : > { %4843 = vmatmul.mubr.msk.bf16.gmra.mrb[76].mxu1 %vm1088_vm2, %v4988_v21  ;;  %4718 = vmatprep.mubr.msk.bf16.mxu0 %vm1088_vm2, %v4989_v22  ;;  %v5030_v22 = vld [vmem:[%s5087_s22 + $0x3e0] sm:$0xff]  }
  0xac   : > { %4846 = vmatprep.mubr.msk.bf16.mxu1 %vm1088_vm2, %v4990_v23  ;;  %v5353_v23 = vld [vmem:[%s5823_s2] ss:$0 sm:$0xff] }
  0xb2   : > { %4719 = vmatmul.mubr.msk.bf16.gmra.mrb[80].mxu0 %vm1088_vm2, %v4991_v24 }
  0xb3   : > { %4847 = vmatmul.mubr.msk.bf16.gmra.mrb[80].mxu1 %vm1088_vm2, %v4992_v25  ;;  %4722 = vmatprep.mubr.msk.bf16.mxu0 %vm1088_vm2, %v4993_v26 }
  0xb4   : > { %4850 = vmatprep.mubr.msk.bf16.mxu1 %vm1088_vm2, %v4994_v27 }
  0xba   : > { %4723 = vmatmul.mubr.msk.bf16.gmra.mrb[84].mxu0 %vm1088_vm2, %v4995_v28 }
  0xbb   : > { %4851 = vmatmul.mubr.msk.bf16.gmra.mrb[84].mxu1 %vm1088_vm2, %v4996_v29  ;;  %4726 = vmatprep.mubr.msk.bf16.mxu0 %vm1088_vm2, %v4997_v30 }
  0xbc   : > { %4854 = vmatprep.mubr.msk.bf16.mxu1 %vm1088_vm2, %v4998_v31 }
  0xc2   : > { %4727 = vmatmul.mubr.msk.bf16.gmra.mrb[88].mxu0 %vm1088_vm2, %v4999_v32 }
  0xc3   : > { %4855 = vmatmul.mubr.msk.bf16.gmra.mrb[88].mxu1 %vm1088_vm2, %v5000_v33  ;;  %4730 = vmatprep.mubr.msk.bf16.mxu0 %vm1088_vm2, %v5001_v34 }
  0xc4   : > { %4858 = vmatprep.mubr.msk.bf16.mxu1 %vm1088_vm2, %v5002_v35 }
  0xca   : > { %4731 = vmatmul.mubr.msk.bf16.gmra.mrb[92].mxu0 %vm1088_vm2, %v5003_v36 }
  0xcb   : > { %4859 = vmatmul.mubr.msk.bf16.gmra.mrb[92].mxu1 %vm1088_vm2, %v5004_v37  ;;  %4734 = vmatprep.mubr.msk.bf16.mxu0 %vm1088_vm2, %v5005_v38 }
  0xcc   : > { %4862 = vmatprep.mubr.msk.bf16.mxu1 %vm1088_vm2, %v5006_v39 }
  0xd2   : > { %4735 = vmatmul.mubr.msk.bf16.gmra.mrb[96].mxu0 %vm1088_vm2, %v5007_v40 }
  0xd3   : > { %4863 = vmatmul.mubr.msk.bf16.gmra.mrb[96].mxu1 %vm1088_vm2, %v5008_v41  ;;  %4738 = vmatprep.mubr.msk.bf16.mxu0 %vm1088_vm2, %v5009_v42 }
  0xd4   : > { %4866 = vmatprep.mubr.msk.bf16.mxu1 %vm1088_vm2, %v5010_v43 }
  0xda   : > { %4739 = vmatmul.mubr.msk.bf16.gmra.mrb[100].mxu0 %vm1088_vm2, %v5011_v44 }
  0xdb   : > { %4867 = vmatmul.mubr.msk.bf16.gmra.mrb[100].mxu1 %vm1088_vm2, %v5012_v45  ;;  %4742 = vmatprep.mubr.msk.bf16.mxu0 %vm1088_vm2, %v5013_v46 }
  0xdc   : > { %4870 = vmatprep.mubr.msk.bf16.mxu1 %vm1088_vm2, %v5014_v47 }
  0xe2   : > { %4743 = vmatmul.mubr.msk.bf16.gmra.mrb[104].mxu0 %vm1088_vm2, %v5015_v48 }
  0xe3   : > { %4871 = vmatmul.mubr.msk.bf16.gmra.mrb[104].mxu1 %vm1088_vm2, %v5016_v49  ;;  %4746 = vmatprep.mubr.msk.bf16.mxu0 %vm1088_vm2, %v5017_v50 }
  0xe4   : > { %4874 = vmatprep.mubr.msk.bf16.mxu1 %vm1088_vm2, %v5018_v51 }
  0xe5   : > { %v4640_v52 = vpop.f32.mrb[0].mxu0 }
  0xe6   : > { %2540 = vst.msk [vmem:[#allocation2 + $0x10] sm:$0xff] %vm2537_vm3, %v4640_v52  ;;  %v4768_v53 = vpop.f32.mrb[0].mxu1  ;;  %v1514_v54 = vpop.f32.mrb[1].mxu0 }
  0xe7   : > { %2668 = vst.msk [vmem:[#allocation2 + $0x410] sm:$0xff] %vm2537_vm3, %v4768_v53  ;;  %2538 = vst.msk [vmem:[#allocation2] sm:$0xff] %vm2537_vm3, %v1514_v54  ;;  %v2026_v56 = vpop.f32.mrb[1].mxu1  ;;  %v4641_v57 = vpop.f32.mrb[2].mxu0 }
  0xe8   : > { %2666 = vst.msk [vmem:[#allocation2 + $0x400] sm:$0xff] %vm2537_vm3, %v2026_v56  ;;  %2541 = vst.msk [vmem:[#allocation2 + $0x18] sm:$0xff] %vm2537_vm3, %v4641_v57  ;;  %v4769_v60 = vpop.f32.mrb[2].mxu1  ;;  %v1517_v61 = vpop.f32.mrb[3].mxu0 }
  0xe9   : > { %2669 = vst.msk [vmem:[#allocation2 + $0x418] sm:$0xff] %vm2537_vm3, %v4769_v60  ;;  %2539 = vst.msk [vmem:[#allocation2 + $0x8] sm:$0xff] %vm2537_vm3, %v1517_v61  ;;  %v2029_v63 = vpop.f32.mrb[3].mxu1 }
  0xea   : > { %2667 = vst.msk [vmem:[#allocation2 + $0x408] sm:$0xff] %vm2537_vm3, %v2029_v63  ;;  %4747 = vmatmul.mubr.msk.bf16.gmra.mrb[108].mxu0 %vm1088_vm2, %v5019_v55  ;;  %v5033_v63 = vld [vmem:[%s5087_s22 + $0x1f0] sm:$0xff]  }
  0xeb   : > { %4875 = vmatmul.mubr.msk.bf16.gmra.mrb[108].mxu1 %vm1088_vm2, %v5020_v58  ;;  %4750 = vmatprep.mubr.msk.bf16.mxu0 %vm1088_vm2, %v5021_v59  ;;  %v5031_v58 = vld [vmem:[%s5087_s22 + $0x1e8] sm:$0xff]  }
  0xec   : > { %4878 = vmatprep.mubr.msk.bf16.mxu1 %vm1088_vm2, %v5022_v62  ;;  %v5032_v62 = vld [vmem:[%s5087_s22 + $0x3e8] sm:$0xff]  }
  0xed   : > { %v4644_v0 = vpop.f32.mrb[4].mxu0 }
  0xee   : > { %2544 = vst.msk [vmem:[#allocation2 + $0x30] sm:$0xff] %vm2537_vm3, %v4644_v0  ;;  %v4772_v1 = vpop.f32.mrb[4].mxu1  ;;  %v1530_v2 = vpop.f32.mrb[5].mxu0 }
  0xef   : > { %2672 = vst.msk [vmem:[#allocation2 + $0x430] sm:$0xff] %vm2537_vm3, %v4772_v1  ;;  %2542 = vst.msk [vmem:[#allocation2 + $0x20] sm:$0xff] %vm2537_vm3, %v1530_v2  ;;  %v2042_v4 = vpop.f32.mrb[5].mxu1  ;;  %v4645_v5 = vpop.f32.mrb[6].mxu0  ;;  %v2797_v13 = vld [vmem:[#allocation2 + $0x10] ss:$2 sm:$0xff] }
  0xf0   : > { %2670 = vst.msk [vmem:[#allocation2 + $0x420] sm:$0xff] %vm2537_vm3, %v2042_v4  ;;  %2545 = vst.msk [vmem:[#allocation2 + $0x38] sm:$0xff] %vm2537_vm3, %v4645_v5  ;;  %v4773_v9 = vpop.f32.mrb[6].mxu1  ;;  %v1533_v10 = vpop.f32.mrb[7].mxu0  ;;  %v2801_v14 = vld [vmem:[#allocation2 + $0x11] ss:$2 sm:$0xff] }
  0xf1   : > { %2673 = vst.msk [vmem:[#allocation2 + $0x438] sm:$0xff] %vm2537_vm3, %v4773_v9  ;;  %2543 = vst.msk [vmem:[#allocation2 + $0x28] sm:$0xff] %vm2537_vm3, %v1533_v10  ;;  %v2045_v11 = vpop.f32.mrb[7].mxu1  ;;  %v3395_v18 = vld [vmem:[#allocation2 + $0x410] ss:$2 sm:$0xff]  ;;  %v2803_v28 = vmax.f32 %v2797_v13, %v2801_v14 }
  0xf2   : > { %4751 = vmatmul.mubr.msk.bf16.gmra.mrb[112].mxu0 %vm1088_vm2, %v5023_v3  ;;  %2671 = vst.msk [vmem:[#allocation2 + $0x428] sm:$0xff] %vm2537_vm3, %v2045_v11  ;;  %v3399_v19 = vld [vmem:[#allocation2 + $0x411] ss:$2 sm:$0xff]  ;;  %v2795_v29 = vld [vmem:[#allocation2] ss:$2 sm:$0xff] }
  0xf3   : > { %4879 = vmatmul.mubr.msk.bf16.gmra.mrb[112].mxu1 %vm1088_vm2, %v5024_v6  ;;  %4754 = vmatprep.mubr.msk.bf16.mxu0 %vm1088_vm2, %v5025_v7  ;;  %v2799_v30 = vld [vmem:[#allocation2 + $0x1] ss:$2 sm:$0xff]  ;;  %v3393_v34 = vld [vmem:[#allocation2 + $0x400] ss:$2 sm:$0xff]  ;;  %v3401_v41 = vmax.f32 %v3395_v18, %v3399_v19  ;;  %v5034_v3 = vld [vmem:[%s5087_s22 + $0x3f0] sm:$0xff]  }
  0xf4   : > { %4882 = vmatprep.mubr.msk.bf16.mxu1 %vm1088_vm2, %v5026_v8  ;;  %v3397_v35 = vld [vmem:[#allocation2 + $0x401] ss:$2 sm:$0xff]  ;;  %v2802_v42 = vmax.f32 %v2795_v29, %v2799_v30  ;;  %v5036_v19 = vld [vmem:[%s5087_s22 + $0x3f8] sm:$0xff]  }
  0xf5   : > { %v4648_v15 = vpop.f32.mrb[8].mxu0  ;;  %v3400_v47 = vmax.f32 %v3393_v34, %v3397_v35 }
  0xf6   : > { %2548 = vst.msk [vmem:[#allocation2 + $0x50] sm:$0xff] %vm2537_vm3, %v4648_v15  ;;  %v4776_v20 = vpop.f32.mrb[8].mxu1  ;;  %v1546_v21 = vpop.f32.mrb[9].mxu0  ;;  %v5035_v15 = vld [vmem:[%s5087_s22 + $0x1f8] sm:$0xff]  }
  0xf7   : > { %v2807_v24 = vld [vmem:[#allocation2 + $0x30] ss:$2 sm:$0xff]  ;;  %v2811_v25 = vld [vmem:[#allocation2 + $0x31] ss:$2 sm:$0xff]  ;;  %2676 = vst.msk [vmem:[#allocation2 + $0x450] sm:$0xff] %vm2537_vm3, %v4776_v20  ;;  %2546 = vst.msk [vmem:[#allocation2 + $0x40] sm:$0xff] %vm2537_vm3, %v1546_v21 }
  0xf8   : > { %v2058_v26 = vpop.f32.mrb[9].mxu1  ;;  %v4649_v27 = vpop.f32.mrb[10].mxu0  ;;  %v2813_v31 = vmax.f32 %v2807_v24, %v2811_v25  ;;  %v3405_v38 = vld [vmem:[#allocation2 + $0x430] ss:$2 sm:$0xff]  ;;  %v3409_v39 = vld [vmem:[#allocation2 + $0x431] ss:$2 sm:$0xff] }
  0xf9   : > { %2674 = vst.msk [vmem:[#allocation2 + $0x440] sm:$0xff] %vm2537_vm3, %v2058_v26  ;;  %2549 = vst.msk [vmem:[#allocation2 + $0x58] sm:$0xff] %vm2537_vm3, %v4649_v27  ;;  %v4777_v32 = vpop.f32.mrb[10].mxu1  ;;  %v1549_v33 = vpop.f32.mrb[11].mxu0  ;;  %v2805_v40 = vld [vmem:[#allocation2 + $0x20] ss:$2 sm:$0xff]  ;;  %v3411_v43 = vmax.f32 %v3405_v38, %v3409_v39 }
  0xfa   : > { %2677 = vst.msk [vmem:[#allocation2 + $0x458] sm:$0xff] %vm2537_vm3, %v4777_v32  ;;  %2547 = vst.msk [vmem:[#allocation2 + $0x48] sm:$0xff] %vm2537_vm3, %v1549_v33  ;;  %v2061_v36 = vpop.f32.mrb[11].mxu1  ;;  %v2815_v37 = vmax.f32 %v2803_v28, %v2813_v31  ;;  %4755 = vmatmul.mubr.msk.bf16.gmra.mrb[116].mxu0 %vm1088_vm2, %v5027_v12  ;;  %v2809_v44 = vld [vmem:[#allocation2 + $0x21] ss:$2 sm:$0xff] }
  0xfb   : > { %2675 = vst.msk [vmem:[#allocation2 + $0x448] sm:$0xff] %vm2537_vm3, %v2061_v36  ;;  %v3403_v45 = vld [vmem:[#allocation2 + $0x420] ss:$2 sm:$0xff]  ;;  %v3407_v46 = vld [vmem:[#allocation2 + $0x421] ss:$2 sm:$0xff]  ;;  %4883 = vmatmul.mubr.msk.bf16.gmra.mrb[116].mxu1 %vm1088_vm2, %v5028_v16  ;;  %4758 = vmatprep.mubr.msk.bf16.mxu0 %vm1088_vm2, %v5029_v17  ;;  %v2812_v49 = vmax.f32 %v2805_v40, %v2809_v44  ;;  %v3413_v51 = vmax.f32 %v3401_v41, %v3411_v43 }
  0xfc   : > { %v2823_v48 = vadd.f32 %v5353_v23, %v2815_v37  ;;  %v3410_v50 = vmax.f32 %v3403_v45, %v3407_v46  ;;  %4886 = vmatprep.mubr.msk.bf16.mxu1 %vm1088_vm2, %v5030_v22 }
  0xfd   : > { %v4652_v52 = vpop.f32.mrb[12].mxu0  ;;  %v2814_v54 = vmax.f32 %v2802_v42, %v2812_v49  ;;  %v3415_v59 = vadd.f32 %v5353_v23, %v3413_v51 }
  0xfe   : > { %v2825_v53 = vmax.f32 %v2823_v48, 0.0  ;;  %v3412_v55 = vmax.f32 %v3400_v47, %v3410_v50  ;;  %2552 = vst.msk [vmem:[#allocation2 + $0x70] sm:$0xff] %vm2537_vm3, %v4652_v52  ;;  %v4780_v56 = vpop.f32.mrb[12].mxu1  ;;  %v1562_v57 = vpop.f32.mrb[13].mxu0 }
  0xff   : > { %2680 = vst.msk [vmem:[#allocation2 + $0x470] sm:$0xff] %vm2537_vm3, %v4780_v56  ;;  %2550 = vst.msk [vmem:[#allocation2 + $0x60] sm:$0xff] %vm2537_vm3, %v1562_v57  ;;  %v2074_v60 = vpop.f32.mrb[13].mxu1  ;;  %v4653_v61 = vpop.f32.mrb[14].mxu0  ;;  %v2822_v1 = vadd.f32 %v5353_v23, %v2814_v54  ;;  %v3417_v4 = vmax.f32 %v3415_v59, 0.0 }
 0x100   : > { %v4441_v0 = vpack.c.bf16 %v2825_v53, %v2825_v53  ;;  %v3414_v2 = vadd.f32 %v5353_v23, %v3412_v55  ;;  %2678 = vst.msk [vmem:[#allocation2 + $0x460] sm:$0xff] %vm2537_vm3, %v2074_v60  ;;  %2553 = vst.msk [vmem:[#allocation2 + $0x78] sm:$0xff] %vm2537_vm3, %v4653_v61  ;;  %v4781_v5 = vpop.f32.mrb[14].mxu1  ;;  %v1565_v8 = vpop.f32.mrb[15].mxu0  ;;  %v2840_v13 = vld [vmem:[#allocation2 + $0x50] ss:$2 sm:$0xff] }
 0x101   : > { %v2824_v6 = vmax.f32 %v2822_v1, 0.0  ;;  %2681 = vst.msk [vmem:[#allocation2 + $0x478] sm:$0xff] %vm2537_vm3, %v4781_v5  ;;  %v2077_v9 = vpop.f32.mrb[15].mxu1  ;;  %v4473_v10 = vpack.c.bf16 %v3417_v4, %v3417_v4  ;;  %2551 = vst.msk [vmem:[#allocation2 + $0x68] sm:$0xff] %vm2537_vm3, %v1565_v8  ;;  %v2844_v14 = vld [vmem:[#allocation2 + $0x51] ss:$2 sm:$0xff] }
 0x102   : > { %2836 = vst.msk [vmem:[%s5373_s29 + $0x4] sm:$0xf] %vm2834_vm4, %v4441_v0  ;;  %v3416_v7 = vmax.f32 %v3414_v2, 0.0  ;;  %4759 = vmatmul.mubr.msk.bf16.gmra.mrb[120].mxu0 %vm1088_vm2, %v5031_v58  ;;  %v3432_v16 = vld [vmem:[#allocation2 + $0x450] ss:$2 sm:$0xff]  ;;  %v2846_v29 = vmax.f32 %v2840_v13, %v2844_v14 }
 0x103   : > { %2679 = vst.msk [vmem:[#allocation2 + $0x468] sm:$0xff] %vm2537_vm3, %v2077_v9  ;;  %4887 = vmatmul.mubr.msk.bf16.gmra.mrb[120].mxu1 %vm1088_vm2, %v5032_v62  ;;  %4762 = vmatprep.mubr.msk.bf16.mxu0 %vm1088_vm2, %v5033_v63  ;;  %v4440_v11 = vpack.c.bf16 %v2824_v6, %v2824_v6  ;;  %v3436_v17 = vld [vmem:[#allocation2 + $0x451] ss:$2 sm:$0xff]  ;;  %v2838_v20 = vld [vmem:[#allocation2 + $0x40] ss:$2 sm:$0xff] }
 0x104   : > { %v4472_v12 = vpack.c.bf16 %v3416_v7, %v3416_v7  ;;  %4890 = vmatprep.mubr.msk.bf16.mxu1 %vm1088_vm2, %v5034_v3  ;;  %4376 = vst.msk [vmem:[%s5373_s29 + $0x84] sm:$0xf] %vm2834_vm4, %v4473_v10  ;;  %v2842_v21 = vld [vmem:[#allocation2 + $0x41] ss:$2 sm:$0xff]  ;;  %v3430_v30 = vld [vmem:[#allocation2 + $0x440] ss:$2 sm:$0xff]  ;;  %v3438_v38 = vmax.f32 %v3432_v16, %v3436_v17 }
 0x105   : > { %v4656_v18 = vpop.f32.mrb[16].mxu0  ;;  %2835 = vst.msk [vmem:[%s5373_s29] sm:$0xf] %vm2834_vm4, %v4440_v11  ;;  %v3434_v31 = vld [vmem:[#allocation2 + $0x441] ss:$2 sm:$0xff]  ;;  %v2845_v44 = vmax.f32 %v2838_v20, %v2842_v21 }
 0x106   : > { %2556 = vst.msk [vmem:[#allocation2 + $0x90] sm:$0xff] %vm2537_vm3, %v4656_v18  ;;  %v4784_v22 = vpop.f32.mrb[16].mxu1  ;;  %v1578_v24 = vpop.f32.mrb[17].mxu0  ;;  %v3437_v47 = vmax.f32 %v3430_v30, %v3434_v31 }
 0x107   : > { %4375 = vst.msk [vmem:[%s5373_s29 + $0x80] sm:$0xf] %vm2834_vm4, %v4472_v12  ;;  %v2850_v25 = vld [vmem:[#allocation2 + $0x70] ss:$2 sm:$0xff]  ;;  %v2854_v26 = vld [vmem:[#allocation2 + $0x71] ss:$2 sm:$0xff] }
 0x108   : > { %2684 = vst.msk [vmem:[#allocation2 + $0x490] sm:$0xff] %vm2537_vm3, %v4784_v22  ;;  %2554 = vst.msk [vmem:[#allocation2 + $0x80] sm:$0xff] %vm2537_vm3, %v1578_v24  ;;  %v2090_v27 = vpop.f32.mrb[17].mxu1  ;;  %v4657_v28 = vpop.f32.mrb[18].mxu0  ;;  %v2856_v32 = vmax.f32 %v2850_v25, %v2854_v26  ;;  %v3442_v35 = vld [vmem:[#allocation2 + $0x470] ss:$2 sm:$0xff] }
 0x109   : > { %2682 = vst.msk [vmem:[#allocation2 + $0x480] sm:$0xff] %vm2537_vm3, %v2090_v27  ;;  %2557 = vst.msk [vmem:[#allocation2 + $0x98] sm:$0xff] %vm2537_vm3, %v4657_v28  ;;  %v4785_v33 = vpop.f32.mrb[18].mxu1  ;;  %v1581_v34 = vpop.f32.mrb[19].mxu0  ;;  %v3446_v36 = vld [vmem:[#allocation2 + $0x471] ss:$2 sm:$0xff] }
 0x10a   : > { %2685 = vst.msk [vmem:[#allocation2 + $0x498] sm:$0xff] %vm2537_vm3, %v4785_v33  ;;  %2555 = vst.msk [vmem:[#allocation2 + $0x88] sm:$0xff] %vm2537_vm3, %v1581_v34  ;;  %v2093_v37 = vpop.f32.mrb[19].mxu1  ;;  %v2858_v39 = vmax.f32 %v2846_v29, %v2856_v32  ;;  %v3448_v40 = vmax.f32 %v3442_v35, %v3446_v36  ;;  %v2848_v41 = vld [vmem:[#allocation2 + $0x60] ss:$2 sm:$0xff]  ;;  %4763 = vmatmul.mubr.msk.bf16.gmra.mrb[124].mxu0 %vm1088_vm2, %v5035_v15 }
 0x10b   : > { %v2852_v42 = vld [vmem:[#allocation2 + $0x61] ss:$2 sm:$0xff]  ;;  %v3440_v43 = vld [vmem:[#allocation2 + $0x460] ss:$2 sm:$0xff]  ;;  %2683 = vst.msk [vmem:[#allocation2 + $0x488] sm:$0xff] %vm2537_vm3, %v2093_v37  ;;  %4891 = vmatmul.mubr.msk.bf16.gmra.mrb[124].mxu1 %vm1088_vm2, %v5036_v19 }
 0x10c   : > { %v2855_v45 = vmax.f32 %v2848_v41, %v2852_v42  ;;  %v3444_v46 = vld [vmem:[#allocation2 + $0x461] ss:$2 sm:$0xff]  ;;  %v2860_v48 = vadd.f32 %v5353_v23, %v2858_v39  ;;  %v3450_v49 = vmax.f32 %v3438_v38, %v3448_v40 }
 0x10d   : > { %v3447_v50 = vmax.f32 %v3440_v43, %v3444_v46  ;;  %v4660_v52 = vpop.f32.mrb[20].mxu0 }
 0x10e   : > { %v2857_v51 = vmax.f32 %v2845_v44, %v2855_v45  ;;  %v2862_v53 = vmax.f32 %v2860_v48, 0.0  ;;  %v3452_v54 = vadd.f32 %v5353_v23, %v3450_v49  ;;  %2560 = vst.msk [vmem:[#allocation2 + $0xb0] sm:$0xff] %vm2537_vm3, %v4660_v52  ;;  %v4788_v56 = vpop.f32.mrb[20].mxu1  ;;  %v1594_v57 = vpop.f32.mrb[21].mxu0 }
 0x10f   : > { %v3449_v55 = vmax.f32 %v3437_v47, %v3447_v50  ;;  %2688 = vst.msk [vmem:[#allocation2 + $0x4b0] sm:$0xff] %vm2537_vm3, %v4788_v56  ;;  %2558 = vst.msk [vmem:[#allocation2 + $0xa0] sm:$0xff] %vm2537_vm3, %v1594_v57  ;;  %v2106_v59 = vpop.f32.mrb[21].mxu1  ;;  %v4661_v60 = vpop.f32.mrb[22].mxu0 }
 0x110   : > { %v2859_v58 = vadd.f32 %v5353_v23, %v2857_v51  ;;  %v4443_v61 = vpack.c.bf16 %v2862_v53, %v2862_v53  ;;  %v3454_v62 = vmax.f32 %v3452_v54, 0.0  ;;  %2686 = vst.msk [vmem:[#allocation2 + $0x4a0] sm:$0xff] %vm2537_vm3, %v2106_v59  ;;  %2561 = vst.msk [vmem:[#allocation2 + $0xb8] sm:$0xff] %vm2537_vm3, %v4661_v60  ;;  %v4789_v0 = vpop.f32.mrb[22].mxu1  ;;  %v1597_v2 = vpop.f32.mrb[23].mxu0 }
 0x111   : > { %v3451_v63 = vadd.f32 %v5353_v23, %v3449_v55  ;;  %2689 = vst.msk [vmem:[#allocation2 + $0x4b8] sm:$0xff] %vm2537_vm3, %v4789_v0  ;;  %2559 = vst.msk [vmem:[#allocation2 + $0xa8] sm:$0xff] %vm2537_vm3, %v1597_v2  ;;  %v2109_v5 = vpop.f32.mrb[23].mxu1  ;;  %v2877_v7 = vld [vmem:[#allocation2 + $0x90] ss:$2 sm:$0xff] }
 0x112   : > { %v2861_v1 = vmax.f32 %v2859_v58, 0.0  ;;  %4316 = vst.msk [vmem:[%s5373_s29 + $0xc] sm:$0xf] %vm2834_vm4, %v4443_v61  ;;  %v4475_v3 = vpack.c.bf16 %v3454_v62, %v3454_v62  ;;  %v2881_v9 = vld [vmem:[#allocation2 + $0x91] ss:$2 sm:$0xff] }
 0x113   : > { %v3453_v4 = vmax.f32 %v3451_v63, 0.0  ;;  %2687 = vst.msk [vmem:[#allocation2 + $0x4a8] sm:$0xff] %vm2537_vm3, %v2109_v5  ;;  %v3469_v10 = vld [vmem:[#allocation2 + $0x490] ss:$2 sm:$0xff]  ;;  %v3473_v11 = vld [vmem:[#allocation2 + $0x491] ss:$2 sm:$0xff]  ;;  %v2883_v24 = vmax.f32 %v2877_v7, %v2881_v9 }
 0x114   : > { %v4442_v6 = vpack.c.bf16 %v2861_v1, %v2861_v1  ;;  %4380 = vst.msk [vmem:[%s5373_s29 + $0x8c] sm:$0xf] %vm2834_vm4, %v4475_v3  ;;  %v2875_v12 = vld [vmem:[#allocation2 + $0x80] ss:$2 sm:$0xff]  ;;  %v2879_v13 = vld [vmem:[#allocation2 + $0x81] ss:$2 sm:$0xff]  ;;  %v3475_v30 = vmax.f32 %v3469_v10, %v3473_v11 }
 0x115   : > { %v4474_v8 = vpack.c.bf16 %v3453_v4, %v3453_v4  ;;  %v4664_v14 = vpop.f32.mrb[24].mxu0  ;;  %v3467_v15 = vld [vmem:[#allocation2 + $0x480] ss:$2 sm:$0xff]  ;;  %v3471_v16 = vld [vmem:[#allocation2 + $0x481] ss:$2 sm:$0xff]  ;;  %v2882_v35 = vmax.f32 %v2875_v12, %v2879_v13 }
 0x116   : > { %4315 = vst.msk [vmem:[%s5373_s29 + $0x8] sm:$0xf] %vm2834_vm4, %v4442_v6  ;;  %v4792_v17 = vpop.f32.mrb[24].mxu1  ;;  %v1610_v18 = vpop.f32.mrb[25].mxu0  ;;  %v3474_v40 = vmax.f32 %v3467_v15, %v3471_v16 }
 0x117   : > { %4379 = vst.msk [vmem:[%s5373_s29 + $0x88] sm:$0xf] %vm2834_vm4, %v4474_v8  ;;  %v2887_v19 = vld [vmem:[#allocation2 + $0xb0] ss:$2 sm:$0xff]  ;;  %v2891_v20 = vld [vmem:[#allocation2 + $0xb1] ss:$2 sm:$0xff] }
 0x118   : > { %2564 = vst.msk [vmem:[#allocation2 + $0xd0] sm:$0xff] %vm2537_vm3, %v4664_v14  ;;  %2692 = vst.msk [vmem:[#allocation2 + $0x4d0] sm:$0xff] %vm2537_vm3, %v4792_v17  ;;  %v2122_v21 = vpop.f32.mrb[25].mxu1  ;;  %v4665_v22 = vpop.f32.mrb[26].mxu0  ;;  %v2893_v25 = vmax.f32 %v2887_v19, %v2891_v20  ;;  %v3479_v26 = vld [vmem:[#allocation2 + $0x4b0] ss:$2 sm:$0xff] }
 0x119   : > { %2562 = vst.msk [vmem:[#allocation2 + $0xc0] sm:$0xff] %vm2537_vm3, %v1610_v18  ;;  %v3483_v27 = vld [vmem:[#allocation2 + $0x4b1] ss:$2 sm:$0xff]  ;;  %2690 = vst.msk [vmem:[#allocation2 + $0x4c0] sm:$0xff] %vm2537_vm3, %v2122_v21  ;;  %v4793_v28 = vpop.f32.mrb[26].mxu1  ;;  %v1613_v29 = vpop.f32.mrb[27].mxu0 }
 0x11a   : > { %2565 = vst.msk [vmem:[#allocation2 + $0xd8] sm:$0xff] %vm2537_vm3, %v4665_v22  ;;  %v3485_v31 = vmax.f32 %v3479_v26, %v3483_v27  ;;  %v2885_v32 = vld [vmem:[#allocation2 + $0xa0] ss:$2 sm:$0xff]  ;;  %v2889_v33 = vld [vmem:[#allocation2 + $0xa1] ss:$2 sm:$0xff]  ;;  %2693 = vst.msk [vmem:[#allocation2 + $0x4d8] sm:$0xff] %vm2537_vm3, %v4793_v28  ;;  %v2895_v36 = vmax.f32 %v2883_v24, %v2893_v25 }
 0x11b   : > { %2563 = vst.msk [vmem:[#allocation2 + $0xc8] sm:$0xff] %vm2537_vm3, %v1613_v29  ;;  %v2125_v34 = vpop.f32.mrb[27].mxu1  ;;  %v2892_v37 = vmax.f32 %v2885_v32, %v2889_v33  ;;  %v3477_v38 = vld [vmem:[#allocation2 + $0x4a0] ss:$2 sm:$0xff]  ;;  %v3481_v39 = vld [vmem:[#allocation2 + $0x4a1] ss:$2 sm:$0xff] }
 0x11c   : > { %2691 = vst.msk [vmem:[#allocation2 + $0x4c8] sm:$0xff] %vm2537_vm3, %v2125_v34  ;;  %v3487_v41 = vmax.f32 %v3475_v30, %v3485_v31  ;;  %v3484_v42 = vmax.f32 %v3477_v38, %v3481_v39  ;;  %v2897_v43 = vadd.f32 %v5353_v23, %v2895_v36 }
 0x11d   : > { %v2894_v44 = vmax.f32 %v2882_v35, %v2892_v37  ;;  %v4668_v47 = vpop.f32.mrb[28].mxu0 }
 0x11e   : > { %v3489_v45 = vadd.f32 %v5353_v23, %v3487_v41  ;;  %v3486_v46 = vmax.f32 %v3474_v40, %v3484_v42  ;;  %v2899_v48 = vmax.f32 %v2897_v43, 0.0  ;;  %2568 = vst.msk [vmem:[#allocation2 + $0xf0] sm:$0xff] %vm2537_vm3, %v4668_v47  ;;  %v4796_v50 = vpop.f32.mrb[28].mxu1  ;;  %v1626_v51 = vpop.f32.mrb[29].mxu0 }
 0x11f   : > { %v2896_v49 = vadd.f32 %v5353_v23, %v2894_v44  ;;  %2696 = vst.msk [vmem:[#allocation2 + $0x4f0] sm:$0xff] %vm2537_vm3, %v4796_v50  ;;  %2566 = vst.msk [vmem:[#allocation2 + $0xe0] sm:$0xff] %vm2537_vm3, %v1626_v51  ;;  %v2138_v54 = vpop.f32.mrb[29].mxu1  ;;  %v4669_v57 = vpop.f32.mrb[30].mxu0 }
 0x120   : > { %v3491_v52 = vmax.f32 %v3489_v45, 0.0  ;;  %v3488_v53 = vadd.f32 %v5353_v23, %v3486_v46  ;;  %v4445_v55 = vpack.c.bf16 %v2899_v48, %v2899_v48  ;;  %2694 = vst.msk [vmem:[#allocation2 + $0x4e0] sm:$0xff] %vm2537_vm3, %v2138_v54  ;;  %2569 = vst.msk [vmem:[#allocation2 + $0xf8] sm:$0xff] %vm2537_vm3, %v4669_v57  ;;  %v4797_v60 = vpop.f32.mrb[30].mxu1  ;;  %v1629_v62 = vpop.f32.mrb[31].mxu0 }
 0x121   : > { %v2898_v56 = vmax.f32 %v2896_v49, 0.0  ;;  %2697 = vst.msk [vmem:[#allocation2 + $0x4f8] sm:$0xff] %vm2537_vm3, %v4797_v60  ;;  %v2141_v63 = vpop.f32.mrb[31].mxu1  ;;  %2567 = vst.msk [vmem:[#allocation2 + $0xe8] sm:$0xff] %vm2537_vm3, %v1629_v62  ;;  %v2914_v1 = vld [vmem:[#allocation2 + $0xd0] ss:$2 sm:$0xff] }
 0x122   : > { %v4477_v58 = vpack.c.bf16 %v3491_v52, %v3491_v52  ;;  %v3490_v59 = vmax.f32 %v3488_v53, 0.0  ;;  %4320 = vst.msk [vmem:[%s5373_s29 + $0x14] sm:$0xf] %vm2834_vm4, %v4445_v55  ;;  %v2918_v2 = vld [vmem:[#allocation2 + $0xd1] ss:$2 sm:$0xff] }
 0x123   : > { %v4444_v61 = vpack.c.bf16 %v2898_v56, %v2898_v56  ;;  %2695 = vst.msk [vmem:[#allocation2 + $0x4e8] sm:$0xff] %vm2537_vm3, %v2141_v63  ;;  %v3506_v3 = vld [vmem:[#allocation2 + $0x4d0] ss:$2 sm:$0xff]  ;;  %v3510_v4 = vld [vmem:[#allocation2 + $0x4d1] ss:$2 sm:$0xff]  ;;  %v2920_v18 = vmax.f32 %v2914_v1, %v2918_v2 }
 0x124   : > { %4384 = vst.msk [vmem:[%s5373_s29 + $0x94] sm:$0xf] %vm2834_vm4, %v4477_v58  ;;  %v4476_v0 = vpack.c.bf16 %v3490_v59, %v3490_v59  ;;  %v2912_v6 = vld [vmem:[#allocation2 + $0xc0] ss:$2 sm:$0xff]  ;;  %v2916_v7 = vld [vmem:[#allocation2 + $0xc1] ss:$2 sm:$0xff]  ;;  %v3512_v24 = vmax.f32 %v3506_v3, %v3510_v4 }
 0x125   : > { %4319 = vst.msk [vmem:[%s5373_s29 + $0x10] sm:$0xf] %vm2834_vm4, %v4444_v61  ;;  %v4672_v5 = vpop.f32.mrb[32].mxu0  ;;  %v3504_v10 = vld [vmem:[#allocation2 + $0x4c0] ss:$2 sm:$0xff]  ;;  %v2919_v29 = vmax.f32 %v2912_v6, %v2916_v7 }
 0x126   : > { %4383 = vst.msk [vmem:[%s5373_s29 + $0x90] sm:$0xf] %vm2834_vm4, %v4476_v0  ;;  %v4800_v8 = vpop.f32.mrb[32].mxu1  ;;  %v1642_v9 = vpop.f32.mrb[33].mxu0  ;;  %v3508_v11 = vld [vmem:[#allocation2 + $0x4c1] ss:$2 sm:$0xff] }
 0x127   : > { %2572 = vst.msk [vmem:[#allocation2 + $0x110] sm:$0xff] %vm2537_vm3, %v4672_v5  ;;  %2700 = vst.msk [vmem:[#allocation2 + $0x510] sm:$0xff] %vm2537_vm3, %v4800_v8  ;;  %v2154_v12 = vpop.f32.mrb[33].mxu1  ;;  %v4673_v13 = vpop.f32.mrb[34].mxu0  ;;  %v2924_v14 = vld [vmem:[#allocation2 + $0xf0] ss:$2 sm:$0xff]  ;;  %v3511_v33 = vmax.f32 %v3504_v10, %v3508_v11 }
 0x128   : > { %2570 = vst.msk [vmem:[#allocation2 + $0x100] sm:$0xff] %vm2537_vm3, %v1642_v9  ;;  %v2928_v15 = vld [vmem:[#allocation2 + $0xf1] ss:$2 sm:$0xff]  ;;  %2698 = vst.msk [vmem:[#allocation2 + $0x500] sm:$0xff] %vm2537_vm3, %v2154_v12  ;;  %v4801_v16 = vpop.f32.mrb[34].mxu1  ;;  %v1645_v17 = vpop.f32.mrb[35].mxu0 }
 0x129   : > { %2573 = vst.msk [vmem:[#allocation2 + $0x118] sm:$0xff] %vm2537_vm3, %v4673_v13  ;;  %v2930_v19 = vmax.f32 %v2924_v14, %v2928_v15  ;;  %v3516_v20 = vld [vmem:[#allocation2 + $0x4f0] ss:$2 sm:$0xff]  ;;  %v3520_v21 = vld [vmem:[#allocation2 + $0x4f1] ss:$2 sm:$0xff]  ;;  %2701 = vst.msk [vmem:[#allocation2 + $0x518] sm:$0xff] %vm2537_vm3, %v4801_v16 }
 0x12a   : > { %2571 = vst.msk [vmem:[#allocation2 + $0x108] sm:$0xff] %vm2537_vm3, %v1645_v17  ;;  %v2157_v22 = vpop.f32.mrb[35].mxu1  ;;  %v3522_v25 = vmax.f32 %v3516_v20, %v3520_v21  ;;  %v2922_v26 = vld [vmem:[#allocation2 + $0xe0] ss:$2 sm:$0xff]  ;;  %v2926_v27 = vld [vmem:[#allocation2 + $0xe1] ss:$2 sm:$0xff] }
 0x12b   : > { %v3514_v28 = vld [vmem:[#allocation2 + $0x4e0] ss:$2 sm:$0xff]  ;;  %2699 = vst.msk [vmem:[#allocation2 + $0x508] sm:$0xff] %vm2537_vm3, %v2157_v22  ;;  %v2932_v30 = vmax.f32 %v2920_v18, %v2930_v19  ;;  %v2929_v31 = vmax.f32 %v2922_v26, %v2926_v27  ;;  %v3518_v32 = vld [vmem:[#allocation2 + $0x4e1] ss:$2 sm:$0xff] }
 0x12c   : > { %v3524_v34 = vmax.f32 %v3512_v24, %v3522_v25  ;;  %v3521_v35 = vmax.f32 %v3514_v28, %v3518_v32 }
 0x12d   : > { %v2934_v36 = vadd.f32 %v5353_v23, %v2932_v30  ;;  %v2931_v37 = vmax.f32 %v2919_v29, %v2929_v31  ;;  %v4676_v38 = vpop.f32.mrb[36].mxu0 }
 0x12e   : > { %v3526_v39 = vadd.f32 %v5353_v23, %v3524_v34  ;;  %v3523_v40 = vmax.f32 %v3511_v33, %v3521_v35  ;;  %2576 = vst.msk [vmem:[#allocation2 + $0x130] sm:$0xff] %vm2537_vm3, %v4676_v38  ;;  %v4804_v41 = vpop.f32.mrb[36].mxu1  ;;  %v1658_v42 = vpop.f32.mrb[37].mxu0 }
 0x12f   : > { %v2936_v43 = vmax.f32 %v2934_v36, 0.0  ;;  %v2933_v44 = vadd.f32 %v5353_v23, %v2931_v37  ;;  %2704 = vst.msk [vmem:[#allocation2 + $0x530] sm:$0xff] %vm2537_vm3, %v4804_v41  ;;  %2574 = vst.msk [vmem:[#allocation2 + $0x120] sm:$0xff] %vm2537_vm3, %v1658_v42  ;;  %v2170_v45 = vpop.f32.mrb[37].mxu1  ;;  %v4677_v48 = vpop.f32.mrb[38].mxu0 }
 0x130   : > { %v3528_v46 = vmax.f32 %v3526_v39, 0.0  ;;  %v3525_v47 = vadd.f32 %v5353_v23, %v3523_v40  ;;  %2702 = vst.msk [vmem:[#allocation2 + $0x520] sm:$0xff] %vm2537_vm3, %v2170_v45  ;;  %2577 = vst.msk [vmem:[#allocation2 + $0x138] sm:$0xff] %vm2537_vm3, %v4677_v48  ;;  %v4805_v51 = vpop.f32.mrb[38].mxu1  ;;  %v1661_v54 = vpop.f32.mrb[39].mxu0 }
 0x131   : > { %v4447_v49 = vpack.c.bf16 %v2936_v43, %v2936_v43  ;;  %v2935_v50 = vmax.f32 %v2933_v44, 0.0  ;;  %2705 = vst.msk [vmem:[#allocation2 + $0x538] sm:$0xff] %vm2537_vm3, %v4805_v51  ;;  %2575 = vst.msk [vmem:[#allocation2 + $0x128] sm:$0xff] %vm2537_vm3, %v1661_v54  ;;  %v2173_v56 = vpop.f32.mrb[39].mxu1  ;;  %v2951_v58 = vld [vmem:[#allocation2 + $0x110] ss:$2 sm:$0xff] }
 0x132   : > { %v4479_v52 = vpack.c.bf16 %v3528_v46, %v3528_v46  ;;  %v3527_v53 = vmax.f32 %v3525_v47, 0.0  ;;  %v2955_v59 = vld [vmem:[#allocation2 + $0x111] ss:$2 sm:$0xff]  ;;  %2703 = vst.msk [vmem:[#allocation2 + $0x528] sm:$0xff] %vm2537_vm3, %v2173_v56  ;;  %v3543_v60 = vld [vmem:[#allocation2 + $0x510] ss:$2 sm:$0xff] }
 0x133   : > { %4324 = vst.msk [vmem:[%s5373_s29 + $0x1c] sm:$0xf] %vm2834_vm4, %v4447_v49  ;;  %v4446_v55 = vpack.c.bf16 %v2935_v50, %v2935_v50  ;;  %v3547_v61 = vld [vmem:[#allocation2 + $0x511] ss:$2 sm:$0xff]  ;;  %v2949_v63 = vld [vmem:[#allocation2 + $0x100] ss:$2 sm:$0xff]  ;;  %v2957_v11 = vmax.f32 %v2951_v58, %v2955_v59 }
 0x134   : > { %4388 = vst.msk [vmem:[%s5373_s29 + $0x9c] sm:$0xf] %vm2834_vm4, %v4479_v52  ;;  %v4478_v57 = vpack.c.bf16 %v3527_v53, %v3527_v53  ;;  %v2953_v0 = vld [vmem:[#allocation2 + $0x101] ss:$2 sm:$0xff]  ;;  %v3541_v3 = vld [vmem:[#allocation2 + $0x500] ss:$2 sm:$0xff]  ;;  %v3549_v16 = vmax.f32 %v3543_v60, %v3547_v61 }
 0x135   : > { %4323 = vst.msk [vmem:[%s5373_s29 + $0x18] sm:$0xf] %vm2834_vm4, %v4446_v55  ;;  %v4680_v62 = vpop.f32.mrb[40].mxu0  ;;  %v3545_v4 = vld [vmem:[#allocation2 + $0x501] ss:$2 sm:$0xff]  ;;  %v2956_v20 = vmax.f32 %v2949_v63, %v2953_v0 }
 0x136   : > { %4387 = vst.msk [vmem:[%s5373_s29 + $0x98] sm:$0xf] %vm2834_vm4, %v4478_v57  ;;  %v4808_v1 = vpop.f32.mrb[40].mxu1  ;;  %v1674_v2 = vpop.f32.mrb[41].mxu0  ;;  %v3548_v26 = vmax.f32 %v3541_v3, %v3545_v4 }
 0x137   : > { %2580 = vst.msk [vmem:[#allocation2 + $0x150] sm:$0xff] %vm2537_vm3, %v4680_v62  ;;  %2708 = vst.msk [vmem:[#allocation2 + $0x550] sm:$0xff] %vm2537_vm3, %v4808_v1  ;;  %v2186_v5 = vpop.f32.mrb[41].mxu1  ;;  %v4681_v6 = vpop.f32.mrb[42].mxu0  ;;  %v2961_v7 = vld [vmem:[#allocation2 + $0x130] ss:$2 sm:$0xff] }
 0x138   : > { %2578 = vst.msk [vmem:[#allocation2 + $0x140] sm:$0xff] %vm2537_vm3, %v1674_v2  ;;  %v2965_v8 = vld [vmem:[#allocation2 + $0x131] ss:$2 sm:$0xff]  ;;  %2706 = vst.msk [vmem:[#allocation2 + $0x540] sm:$0xff] %vm2537_vm3, %v2186_v5  ;;  %v4809_v9 = vpop.f32.mrb[42].mxu1  ;;  %v1677_v10 = vpop.f32.mrb[43].mxu0 }
 0x139   : > { %2581 = vst.msk [vmem:[#allocation2 + $0x158] sm:$0xff] %vm2537_vm3, %v4681_v6  ;;  %v2967_v12 = vmax.f32 %v2961_v7, %v2965_v8  ;;  %v3553_v13 = vld [vmem:[#allocation2 + $0x530] ss:$2 sm:$0xff]  ;;  %v3557_v14 = vld [vmem:[#allocation2 + $0x531] ss:$2 sm:$0xff]  ;;  %2709 = vst.msk [vmem:[#allocation2 + $0x558] sm:$0xff] %vm2537_vm3, %v4809_v9 }
 0x13a   : > { %2579 = vst.msk [vmem:[#allocation2 + $0x148] sm:$0xff] %vm2537_vm3, %v1677_v10  ;;  %v2189_v15 = vpop.f32.mrb[43].mxu1  ;;  %v3559_v17 = vmax.f32 %v3553_v13, %v3557_v14  ;;  %v2959_v18 = vld [vmem:[#allocation2 + $0x120] ss:$2 sm:$0xff]  ;;  %v2963_v19 = vld [vmem:[#allocation2 + $0x121] ss:$2 sm:$0xff] }
 0x13b   : > { %2707 = vst.msk [vmem:[#allocation2 + $0x548] sm:$0xff] %vm2537_vm3, %v2189_v15  ;;  %v2969_v21 = vmax.f32 %v2957_v11, %v2967_v12  ;;  %v2966_v22 = vmax.f32 %v2959_v18, %v2963_v19  ;;  %v3551_v24 = vld [vmem:[#allocation2 + $0x520] ss:$2 sm:$0xff]  ;;  %v3555_v25 = vld [vmem:[#allocation2 + $0x521] ss:$2 sm:$0xff] }
 0x13c   : > { %v3561_v27 = vmax.f32 %v3549_v16, %v3559_v17  ;;  %v3558_v28 = vmax.f32 %v3551_v24, %v3555_v25 }
 0x13d   : > { %v2971_v29 = vadd.f32 %v5353_v23, %v2969_v21  ;;  %v2968_v30 = vmax.f32 %v2956_v20, %v2966_v22  ;;  %v4684_v31 = vpop.f32.mrb[44].mxu0 }
 0x13e   : > { %v3563_v32 = vadd.f32 %v5353_v23, %v3561_v27  ;;  %v3560_v33 = vmax.f32 %v3548_v26, %v3558_v28  ;;  %2584 = vst.msk [vmem:[#allocation2 + $0x170] sm:$0xff] %vm2537_vm3, %v4684_v31  ;;  %v4812_v34 = vpop.f32.mrb[44].mxu1  ;;  %v1690_v35 = vpop.f32.mrb[45].mxu0 }
 0x13f   : > { %v2973_v36 = vmax.f32 %v2971_v29, 0.0  ;;  %v2970_v37 = vadd.f32 %v5353_v23, %v2968_v30  ;;  %2712 = vst.msk [vmem:[#allocation2 + $0x570] sm:$0xff] %vm2537_vm3, %v4812_v34  ;;  %2582 = vst.msk [vmem:[#allocation2 + $0x160] sm:$0xff] %vm2537_vm3, %v1690_v35  ;;  %v2202_v38 = vpop.f32.mrb[45].mxu1  ;;  %v4685_v41 = vpop.f32.mrb[46].mxu0 }
 0x140   : > { %v3565_v39 = vmax.f32 %v3563_v32, 0.0  ;;  %v3562_v40 = vadd.f32 %v5353_v23, %v3560_v33  ;;  %2710 = vst.msk [vmem:[#allocation2 + $0x560] sm:$0xff] %vm2537_vm3, %v2202_v38  ;;  %2585 = vst.msk [vmem:[#allocation2 + $0x178] sm:$0xff] %vm2537_vm3, %v4685_v41  ;;  %v4813_v44 = vpop.f32.mrb[46].mxu1  ;;  %v1693_v47 = vpop.f32.mrb[47].mxu0 }
 0x141   : > { %v4449_v42 = vpack.c.bf16 %v2973_v36, %v2973_v36  ;;  %v2972_v43 = vmax.f32 %v2970_v37, 0.0  ;;  %2713 = vst.msk [vmem:[#allocation2 + $0x578] sm:$0xff] %vm2537_vm3, %v4813_v44  ;;  %2583 = vst.msk [vmem:[#allocation2 + $0x168] sm:$0xff] %vm2537_vm3, %v1693_v47  ;;  %v2205_v49 = vpop.f32.mrb[47].mxu1  ;;  %v2988_v51 = vld [vmem:[#allocation2 + $0x150] ss:$2 sm:$0xff] }
 0x142   : > { %v4481_v45 = vpack.c.bf16 %v3565_v39, %v3565_v39  ;;  %v3564_v46 = vmax.f32 %v3562_v40, 0.0  ;;  %v2992_v52 = vld [vmem:[#allocation2 + $0x151] ss:$2 sm:$0xff]  ;;  %2711 = vst.msk [vmem:[#allocation2 + $0x568] sm:$0xff] %vm2537_vm3, %v2205_v49  ;;  %v3580_v53 = vld [vmem:[#allocation2 + $0x550] ss:$2 sm:$0xff] }
 0x143   : > { %4328 = vst.msk [vmem:[%s5373_s29 + $0x24] sm:$0xf] %vm2834_vm4, %v4449_v42  ;;  %v4448_v48 = vpack.c.bf16 %v2972_v43, %v2972_v43  ;;  %v3584_v54 = vld [vmem:[#allocation2 + $0x551] ss:$2 sm:$0xff]  ;;  %v2986_v56 = vld [vmem:[#allocation2 + $0x140] ss:$2 sm:$0xff]  ;;  %v2994_v4 = vmax.f32 %v2988_v51, %v2992_v52 }
 0x144   : > { %4392 = vst.msk [vmem:[%s5373_s29 + $0xa4] sm:$0xf] %vm2834_vm4, %v4481_v45  ;;  %v4480_v50 = vpack.c.bf16 %v3564_v46, %v3564_v46  ;;  %v2990_v57 = vld [vmem:[#allocation2 + $0x141] ss:$2 sm:$0xff]  ;;  %v3578_v60 = vld [vmem:[#allocation2 + $0x540] ss:$2 sm:$0xff]  ;;  %v3586_v9 = vmax.f32 %v3580_v53, %v3584_v54 }
 0x145   : > { %4327 = vst.msk [vmem:[%s5373_s29 + $0x20] sm:$0xf] %vm2834_vm4, %v4448_v48  ;;  %v4688_v55 = vpop.f32.mrb[48].mxu0  ;;  %v3582_v61 = vld [vmem:[#allocation2 + $0x541] ss:$2 sm:$0xff]  ;;  %v2993_v13 = vmax.f32 %v2986_v56, %v2990_v57 }
 0x146   : > { %4391 = vst.msk [vmem:[%s5373_s29 + $0xa0] sm:$0xf] %vm2834_vm4, %v4480_v50  ;;  %v4816_v58 = vpop.f32.mrb[48].mxu1  ;;  %v1706_v59 = vpop.f32.mrb[49].mxu0  ;;  %v3585_v18 = vmax.f32 %v3578_v60, %v3582_v61 }
 0x147   : > { %2588 = vst.msk [vmem:[#allocation2 + $0x190] sm:$0xff] %vm2537_vm3, %v4688_v55  ;;  %2716 = vst.msk [vmem:[#allocation2 + $0x590] sm:$0xff] %vm2537_vm3, %v4816_v58  ;;  %v2218_v62 = vpop.f32.mrb[49].mxu1  ;;  %v4689_v63 = vpop.f32.mrb[50].mxu0  ;;  %v2998_v0 = vld [vmem:[#allocation2 + $0x170] ss:$2 sm:$0xff] }
 0x148   : > { %2586 = vst.msk [vmem:[#allocation2 + $0x180] sm:$0xff] %vm2537_vm3, %v1706_v59  ;;  %v3002_v1 = vld [vmem:[#allocation2 + $0x171] ss:$2 sm:$0xff]  ;;  %2714 = vst.msk [vmem:[#allocation2 + $0x580] sm:$0xff] %vm2537_vm3, %v2218_v62  ;;  %v4817_v2 = vpop.f32.mrb[50].mxu1  ;;  %v1709_v3 = vpop.f32.mrb[51].mxu0 }
 0x149   : > { %2589 = vst.msk [vmem:[#allocation2 + $0x198] sm:$0xff] %vm2537_vm3, %v4689_v63  ;;  %v3004_v5 = vmax.f32 %v2998_v0, %v3002_v1  ;;  %v3590_v6 = vld [vmem:[#allocation2 + $0x570] ss:$2 sm:$0xff]  ;;  %v3594_v7 = vld [vmem:[#allocation2 + $0x571] ss:$2 sm:$0xff]  ;;  %2717 = vst.msk [vmem:[#allocation2 + $0x598] sm:$0xff] %vm2537_vm3, %v4817_v2 }
 0x14a   : > { %2587 = vst.msk [vmem:[#allocation2 + $0x188] sm:$0xff] %vm2537_vm3, %v1709_v3  ;;  %v2221_v8 = vpop.f32.mrb[51].mxu1  ;;  %v3596_v10 = vmax.f32 %v3590_v6, %v3594_v7  ;;  %v2996_v11 = vld [vmem:[#allocation2 + $0x160] ss:$2 sm:$0xff]  ;;  %v3000_v12 = vld [vmem:[#allocation2 + $0x161] ss:$2 sm:$0xff] }
 0x14b   : > { %2715 = vst.msk [vmem:[#allocation2 + $0x588] sm:$0xff] %vm2537_vm3, %v2221_v8  ;;  %v3006_v14 = vmax.f32 %v2994_v4, %v3004_v5  ;;  %v3003_v15 = vmax.f32 %v2996_v11, %v3000_v12  ;;  %v3588_v16 = vld [vmem:[#allocation2 + $0x560] ss:$2 sm:$0xff]  ;;  %v3592_v17 = vld [vmem:[#allocation2 + $0x561] ss:$2 sm:$0xff] }
 0x14c   : > { %v3598_v19 = vmax.f32 %v3586_v9, %v3596_v10  ;;  %v3595_v20 = vmax.f32 %v3588_v16, %v3592_v17  ;;  %v5556_v17 = vld [vmem:[%s5823_s2] ss:$0 sm:$0xff] }
 0x14d   : > { %v3008_v21 = vadd.f32 %v5353_v23, %v3006_v14  ;;  %v3005_v22 = vmax.f32 %v2993_v13, %v3003_v15  ;;  %v4692_v24 = vpop.f32.mrb[52].mxu0 }
 0x14e   : > { %v3600_v25 = vadd.f32 %v5353_v23, %v3598_v19  ;;  %v3597_v26 = vmax.f32 %v3585_v18, %v3595_v20  ;;  %2592 = vst.msk [vmem:[#allocation2 + $0x1b0] sm:$0xff] %vm2537_vm3, %v4692_v24  ;;  %v4820_v27 = vpop.f32.mrb[52].mxu1  ;;  %v1722_v28 = vpop.f32.mrb[53].mxu0 }
 0x14f   : > { %v3010_v29 = vmax.f32 %v3008_v21, 0.0  ;;  %v3007_v30 = vadd.f32 %v5353_v23, %v3005_v22  ;;  %2720 = vst.msk [vmem:[#allocation2 + $0x5b0] sm:$0xff] %vm2537_vm3, %v4820_v27  ;;  %2590 = vst.msk [vmem:[#allocation2 + $0x1a0] sm:$0xff] %vm2537_vm3, %v1722_v28  ;;  %v2234_v31 = vpop.f32.mrb[53].mxu1  ;;  %v4693_v34 = vpop.f32.mrb[54].mxu0 }
 0x150   : > { %v3602_v32 = vmax.f32 %v3600_v25, 0.0  ;;  %v3599_v33 = vadd.f32 %v5353_v23, %v3597_v26  ;;  %2718 = vst.msk [vmem:[#allocation2 + $0x5a0] sm:$0xff] %vm2537_vm3, %v2234_v31  ;;  %2593 = vst.msk [vmem:[#allocation2 + $0x1b8] sm:$0xff] %vm2537_vm3, %v4693_v34  ;;  %v4821_v37 = vpop.f32.mrb[54].mxu1  ;;  %v1725_v40 = vpop.f32.mrb[55].mxu0 }
 0x151   : > { %v4451_v35 = vpack.c.bf16 %v3010_v29, %v3010_v29  ;;  %v3009_v36 = vmax.f32 %v3007_v30, 0.0  ;;  %2721 = vst.msk [vmem:[#allocation2 + $0x5b8] sm:$0xff] %vm2537_vm3, %v4821_v37  ;;  %2591 = vst.msk [vmem:[#allocation2 + $0x1a8] sm:$0xff] %vm2537_vm3, %v1725_v40  ;;  %v2237_v42 = vpop.f32.mrb[55].mxu1  ;;  %v3025_v44 = vld [vmem:[#allocation2 + $0x190] ss:$2 sm:$0xff] }
 0x152   : > { %v4483_v38 = vpack.c.bf16 %v3602_v32, %v3602_v32  ;;  %v3601_v39 = vmax.f32 %v3599_v33, 0.0  ;;  %v3029_v45 = vld [vmem:[#allocation2 + $0x191] ss:$2 sm:$0xff]  ;;  %2719 = vst.msk [vmem:[#allocation2 + $0x5a8] sm:$0xff] %vm2537_vm3, %v2237_v42  ;;  %v3617_v46 = vld [vmem:[#allocation2 + $0x590] ss:$2 sm:$0xff] }
 0x153   : > { %4332 = vst.msk [vmem:[%s5373_s29 + $0x2c] sm:$0xf] %vm2834_vm4, %v4451_v35  ;;  %v4450_v41 = vpack.c.bf16 %v3009_v36, %v3009_v36  ;;  %v3621_v47 = vld [vmem:[#allocation2 + $0x591] ss:$2 sm:$0xff]  ;;  %v3023_v49 = vld [vmem:[#allocation2 + $0x180] ss:$2 sm:$0xff]  ;;  %v3031_v61 = vmax.f32 %v3025_v44, %v3029_v45 }
 0x154   : > { %4396 = vst.msk [vmem:[%s5373_s29 + $0xac] sm:$0xf] %vm2834_vm4, %v4483_v38  ;;  %v4482_v43 = vpack.c.bf16 %v3601_v39, %v3601_v39  ;;  %v3027_v50 = vld [vmem:[#allocation2 + $0x181] ss:$2 sm:$0xff]  ;;  %v3615_v53 = vld [vmem:[#allocation2 + $0x580] ss:$2 sm:$0xff]  ;;  %v3623_v2 = vmax.f32 %v3617_v46, %v3621_v47 }
 0x155   : > { %4331 = vst.msk [vmem:[%s5373_s29 + $0x28] sm:$0xf] %vm2834_vm4, %v4450_v41  ;;  %v4696_v48 = vpop.f32.mrb[56].mxu0  ;;  %v3619_v54 = vld [vmem:[#allocation2 + $0x581] ss:$2 sm:$0xff]  ;;  %v3030_v6 = vmax.f32 %v3023_v49, %v3027_v50 }
 0x156   : > { %4395 = vst.msk [vmem:[%s5373_s29 + $0xa8] sm:$0xf] %vm2834_vm4, %v4482_v43  ;;  %v4824_v51 = vpop.f32.mrb[56].mxu1  ;;  %v1738_v52 = vpop.f32.mrb[57].mxu0  ;;  %v3622_v11 = vmax.f32 %v3615_v53, %v3619_v54 }
 0x157   : > { %2596 = vst.msk [vmem:[#allocation2 + $0x1d0] sm:$0xff] %vm2537_vm3, %v4696_v48  ;;  %2724 = vst.msk [vmem:[#allocation2 + $0x5d0] sm:$0xff] %vm2537_vm3, %v4824_v51  ;;  %v2250_v55 = vpop.f32.mrb[57].mxu1  ;;  %v4697_v56 = vpop.f32.mrb[58].mxu0  ;;  %v3035_v57 = vld [vmem:[#allocation2 + $0x1b0] ss:$2 sm:$0xff] }
 0x158   : > { %2594 = vst.msk [vmem:[#allocation2 + $0x1c0] sm:$0xff] %vm2537_vm3, %v1738_v52  ;;  %v3039_v58 = vld [vmem:[#allocation2 + $0x1b1] ss:$2 sm:$0xff]  ;;  %2722 = vst.msk [vmem:[#allocation2 + $0x5c0] sm:$0xff] %vm2537_vm3, %v2250_v55  ;;  %v4825_v59 = vpop.f32.mrb[58].mxu1  ;;  %v1741_v60 = vpop.f32.mrb[59].mxu0 }
 0x159   : > { %2597 = vst.msk [vmem:[#allocation2 + $0x1d8] sm:$0xff] %vm2537_vm3, %v4697_v56  ;;  %v3041_v62 = vmax.f32 %v3035_v57, %v3039_v58  ;;  %v3627_v63 = vld [vmem:[#allocation2 + $0x5b0] ss:$2 sm:$0xff]  ;;  %v3631_v0 = vld [vmem:[#allocation2 + $0x5b1] ss:$2 sm:$0xff]  ;;  %2725 = vst.msk [vmem:[#allocation2 + $0x5d8] sm:$0xff] %vm2537_vm3, %v4825_v59 }
 0x15a   : > { %2595 = vst.msk [vmem:[#allocation2 + $0x1c8] sm:$0xff] %vm2537_vm3, %v1741_v60  ;;  %v2253_v1 = vpop.f32.mrb[59].mxu1  ;;  %v3633_v3 = vmax.f32 %v3627_v63, %v3631_v0  ;;  %v3033_v4 = vld [vmem:[#allocation2 + $0x1a0] ss:$2 sm:$0xff]  ;;  %v3037_v5 = vld [vmem:[#allocation2 + $0x1a1] ss:$2 sm:$0xff] }
 0x15b   : > { %2723 = vst.msk [vmem:[#allocation2 + $0x5c8] sm:$0xff] %vm2537_vm3, %v2253_v1  ;;  %v3043_v7 = vmax.f32 %v3031_v61, %v3041_v62  ;;  %v3040_v8 = vmax.f32 %v3033_v4, %v3037_v5  ;;  %v3625_v9 = vld [vmem:[#allocation2 + $0x5a0] ss:$2 sm:$0xff]  ;;  %v3629_v10 = vld [vmem:[#allocation2 + $0x5a1] ss:$2 sm:$0xff] }
 0x15c   : > { %v3635_v12 = vmax.f32 %v3623_v2, %v3633_v3  ;;  %v3632_v13 = vmax.f32 %v3625_v9, %v3629_v10 }
 0x15d   : > { %v3045_v14 = vadd.f32 %v5353_v23, %v3043_v7  ;;  %v3042_v15 = vmax.f32 %v3030_v6, %v3040_v8  ;;  %v4700_v16 = vpop.f32.mrb[60].mxu0 }
 0x15e   : > { %v3637_v18 = vadd.f32 %v5556_v17, %v3635_v12  ;;  %v3634_v19 = vmax.f32 %v3622_v11, %v3632_v13  ;;  %2600 = vst.msk [vmem:[#allocation2 + $0x1f0] sm:$0xff] %vm2537_vm3, %v4700_v16  ;;  %v4828_v20 = vpop.f32.mrb[60].mxu1  ;;  %v1754_v21 = vpop.f32.mrb[61].mxu0 }
 0x15f   : > { %v3047_v22 = vmax.f32 %v3045_v14, 0.0  ;;  %v3044_v24 = vadd.f32 %v5556_v17, %v3042_v15  ;;  %2728 = vst.msk [vmem:[#allocation2 + $0x5f0] sm:$0xff] %vm2537_vm3, %v4828_v20  ;;  %2598 = vst.msk [vmem:[#allocation2 + $0x1e0] sm:$0xff] %vm2537_vm3, %v1754_v21  ;;  %v2266_v23 = vpop.f32.mrb[61].mxu1  ;;  %v4701_v27 = vpop.f32.mrb[62].mxu0 }
 0x160   : > { %v3639_v25 = vmax.f32 %v3637_v18, 0.0  ;;  %v3636_v26 = vadd.f32 %v5556_v17, %v3634_v19  ;;  %2726 = vst.msk [vmem:[#allocation2 + $0x5e0] sm:$0xff] %vm2537_vm3, %v2266_v23  ;;  %2601 = vst.msk [vmem:[#allocation2 + $0x1f8] sm:$0xff] %vm2537_vm3, %v4701_v27  ;;  %v4829_v30 = vpop.f32.mrb[62].mxu1  ;;  %v1757_v33 = vpop.f32.mrb[63].mxu0 }
 0x161   : > { %v4453_v28 = vpack.c.bf16 %v3047_v22, %v3047_v22  ;;  %v3046_v29 = vmax.f32 %v3044_v24, 0.0  ;;  %2729 = vst.msk [vmem:[#allocation2 + $0x5f8] sm:$0xff] %vm2537_vm3, %v4829_v30  ;;  %2599 = vst.msk [vmem:[#allocation2 + $0x1e8] sm:$0xff] %vm2537_vm3, %v1757_v33  ;;  %v2269_v35 = vpop.f32.mrb[63].mxu1  ;;  %v3062_v37 = vld [vmem:[#allocation2 + $0x1d0] ss:$2 sm:$0xff] }
 0x162   : > { %v4485_v31 = vpack.c.bf16 %v3639_v25, %v3639_v25  ;;  %v3638_v32 = vmax.f32 %v3636_v26, 0.0  ;;  %v3066_v38 = vld [vmem:[#allocation2 + $0x1d1] ss:$2 sm:$0xff]  ;;  %2727 = vst.msk [vmem:[#allocation2 + $0x5e8] sm:$0xff] %vm2537_vm3, %v2269_v35  ;;  %v3654_v39 = vld [vmem:[#allocation2 + $0x5d0] ss:$2 sm:$0xff] }
 0x163   : > { %4336 = vst.msk [vmem:[%s5373_s29 + $0x34] sm:$0xf] %vm2834_vm4, %v4453_v28  ;;  %v4452_v34 = vpack.c.bf16 %v3046_v29, %v3046_v29  ;;  %v3658_v40 = vld [vmem:[#allocation2 + $0x5d1] ss:$2 sm:$0xff]  ;;  %v3060_v42 = vld [vmem:[#allocation2 + $0x1c0] ss:$2 sm:$0xff]  ;;  %v3068_v54 = vmax.f32 %v3062_v37, %v3066_v38 }
 0x164   : > { %4400 = vst.msk [vmem:[%s5373_s29 + $0xb4] sm:$0xf] %vm2834_vm4, %v4485_v31  ;;  %v4484_v36 = vpack.c.bf16 %v3638_v32, %v3638_v32  ;;  %v3064_v43 = vld [vmem:[#allocation2 + $0x1c1] ss:$2 sm:$0xff]  ;;  %v3652_v46 = vld [vmem:[#allocation2 + $0x5c0] ss:$2 sm:$0xff]  ;;  %v3660_v59 = vmax.f32 %v3654_v39, %v3658_v40 }
 0x165   : > { %4335 = vst.msk [vmem:[%s5373_s29 + $0x30] sm:$0xf] %vm2834_vm4, %v4452_v34  ;;  %v4704_v41 = vpop.f32.mrb[64].mxu0  ;;  %v3656_v47 = vld [vmem:[#allocation2 + $0x5c1] ss:$2 sm:$0xff]  ;;  %v3067_v63 = vmax.f32 %v3060_v42, %v3064_v43 }
 0x166   : > { %4399 = vst.msk [vmem:[%s5373_s29 + $0xb0] sm:$0xf] %vm2834_vm4, %v4484_v36  ;;  %v4832_v44 = vpop.f32.mrb[64].mxu1  ;;  %v1770_v45 = vpop.f32.mrb[65].mxu0  ;;  %v3659_v4 = vmax.f32 %v3652_v46, %v3656_v47 }
 0x167   : > { %2604 = vst.msk [vmem:[#allocation2 + $0x210] sm:$0xff] %vm2537_vm3, %v4704_v41  ;;  %2732 = vst.msk [vmem:[#allocation2 + $0x610] sm:$0xff] %vm2537_vm3, %v4832_v44  ;;  %v2282_v48 = vpop.f32.mrb[65].mxu1  ;;  %v4705_v49 = vpop.f32.mrb[66].mxu0  ;;  %v3072_v50 = vld [vmem:[#allocation2 + $0x1f0] ss:$2 sm:$0xff] }
 0x168   : > { %2602 = vst.msk [vmem:[#allocation2 + $0x200] sm:$0xff] %vm2537_vm3, %v1770_v45  ;;  %v3076_v51 = vld [vmem:[#allocation2 + $0x1f1] ss:$2 sm:$0xff]  ;;  %2730 = vst.msk [vmem:[#allocation2 + $0x600] sm:$0xff] %vm2537_vm3, %v2282_v48  ;;  %v4833_v52 = vpop.f32.mrb[66].mxu1  ;;  %v1773_v53 = vpop.f32.mrb[67].mxu0 }
 0x169   : > { %2605 = vst.msk [vmem:[#allocation2 + $0x218] sm:$0xff] %vm2537_vm3, %v4705_v49  ;;  %v3078_v55 = vmax.f32 %v3072_v50, %v3076_v51  ;;  %v3664_v56 = vld [vmem:[#allocation2 + $0x5f0] ss:$2 sm:$0xff]  ;;  %v3668_v57 = vld [vmem:[#allocation2 + $0x5f1] ss:$2 sm:$0xff]  ;;  %2733 = vst.msk [vmem:[#allocation2 + $0x618] sm:$0xff] %vm2537_vm3, %v4833_v52 }
 0x16a   : > { %2603 = vst.msk [vmem:[#allocation2 + $0x208] sm:$0xff] %vm2537_vm3, %v1773_v53  ;;  %v2285_v58 = vpop.f32.mrb[67].mxu1  ;;  %v3670_v60 = vmax.f32 %v3664_v56, %v3668_v57  ;;  %v3070_v61 = vld [vmem:[#allocation2 + $0x1e0] ss:$2 sm:$0xff]  ;;  %v3074_v62 = vld [vmem:[#allocation2 + $0x1e1] ss:$2 sm:$0xff] }
 0x16b   : > { %2731 = vst.msk [vmem:[#allocation2 + $0x608] sm:$0xff] %vm2537_vm3, %v2285_v58  ;;  %v3080_v0 = vmax.f32 %v3068_v54, %v3078_v55  ;;  %v3077_v1 = vmax.f32 %v3070_v61, %v3074_v62  ;;  %v3662_v2 = vld [vmem:[#allocation2 + $0x5e0] ss:$2 sm:$0xff]  ;;  %v3666_v3 = vld [vmem:[#allocation2 + $0x5e1] ss:$2 sm:$0xff] }
 0x16c   : > { %v3672_v5 = vmax.f32 %v3660_v59, %v3670_v60  ;;  %v3669_v6 = vmax.f32 %v3662_v2, %v3666_v3 }
 0x16d   : > { %v3082_v7 = vadd.f32 %v5556_v17, %v3080_v0  ;;  %v3079_v8 = vmax.f32 %v3067_v63, %v3077_v1  ;;  %v4708_v9 = vpop.f32.mrb[68].mxu0 }
 0x16e   : > { %v3674_v10 = vadd.f32 %v5556_v17, %v3672_v5  ;;  %v3671_v11 = vmax.f32 %v3659_v4, %v3669_v6  ;;  %2608 = vst.msk [vmem:[#allocation2 + $0x230] sm:$0xff] %vm2537_vm3, %v4708_v9  ;;  %v4836_v12 = vpop.f32.mrb[68].mxu1  ;;  %v1786_v13 = vpop.f32.mrb[69].mxu0 }
 0x16f   : > { %v3084_v14 = vmax.f32 %v3082_v7, 0.0  ;;  %v3081_v15 = vadd.f32 %v5556_v17, %v3079_v8  ;;  %2736 = vst.msk [vmem:[#allocation2 + $0x630] sm:$0xff] %vm2537_vm3, %v4836_v12  ;;  %2606 = vst.msk [vmem:[#allocation2 + $0x220] sm:$0xff] %vm2537_vm3, %v1786_v13  ;;  %v2298_v16 = vpop.f32.mrb[69].mxu1  ;;  %v4709_v20 = vpop.f32.mrb[70].mxu0 }
 0x170   : > { %v3676_v18 = vmax.f32 %v3674_v10, 0.0  ;;  %v3673_v19 = vadd.f32 %v5556_v17, %v3671_v11  ;;  %2734 = vst.msk [vmem:[#allocation2 + $0x620] sm:$0xff] %vm2537_vm3, %v2298_v16  ;;  %2609 = vst.msk [vmem:[#allocation2 + $0x238] sm:$0xff] %vm2537_vm3, %v4709_v20  ;;  %v4837_v24 = vpop.f32.mrb[70].mxu1  ;;  %v1789_v26 = vpop.f32.mrb[71].mxu0 }
 0x171   : > { %v4455_v21 = vpack.c.bf16 %v3084_v14, %v3084_v14  ;;  %v3083_v22 = vmax.f32 %v3081_v15, 0.0  ;;  %2737 = vst.msk [vmem:[#allocation2 + $0x638] sm:$0xff] %vm2537_vm3, %v4837_v24  ;;  %2607 = vst.msk [vmem:[#allocation2 + $0x228] sm:$0xff] %vm2537_vm3, %v1789_v26  ;;  %v2301_v28 = vpop.f32.mrb[71].mxu1  ;;  %v3099_v30 = vld [vmem:[#allocation2 + $0x210] ss:$2 sm:$0xff] }
 0x172   : > { %v4487_v23 = vpack.c.bf16 %v3676_v18, %v3676_v18  ;;  %v3675_v25 = vmax.f32 %v3673_v19, 0.0  ;;  %v3103_v31 = vld [vmem:[#allocation2 + $0x211] ss:$2 sm:$0xff]  ;;  %2735 = vst.msk [vmem:[#allocation2 + $0x628] sm:$0xff] %vm2537_vm3, %v2301_v28  ;;  %v3691_v32 = vld [vmem:[#allocation2 + $0x610] ss:$2 sm:$0xff] }
 0x173   : > { %4340 = vst.msk [vmem:[%s5373_s29 + $0x3c] sm:$0xf] %vm2834_vm4, %v4455_v21  ;;  %v4454_v27 = vpack.c.bf16 %v3083_v22, %v3083_v22  ;;  %v3695_v33 = vld [vmem:[#allocation2 + $0x611] ss:$2 sm:$0xff]  ;;  %v3097_v35 = vld [vmem:[#allocation2 + $0x200] ss:$2 sm:$0xff]  ;;  %v3105_v47 = vmax.f32 %v3099_v30, %v3103_v31 }
 0x174   : > { %4404 = vst.msk [vmem:[%s5373_s29 + $0xbc] sm:$0xf] %vm2834_vm4, %v4487_v23  ;;  %v4486_v29 = vpack.c.bf16 %v3675_v25, %v3675_v25  ;;  %v3101_v36 = vld [vmem:[#allocation2 + $0x201] ss:$2 sm:$0xff]  ;;  %v3689_v39 = vld [vmem:[#allocation2 + $0x600] ss:$2 sm:$0xff]  ;;  %v3697_v52 = vmax.f32 %v3691_v32, %v3695_v33 }
 0x175   : > { %4339 = vst.msk [vmem:[%s5373_s29 + $0x38] sm:$0xf] %vm2834_vm4, %v4454_v27  ;;  %v4712_v34 = vpop.f32.mrb[72].mxu0  ;;  %v3693_v40 = vld [vmem:[#allocation2 + $0x601] ss:$2 sm:$0xff]  ;;  %v3104_v56 = vmax.f32 %v3097_v35, %v3101_v36 }
 0x176   : > { %4403 = vst.msk [vmem:[%s5373_s29 + $0xb8] sm:$0xf] %vm2834_vm4, %v4486_v29  ;;  %v4840_v37 = vpop.f32.mrb[72].mxu1  ;;  %v1802_v38 = vpop.f32.mrb[73].mxu0  ;;  %v3696_v61 = vmax.f32 %v3689_v39, %v3693_v40 }
 0x177   : > { %2612 = vst.msk [vmem:[#allocation2 + $0x250] sm:$0xff] %vm2537_vm3, %v4712_v34  ;;  %2740 = vst.msk [vmem:[#allocation2 + $0x650] sm:$0xff] %vm2537_vm3, %v4840_v37  ;;  %v2314_v41 = vpop.f32.mrb[73].mxu1  ;;  %v4713_v42 = vpop.f32.mrb[74].mxu0  ;;  %v3109_v43 = vld [vmem:[#allocation2 + $0x230] ss:$2 sm:$0xff] }
 0x178   : > { %2610 = vst.msk [vmem:[#allocation2 + $0x240] sm:$0xff] %vm2537_vm3, %v1802_v38  ;;  %v3113_v44 = vld [vmem:[#allocation2 + $0x231] ss:$2 sm:$0xff]  ;;  %2738 = vst.msk [vmem:[#allocation2 + $0x640] sm:$0xff] %vm2537_vm3, %v2314_v41  ;;  %v4841_v45 = vpop.f32.mrb[74].mxu1  ;;  %v1805_v46 = vpop.f32.mrb[75].mxu0 }
 0x179   : > { %2613 = vst.msk [vmem:[#allocation2 + $0x258] sm:$0xff] %vm2537_vm3, %v4713_v42  ;;  %v3115_v48 = vmax.f32 %v3109_v43, %v3113_v44  ;;  %v3701_v49 = vld [vmem:[#allocation2 + $0x630] ss:$2 sm:$0xff]  ;;  %v3705_v50 = vld [vmem:[#allocation2 + $0x631] ss:$2 sm:$0xff]  ;;  %2741 = vst.msk [vmem:[#allocation2 + $0x658] sm:$0xff] %vm2537_vm3, %v4841_v45 }
 0x17a   : > { %2611 = vst.msk [vmem:[#allocation2 + $0x248] sm:$0xff] %vm2537_vm3, %v1805_v46  ;;  %v2317_v51 = vpop.f32.mrb[75].mxu1  ;;  %v3707_v53 = vmax.f32 %v3701_v49, %v3705_v50  ;;  %v3107_v54 = vld [vmem:[#allocation2 + $0x220] ss:$2 sm:$0xff]  ;;  %v3111_v55 = vld [vmem:[#allocation2 + $0x221] ss:$2 sm:$0xff] }
 0x17b   : > { %2739 = vst.msk [vmem:[#allocation2 + $0x648] sm:$0xff] %vm2537_vm3, %v2317_v51  ;;  %v3117_v57 = vmax.f32 %v3105_v47, %v3115_v48  ;;  %v3114_v58 = vmax.f32 %v3107_v54, %v3111_v55  ;;  %v3699_v59 = vld [vmem:[#allocation2 + $0x620] ss:$2 sm:$0xff]  ;;  %v3703_v60 = vld [vmem:[#allocation2 + $0x621] ss:$2 sm:$0xff] }
 0x17c   : > { %v3709_v62 = vmax.f32 %v3697_v52, %v3707_v53  ;;  %v3706_v63 = vmax.f32 %v3699_v59, %v3703_v60 }
 0x17d   : > { %v3119_v0 = vadd.f32 %v5556_v17, %v3117_v57  ;;  %v3116_v1 = vmax.f32 %v3104_v56, %v3114_v58  ;;  %v4716_v2 = vpop.f32.mrb[76].mxu0 }
 0x17e   : > { %v3711_v3 = vadd.f32 %v5556_v17, %v3709_v62  ;;  %v3708_v4 = vmax.f32 %v3696_v61, %v3706_v63  ;;  %2616 = vst.msk [vmem:[#allocation2 + $0x270] sm:$0xff] %vm2537_vm3, %v4716_v2  ;;  %v4844_v5 = vpop.f32.mrb[76].mxu1  ;;  %v1818_v6 = vpop.f32.mrb[77].mxu0 }
 0x17f   : > { %v3121_v7 = vmax.f32 %v3119_v0, 0.0  ;;  %v3118_v8 = vadd.f32 %v5556_v17, %v3116_v1  ;;  %2744 = vst.msk [vmem:[#allocation2 + $0x670] sm:$0xff] %vm2537_vm3, %v4844_v5  ;;  %2614 = vst.msk [vmem:[#allocation2 + $0x260] sm:$0xff] %vm2537_vm3, %v1818_v6  ;;  %v2330_v9 = vpop.f32.mrb[77].mxu1  ;;  %v4717_v12 = vpop.f32.mrb[78].mxu0 }
 0x180   : > { %v3713_v10 = vmax.f32 %v3711_v3, 0.0  ;;  %v3710_v11 = vadd.f32 %v5556_v17, %v3708_v4  ;;  %2742 = vst.msk [vmem:[#allocation2 + $0x660] sm:$0xff] %vm2537_vm3, %v2330_v9  ;;  %2617 = vst.msk [vmem:[#allocation2 + $0x278] sm:$0xff] %vm2537_vm3, %v4717_v12  ;;  %v4845_v15 = vpop.f32.mrb[78].mxu1  ;;  %v1821_v19 = vpop.f32.mrb[79].mxu0 }
 0x181   : > { %v4457_v13 = vpack.c.bf16 %v3121_v7, %v3121_v7  ;;  %v3120_v14 = vmax.f32 %v3118_v8, 0.0  ;;  %2745 = vst.msk [vmem:[#allocation2 + $0x678] sm:$0xff] %vm2537_vm3, %v4845_v15  ;;  %2615 = vst.msk [vmem:[#allocation2 + $0x268] sm:$0xff] %vm2537_vm3, %v1821_v19  ;;  %v2333_v21 = vpop.f32.mrb[79].mxu1  ;;  %v3136_v24 = vld [vmem:[#allocation2 + $0x250] ss:$2 sm:$0xff] }
 0x182   : > { %v4489_v16 = vpack.c.bf16 %v3713_v10, %v3713_v10  ;;  %v3712_v18 = vmax.f32 %v3710_v11, 0.0  ;;  %v3140_v23 = vld [vmem:[#allocation2 + $0x251] ss:$2 sm:$0xff]  ;;  %2743 = vst.msk [vmem:[#allocation2 + $0x668] sm:$0xff] %vm2537_vm3, %v2333_v21  ;;  %v3728_v25 = vld [vmem:[#allocation2 + $0x650] ss:$2 sm:$0xff] }
 0x183   : > { %4344 = vst.msk [vmem:[%s5373_s29 + $0x44] sm:$0xf] %vm2834_vm4, %v4457_v13  ;;  %v4456_v20 = vpack.c.bf16 %v3120_v14, %v3120_v14  ;;  %v3732_v26 = vld [vmem:[#allocation2 + $0x651] ss:$2 sm:$0xff]  ;;  %v3134_v28 = vld [vmem:[#allocation2 + $0x240] ss:$2 sm:$0xff]  ;;  %v3142_v40 = vmax.f32 %v3136_v24, %v3140_v23 }
 0x184   : > { %4408 = vst.msk [vmem:[%s5373_s29 + $0xc4] sm:$0xf] %vm2834_vm4, %v4489_v16  ;;  %v4488_v22 = vpack.c.bf16 %v3712_v18, %v3712_v18  ;;  %v3138_v29 = vld [vmem:[#allocation2 + $0x241] ss:$2 sm:$0xff]  ;;  %v3726_v32 = vld [vmem:[#allocation2 + $0x640] ss:$2 sm:$0xff]  ;;  %v3734_v45 = vmax.f32 %v3728_v25, %v3732_v26 }
 0x185   : > { %4343 = vst.msk [vmem:[%s5373_s29 + $0x40] sm:$0xf] %vm2834_vm4, %v4456_v20  ;;  %v4720_v27 = vpop.f32.mrb[80].mxu0  ;;  %v3730_v33 = vld [vmem:[#allocation2 + $0x641] ss:$2 sm:$0xff]  ;;  %v3141_v49 = vmax.f32 %v3134_v28, %v3138_v29 }
 0x186   : > { %4407 = vst.msk [vmem:[%s5373_s29 + $0xc0] sm:$0xf] %vm2834_vm4, %v4488_v22  ;;  %v4848_v30 = vpop.f32.mrb[80].mxu1  ;;  %v1834_v31 = vpop.f32.mrb[81].mxu0  ;;  %v3733_v54 = vmax.f32 %v3726_v32, %v3730_v33 }
 0x187   : > { %2620 = vst.msk [vmem:[#allocation2 + $0x290] sm:$0xff] %vm2537_vm3, %v4720_v27  ;;  %2748 = vst.msk [vmem:[#allocation2 + $0x690] sm:$0xff] %vm2537_vm3, %v4848_v30  ;;  %v2346_v34 = vpop.f32.mrb[81].mxu1  ;;  %v4721_v35 = vpop.f32.mrb[82].mxu0  ;;  %v3146_v36 = vld [vmem:[#allocation2 + $0x270] ss:$2 sm:$0xff] }
 0x188   : > { %2618 = vst.msk [vmem:[#allocation2 + $0x280] sm:$0xff] %vm2537_vm3, %v1834_v31  ;;  %v3150_v37 = vld [vmem:[#allocation2 + $0x271] ss:$2 sm:$0xff]  ;;  %2746 = vst.msk [vmem:[#allocation2 + $0x680] sm:$0xff] %vm2537_vm3, %v2346_v34  ;;  %v4849_v38 = vpop.f32.mrb[82].mxu1  ;;  %v1837_v39 = vpop.f32.mrb[83].mxu0 }
 0x189   : > { %2621 = vst.msk [vmem:[#allocation2 + $0x298] sm:$0xff] %vm2537_vm3, %v4721_v35  ;;  %v3152_v41 = vmax.f32 %v3146_v36, %v3150_v37  ;;  %v3738_v42 = vld [vmem:[#allocation2 + $0x670] ss:$2 sm:$0xff]  ;;  %v3742_v43 = vld [vmem:[#allocation2 + $0x671] ss:$2 sm:$0xff]  ;;  %2749 = vst.msk [vmem:[#allocation2 + $0x698] sm:$0xff] %vm2537_vm3, %v4849_v38 }
 0x18a   : > { %2619 = vst.msk [vmem:[#allocation2 + $0x288] sm:$0xff] %vm2537_vm3, %v1837_v39  ;;  %v2349_v44 = vpop.f32.mrb[83].mxu1  ;;  %v3744_v46 = vmax.f32 %v3738_v42, %v3742_v43  ;;  %v3144_v47 = vld [vmem:[#allocation2 + $0x260] ss:$2 sm:$0xff]  ;;  %v3148_v48 = vld [vmem:[#allocation2 + $0x261] ss:$2 sm:$0xff] }
 0x18b   : > { %2747 = vst.msk [vmem:[#allocation2 + $0x688] sm:$0xff] %vm2537_vm3, %v2349_v44  ;;  %v3154_v50 = vmax.f32 %v3142_v40, %v3152_v41  ;;  %v3151_v51 = vmax.f32 %v3144_v47, %v3148_v48  ;;  %v3736_v52 = vld [vmem:[#allocation2 + $0x660] ss:$2 sm:$0xff]  ;;  %v3740_v53 = vld [vmem:[#allocation2 + $0x661] ss:$2 sm:$0xff] }
 0x18c   : > { %v3746_v55 = vmax.f32 %v3734_v45, %v3744_v46  ;;  %v3743_v56 = vmax.f32 %v3736_v52, %v3740_v53 }
 0x18d   : > { %v3156_v57 = vadd.f32 %v5556_v17, %v3154_v50  ;;  %v3153_v58 = vmax.f32 %v3141_v49, %v3151_v51  ;;  %v4724_v59 = vpop.f32.mrb[84].mxu0 }
 0x18e   : > { %v3748_v60 = vadd.f32 %v5556_v17, %v3746_v55  ;;  %v3745_v61 = vmax.f32 %v3733_v54, %v3743_v56  ;;  %2624 = vst.msk [vmem:[#allocation2 + $0x2b0] sm:$0xff] %vm2537_vm3, %v4724_v59  ;;  %v4852_v62 = vpop.f32.mrb[84].mxu1  ;;  %v1850_v63 = vpop.f32.mrb[85].mxu0 }
 0x18f   : > { %v3158_v0 = vmax.f32 %v3156_v57, 0.0  ;;  %v3155_v1 = vadd.f32 %v5556_v17, %v3153_v58  ;;  %2752 = vst.msk [vmem:[#allocation2 + $0x6b0] sm:$0xff] %vm2537_vm3, %v4852_v62  ;;  %2622 = vst.msk [vmem:[#allocation2 + $0x2a0] sm:$0xff] %vm2537_vm3, %v1850_v63  ;;  %v2362_v2 = vpop.f32.mrb[85].mxu1  ;;  %v4725_v5 = vpop.f32.mrb[86].mxu0 }
 0x190   : > { %v3750_v3 = vmax.f32 %v3748_v60, 0.0  ;;  %v3747_v4 = vadd.f32 %v5556_v17, %v3745_v61  ;;  %2750 = vst.msk [vmem:[#allocation2 + $0x6a0] sm:$0xff] %vm2537_vm3, %v2362_v2  ;;  %2625 = vst.msk [vmem:[#allocation2 + $0x2b8] sm:$0xff] %vm2537_vm3, %v4725_v5  ;;  %v4853_v8 = vpop.f32.mrb[86].mxu1  ;;  %v1853_v11 = vpop.f32.mrb[87].mxu0 }
 0x191   : > { %v4459_v6 = vpack.c.bf16 %v3158_v0, %v3158_v0  ;;  %v3157_v7 = vmax.f32 %v3155_v1, 0.0  ;;  %2753 = vst.msk [vmem:[#allocation2 + $0x6b8] sm:$0xff] %vm2537_vm3, %v4853_v8  ;;  %2623 = vst.msk [vmem:[#allocation2 + $0x2a8] sm:$0xff] %vm2537_vm3, %v1853_v11  ;;  %v2365_v13 = vpop.f32.mrb[87].mxu1  ;;  %v3173_v15 = vld [vmem:[#allocation2 + $0x290] ss:$2 sm:$0xff] }
 0x192   : > { %v4491_v9 = vpack.c.bf16 %v3750_v3, %v3750_v3  ;;  %v3749_v10 = vmax.f32 %v3747_v4, 0.0  ;;  %v3177_v16 = vld [vmem:[#allocation2 + $0x291] ss:$2 sm:$0xff]  ;;  %2751 = vst.msk [vmem:[#allocation2 + $0x6a8] sm:$0xff] %vm2537_vm3, %v2365_v13  ;;  %v3765_v18 = vld [vmem:[#allocation2 + $0x690] ss:$2 sm:$0xff] }
 0x193   : > { %4348 = vst.msk [vmem:[%s5373_s29 + $0x4c] sm:$0xf] %vm2834_vm4, %v4459_v6  ;;  %v4458_v12 = vpack.c.bf16 %v3157_v7, %v3157_v7  ;;  %v3769_v19 = vld [vmem:[#allocation2 + $0x691] ss:$2 sm:$0xff]  ;;  %v3171_v21 = vld [vmem:[#allocation2 + $0x280] ss:$2 sm:$0xff]  ;;  %v3179_v33 = vmax.f32 %v3173_v15, %v3177_v16 }
 0x194   : > { %4412 = vst.msk [vmem:[%s5373_s29 + $0xcc] sm:$0xf] %vm2834_vm4, %v4491_v9  ;;  %v4490_v14 = vpack.c.bf16 %v3749_v10, %v3749_v10  ;;  %v3175_v22 = vld [vmem:[#allocation2 + $0x281] ss:$2 sm:$0xff]  ;;  %v3763_v25 = vld [vmem:[#allocation2 + $0x680] ss:$2 sm:$0xff]  ;;  %v3771_v38 = vmax.f32 %v3765_v18, %v3769_v19 }
 0x195   : > { %4347 = vst.msk [vmem:[%s5373_s29 + $0x48] sm:$0xf] %vm2834_vm4, %v4458_v12  ;;  %v4728_v20 = vpop.f32.mrb[88].mxu0  ;;  %v3767_v26 = vld [vmem:[#allocation2 + $0x681] ss:$2 sm:$0xff]  ;;  %v3178_v42 = vmax.f32 %v3171_v21, %v3175_v22 }
 0x196   : > { %4411 = vst.msk [vmem:[%s5373_s29 + $0xc8] sm:$0xf] %vm2834_vm4, %v4490_v14  ;;  %v4856_v24 = vpop.f32.mrb[88].mxu1  ;;  %v1866_v23 = vpop.f32.mrb[89].mxu0  ;;  %v3770_v47 = vmax.f32 %v3763_v25, %v3767_v26 }
 0x197   : > { %2628 = vst.msk [vmem:[#allocation2 + $0x2d0] sm:$0xff] %vm2537_vm3, %v4728_v20  ;;  %2756 = vst.msk [vmem:[#allocation2 + $0x6d0] sm:$0xff] %vm2537_vm3, %v4856_v24  ;;  %v2378_v27 = vpop.f32.mrb[89].mxu1  ;;  %v4729_v28 = vpop.f32.mrb[90].mxu0  ;;  %v3183_v29 = vld [vmem:[#allocation2 + $0x2b0] ss:$2 sm:$0xff] }
 0x198   : > { %2626 = vst.msk [vmem:[#allocation2 + $0x2c0] sm:$0xff] %vm2537_vm3, %v1866_v23  ;;  %v3187_v30 = vld [vmem:[#allocation2 + $0x2b1] ss:$2 sm:$0xff]  ;;  %2754 = vst.msk [vmem:[#allocation2 + $0x6c0] sm:$0xff] %vm2537_vm3, %v2378_v27  ;;  %v4857_v31 = vpop.f32.mrb[90].mxu1  ;;  %v1869_v32 = vpop.f32.mrb[91].mxu0 }
 0x199   : > { %2629 = vst.msk [vmem:[#allocation2 + $0x2d8] sm:$0xff] %vm2537_vm3, %v4729_v28  ;;  %v3189_v34 = vmax.f32 %v3183_v29, %v3187_v30  ;;  %v3775_v35 = vld [vmem:[#allocation2 + $0x6b0] ss:$2 sm:$0xff]  ;;  %v3779_v36 = vld [vmem:[#allocation2 + $0x6b1] ss:$2 sm:$0xff]  ;;  %2757 = vst.msk [vmem:[#allocation2 + $0x6d8] sm:$0xff] %vm2537_vm3, %v4857_v31 }
 0x19a   : > { %2627 = vst.msk [vmem:[#allocation2 + $0x2c8] sm:$0xff] %vm2537_vm3, %v1869_v32  ;;  %v2381_v37 = vpop.f32.mrb[91].mxu1  ;;  %v3781_v39 = vmax.f32 %v3775_v35, %v3779_v36  ;;  %v3181_v40 = vld [vmem:[#allocation2 + $0x2a0] ss:$2 sm:$0xff]  ;;  %v3185_v41 = vld [vmem:[#allocation2 + $0x2a1] ss:$2 sm:$0xff] }
 0x19b   : > { %2755 = vst.msk [vmem:[#allocation2 + $0x6c8] sm:$0xff] %vm2537_vm3, %v2381_v37  ;;  %v3191_v43 = vmax.f32 %v3179_v33, %v3189_v34  ;;  %v3188_v44 = vmax.f32 %v3181_v40, %v3185_v41  ;;  %v3773_v45 = vld [vmem:[#allocation2 + $0x6a0] ss:$2 sm:$0xff]  ;;  %v3777_v46 = vld [vmem:[#allocation2 + $0x6a1] ss:$2 sm:$0xff] }
 0x19c   : > { %v3783_v48 = vmax.f32 %v3771_v38, %v3781_v39  ;;  %v3780_v49 = vmax.f32 %v3773_v45, %v3777_v46 }
 0x19d   : > { %v3193_v50 = vadd.f32 %v5556_v17, %v3191_v43  ;;  %v3190_v51 = vmax.f32 %v3178_v42, %v3188_v44  ;;  %v4732_v52 = vpop.f32.mrb[92].mxu0 }
 0x19e   : > { %v3785_v53 = vadd.f32 %v5556_v17, %v3783_v48  ;;  %v3782_v54 = vmax.f32 %v3770_v47, %v3780_v49  ;;  %2632 = vst.msk [vmem:[#allocation2 + $0x2f0] sm:$0xff] %vm2537_vm3, %v4732_v52  ;;  %v4860_v55 = vpop.f32.mrb[92].mxu1  ;;  %v1882_v56 = vpop.f32.mrb[93].mxu0 }
 0x19f   : > { %v3195_v57 = vmax.f32 %v3193_v50, 0.0  ;;  %v3192_v58 = vadd.f32 %v5556_v17, %v3190_v51  ;;  %2760 = vst.msk [vmem:[#allocation2 + $0x6f0] sm:$0xff] %vm2537_vm3, %v4860_v55  ;;  %2630 = vst.msk [vmem:[#allocation2 + $0x2e0] sm:$0xff] %vm2537_vm3, %v1882_v56  ;;  %v2394_v59 = vpop.f32.mrb[93].mxu1  ;;  %v4733_v62 = vpop.f32.mrb[94].mxu0 }
 0x1a0   : > { %v3787_v60 = vmax.f32 %v3785_v53, 0.0  ;;  %v3784_v61 = vadd.f32 %v5556_v17, %v3782_v54  ;;  %2758 = vst.msk [vmem:[#allocation2 + $0x6e0] sm:$0xff] %vm2537_vm3, %v2394_v59  ;;  %2633 = vst.msk [vmem:[#allocation2 + $0x2f8] sm:$0xff] %vm2537_vm3, %v4733_v62  ;;  %v4861_v1 = vpop.f32.mrb[94].mxu1  ;;  %v1885_v4 = vpop.f32.mrb[95].mxu0 }
 0x1a1   : > { %v4461_v63 = vpack.c.bf16 %v3195_v57, %v3195_v57  ;;  %v3194_v0 = vmax.f32 %v3192_v58, 0.0  ;;  %2761 = vst.msk [vmem:[#allocation2 + $0x6f8] sm:$0xff] %vm2537_vm3, %v4861_v1  ;;  %2631 = vst.msk [vmem:[#allocation2 + $0x2e8] sm:$0xff] %vm2537_vm3, %v1885_v4  ;;  %v2397_v6 = vpop.f32.mrb[95].mxu1  ;;  %v3210_v8 = vld [vmem:[#allocation2 + $0x2d0] ss:$2 sm:$0xff] }
 0x1a2   : > { %v4493_v2 = vpack.c.bf16 %v3787_v60, %v3787_v60  ;;  %v3786_v3 = vmax.f32 %v3784_v61, 0.0  ;;  %v3214_v9 = vld [vmem:[#allocation2 + $0x2d1] ss:$2 sm:$0xff]  ;;  %2759 = vst.msk [vmem:[#allocation2 + $0x6e8] sm:$0xff] %vm2537_vm3, %v2397_v6  ;;  %v3802_v10 = vld [vmem:[#allocation2 + $0x6d0] ss:$2 sm:$0xff] }
 0x1a3   : > { %4352 = vst.msk [vmem:[%s5373_s29 + $0x54] sm:$0xf] %vm2834_vm4, %v4461_v63  ;;  %v4460_v5 = vpack.c.bf16 %v3194_v0, %v3194_v0  ;;  %v3806_v11 = vld [vmem:[#allocation2 + $0x6d1] ss:$2 sm:$0xff]  ;;  %v3208_v13 = vld [vmem:[#allocation2 + $0x2c0] ss:$2 sm:$0xff]  ;;  %v3216_v26 = vmax.f32 %v3210_v8, %v3214_v9 }
 0x1a4   : > { %4416 = vst.msk [vmem:[%s5373_s29 + $0xd4] sm:$0xf] %vm2834_vm4, %v4493_v2  ;;  %v4492_v7 = vpack.c.bf16 %v3786_v3, %v3786_v3  ;;  %v3212_v14 = vld [vmem:[#allocation2 + $0x2c1] ss:$2 sm:$0xff]  ;;  %v3800_v18 = vld [vmem:[#allocation2 + $0x6c0] ss:$2 sm:$0xff]  ;;  %v3808_v31 = vmax.f32 %v3802_v10, %v3806_v11 }
 0x1a5   : > { %4351 = vst.msk [vmem:[%s5373_s29 + $0x50] sm:$0xf] %vm2834_vm4, %v4460_v5  ;;  %v4736_v12 = vpop.f32.mrb[96].mxu0  ;;  %v3804_v19 = vld [vmem:[#allocation2 + $0x6c1] ss:$2 sm:$0xff]  ;;  %v3215_v35 = vmax.f32 %v3208_v13, %v3212_v14 }
 0x1a6   : > { %4415 = vst.msk [vmem:[%s5373_s29 + $0xd0] sm:$0xf] %vm2834_vm4, %v4492_v7  ;;  %v4864_v15 = vpop.f32.mrb[96].mxu1  ;;  %v1898_v16 = vpop.f32.mrb[97].mxu0  ;;  %v3807_v40 = vmax.f32 %v3800_v18, %v3804_v19 }
 0x1a7   : > { %2636 = vst.msk [vmem:[#allocation2 + $0x310] sm:$0xff] %vm2537_vm3, %v4736_v12  ;;  %2764 = vst.msk [vmem:[#allocation2 + $0x710] sm:$0xff] %vm2537_vm3, %v4864_v15  ;;  %v2410_v20 = vpop.f32.mrb[97].mxu1  ;;  %v4737_v21 = vpop.f32.mrb[98].mxu0  ;;  %v3220_v22 = vld [vmem:[#allocation2 + $0x2f0] ss:$2 sm:$0xff] }
 0x1a8   : > { %2634 = vst.msk [vmem:[#allocation2 + $0x300] sm:$0xff] %vm2537_vm3, %v1898_v16  ;;  %v3224_v24 = vld [vmem:[#allocation2 + $0x2f1] ss:$2 sm:$0xff]  ;;  %2762 = vst.msk [vmem:[#allocation2 + $0x700] sm:$0xff] %vm2537_vm3, %v2410_v20  ;;  %v4865_v23 = vpop.f32.mrb[98].mxu1  ;;  %v1901_v25 = vpop.f32.mrb[99].mxu0 }
 0x1a9   : > { %2637 = vst.msk [vmem:[#allocation2 + $0x318] sm:$0xff] %vm2537_vm3, %v4737_v21  ;;  %v3226_v27 = vmax.f32 %v3220_v22, %v3224_v24  ;;  %v3812_v28 = vld [vmem:[#allocation2 + $0x6f0] ss:$2 sm:$0xff]  ;;  %v3816_v29 = vld [vmem:[#allocation2 + $0x6f1] ss:$2 sm:$0xff]  ;;  %2765 = vst.msk [vmem:[#allocation2 + $0x718] sm:$0xff] %vm2537_vm3, %v4865_v23 }
 0x1aa   : > { %2635 = vst.msk [vmem:[#allocation2 + $0x308] sm:$0xff] %vm2537_vm3, %v1901_v25  ;;  %v2413_v30 = vpop.f32.mrb[99].mxu1  ;;  %v3818_v32 = vmax.f32 %v3812_v28, %v3816_v29  ;;  %v3218_v33 = vld [vmem:[#allocation2 + $0x2e0] ss:$2 sm:$0xff]  ;;  %v3222_v34 = vld [vmem:[#allocation2 + $0x2e1] ss:$2 sm:$0xff] }
 0x1ab   : > { %2763 = vst.msk [vmem:[#allocation2 + $0x708] sm:$0xff] %vm2537_vm3, %v2413_v30  ;;  %v3228_v36 = vmax.f32 %v3216_v26, %v3226_v27  ;;  %v3225_v37 = vmax.f32 %v3218_v33, %v3222_v34  ;;  %v3810_v38 = vld [vmem:[#allocation2 + $0x6e0] ss:$2 sm:$0xff]  ;;  %v3814_v39 = vld [vmem:[#allocation2 + $0x6e1] ss:$2 sm:$0xff] }
 0x1ac   : > { %v3820_v41 = vmax.f32 %v3808_v31, %v3818_v32  ;;  %v3817_v42 = vmax.f32 %v3810_v38, %v3814_v39 }
 0x1ad   : > { %v3230_v43 = vadd.f32 %v5556_v17, %v3228_v36  ;;  %v3227_v44 = vmax.f32 %v3215_v35, %v3225_v37  ;;  %v4740_v45 = vpop.f32.mrb[100].mxu0 }
 0x1ae   : > { %v3822_v46 = vadd.f32 %v5556_v17, %v3820_v41  ;;  %v3819_v47 = vmax.f32 %v3807_v40, %v3817_v42  ;;  %2640 = vst.msk [vmem:[#allocation2 + $0x330] sm:$0xff] %vm2537_vm3, %v4740_v45  ;;  %v4868_v48 = vpop.f32.mrb[100].mxu1  ;;  %v1914_v49 = vpop.f32.mrb[101].mxu0 }
 0x1af   : > { %v3232_v50 = vmax.f32 %v3230_v43, 0.0  ;;  %v3229_v51 = vadd.f32 %v5556_v17, %v3227_v44  ;;  %2768 = vst.msk [vmem:[#allocation2 + $0x730] sm:$0xff] %vm2537_vm3, %v4868_v48  ;;  %2638 = vst.msk [vmem:[#allocation2 + $0x320] sm:$0xff] %vm2537_vm3, %v1914_v49  ;;  %v2426_v52 = vpop.f32.mrb[101].mxu1  ;;  %v4741_v55 = vpop.f32.mrb[102].mxu0 }
 0x1b0   : > { %v3824_v53 = vmax.f32 %v3822_v46, 0.0  ;;  %v3821_v54 = vadd.f32 %v5556_v17, %v3819_v47  ;;  %2766 = vst.msk [vmem:[#allocation2 + $0x720] sm:$0xff] %vm2537_vm3, %v2426_v52  ;;  %2641 = vst.msk [vmem:[#allocation2 + $0x338] sm:$0xff] %vm2537_vm3, %v4741_v55  ;;  %v4869_v58 = vpop.f32.mrb[102].mxu1  ;;  %v1917_v61 = vpop.f32.mrb[103].mxu0 }
 0x1b1   : > { %v4463_v56 = vpack.c.bf16 %v3232_v50, %v3232_v50  ;;  %v3231_v57 = vmax.f32 %v3229_v51, 0.0  ;;  %2769 = vst.msk [vmem:[#allocation2 + $0x738] sm:$0xff] %vm2537_vm3, %v4869_v58  ;;  %2639 = vst.msk [vmem:[#allocation2 + $0x328] sm:$0xff] %vm2537_vm3, %v1917_v61  ;;  %v2429_v63 = vpop.f32.mrb[103].mxu1  ;;  %v3247_v1 = vld [vmem:[#allocation2 + $0x310] ss:$2 sm:$0xff] }
 0x1b2   : > { %v4495_v59 = vpack.c.bf16 %v3824_v53, %v3824_v53  ;;  %v3823_v60 = vmax.f32 %v3821_v54, 0.0  ;;  %v3251_v2 = vld [vmem:[#allocation2 + $0x311] ss:$2 sm:$0xff]  ;;  %2767 = vst.msk [vmem:[#allocation2 + $0x728] sm:$0xff] %vm2537_vm3, %v2429_v63  ;;  %v3839_v3 = vld [vmem:[#allocation2 + $0x710] ss:$2 sm:$0xff] }
 0x1b3   : > { %4356 = vst.msk [vmem:[%s5373_s29 + $0x5c] sm:$0xf] %vm2834_vm4, %v4463_v56  ;;  %v4462_v62 = vpack.c.bf16 %v3231_v57, %v3231_v57  ;;  %v3843_v4 = vld [vmem:[#allocation2 + $0x711] ss:$2 sm:$0xff]  ;;  %v3245_v6 = vld [vmem:[#allocation2 + $0x300] ss:$2 sm:$0xff]  ;;  %v3253_v19 = vmax.f32 %v3247_v1, %v3251_v2 }
 0x1b4   : > { %4420 = vst.msk [vmem:[%s5373_s29 + $0xdc] sm:$0xf] %vm2834_vm4, %v4495_v59  ;;  %v4494_v0 = vpack.c.bf16 %v3823_v60, %v3823_v60  ;;  %v3249_v7 = vld [vmem:[#allocation2 + $0x301] ss:$2 sm:$0xff]  ;;  %v3837_v10 = vld [vmem:[#allocation2 + $0x700] ss:$2 sm:$0xff]  ;;  %v3845_v23 = vmax.f32 %v3839_v3, %v3843_v4 }
 0x1b5   : > { %4355 = vst.msk [vmem:[%s5373_s29 + $0x58] sm:$0xf] %vm2834_vm4, %v4462_v62  ;;  %v4744_v5 = vpop.f32.mrb[104].mxu0  ;;  %v3841_v11 = vld [vmem:[#allocation2 + $0x701] ss:$2 sm:$0xff]  ;;  %v3252_v28 = vmax.f32 %v3245_v6, %v3249_v7 }
 0x1b6   : > { %4419 = vst.msk [vmem:[%s5373_s29 + $0xd8] sm:$0xf] %vm2834_vm4, %v4494_v0  ;;  %v4872_v8 = vpop.f32.mrb[104].mxu1  ;;  %v1930_v9 = vpop.f32.mrb[105].mxu0  ;;  %v3844_v33 = vmax.f32 %v3837_v10, %v3841_v11 }
 0x1b7   : > { %2644 = vst.msk [vmem:[#allocation2 + $0x350] sm:$0xff] %vm2537_vm3, %v4744_v5  ;;  %2772 = vst.msk [vmem:[#allocation2 + $0x750] sm:$0xff] %vm2537_vm3, %v4872_v8  ;;  %v2442_v12 = vpop.f32.mrb[105].mxu1  ;;  %v4745_v13 = vpop.f32.mrb[106].mxu0  ;;  %v3257_v14 = vld [vmem:[#allocation2 + $0x330] ss:$2 sm:$0xff] }
 0x1b8   : > { %2642 = vst.msk [vmem:[#allocation2 + $0x340] sm:$0xff] %vm2537_vm3, %v1930_v9  ;;  %v3261_v15 = vld [vmem:[#allocation2 + $0x331] ss:$2 sm:$0xff]  ;;  %2770 = vst.msk [vmem:[#allocation2 + $0x740] sm:$0xff] %vm2537_vm3, %v2442_v12  ;;  %v4873_v16 = vpop.f32.mrb[106].mxu1  ;;  %v1933_v18 = vpop.f32.mrb[107].mxu0 }
 0x1b9   : > { %2645 = vst.msk [vmem:[#allocation2 + $0x358] sm:$0xff] %vm2537_vm3, %v4745_v13  ;;  %v3263_v20 = vmax.f32 %v3257_v14, %v3261_v15  ;;  %v3849_v21 = vld [vmem:[#allocation2 + $0x730] ss:$2 sm:$0xff]  ;;  %v3853_v22 = vld [vmem:[#allocation2 + $0x731] ss:$2 sm:$0xff]  ;;  %2773 = vst.msk [vmem:[#allocation2 + $0x758] sm:$0xff] %vm2537_vm3, %v4873_v16 }
 0x1ba   : > { %2643 = vst.msk [vmem:[#allocation2 + $0x348] sm:$0xff] %vm2537_vm3, %v1933_v18  ;;  %v2445_v24 = vpop.f32.mrb[107].mxu1  ;;  %v3855_v25 = vmax.f32 %v3849_v21, %v3853_v22  ;;  %v3255_v26 = vld [vmem:[#allocation2 + $0x320] ss:$2 sm:$0xff]  ;;  %v3259_v27 = vld [vmem:[#allocation2 + $0x321] ss:$2 sm:$0xff] }
 0x1bb   : > { %2771 = vst.msk [vmem:[#allocation2 + $0x748] sm:$0xff] %vm2537_vm3, %v2445_v24  ;;  %v3265_v29 = vmax.f32 %v3253_v19, %v3263_v20  ;;  %v3262_v30 = vmax.f32 %v3255_v26, %v3259_v27  ;;  %v3847_v31 = vld [vmem:[#allocation2 + $0x720] ss:$2 sm:$0xff]  ;;  %v3851_v32 = vld [vmem:[#allocation2 + $0x721] ss:$2 sm:$0xff] }
 0x1bc   : > { %v3857_v34 = vmax.f32 %v3845_v23, %v3855_v25  ;;  %v3854_v35 = vmax.f32 %v3847_v31, %v3851_v32 }
 0x1bd   : > { %v3267_v36 = vadd.f32 %v5556_v17, %v3265_v29  ;;  %v3264_v37 = vmax.f32 %v3252_v28, %v3262_v30  ;;  %v4748_v38 = vpop.f32.mrb[108].mxu0  ;;  %v5756_v28 = vld [vmem:[%s5823_s2] ss:$0 sm:$0xff] }
 0x1be   : > { %v3859_v39 = vadd.f32 %v5556_v17, %v3857_v34  ;;  %v3856_v40 = vmax.f32 %v3844_v33, %v3854_v35  ;;  %2648 = vst.msk [vmem:[#allocation2 + $0x370] sm:$0xff] %vm2537_vm3, %v4748_v38  ;;  %v4876_v41 = vpop.f32.mrb[108].mxu1  ;;  %v1946_v42 = vpop.f32.mrb[109].mxu0 }
 0x1bf   : > { %v3269_v43 = vmax.f32 %v3267_v36, 0.0  ;;  %v3266_v44 = vadd.f32 %v5556_v17, %v3264_v37  ;;  %2776 = vst.msk [vmem:[#allocation2 + $0x770] sm:$0xff] %vm2537_vm3, %v4876_v41  ;;  %2646 = vst.msk [vmem:[#allocation2 + $0x360] sm:$0xff] %vm2537_vm3, %v1946_v42  ;;  %v2458_v45 = vpop.f32.mrb[109].mxu1  ;;  %v4749_v48 = vpop.f32.mrb[110].mxu0 }
 0x1c0   : > { %v3861_v46 = vmax.f32 %v3859_v39, 0.0  ;;  %v3858_v47 = vadd.f32 %v5556_v17, %v3856_v40  ;;  %2774 = vst.msk [vmem:[#allocation2 + $0x760] sm:$0xff] %vm2537_vm3, %v2458_v45  ;;  %2649 = vst.msk [vmem:[#allocation2 + $0x378] sm:$0xff] %vm2537_vm3, %v4749_v48  ;;  %v4877_v51 = vpop.f32.mrb[110].mxu1  ;;  %v1949_v54 = vpop.f32.mrb[111].mxu0 }
 0x1c1   : > { %v4465_v49 = vpack.c.bf16 %v3269_v43, %v3269_v43  ;;  %v3268_v50 = vmax.f32 %v3266_v44, 0.0  ;;  %2777 = vst.msk [vmem:[#allocation2 + $0x778] sm:$0xff] %vm2537_vm3, %v4877_v51  ;;  %2647 = vst.msk [vmem:[#allocation2 + $0x368] sm:$0xff] %vm2537_vm3, %v1949_v54  ;;  %v2461_v17 = vpop.f32.mrb[111].mxu1  ;;  %v3284_v57 = vld [vmem:[#allocation2 + $0x350] ss:$2 sm:$0xff] }
 0x1c2   : > { %v4497_v52 = vpack.c.bf16 %v3861_v46, %v3861_v46  ;;  %v3860_v53 = vmax.f32 %v3858_v47, 0.0  ;;  %v3288_v58 = vld [vmem:[#allocation2 + $0x351] ss:$2 sm:$0xff]  ;;  %2775 = vst.msk [vmem:[#allocation2 + $0x768] sm:$0xff] %vm2537_vm3, %v2461_v17  ;;  %v3876_v59 = vld [vmem:[#allocation2 + $0x750] ss:$2 sm:$0xff] }
 0x1c3   : > { %4360 = vst.msk [vmem:[%s5373_s29 + $0x64] sm:$0xf] %vm2834_vm4, %v4465_v49  ;;  %v4464_v55 = vpack.c.bf16 %v3268_v50, %v3268_v50  ;;  %v3880_v60 = vld [vmem:[#allocation2 + $0x751] ss:$2 sm:$0xff]  ;;  %v3282_v62 = vld [vmem:[#allocation2 + $0x340] ss:$2 sm:$0xff]  ;;  %v3290_v10 = vmax.f32 %v3284_v57, %v3288_v58 }
 0x1c4   : > { %4424 = vst.msk [vmem:[%s5373_s29 + $0xe4] sm:$0xf] %vm2834_vm4, %v4497_v52  ;;  %v4496_v56 = vpack.c.bf16 %v3860_v53, %v3860_v53  ;;  %v3286_v63 = vld [vmem:[#allocation2 + $0x341] ss:$2 sm:$0xff]  ;;  %v3874_v2 = vld [vmem:[#allocation2 + $0x740] ss:$2 sm:$0xff]  ;;  %v3882_v15 = vmax.f32 %v3876_v59, %v3880_v60 }
 0x1c5   : > { %4359 = vst.msk [vmem:[%s5373_s29 + $0x60] sm:$0xf] %vm2834_vm4, %v4464_v55  ;;  %v4752_v61 = vpop.f32.mrb[112].mxu0  ;;  %v3878_v3 = vld [vmem:[#allocation2 + $0x741] ss:$2 sm:$0xff]  ;;  %v3289_v20 = vmax.f32 %v3282_v62, %v3286_v63 }
 0x1c6   : > { %4423 = vst.msk [vmem:[%s5373_s29 + $0xe0] sm:$0xf] %vm2834_vm4, %v4496_v56  ;;  %v4880_v0 = vpop.f32.mrb[112].mxu1  ;;  %v1962_v1 = vpop.f32.mrb[113].mxu0  ;;  %v3881_v25 = vmax.f32 %v3874_v2, %v3878_v3 }
 0x1c7   : > { %2652 = vst.msk [vmem:[#allocation2 + $0x390] sm:$0xff] %vm2537_vm3, %v4752_v61  ;;  %2780 = vst.msk [vmem:[#allocation2 + $0x790] sm:$0xff] %vm2537_vm3, %v4880_v0  ;;  %v2474_v4 = vpop.f32.mrb[113].mxu1  ;;  %v4753_v5 = vpop.f32.mrb[114].mxu0  ;;  %v3294_v6 = vld [vmem:[#allocation2 + $0x370] ss:$2 sm:$0xff] }
 0x1c8   : > { %2650 = vst.msk [vmem:[#allocation2 + $0x380] sm:$0xff] %vm2537_vm3, %v1962_v1  ;;  %v3298_v7 = vld [vmem:[#allocation2 + $0x371] ss:$2 sm:$0xff]  ;;  %2778 = vst.msk [vmem:[#allocation2 + $0x780] sm:$0xff] %vm2537_vm3, %v2474_v4  ;;  %v4881_v8 = vpop.f32.mrb[114].mxu1  ;;  %v1965_v9 = vpop.f32.mrb[115].mxu0 }
 0x1c9   : > { %2653 = vst.msk [vmem:[#allocation2 + $0x398] sm:$0xff] %vm2537_vm3, %v4753_v5  ;;  %v3300_v11 = vmax.f32 %v3294_v6, %v3298_v7  ;;  %v3886_v12 = vld [vmem:[#allocation2 + $0x770] ss:$2 sm:$0xff]  ;;  %v3890_v13 = vld [vmem:[#allocation2 + $0x771] ss:$2 sm:$0xff]  ;;  %2781 = vst.msk [vmem:[#allocation2 + $0x798] sm:$0xff] %vm2537_vm3, %v4881_v8 }
 0x1ca   : > { %2651 = vst.msk [vmem:[#allocation2 + $0x388] sm:$0xff] %vm2537_vm3, %v1965_v9  ;;  %v2477_v14 = vpop.f32.mrb[115].mxu1  ;;  %v3892_v16 = vmax.f32 %v3886_v12, %v3890_v13  ;;  %v3292_v18 = vld [vmem:[#allocation2 + $0x360] ss:$2 sm:$0xff]  ;;  %v3296_v19 = vld [vmem:[#allocation2 + $0x361] ss:$2 sm:$0xff] }
 0x1cb   : > { %2779 = vst.msk [vmem:[#allocation2 + $0x788] sm:$0xff] %vm2537_vm3, %v2477_v14  ;;  %v3302_v21 = vmax.f32 %v3290_v10, %v3300_v11  ;;  %v3299_v22 = vmax.f32 %v3292_v18, %v3296_v19  ;;  %v3884_v24 = vld [vmem:[#allocation2 + $0x760] ss:$2 sm:$0xff]  ;;  %v3888_v23 = vld [vmem:[#allocation2 + $0x761] ss:$2 sm:$0xff] }
 0x1cc   : > { %v3894_v26 = vmax.f32 %v3882_v15, %v3892_v16  ;;  %v3891_v27 = vmax.f32 %v3884_v24, %v3888_v23 }
 0x1cd   : > { %v3304_v29 = vadd.f32 %v5756_v28, %v3302_v21  ;;  %v3301_v30 = vmax.f32 %v3289_v20, %v3299_v22  ;;  %v4756_v31 = vpop.f32.mrb[116].mxu0 }
 0x1ce   : > { %v3896_v32 = vadd.f32 %v5756_v28, %v3894_v26  ;;  %v3893_v33 = vmax.f32 %v3881_v25, %v3891_v27  ;;  %2656 = vst.msk [vmem:[#allocation2 + $0x3b0] sm:$0xff] %vm2537_vm3, %v4756_v31  ;;  %v4884_v34 = vpop.f32.mrb[116].mxu1  ;;  %v1978_v35 = vpop.f32.mrb[117].mxu0 }
 0x1cf   : > { %v3306_v36 = vmax.f32 %v3304_v29, 0.0  ;;  %v3303_v37 = vadd.f32 %v5756_v28, %v3301_v30  ;;  %2784 = vst.msk [vmem:[#allocation2 + $0x7b0] sm:$0xff] %vm2537_vm3, %v4884_v34  ;;  %2654 = vst.msk [vmem:[#allocation2 + $0x3a0] sm:$0xff] %vm2537_vm3, %v1978_v35  ;;  %v2490_v38 = vpop.f32.mrb[117].mxu1  ;;  %v4757_v41 = vpop.f32.mrb[118].mxu0 }
 0x1d0   : > { %v3898_v39 = vmax.f32 %v3896_v32, 0.0  ;;  %v3895_v40 = vadd.f32 %v5756_v28, %v3893_v33  ;;  %2782 = vst.msk [vmem:[#allocation2 + $0x7a0] sm:$0xff] %vm2537_vm3, %v2490_v38  ;;  %2657 = vst.msk [vmem:[#allocation2 + $0x3b8] sm:$0xff] %vm2537_vm3, %v4757_v41  ;;  %v4885_v44 = vpop.f32.mrb[118].mxu1  ;;  %v1981_v47 = vpop.f32.mrb[119].mxu0 }
 0x1d1   : > { %v4467_v42 = vpack.c.bf16 %v3306_v36, %v3306_v36  ;;  %v3305_v43 = vmax.f32 %v3303_v37, 0.0  ;;  %2785 = vst.msk [vmem:[#allocation2 + $0x7b8] sm:$0xff] %vm2537_vm3, %v4885_v44  ;;  %2655 = vst.msk [vmem:[#allocation2 + $0x3a8] sm:$0xff] %vm2537_vm3, %v1981_v47  ;;  %v2493_v49 = vpop.f32.mrb[119].mxu1  ;;  %v3321_v51 = vld [vmem:[#allocation2 + $0x390] ss:$2 sm:$0xff] }
 0x1d2   : > { %v4499_v45 = vpack.c.bf16 %v3898_v39, %v3898_v39  ;;  %v3897_v46 = vmax.f32 %v3895_v40, 0.0  ;;  %v3325_v52 = vld [vmem:[#allocation2 + $0x391] ss:$2 sm:$0xff]  ;;  %2783 = vst.msk [vmem:[#allocation2 + $0x7a8] sm:$0xff] %vm2537_vm3, %v2493_v49  ;;  %v3913_v53 = vld [vmem:[#allocation2 + $0x790] ss:$2 sm:$0xff] }
 0x1d3   : > { %4364 = vst.msk [vmem:[%s5373_s29 + $0x6c] sm:$0xf] %vm2834_vm4, %v4467_v42  ;;  %v4466_v48 = vpack.c.bf16 %v3305_v43, %v3305_v43  ;;  %v3917_v54 = vld [vmem:[#allocation2 + $0x791] ss:$2 sm:$0xff]  ;;  %v3319_v17 = vld [vmem:[#allocation2 + $0x380] ss:$2 sm:$0xff]  ;;  %v3327_v3 = vmax.f32 %v3321_v51, %v3325_v52 }
 0x1d4   : > { %4428 = vst.msk [vmem:[%s5373_s29 + $0xec] sm:$0xf] %vm2834_vm4, %v4499_v45  ;;  %v4498_v50 = vpack.c.bf16 %v3897_v46, %v3897_v46  ;;  %v3323_v56 = vld [vmem:[#allocation2 + $0x381] ss:$2 sm:$0xff]  ;;  %v3911_v59 = vld [vmem:[#allocation2 + $0x780] ss:$2 sm:$0xff]  ;;  %v3919_v8 = vmax.f32 %v3913_v53, %v3917_v54 }
 0x1d5   : > { %4363 = vst.msk [vmem:[%s5373_s29 + $0x68] sm:$0xf] %vm2834_vm4, %v4466_v48  ;;  %v4760_v55 = vpop.f32.mrb[120].mxu0  ;;  %v3915_v60 = vld [vmem:[#allocation2 + $0x781] ss:$2 sm:$0xff]  ;;  %v3326_v12 = vmax.f32 %v3319_v17, %v3323_v56 }
 0x1d6   : > { %4427 = vst.msk [vmem:[%s5373_s29 + $0xe8] sm:$0xf] %vm2834_vm4, %v4498_v50  ;;  %v4888_v57 = vpop.f32.mrb[120].mxu1  ;;  %v1994_v58 = vpop.f32.mrb[121].mxu0  ;;  %v3918_v18 = vmax.f32 %v3911_v59, %v3915_v60 }
 0x1d7   : > { %2660 = vst.msk [vmem:[#allocation2 + $0x3d0] sm:$0xff] %vm2537_vm3, %v4760_v55  ;;  %2788 = vst.msk [vmem:[#allocation2 + $0x7d0] sm:$0xff] %vm2537_vm3, %v4888_v57  ;;  %v2506_v61 = vpop.f32.mrb[121].mxu1  ;;  %v4761_v62 = vpop.f32.mrb[122].mxu0  ;;  %v3331_v63 = vld [vmem:[#allocation2 + $0x3b0] ss:$2 sm:$0xff] }
 0x1d8   : > { %2658 = vst.msk [vmem:[#allocation2 + $0x3c0] sm:$0xff] %vm2537_vm3, %v1994_v58  ;;  %v3335_v0 = vld [vmem:[#allocation2 + $0x3b1] ss:$2 sm:$0xff]  ;;  %2786 = vst.msk [vmem:[#allocation2 + $0x7c0] sm:$0xff] %vm2537_vm3, %v2506_v61  ;;  %v4889_v1 = vpop.f32.mrb[122].mxu1  ;;  %v1997_v2 = vpop.f32.mrb[123].mxu0 }
 0x1d9   : > { %2661 = vst.msk [vmem:[#allocation2 + $0x3d8] sm:$0xff] %vm2537_vm3, %v4761_v62  ;;  %v3337_v4 = vmax.f32 %v3331_v63, %v3335_v0  ;;  %v3923_v5 = vld [vmem:[#allocation2 + $0x7b0] ss:$2 sm:$0xff]  ;;  %v3927_v6 = vld [vmem:[#allocation2 + $0x7b1] ss:$2 sm:$0xff]  ;;  %2789 = vst.msk [vmem:[#allocation2 + $0x7d8] sm:$0xff] %vm2537_vm3, %v4889_v1 }
 0x1da   : > { %2659 = vst.msk [vmem:[#allocation2 + $0x3c8] sm:$0xff] %vm2537_vm3, %v1997_v2  ;;  %v2509_v7 = vpop.f32.mrb[123].mxu1  ;;  %v3929_v9 = vmax.f32 %v3923_v5, %v3927_v6  ;;  %v3329_v10 = vld [vmem:[#allocation2 + $0x3a0] ss:$2 sm:$0xff]  ;;  %v3333_v11 = vld [vmem:[#allocation2 + $0x3a1] ss:$2 sm:$0xff] }
 0x1db   : > { %2787 = vst.msk [vmem:[#allocation2 + $0x7c8] sm:$0xff] %vm2537_vm3, %v2509_v7  ;;  %v3339_v13 = vmax.f32 %v3327_v3, %v3337_v4  ;;  %v3336_v14 = vmax.f32 %v3329_v10, %v3333_v11  ;;  %v3921_v15 = vld [vmem:[#allocation2 + $0x7a0] ss:$2 sm:$0xff]  ;;  %v3925_v16 = vld [vmem:[#allocation2 + $0x7a1] ss:$2 sm:$0xff] }
 0x1dc   : > { %v3931_v19 = vmax.f32 %v3919_v8, %v3929_v9  ;;  %v3928_v20 = vmax.f32 %v3921_v15, %v3925_v16 }
 0x1dd   : > { %v3341_v21 = vadd.f32 %v5756_v28, %v3339_v13  ;;  %v3338_v22 = vmax.f32 %v3326_v12, %v3336_v14  ;;  %v4764_v24 = vpop.f32.mrb[124].mxu0 }
 0x1de   : > { %v3933_v23 = vadd.f32 %v5756_v28, %v3931_v19  ;;  %v3930_v25 = vmax.f32 %v3918_v18, %v3928_v20  ;;  %2664 = vst.msk [vmem:[#allocation2 + $0x3f0] sm:$0xff] %vm2537_vm3, %v4764_v24  ;;  %v4892_v26 = vpop.f32.mrb[124].mxu1  ;;  %v2010_v27 = vpop.f32.mrb[125].mxu0 }
 0x1df   : > { %v3343_v29 = vmax.f32 %v3341_v21, 0.0  ;;  %v3340_v30 = vadd.f32 %v5756_v28, %v3338_v22  ;;  %2792 = vst.msk [vmem:[#allocation2 + $0x7f0] sm:$0xff] %vm2537_vm3, %v4892_v26  ;;  %2662 = vst.msk [vmem:[#allocation2 + $0x3e0] sm:$0xff] %vm2537_vm3, %v2010_v27  ;;  %v2522_v31 = vpop.f32.mrb[125].mxu1  ;;  %v4765_v34 = vpop.f32.mrb[126].mxu0 }
 0x1e0   : > { %v3935_v32 = vmax.f32 %v3933_v23, 0.0  ;;  %v3932_v33 = vadd.f32 %v5756_v28, %v3930_v25  ;;  %2790 = vst.msk [vmem:[#allocation2 + $0x7e0] sm:$0xff] %vm2537_vm3, %v2522_v31  ;;  %2665 = vst.msk [vmem:[#allocation2 + $0x3f8] sm:$0xff] %vm2537_vm3, %v4765_v34  ;;  %v4893_v37 = vpop.f32.mrb[126].mxu1  ;;  %v2013_v40 = vpop.f32.mrb[127].mxu0 }
 0x1e1   : > { %v4469_v35 = vpack.c.bf16 %v3343_v29, %v3343_v29  ;;  %v3342_v36 = vmax.f32 %v3340_v30, 0.0  ;;  %2793 = vst.msk [vmem:[#allocation2 + $0x7f8] sm:$0xff] %vm2537_vm3, %v4893_v37  ;;  %2663 = vst.msk [vmem:[#allocation2 + $0x3e8] sm:$0xff] %vm2537_vm3, %v2013_v40  ;;  %v2525_v42 = vpop.f32.mrb[127].mxu1  ;;  %v3358_v44 = vld [vmem:[#allocation2 + $0x3d0] ss:$2 sm:$0xff] }
 0x1e2   : > { %v4501_v38 = vpack.c.bf16 %v3935_v32, %v3935_v32  ;;  %v3934_v39 = vmax.f32 %v3932_v33, 0.0  ;;  %2791 = vst.msk [vmem:[#allocation2 + $0x7e8] sm:$0xff] %vm2537_vm3, %v2525_v42  ;;  %v3362_v45 = vld [vmem:[#allocation2 + $0x3d1] ss:$2 sm:$0xff]  ;;  %v3950_v46 = vld [vmem:[#allocation2 + $0x7d0] ss:$2 sm:$0xff] }
 0x1e3   : > { %4368 = vst.msk [vmem:[%s5373_s29 + $0x74] sm:$0xf] %vm2834_vm4, %v4469_v35  ;;  %v4468_v41 = vpack.c.bf16 %v3342_v36, %v3342_v36  ;;  %v3954_v47 = vld [vmem:[#allocation2 + $0x7d1] ss:$2 sm:$0xff]  ;;  %v3356_v48 = vld [vmem:[#allocation2 + $0x3c0] ss:$2 sm:$0xff]  ;;  %v3364_v53 = vmax.f32 %v3358_v44, %v3362_v45 }
 0x1e4   : > { %4432 = vst.msk [vmem:[%s5373_s29 + $0xf4] sm:$0xf] %vm2834_vm4, %v4501_v38  ;;  %v4500_v43 = vpack.c.bf16 %v3934_v39, %v3934_v39  ;;  %v3360_v49 = vld [vmem:[#allocation2 + $0x3c1] ss:$2 sm:$0xff]  ;;  %v3948_v50 = vld [vmem:[#allocation2 + $0x7c0] ss:$2 sm:$0xff]  ;;  %v3956_v57 = vmax.f32 %v3950_v46, %v3954_v47 }
 0x1e5   : > { %4367 = vst.msk [vmem:[%s5373_s29 + $0x70] sm:$0xf] %vm2834_vm4, %v4468_v41  ;;  %v3952_v54 = vld [vmem:[#allocation2 + $0x7c1] ss:$2 sm:$0xff]  ;;  %v3363_v61 = vmax.f32 %v3356_v48, %v3360_v49 }
 0x1e6   : > { %4431 = vst.msk [vmem:[%s5373_s29 + $0xf0] sm:$0xf] %vm2834_vm4, %v4500_v43  ;;  %v3955_v2 = vmax.f32 %v3948_v50, %v3952_v54 }
 0x1e7   : > { %v3368_v51 = vld [vmem:[#allocation2 + $0x3f0] ss:$2 sm:$0xff]  ;;  %v3372_v52 = vld [vmem:[#allocation2 + $0x3f1] ss:$2 sm:$0xff] }
 0x1e8   : > { %v3374_v55 = vmax.f32 %v3368_v51, %v3372_v52  ;;  %v3960_v17 = vld [vmem:[#allocation2 + $0x7f0] ss:$2 sm:$0xff]  ;;  %v3964_v56 = vld [vmem:[#allocation2 + $0x7f1] ss:$2 sm:$0xff]  ;;  %v3366_v59 = vld [vmem:[#allocation2 + $0x3e0] ss:$2 sm:$0xff] }
 0x1e9   : > { %v3966_v58 = vmax.f32 %v3960_v17, %v3964_v56  ;;  %v3370_v60 = vld [vmem:[#allocation2 + $0x3e1] ss:$2 sm:$0xff]  ;;  %v3958_v0 = vld [vmem:[#allocation2 + $0x7e0] ss:$2 sm:$0xff] }
 0x1ea   : > { %v3376_v62 = vmax.f32 %v3364_v53, %v3374_v55  ;;  %v3373_v63 = vmax.f32 %v3366_v59, %v3370_v60  ;;  %v3962_v1 = vld [vmem:[#allocation2 + $0x7e1] ss:$2 sm:$0xff] }
 0x1eb   : > { %v3968_v3 = vmax.f32 %v3956_v57, %v3966_v58  ;;  %v3965_v4 = vmax.f32 %v3958_v0, %v3962_v1 }
 0x1ec   : > { %v3378_v5 = vadd.f32 %v5756_v28, %v3376_v62  ;;  %v3375_v6 = vmax.f32 %v3363_v61, %v3373_v63 }
 0x1ed   : > { %v3970_v7 = vadd.f32 %v5756_v28, %v3968_v3  ;;  %v3967_v8 = vmax.f32 %v3955_v2, %v3965_v4 }
 0x1ee   : > { %v3380_v9 = vmax.f32 %v3378_v5, 0.0  ;;  %v3377_v10 = vadd.f32 %v5756_v28, %v3375_v6 }
 0x1ef   : > { %v3972_v11 = vmax.f32 %v3970_v7, 0.0  ;;  %v3969_v12 = vadd.f32 %v5756_v28, %v3967_v8 }
 0x1f0   : > { %v4471_v13 = vpack.c.bf16 %v3380_v9, %v3380_v9  ;;  %v3379_v14 = vmax.f32 %v3377_v10, 0.0 }
 0x1f1   : > { %v4503_v15 = vpack.c.bf16 %v3972_v11, %v3972_v11  ;;  %v3971_v16 = vmax.f32 %v3969_v12, 0.0 }
 0x1f2   : > { %4372 = vst.msk [vmem:[%s5373_s29 + $0x7c] sm:$0xf] %vm2834_vm4, %v4471_v13  ;;  %v4470_v18 = vpack.c.bf16 %v3379_v14, %v3379_v14 }
 0x1f3   : > { %4436 = vst.msk [vmem:[%s5373_s29 + $0xfc] sm:$0xf] %vm2834_vm4, %v4503_v15  ;;  %v4502_v19 = vpack.c.bf16 %v3971_v16, %v3971_v16 }
 0x1f4   : > { %4371 = vst.msk [vmem:[%s5373_s29 + $0x78] sm:$0xf] %vm2834_vm4, %v4470_v18 }
 0x1f5   : > { %4435 = vst.msk [vmem:[%s5373_s29 + $0xf8] sm:$0xf] %vm2834_vm4, %v4502_v19 }
 0x1f6 PF: > { %s13_s12 = sadd.s32 1, %s5045_s12  }
 0x1f7   : > { %p10_p5 = scmp.ge.s32.totalorder %s13_s12, 4  }
 0x1f9   :  { %12 = sbr.rel (!%p10_p5) target bundleno = 1 (0x1), region = 348 }

// kernel: _lambda_.6
= control target key start
LH: loop header
LB: loop body
LE: loop exit
PB: predicated region body
PF: predicated region fallthrough
CT: control target
= control target key end

     0   :  { %s1645_s12 = smov 0   ;;  %s1886_s0 = inlined_call_operand.vmem [shape: bf16[256,576], index: 0, kind: input, shape index: {}]   ;;  %s1887_s1 = inlined_call_operand.vmem [shape: bf16[576,128], index: 1, kind: input, shape index: {}]   ;;  %s1888_s2 = inlined_call_operand.vmem [shape: f32[1,128], index: 2, kind: input, shape index: {}]   ;;  %s1889_s3 = inlined_call_operand.vmem [shape: bf16[4,4,4,128], index: 3, kind: output, shape index: {}]  }
   0x1 LB: > { %s1239_s13 = sadd.s32 4294967295, %s1623_s12   ;;  %p1243_p0 = scmp.ge.s32.totalorder %s1623_s12, 1  ;;  %s1623_s12 = sphi %s1645_s12, %s13_s12  }
   0x2   : > { %p139_p1 = scmp.lt.s32.totalorder %s1623_s12, 3 }
   0x4   : > { %p140_p2 = pnand %p1243_p0, %p139_p1 }
   0x5   : > { %v1525_v0 = vld [vmem:[%s1887_s1 + $0x40] sm:$0xff] (!%p140_p2)   ;;  %v1529_v4 = vld [vmem:[%s1887_s1 + $0x48] sm:$0xff] (!%p140_p2)   ;;  %v1533_v8 = vld [vmem:[%s1887_s1 + $0x50] sm:$0xff] (!%p140_p2)   ;;  %s1244_s19 = sshll.u32 (!%p140_p2), %s1239_s13, 4  ;;  %vm716_vm0 = vcmask (!%p140_p2), 523264   ;;  %s1246_s16 = sshll.u32 (!%p140_p2), %s1239_s13, 1 }
   0x6   : > { %143 = sbr.rel (%p140_p2) target bundleno = 358 (0x166), region = 32  ;;  %v1526_v1 = vld [vmem:[%s1887_s1 + $0xc0] sm:$0xff] (!%p140_p2)   ;;  %1344 = vmatprep.subr.bf16.mxu0 (!%p140_p2), %v1525_v0  ;;  %v1530_v5 = vld [vmem:[%s1887_s1 + $0xc8] sm:$0xff] (!%p140_p2)   ;;  %v1534_v9 = vld [vmem:[%s1887_s1 + $0xd0] sm:$0xff] (!%p140_p2)   ;;  %p166_p3 = scmp.lt.s32.totalorder (!%p140_p2), %s1244_s19, 31 }
   0x7   : > { %v1527_v2 = vld [vmem:[%s1887_s1] sm:$0xff] (!%p140_p2)   ;;  %1408 = vmatprep.subr.bf16.mxu1 (!%p140_p2), %v1526_v1  ;;  %v1531_v6 = vld [vmem:[%s1887_s1 + $0x8] sm:$0xff] (!%p140_p2)   ;;  %v1535_v10 = vld [vmem:[%s1887_s1 + $0x10] sm:$0xff] (!%p140_p2)   ;;  %p173_p4 = scmp.lt.s32.totalorder (!%p140_p2), %s1246_s16, 3 }
   0x8   : > { %v1528_v3 = vld [vmem:[%s1887_s1 + $0x80] sm:$0xff] (!%p140_p2)   ;;  %1345 = vmatpush3.bf16.msra.mxu0 (!%p140_p2), %v1527_v2  ;;  %v1532_v7 = vld [vmem:[%s1887_s1 + $0x88] sm:$0xff] (!%p140_p2)   ;;  %v1536_v11 = vld [vmem:[%s1887_s1 + $0x90] sm:$0xff] (!%p140_p2)  }
   0x9   : > { %1409 = vmatpush3.bf16.msra.mxu1 (!%p140_p2), %v1528_v3  ;;  %1346 = vmatprep.subr.bf16.mxu0 (!%p140_p2), %v1529_v4  ;;  %v1537_v12 = vld [vmem:[%s1887_s1 + $0x58] sm:$0xff] (!%p140_p2)   ;;  %v1541_v16 = vld [vmem:[%s1887_s1 + $0x60] sm:$0xff] (!%p140_p2)   ;;  %v1545_v20 = vld [vmem:[%s1887_s1 + $0x68] sm:$0xff] (!%p140_p2)  }
   0xa   : > { %1410 = vmatprep.subr.bf16.mxu1 (!%p140_p2), %v1530_v5  ;;  %v1538_v13 = vld [vmem:[%s1887_s1 + $0xd8] sm:$0xff] (!%p140_p2)   ;;  %v1542_v17 = vld [vmem:[%s1887_s1 + $0xe0] sm:$0xff] (!%p140_p2)   ;;  %v1546_v21 = vld [vmem:[%s1887_s1 + $0xe8] sm:$0xff] (!%p140_p2)  }
   0xb   : > { %v1539_v14 = vld [vmem:[%s1887_s1 + $0x18] sm:$0xff] (!%p140_p2)   ;;  %v1543_v18 = vld [vmem:[%s1887_s1 + $0x20] sm:$0xff] (!%p140_p2)   ;;  %v1547_v22 = vld [vmem:[%s1887_s1 + $0x28] sm:$0xff] (!%p140_p2)  }
   0xc   : > { %1347 = vmatpush3.bf16.msra.mxu0 (!%p140_p2), %v1531_v6  ;;  %v1540_v15 = vld [vmem:[%s1887_s1 + $0x98] sm:$0xff] (!%p140_p2)   ;;  %v1544_v19 = vld [vmem:[%s1887_s1 + $0xa0] sm:$0xff] (!%p140_p2)   ;;  %v1548_v23 = vld [vmem:[%s1887_s1 + $0xa8] sm:$0xff] (!%p140_p2)  }
   0xd   : > { %1411 = vmatpush3.bf16.msra.mxu1 %v1532_v7  ;;  %1348 = vmatprep.subr.bf16.mxu0 %v1533_v8  ;;  %s1891_s19 = smov (!%p166_p3, %s1244_s19), 31  ;;  %v1549_v24 = vld [vmem:[%s1887_s1 + $0x70] sm:$0xff]   ;;  %v1553_v28 = vld [vmem:[%s1887_s1 + $0x78] sm:$0xff]   ;;  %v1563_v36 = vld [vmem:[%s1887_s1 + $0x100] sm:$0xff]   ;;  %s1893_s16 = smov (!%p173_p4, %s1246_s16), 3 }
   0xe   : > { %1412 = vmatprep.subr.bf16.mxu1 %v1534_v9  ;;  %v1550_v25 = vld [vmem:[%s1887_s1 + $0xf0] sm:$0xff]   ;;  %s1516_s17 = smul.u32 20, %s1891_s19  ;;  %v1554_v29 = vld [vmem:[%s1887_s1 + $0xf8] sm:$0xff]   ;;  %v1576_v42 = vld [vmem:[%s1887_s1 + $0x108] sm:$0xff]   ;;  %s1343_s18 = sshll.u32 %s1893_s16, 3 }
   0xf   : > { %v1551_v26 = vld [vmem:[%s1887_s1 + $0x30] sm:$0xff]   ;;  %v1555_v30 = vld [vmem:[%s1887_s1 + $0x38] sm:$0xff]   ;;  %s1863_s22 = scalar_lea.vmem %s1889_s3, %s1343_s18 }
  0x10   : > { %1349 = vmatpush3.bf16.msra.mxu0 %v1535_v10  ;;  %v1552_v27 = vld [vmem:[%s1887_s1 + $0xb0] sm:$0xff]   ;;  %s1748_s28 = scalar_lea.vmem %s1886_s0, %s1516_s17  ;;  %v1556_v31 = vld [vmem:[%s1887_s1 + $0xb8] sm:$0xff]  }
  0x11   : > { %1413 = vmatpush3.bf16.msra.mxu1 %v1536_v11  ;;  %1350 = vmatprep.subr.bf16.mxu0 %v1537_v12  ;;  %v1557_v32 = vld [vmem:[%s1748_s28] ss:$20 sps:$4 sm:$0xff]   ;;  %v1559_v33 = vld [vmem:[%s1748_s28 + $0x4] ss:$20 sps:$4 sm:$0xff]   ;;  %v1560_v34 = vld [vmem:[%s1748_s28 + $0x8] ss:$20 sps:$4 sm:$0xff]  }
  0x12   : > { %1414 = vmatprep.subr.bf16.mxu1 %v1538_v13  ;;  %v1562_v35 = vld [vmem:[%s1748_s28 + $0xc] ss:$20 sps:$4 sm:$0xff]   ;;  %773 = vmatprep.mubr.bf16.mxu0 %v1559_v33  ;;  %v1566_v38 = vld [vmem:[%s1748_s28 + $0x34] ss:$20 sps:$4 sm:$0xff]   ;;  %v1569_v40 = vld [vmem:[%s1748_s28 + $0x30] ss:$20 sps:$4 sm:$0xff]  }
  0x13   : > { %870 = vmatprep.mubr.bf16.mxu1 %v1562_v35  ;;  %v1564_v37 = vld [vmem:[%s1748_s28 + $0x2c] ss:$20 sps:$4 sm:$0xff]   ;;  %v1568_v39 = vld [vmem:[%s1748_s28 + $0x28] ss:$20 sps:$4 sm:$0xff]   ;;  %v1574_v44 = vld [vmem:[%s1748_s28 + $0x50] ss:$20 sps:$4 sm:$0xff]  }
  0x14   : > { %1351 = vmatpush3.bf16.msra.mxu0 %v1539_v14  ;;  %v1570_v41 = vld [vmem:[%s1748_s28 + $0x54] ss:$20 sps:$4 sm:$0xff]   ;;  %v1572_v43 = vld [vmem:[%s1748_s28 + $0x5c] ss:$20 sps:$4 sm:$0xff]   ;;  %v1575_v45 = vld [vmem:[%s1748_s28 + $0x58] ss:$20 sps:$4 sm:$0xff]  }
  0x15   : > { %1415 = vmatpush3.bf16.msra.mxu1 %v1540_v15  ;;  %1352 = vmatprep.subr.bf16.mxu0 %v1541_v16  ;;  %v1589_v46 = vld [vmem:[%s1887_s1 + $0x110] sm:$0xff]   ;;  %v1579_v48 = vld [vmem:[%s1748_s28 + $0x84] ss:$20 sps:$4 sm:$0xff]   ;;  %v1585_v53 = vld [vmem:[%s1748_s28 + $0xac] ss:$20 sps:$4 sm:$0xff]  }
  0x16   : > { %1416 = vmatprep.subr.bf16.mxu1 %v1542_v17  ;;  %v1577_v47 = vld [vmem:[%s1748_s28 + $0x7c] ss:$20 sps:$4 sm:$0xff]   ;;  %v1581_v50 = vld [vmem:[%s1748_s28 + $0x78] ss:$20 sps:$4 sm:$0xff]   ;;  %v1582_v51 = vld [vmem:[%s1748_s28 + $0x80] ss:$20 sps:$4 sm:$0xff]  }
  0x17   : > { %v1602_v49 = vld [vmem:[%s1887_s1 + $0x118] sm:$0xff]   ;;  %v1587_v54 = vld [vmem:[%s1748_s28 + $0xa0] ss:$20 sps:$4 sm:$0xff]   ;;  %v1595_v59 = vld [vmem:[%s1748_s28 + $0xd0] ss:$20 sps:$4 sm:$0xff]  }
  0x18   : > { %1353 = vmatpush3.bf16.msra.mxu0 %v1543_v18  ;;  %v1583_v52 = vld [vmem:[%s1748_s28 + $0xa4] ss:$20 sps:$4 sm:$0xff]   ;;  %v1588_v55 = vld [vmem:[%s1748_s28 + $0xa8] ss:$20 sps:$4 sm:$0xff]   ;;  %v1590_v56 = vld [vmem:[%s1748_s28 + $0xcc] ss:$20 sps:$4 sm:$0xff]  }
  0x19   : > { %1417 = vmatpush3.bf16.msra.mxu1 %v1544_v19  ;;  %1354 = vmatprep.subr.bf16.mxu0 %v1545_v20  ;;  %v1592_v57 = vld [vmem:[%s1748_s28 + $0xd4] ss:$20 sps:$4 sm:$0xff]   ;;  %v1598_v61 = vld [vmem:[%s1748_s28 + $0xfc] ss:$20 sps:$4 sm:$0xff]   ;;  %v1601_v63 = vld [vmem:[%s1748_s28 + $0xf8] ss:$20 sps:$4 sm:$0xff]  }
  0x1a   : > { %1418 = vmatprep.subr.bf16.mxu1 %v1546_v21  ;;  %v1594_v58 = vld [vmem:[%s1748_s28 + $0xc8] ss:$20 sps:$4 sm:$0xff]   ;;  %v1600_v62 = vld [vmem:[%s1748_s28 + $0xf0] ss:$20 sps:$4 sm:$0xff]   ;;  %v1607_v2 = vld [vmem:[%s1748_s28 + $0x118] ss:$20 sps:$4 sm:$0xff]  }
  0x1b   : > { %v1596_v60 = vld [vmem:[%s1748_s28 + $0xf4] ss:$20 sps:$4 sm:$0xff]   ;;  %v1603_v0 = vld [vmem:[%s1748_s28 + $0x11c] ss:$20 sps:$4 sm:$0xff]   ;;  %v1605_v1 = vld [vmem:[%s1748_s28 + $0x124] ss:$20 sps:$4 sm:$0xff]  }
  0x1c   : > { %1355 = vmatpush3.bf16.msra.mxu0 %v1547_v22  ;;  %v1608_v3 = vld [vmem:[%s1748_s28 + $0x120] ss:$20 sps:$4 sm:$0xff]   ;;  %v1609_v4 = vld [vmem:[%s1748_s28 + $0x10] ss:$20 sps:$4 sm:$0xff]   ;;  %v1611_v6 = vld [vmem:[%s1748_s28 + $0x38] ss:$20 sps:$4 sm:$0xff]  }
  0x1d   : > { %1419 = vmatpush3.bf16.msra.mxu1 %v1548_v23  ;;  %1356 = vmatprep.subr.bf16.mxu0 %v1549_v24  ;;  %v1610_v5 = vld [vmem:[%s1748_s28 + $0xb0] ss:$20 sps:$4 sm:$0xff]   ;;  %v1612_v7 = vld [vmem:[%s1748_s28 + $0xd8] ss:$20 sps:$4 sm:$0xff]   ;;  %v1613_v8 = vld [vmem:[%s1748_s28 + $0x60] ss:$20 sps:$4 sm:$0xff]  }
  0x1e   : > { %1420 = vmatprep.subr.bf16.mxu1 %v1550_v25  ;;  %v1614_v9 = vld [vmem:[%s1748_s28 + $0x100] ss:$20 sps:$4 sm:$0xff]   ;;  %v1615_v10 = vld [vmem:[%s1748_s28 + $0x88] ss:$20 sps:$4 sm:$0xff]  }
  0x1f   : > { %v1616_v11 = vld [vmem:[%s1748_s28 + $0x128] ss:$20 sps:$4 sm:$0xff]  }
  0x20   : > { %1357 = vmatpush3.bf16.msra.mxu0 %v1551_v26 }
  0x21   : > { %1421 = vmatpush3.bf16.msra.mxu1 %v1552_v27  ;;  %1358 = vmatprep.subr.bf16.mxu0 %v1553_v28 }
  0x22   : > { %1422 = vmatprep.subr.bf16.mxu1 %v1554_v29 }
  0x24   : > { %1359 = vmatpush3.bf16.msra.mxu0 %v1555_v30 }
  0x25   : > { %1423 = vmatpush3.bf16.msra.mxu1 %v1556_v31  ;;  %1484 = vmatprep.subr.bf16.mxu0 %v1563_v36 }
  0x26   : > { %1508 = vmatprep.subr.bf16.mxu1 %v1563_v36 }
  0x27   : > { %774 = vmatmul.mubr.bf16.vlgmr.msra.gmra.mrb[0].mxu0 %v1557_v32 }
  0x28   : > { %871 = vmatmul.mubr.bf16.vlgmr.msra.gmra.mrb[0].mxu1 %v1560_v34  ;;  %1485 = vmatpush3.bf16.msra.mxu0 %v1563_v36 }
  0x29   : > { %1512 = vmatpush3.bf16.msra.mxu1 %v1563_v36  ;;  %781 = vmatprep.mubr.bf16.mxu0 %v1564_v37 }
  0x2a   : > { %878 = vmatprep.mubr.bf16.mxu1 %v1566_v38  ;;  %1486 = vmatprep.subr.bf16.mxu0 %v1576_v42 }
  0x2b   : > { %1509 = vmatprep.subr.bf16.mxu1 %v1576_v42 }
  0x2c   : > { %1487 = vmatpush3.bf16.msra.mxu0 %v1576_v42 }
  0x2d   : > { %1513 = vmatpush3.bf16.msra.mxu1 %v1576_v42  ;;  %1488 = vmatprep.subr.bf16.mxu0 %v1589_v46 }
  0x2e   : > { %1510 = vmatprep.subr.bf16.mxu1 %v1589_v46 }
  0x2f   : > { %782 = vmatmul.mubr.bf16.gmra.mrb[4].mxu0 %v1568_v39 }
  0x30   : > { %879 = vmatmul.mubr.bf16.gmra.mrb[4].mxu1 %v1569_v40  ;;  %789 = vmatprep.mubr.bf16.mxu0 %v1570_v41 }
  0x31   : > { %886 = vmatprep.mubr.bf16.mxu1 %v1572_v43  ;;  %1489 = vmatpush3.bf16.msra.mxu0 %v1589_v46 }
  0x32   : > { %1514 = vmatpush3.bf16.msra.mxu1 %v1589_v46  ;;  %1490 = vmatprep.subr.bf16.mxu0 %v1602_v49 }
  0x33   : > { %1511 = vmatprep.subr.bf16.mxu1 %v1602_v49 }
  0x35   : > { %1491 = vmatpush3.bf16.msra.mxu0 %v1602_v49 }
  0x36   : > { %1515 = vmatpush3.bf16.msra.mxu1 %v1602_v49 }
  0x37   : > { %790 = vmatmul.mubr.bf16.gmra.mrb[8].mxu0 %v1574_v44 }
  0x38   : > { %887 = vmatmul.mubr.bf16.gmra.mrb[8].mxu1 %v1575_v45  ;;  %797 = vmatprep.mubr.bf16.mxu0 %v1577_v47 }
  0x39   : > { %894 = vmatprep.mubr.bf16.mxu1 %v1579_v48 }
  0x3f   : > { %798 = vmatmul.mubr.bf16.gmra.mrb[12].mxu0 %v1581_v50 }
  0x40   : > { %895 = vmatmul.mubr.bf16.gmra.mrb[12].mxu1 %v1582_v51  ;;  %805 = vmatprep.mubr.bf16.mxu0 %v1583_v52 }
  0x41   : > { %902 = vmatprep.mubr.bf16.mxu1 %v1585_v53 }
  0x47   : > { %806 = vmatmul.mubr.bf16.gmra.mrb[16].mxu0 %v1587_v54 }
  0x48   : > { %903 = vmatmul.mubr.bf16.gmra.mrb[16].mxu1 %v1588_v55  ;;  %813 = vmatprep.mubr.bf16.mxu0 %v1590_v56 }
  0x49   : > { %910 = vmatprep.mubr.bf16.mxu1 %v1592_v57 }
  0x4f   : > { %814 = vmatmul.mubr.bf16.gmra.mrb[20].mxu0 %v1594_v58 }
  0x50   : > { %911 = vmatmul.mubr.bf16.gmra.mrb[20].mxu1 %v1595_v59  ;;  %821 = vmatprep.mubr.bf16.mxu0 %v1596_v60 }
  0x51   : > { %918 = vmatprep.mubr.bf16.mxu1 %v1598_v61 }
  0x57   : > { %822 = vmatmul.mubr.bf16.gmra.mrb[24].mxu0 %v1600_v62 }
  0x58   : > { %919 = vmatmul.mubr.bf16.gmra.mrb[24].mxu1 %v1601_v63  ;;  %829 = vmatprep.mubr.bf16.mxu0 %v1603_v0 }
  0x59   : > { %926 = vmatprep.mubr.bf16.mxu1 %v1605_v1 }
  0x5f   : > { %830 = vmatmul.mubr.bf16.gmra.mrb[28].mxu0 %v1607_v2 }
  0x60   : > { %927 = vmatmul.mubr.bf16.gmra.mrb[28].mxu1 %v1608_v3  ;;  %1492 = vmatprep.mubr.msk.bf16.mxu0 %vm716_vm0, %v1609_v4 }
  0x61   : > { %1500 = vmatprep.mubr.msk.bf16.mxu1 %vm716_vm0, %v1610_v5 }
  0x67   : > { %1493 = vmatmul.mubr.msk.bf16.vlgmr.msra.gmra.mrb[32].mxu0 %vm716_vm0, %v1611_v6 }
  0x68   : > { %1501 = vmatmul.mubr.msk.bf16.vlgmr.msra.gmra.mrb[32].mxu1 %vm716_vm0, %v1612_v7  ;;  %1496 = vmatprep.mubr.msk.bf16.mxu0 %vm716_vm0, %v1613_v8 }
  0x69   : > { %1504 = vmatprep.mubr.msk.bf16.mxu1 %vm716_vm0, %v1614_v9 }
  0x6f   : > { %1497 = vmatmul.mubr.msk.bf16.gmra.mrb[36].mxu0 %vm716_vm0, %v1615_v10 }
  0x70   : > { %1505 = vmatmul.mubr.msk.bf16.gmra.mrb[36].mxu1 %vm716_vm0, %v1616_v11 }
  0xfa   : > { %v1360_v12 = vpop.f32.mrb[0].mxu0 }
  0xfb   : > { %v1424_v13 = vpop.f32.mrb[0].mxu1  ;;  %v1361_v14 = vpop.f32.mrb[1].mxu0 }
  0xfc   : > { %v1362_v15 = vadd.f32 %v1361_v14, %v1360_v12  ;;  %v1425_v16 = vpop.f32.mrb[1].mxu1  ;;  %v1363_v17 = vpop.f32.mrb[2].mxu0 }
  0xfd   : > { %v1426_v18 = vadd.f32 %v1425_v16, %v1424_v13  ;;  %v1427_v19 = vpop.f32.mrb[2].mxu1  ;;  %v1364_v20 = vpop.f32.mrb[3].mxu0 }
  0xfe   : > { %v1365_v21 = vadd.f32 %v1364_v20, %v1363_v17  ;;  %v1428_v22 = vpop.f32.mrb[3].mxu1 }
  0xff   : > { %v1429_v23 = vadd.f32 %v1428_v22, %v1427_v19  ;;  %v1816_v24 = vadd.f32 %v1426_v18, %v1362_v15 }
 0x101   : > { %v1818_v25 = vadd.f32 %v1429_v23, %v1365_v21 }
 0x102   : > { %v1366_v26 = vpop.f32.mrb[4].mxu0 }
 0x103   : > { %v1430_v27 = vpop.f32.mrb[4].mxu1  ;;  %v1367_v28 = vpop.f32.mrb[5].mxu0 }
 0x104   : > { %v1368_v29 = vadd.f32 %v1367_v28, %v1366_v26  ;;  %v1431_v30 = vpop.f32.mrb[5].mxu1  ;;  %v1369_v31 = vpop.f32.mrb[6].mxu0 }
 0x105   : > { %v1432_v32 = vadd.f32 %v1431_v30, %v1430_v27  ;;  %v1433_v33 = vpop.f32.mrb[6].mxu1  ;;  %v1370_v34 = vpop.f32.mrb[7].mxu0 }
 0x106   : > { %v1371_v35 = vadd.f32 %v1370_v34, %v1369_v31  ;;  %v1434_v36 = vpop.f32.mrb[7].mxu1 }
 0x107   : > { %v1435_v37 = vadd.f32 %v1434_v36, %v1433_v33  ;;  %v1820_v38 = vadd.f32 %v1432_v32, %v1368_v29 }
 0x109   : > { %v1822_v39 = vadd.f32 %v1435_v37, %v1371_v35 }
 0x10a   : > { %v1372_v40 = vpop.f32.mrb[8].mxu0 }
 0x10b   : > { %v1436_v41 = vpop.f32.mrb[8].mxu1  ;;  %v1373_v42 = vpop.f32.mrb[9].mxu0 }
 0x10c   : > { %v1374_v43 = vadd.f32 %v1373_v42, %v1372_v40  ;;  %v1437_v44 = vpop.f32.mrb[9].mxu1  ;;  %v1375_v45 = vpop.f32.mrb[10].mxu0 }
 0x10d   : > { %v1438_v46 = vadd.f32 %v1437_v44, %v1436_v41  ;;  %v1439_v47 = vpop.f32.mrb[10].mxu1  ;;  %v1376_v48 = vpop.f32.mrb[11].mxu0 }
 0x10e   : > { %v1377_v49 = vadd.f32 %v1376_v48, %v1375_v45  ;;  %v1440_v50 = vpop.f32.mrb[11].mxu1 }
 0x10f   : > { %v1441_v51 = vadd.f32 %v1440_v50, %v1439_v47  ;;  %v1824_v52 = vadd.f32 %v1438_v46, %v1374_v43 }
 0x111   : > { %v1826_v53 = vadd.f32 %v1441_v51, %v1377_v49 }
 0x112   : > { %v1378_v54 = vpop.f32.mrb[12].mxu0 }
 0x113   : > { %v1442_v55 = vpop.f32.mrb[12].mxu1  ;;  %v1379_v56 = vpop.f32.mrb[13].mxu0 }
 0x114   : > { %v1380_v57 = vadd.f32 %v1379_v56, %v1378_v54  ;;  %v1443_v58 = vpop.f32.mrb[13].mxu1  ;;  %v1381_v59 = vpop.f32.mrb[14].mxu0 }
 0x115   : > { %v1444_v60 = vadd.f32 %v1443_v58, %v1442_v55  ;;  %v1445_v61 = vpop.f32.mrb[14].mxu1  ;;  %v1382_v62 = vpop.f32.mrb[15].mxu0 }
 0x116   : > { %v1383_v63 = vadd.f32 %v1382_v62, %v1381_v59  ;;  %v1446_v0 = vpop.f32.mrb[15].mxu1 }
 0x117   : > { %v1447_v1 = vadd.f32 %v1446_v0, %v1445_v61  ;;  %v1828_v2 = vadd.f32 %v1444_v60, %v1380_v57 }
 0x119   : > { %v1830_v3 = vadd.f32 %v1447_v1, %v1383_v63 }
 0x11a   : > { %v1384_v4 = vpop.f32.mrb[16].mxu0 }
 0x11b   : > { %v1448_v5 = vpop.f32.mrb[16].mxu1  ;;  %v1385_v6 = vpop.f32.mrb[17].mxu0 }
 0x11c   : > { %v1386_v7 = vadd.f32 %v1385_v6, %v1384_v4  ;;  %v1449_v8 = vpop.f32.mrb[17].mxu1  ;;  %v1387_v9 = vpop.f32.mrb[18].mxu0 }
 0x11d   : > { %v1450_v10 = vadd.f32 %v1449_v8, %v1448_v5  ;;  %v1451_v11 = vpop.f32.mrb[18].mxu1  ;;  %v1388_v12 = vpop.f32.mrb[19].mxu0 }
 0x11e   : > { %v1389_v13 = vadd.f32 %v1388_v12, %v1387_v9  ;;  %v1452_v14 = vpop.f32.mrb[19].mxu1 }
 0x11f   : > { %v1453_v15 = vadd.f32 %v1452_v14, %v1451_v11  ;;  %v905_v16 = vadd.f32 %v1450_v10, %v1386_v7 }
 0x121   : > { %v1832_v17 = vadd.f32 %v1453_v15, %v1389_v13 }
 0x122   : > { %v1390_v18 = vpop.f32.mrb[20].mxu0 }
 0x123   : > { %v1454_v19 = vpop.f32.mrb[20].mxu1  ;;  %v1391_v20 = vpop.f32.mrb[21].mxu0 }
 0x124   : > { %v1392_v21 = vadd.f32 %v1391_v20, %v1390_v18  ;;  %v1455_v22 = vpop.f32.mrb[21].mxu1  ;;  %v1393_v23 = vpop.f32.mrb[22].mxu0 }
 0x125   : > { %v1456_v26 = vadd.f32 %v1455_v22, %v1454_v19  ;;  %v1457_v27 = vpop.f32.mrb[22].mxu1  ;;  %v1394_v28 = vpop.f32.mrb[23].mxu0 }
 0x126   : > { %v1395_v29 = vadd.f32 %v1394_v28, %v1393_v23  ;;  %v1458_v30 = vpop.f32.mrb[23].mxu1 }
 0x127   : > { %v1459_v31 = vadd.f32 %v1458_v30, %v1457_v27  ;;  %v913_v32 = vadd.f32 %v1456_v26, %v1392_v21 }
 0x129   : > { %v916_v33 = vadd.f32 %v1459_v31, %v1395_v29 }
 0x12a   : > { %v1396_v34 = vpop.f32.mrb[24].mxu0 }
 0x12b   : > { %v1460_v35 = vpop.f32.mrb[24].mxu1  ;;  %v1397_v36 = vpop.f32.mrb[25].mxu0 }
 0x12c   : > { %v1398_v37 = vadd.f32 %v1397_v36, %v1396_v34  ;;  %v1461_v40 = vpop.f32.mrb[25].mxu1  ;;  %v1399_v41 = vpop.f32.mrb[26].mxu0 }
 0x12d   : > { %v1462_v42 = vadd.f32 %v1461_v40, %v1460_v35  ;;  %v1463_v43 = vpop.f32.mrb[26].mxu1  ;;  %v1400_v44 = vpop.f32.mrb[27].mxu0 }
 0x12e   : > { %v1401_v45 = vadd.f32 %v1400_v44, %v1399_v41  ;;  %v1464_v46 = vpop.f32.mrb[27].mxu1 }
 0x12f   : > { %v1465_v47 = vadd.f32 %v1464_v46, %v1463_v43  ;;  %v1834_v48 = vadd.f32 %v1462_v42, %v1398_v37 }
 0x131   : > { %v1836_v49 = vadd.f32 %v1465_v47, %v1401_v45 }
 0x132   : > { %v1402_v50 = vpop.f32.mrb[28].mxu0 }
 0x133   : > { %v1466_v51 = vpop.f32.mrb[28].mxu1  ;;  %v1403_v54 = vpop.f32.mrb[29].mxu0 }
 0x134   : > { %v1404_v55 = vadd.f32 %v1403_v54, %v1402_v50  ;;  %v1467_v56 = vpop.f32.mrb[29].mxu1  ;;  %v1405_v57 = vpop.f32.mrb[30].mxu0 }
 0x135   : > { %v1468_v58 = vadd.f32 %v1467_v56, %v1466_v51  ;;  %v1469_v59 = vpop.f32.mrb[30].mxu1  ;;  %v1406_v60 = vpop.f32.mrb[31].mxu0 }
 0x136   : > { %v1407_v61 = vadd.f32 %v1406_v60, %v1405_v57  ;;  %v1470_v62 = vpop.f32.mrb[31].mxu1 }
 0x137   : > { %v1471_v63 = vadd.f32 %v1470_v62, %v1469_v59  ;;  %v929_v0 = vadd.f32 %v1468_v58, %v1404_v55 }
 0x139   : > { %v1838_v1 = vadd.f32 %v1471_v63, %v1407_v61 }
 0x13a   : > { %v1494_v4 = vpop.f32.mrb[32].mxu0 }
 0x13b   : > { %v978_v5 = vadd.f32 %v1494_v4, %v1820_v38  ;;  %v1502_v6 = vpop.f32.mrb[32].mxu1  ;;  %v969_v7 = vpop.f32.mrb[33].mxu0 }
 0x13c   : > { %v1010_v8 = vadd.f32 %v1502_v6, %v913_v32  ;;  %v970_v9 = vadd.f32 %v969_v7, %v1816_v24  ;;  %v1001_v10 = vpop.f32.mrb[33].mxu1  ;;  %v1495_v11 = vpop.f32.mrb[34].mxu0 }
 0x13d   : > { %1034 = vst [vmem:[#allocation2 + $0x10] sm:$0xff] %v978_v5  ;;  %v1002_v12 = vadd.f32 %v1001_v10, %v905_v16  ;;  %v981_v13 = vadd.f32 %v1495_v11, %v1822_v39  ;;  %v1503_v14 = vpop.f32.mrb[34].mxu1  ;;  %v972_v15 = vpop.f32.mrb[35].mxu0 }
 0x13e   : > { %1042 = vst [vmem:[#allocation2 + $0x50] sm:$0xff] %v1010_v8  ;;  %1032 = vst [vmem:[#allocation2] sm:$0xff] %v970_v9  ;;  %v1013_v18 = vadd.f32 %v1503_v14, %v916_v33  ;;  %v973_v38 = vadd.f32 %v972_v15, %v1818_v25  ;;  %v1004_v19 = vpop.f32.mrb[35].mxu1 }
 0x13f   : > { %1040 = vst [vmem:[#allocation2 + $0x40] sm:$0xff] %v1002_v12  ;;  %1035 = vst [vmem:[#allocation2 + $0x18] sm:$0xff] %v981_v13  ;;  %v1005_v24 = vadd.f32 %v1004_v19, %v1832_v17 }
 0x140   : > { %1043 = vst [vmem:[#allocation2 + $0x58] sm:$0xff] %v1013_v18  ;;  %1033 = vst [vmem:[#allocation2 + $0x8] sm:$0xff] %v973_v38 }
 0x141   : > { %1041 = vst [vmem:[#allocation2 + $0x48] sm:$0xff] %v1005_v24 }
 0x142   : > { %v1498_v20 = vpop.f32.mrb[36].mxu0 }
 0x143   : > { %v994_v39 = vadd.f32 %v1498_v20, %v1828_v2  ;;  %v1506_v16 = vpop.f32.mrb[36].mxu1  ;;  %v985_v21 = vpop.f32.mrb[37].mxu0  ;;  %v1854_v2 = vld [vmem:[%s1888_s2] ss:$0 sm:$0xff] }
 0x144   : > { %v1070_v22 = vld [vmem:[#allocation2 + $0x10] ss:$2 sm:$0xf]  ;;  %v1072_v23 = vld [vmem:[#allocation2 + $0x11] ss:$2 sm:$0xf]  ;;  %v1026_v26 = vadd.f32 %v1506_v16, %v929_v0  ;;  %v986_v25 = vadd.f32 %v985_v21, %v1824_v52 }
 0x145   : > { %v1134_v27 = vld [vmem:[#allocation2 + $0x50] ss:$2 sm:$0xf]  ;;  %v1136_v28 = vld [vmem:[#allocation2 + $0x51] ss:$2 sm:$0xf]  ;;  %v1073_v34 = vmax.f32 %v1070_v22, %v1072_v23 }
 0x146   : > { %1038 = vst [vmem:[#allocation2 + $0x30] sm:$0xff] %v994_v39  ;;  %v1049_v29 = vld [vmem:[#allocation2] ss:$2 sm:$0xf]  ;;  %1046 = vst [vmem:[#allocation2 + $0x70] sm:$0xff] %v1026_v26  ;;  %v1137_v37 = vmax.f32 %v1134_v27, %v1136_v28  ;;  %v1017_v61 = vpop.f32.mrb[37].mxu1 }
 0x147   : > { %v1051_v17 = vld [vmem:[#allocation2 + $0x1] ss:$2 sm:$0xf]  ;;  %1036 = vst [vmem:[#allocation2 + $0x20] sm:$0xff] %v986_v25  ;;  %v1499_v62 = vpop.f32.mrb[38].mxu0  ;;  %v1018_v4 = vadd.f32 %v1017_v61, %v1834_v48  ;;  %v1507_v6 = vpop.f32.mrb[38].mxu1 }
 0x148   : > { %v1118_v30 = vld [vmem:[#allocation2 + $0x40] ss:$2 sm:$0xf]  ;;  %v1120_v31 = vld [vmem:[#allocation2 + $0x41] ss:$2 sm:$0xf]  ;;  %v1052_v43 = vmax.f32 %v1049_v29, %v1051_v17  ;;  %v997_v5 = vadd.f32 %v1499_v62, %v1830_v3  ;;  %v1029_v10 = vadd.f32 %v1507_v6, %v1838_v1 }
 0x149   : > { %v1075_v32 = vld [vmem:[#allocation2 + $0x18] ss:$2 sm:$0xf]  ;;  %v1077_v33 = vld [vmem:[#allocation2 + $0x19] ss:$2 sm:$0xf]  ;;  %v1121_v50 = vmax.f32 %v1118_v30, %v1120_v31 }
 0x14a   : > { %v1078_v35 = vmax.f32 %v1075_v32, %v1077_v33  ;;  %v1139_v52 = vld [vmem:[#allocation2 + $0x58] ss:$2 sm:$0xf]  ;;  %v1141_v36 = vld [vmem:[#allocation2 + $0x59] ss:$2 sm:$0xf] }
 0x14b   : > { %v1142_v40 = vmax.f32 %v1139_v52, %v1141_v36  ;;  %v1054_v41 = vld [vmem:[#allocation2 + $0x8] ss:$2 sm:$0xf]  ;;  %v1056_v42 = vld [vmem:[#allocation2 + $0x9] ss:$2 sm:$0xf] }
 0x14c   : > { %v1079_v44 = vmax.f32 %v1073_v34, %v1078_v35  ;;  %v1057_v45 = vmax.f32 %v1054_v41, %v1056_v42  ;;  %v1123_v46 = vld [vmem:[#allocation2 + $0x48] ss:$2 sm:$0xf]  ;;  %v1125_v47 = vld [vmem:[#allocation2 + $0x49] ss:$2 sm:$0xf] }
 0x14d   : > { %v1143_v51 = vmax.f32 %v1137_v37, %v1142_v40  ;;  %v1126_v54 = vmax.f32 %v1123_v46, %v1125_v47  ;;  %v988_v7 = vpop.f32.mrb[39].mxu0  ;;  %v1020_v12 = vpop.f32.mrb[39].mxu1  ;;  %1044 = vst [vmem:[#allocation2 + $0x60] sm:$0xff] %v1018_v4  ;;  %1039 = vst [vmem:[#allocation2 + $0x38] sm:$0xff] %v997_v5 }
 0x14e   : > { %v1080_v55 = vadd.f32 %v1854_v2, %v1079_v44  ;;  %v1058_v56 = vmax.f32 %v1052_v43, %v1057_v45  ;;  %v989_v11 = vadd.f32 %v988_v7, %v1826_v53  ;;  %v1021_v48 = vadd.f32 %v1020_v12, %v1836_v49  ;;  %1047 = vst [vmem:[#allocation2 + $0x78] sm:$0xff] %v1029_v10  ;;  %v1102_v1 = vld [vmem:[#allocation2 + $0x30] ss:$2 sm:$0xf] }
 0x14f   : > { %v1144_v57 = vadd.f32 %v1854_v2, %v1143_v51  ;;  %v1127_v58 = vmax.f32 %v1121_v50, %v1126_v54  ;;  %v1104_v18 = vld [vmem:[#allocation2 + $0x31] ss:$2 sm:$0xf]  ;;  %v1166_v38 = vld [vmem:[#allocation2 + $0x70] ss:$2 sm:$0xf] }
 0x150   : > { %v1081_v59 = vmax.f32 %v1080_v55, 0.0  ;;  %v1065_v60 = vadd.f32 %v1854_v2, %v1058_v56  ;;  %1037 = vst [vmem:[#allocation2 + $0x28] sm:$0xff] %v989_v11  ;;  %1045 = vst [vmem:[#allocation2 + $0x68] sm:$0xff] %v1021_v48  ;;  %v1168_v53 = vld [vmem:[#allocation2 + $0x71] ss:$2 sm:$0xf]  ;;  %v1105_v49 = vmax.f32 %v1102_v1, %v1104_v18 }
 0x151   : > { %v1145_v63 = vmax.f32 %v1144_v57, 0.0  ;;  %v1128_v0 = vadd.f32 %v1854_v2, %v1127_v58  ;;  %v1086_v19 = vld [vmem:[#allocation2 + $0x20] ss:$2 sm:$0xf]  ;;  %v1169_v25 = vmax.f32 %v1166_v38, %v1168_v53 }
 0x152   : > { %v1082_v8 = vpack.c.bf16 %v1081_v59, %v1081_v59  ;;  %v1066_v9 = vmax.f32 %v1065_v60, 0.0  ;;  %v1088_v24 = vld [vmem:[#allocation2 + $0x21] ss:$2 sm:$0xf] }
 0x153   : > { %v1146_v13 = vpack.c.bf16 %v1145_v63, %v1145_v63  ;;  %v1129_v14 = vmax.f32 %v1128_v0, 0.0  ;;  %v1089_v17 = vmax.f32 %v1086_v19, %v1088_v24 }
 0x154   : > { %1334 = vst [vmem:[%s1863_s22 + $0x2] sm:$0x3] %v1082_v8  ;;  %v1067_v3 = vpack.c.bf16 %v1066_v9, %v1066_v9  ;;  %v1150_v20 = vld [vmem:[#allocation2 + $0x60] ss:$2 sm:$0xf] }
 0x155   : > { %1338 = vst [vmem:[%s1863_s22 + $0xa] sm:$0x3] %v1146_v13  ;;  %v1130_v15 = vpack.c.bf16 %v1129_v14, %v1129_v14  ;;  %v1152_v39 = vld [vmem:[#allocation2 + $0x61] ss:$2 sm:$0xf] }
 0x156   : > { %1068 = vst [vmem:[%s1863_s22] sm:$0x3] %v1067_v3  ;;  %v1107_v16 = vld [vmem:[#allocation2 + $0x38] ss:$2 sm:$0xf]  ;;  %v1153_v34 = vmax.f32 %v1150_v20, %v1152_v39 }
 0x157   : > { %1337 = vst [vmem:[%s1863_s22 + $0x8] sm:$0x3] %v1130_v15  ;;  %v1109_v21 = vld [vmem:[#allocation2 + $0x39] ss:$2 sm:$0xf] }
 0x158   : > { %v1110_v22 = vmax.f32 %v1107_v16, %v1109_v21  ;;  %v1171_v23 = vld [vmem:[#allocation2 + $0x78] ss:$2 sm:$0xf]  ;;  %v1173_v26 = vld [vmem:[#allocation2 + $0x79] ss:$2 sm:$0xf] }
 0x159   : > { %v1174_v27 = vmax.f32 %v1171_v23, %v1173_v26  ;;  %v1091_v28 = vld [vmem:[#allocation2 + $0x28] ss:$2 sm:$0xf]  ;;  %v1093_v29 = vld [vmem:[#allocation2 + $0x29] ss:$2 sm:$0xf] }
 0x15a   : > { %v1111_v30 = vmax.f32 %v1105_v49, %v1110_v22  ;;  %v1094_v31 = vmax.f32 %v1091_v28, %v1093_v29  ;;  %v1155_v32 = vld [vmem:[#allocation2 + $0x68] ss:$2 sm:$0xf]  ;;  %v1157_v33 = vld [vmem:[#allocation2 + $0x69] ss:$2 sm:$0xf] }
 0x15b   : > { %v1175_v35 = vmax.f32 %v1169_v25, %v1174_v27  ;;  %v1158_v52 = vmax.f32 %v1155_v32, %v1157_v33 }
 0x15c   : > { %v1112_v36 = vadd.f32 %v1854_v2, %v1111_v30  ;;  %v1095_v37 = vmax.f32 %v1089_v17, %v1094_v31 }
 0x15d   : > { %v1176_v40 = vadd.f32 %v1854_v2, %v1175_v35  ;;  %v1159_v41 = vmax.f32 %v1153_v34, %v1158_v52 }
 0x15e   : > { %v1113_v42 = vmax.f32 %v1112_v36, 0.0  ;;  %v1096_v43 = vadd.f32 %v1854_v2, %v1095_v37 }
 0x15f   : > { %v1177_v44 = vmax.f32 %v1176_v40, 0.0  ;;  %v1160_v45 = vadd.f32 %v1854_v2, %v1159_v41 }
 0x160   : > { %v1114_v46 = vpack.c.bf16 %v1113_v42, %v1113_v42  ;;  %v1097_v47 = vmax.f32 %v1096_v43, 0.0 }
 0x161   : > { %v1178_v50 = vpack.c.bf16 %v1177_v44, %v1177_v44  ;;  %v1161_v51 = vmax.f32 %v1160_v45, 0.0 }
 0x162   : > { %1336 = vst [vmem:[%s1863_s22 + $0x6] sm:$0x3] %v1114_v46  ;;  %v1098_v54 = vpack.c.bf16 %v1097_v47, %v1097_v47 }
 0x163   : > { %1340 = vst [vmem:[%s1863_s22 + $0xe] sm:$0x3] %v1178_v50  ;;  %v1162_v55 = vpack.c.bf16 %v1161_v51, %v1161_v51 }
 0x164   : > { %1335 = vst [vmem:[%s1863_s22 + $0x4] sm:$0x3] %v1098_v54 }
 0x165   : > { %1339 = vst [vmem:[%s1863_s22 + $0xc] sm:$0x3] %v1162_v55 }
 0x166 PF: > { %s13_s12 = sadd.s32 1, %s1623_s12  }
 0x167   : > { %p10_p5 = scmp.ge.s32.totalorder %s13_s12, 4  }
 0x169   :  { %12 = sbr.rel (!%p10_p5) target bundleno = 1 (0x1), region = 100 }

// kernel: _lambda_.7
= control target key start
LH: loop header
LB: loop body
LE: loop exit
PB: predicated region body
PF: predicated region fallthrough
CT: control target
= control target key end

     0   :  { %v540_v36 = vlaneseq  ;;  %v5709_v37 = vmov 1983009808   ;;  %s7477_s0 = inlined_call_operand.vmem [shape: bf16[4,2048], index: 0, kind: input, shape index: {}]   ;;  %s7478_s1 = inlined_call_operand.vmem [shape: bf16[2048,512], index: 1, kind: input, shape index: {}]   ;;  %s7479_s2 = inlined_call_operand.vmem [shape: f32[1,512], index: 2, kind: input, shape index: {}]   ;;  %s7480_s3 = inlined_call_operand.vmem [shape: bf16[512,128], index: 3, kind: input, shape index: {}]   ;;  %s7481_s4 = inlined_call_operand.vmem [shape: f32[1,128], index: 4, kind: input, shape index: {}]   ;;  %s7482_s5 = inlined_call_operand.hbm [shape: f32[4,128], index: 5, kind: output, shape index: {}]  }
   0x1   :  { %v4881_v0 = vld [vmem:[%s7478_s1 + $0x4] ss:$16 sps:$4 sm:$0xff]   ;;  %v4883_v1 = vld [vmem:[%s7478_s1 + $0xc] ss:$16 sps:$4 sm:$0xff]   ;;  %v4885_v2 = vld [vmem:[%s7478_s1] ss:$16 sps:$4 sm:$0xff]   ;;  %v566_v38 = vunpack.c.l.s4 %v5709_v37 }
   0x2   :  { %3208 = vmatprep.subr.bf16.mxu0 %v4881_v0  ;;  %v4886_v3 = vld [vmem:[%s7478_s1 + $0x8] ss:$16 sps:$4 sm:$0xff]   ;;  %3536 = vmatprep.subr.bf16.mxu1 %v4883_v1  ;;  %v4887_v4 = vld [vmem:[%s7478_s1 + $0x24] ss:$16 sps:$4 sm:$0xff]   ;;  %v4889_v5 = vld [vmem:[%s7478_s1 + $0x2c] ss:$16 sps:$4 sm:$0xff]  }
   0x3   :  { %3209 = vmatpush1.bf16.msra.mxu0 %v4885_v2  ;;  %3537 = vmatpush1.bf16.msra.mxu1 %v4886_v3  ;;  %v4891_v6 = vld [vmem:[%s7478_s1 + $0x20] ss:$16 sps:$4 sm:$0xff]   ;;  %v4892_v7 = vld [vmem:[%s7478_s1 + $0x28] ss:$16 sps:$4 sm:$0xff]   ;;  %v4893_v8 = vld [vmem:[%s7478_s1 + $0x44] ss:$16 sps:$4 sm:$0xff]   ;;  %v567_v43 = vunpack.c.0.s8 %v566_v38 }
   0x4   :  { %3210 = vmatprep.subr.bf16.mxu0 %v4887_v4  ;;  %3538 = vmatprep.subr.bf16.mxu1 %v4889_v5  ;;  %v4895_v9 = vld [vmem:[%s7478_s1 + $0x4c] ss:$16 sps:$4 sm:$0xff]   ;;  %v4897_v10 = vld [vmem:[%s7478_s1 + $0x40] ss:$16 sps:$4 sm:$0xff]   ;;  %v4898_v11 = vld [vmem:[%s7478_s1 + $0x48] ss:$16 sps:$4 sm:$0xff]  }
   0x5   :  { %v4899_v12 = vld [vmem:[%s7478_s1 + $0x64] ss:$16 sps:$4 sm:$0xff]   ;;  %v4901_v13 = vld [vmem:[%s7478_s1 + $0x6c] ss:$16 sps:$4 sm:$0xff]   ;;  %v4903_v14 = vld [vmem:[%s7478_s1 + $0x60] ss:$16 sps:$4 sm:$0xff]  }
   0x6   :  { %v4904_v15 = vld [vmem:[%s7478_s1 + $0x68] ss:$16 sps:$4 sm:$0xff]   ;;  %v4905_v16 = vld [vmem:[%s7478_s1 + $0x84] ss:$16 sps:$4 sm:$0xff]   ;;  %v4907_v17 = vld [vmem:[%s7478_s1 + $0x8c] ss:$16 sps:$4 sm:$0xff]  }
   0x7   :  { %3211 = vmatpush1.bf16.msra.mxu0 %v4891_v6  ;;  %3539 = vmatpush1.bf16.msra.mxu1 %v4892_v7  ;;  %v4909_v18 = vld [vmem:[%s7478_s1 + $0x80] ss:$16 sps:$4 sm:$0xff]   ;;  %v4910_v19 = vld [vmem:[%s7478_s1 + $0x88] ss:$16 sps:$4 sm:$0xff]   ;;  %v4911_v20 = vld [vmem:[%s7478_s1 + $0xa4] ss:$16 sps:$4 sm:$0xff]  }
   0x8   :  { %3212 = vmatprep.subr.bf16.mxu0 %v4893_v8  ;;  %3540 = vmatprep.subr.bf16.mxu1 %v4895_v9  ;;  %v4913_v21 = vld [vmem:[%s7478_s1 + $0xac] ss:$16 sps:$4 sm:$0xff]   ;;  %v4915_v22 = vld [vmem:[%s7478_s1 + $0xa0] ss:$16 sps:$4 sm:$0xff]   ;;  %v4916_v23 = vld [vmem:[%s7478_s1 + $0xa8] ss:$16 sps:$4 sm:$0xff]  }
   0x9   :  { %v4917_v24 = vld [vmem:[%s7478_s1 + $0xc4] ss:$16 sps:$4 sm:$0xff]   ;;  %v4919_v25 = vld [vmem:[%s7478_s1 + $0xcc] ss:$16 sps:$4 sm:$0xff]   ;;  %v4921_v26 = vld [vmem:[%s7478_s1 + $0xc0] ss:$16 sps:$4 sm:$0xff]  }
   0xa   :  { %v4922_v27 = vld [vmem:[%s7478_s1 + $0xc8] ss:$16 sps:$4 sm:$0xff]   ;;  %v4923_v28 = vld [vmem:[%s7478_s1 + $0xe4] ss:$16 sps:$4 sm:$0xff]   ;;  %v4925_v29 = vld [vmem:[%s7478_s1 + $0xec] ss:$16 sps:$4 sm:$0xff]  }
   0xb   :  { %3213 = vmatpush1.bf16.msra.mxu0 %v4897_v10  ;;  %3541 = vmatpush1.bf16.msra.mxu1 %v4898_v11  ;;  %v4927_v30 = vld [vmem:[%s7478_s1 + $0xe0] ss:$16 sps:$4 sm:$0xff]   ;;  %v4928_v31 = vld [vmem:[%s7478_s1 + $0xe8] ss:$16 sps:$4 sm:$0xff]   ;;  %v4929_v32 = vld [vmem:[%s7478_s1 + $0x104] ss:$16 sps:$4 sm:$0xff]  }
   0xc   :  { %3214 = vmatprep.subr.bf16.mxu0 %v4899_v12  ;;  %3542 = vmatprep.subr.bf16.mxu1 %v4901_v13  ;;  %v4931_v33 = vld [vmem:[%s7478_s1 + $0x10c] ss:$16 sps:$4 sm:$0xff]   ;;  %v4933_v34 = vld [vmem:[%s7478_s1 + $0x100] ss:$16 sps:$4 sm:$0xff]   ;;  %v4934_v35 = vld [vmem:[%s7478_s1 + $0x108] ss:$16 sps:$4 sm:$0xff]  }
   0xd   :  { %v4935_v39 = vld [vmem:[%s7478_s1 + $0x124] ss:$16 sps:$4 sm:$0xff]   ;;  %v4937_v40 = vld [vmem:[%s7478_s1 + $0x12c] ss:$16 sps:$4 sm:$0xff]   ;;  %v4939_v41 = vld [vmem:[%s7478_s1 + $0x120] ss:$16 sps:$4 sm:$0xff]  }
   0xe   :  { %v5858_v42 = vshrl.u32 %v540_v36, 7  ;;  %v4940_v44 = vld [vmem:[%s7478_s1 + $0x128] ss:$16 sps:$4 sm:$0xff]   ;;  %v4941_v45 = vld [vmem:[%s7478_s1 + $0x144] ss:$16 sps:$4 sm:$0xff]  }
   0xf   :  { %3215 = vmatpush1.bf16.msra.mxu0 %v4903_v14  ;;  %3543 = vmatpush1.bf16.msra.mxu1 %v4904_v15  ;;  %v4943_v46 = vld [vmem:[%s7478_s1 + $0x14c] ss:$16 sps:$4 sm:$0xff]   ;;  %v4945_v47 = vld [vmem:[%s7478_s1 + $0x140] ss:$16 sps:$4 sm:$0xff]   ;;  %v4946_v48 = vld [vmem:[%s7478_s1 + $0x148] ss:$16 sps:$4 sm:$0xff]  }
  0x10   :  { %3216 = vmatprep.subr.bf16.mxu0 %v4905_v16  ;;  %3544 = vmatprep.subr.bf16.mxu1 %v4907_v17  ;;  %v5876_v49 = vsub.s32 %v567_v43, %v5858_v42  ;;  %v4947_v50 = vld [vmem:[%s7478_s1 + $0x164] ss:$16 sps:$4 sm:$0xff]   ;;  %v4949_v51 = vld [vmem:[%s7478_s1 + $0x16c] ss:$16 sps:$4 sm:$0xff]   ;;  %v4951_v53 = vld [vmem:[%s7478_s1 + $0x160] ss:$16 sps:$4 sm:$0xff]  }
  0x11   :  { %v22_v52 = vld [vmem:[%s7477_s0] sm:$0xff]  ;;  %v4952_v55 = vld [vmem:[%s7478_s1 + $0x168] ss:$16 sps:$4 sm:$0xff]   ;;  %v4955_v57 = vld [vmem:[%s7478_s1 + $0x18c] ss:$16 sps:$4 sm:$0xff]  }
  0x12   :  { %v571_v54 = vrot.slane %v22_v52, %v5876_v49  ;;  %v4953_v56 = vld [vmem:[%s7478_s1 + $0x184] ss:$16 sps:$4 sm:$0xff]   ;;  %v4957_v59 = vld [vmem:[%s7478_s1 + $0x180] ss:$16 sps:$4 sm:$0xff]   ;;  %v4958_v60 = vld [vmem:[%s7478_s1 + $0x188] ss:$16 sps:$4 sm:$0xff]   ;;  %v564_v7 = vcombine.high %v22_v52, %v22_v52 }
  0x13   :  { %3217 = vmatpush1.bf16.msra.mxu0 %v4909_v18  ;;  %3545 = vmatpush1.bf16.msra.mxu1 %v4910_v19  ;;  %v4959_v61 = vld [vmem:[%s7478_s1 + $0x1a4] ss:$16 sps:$4 sm:$0xff]   ;;  %v4961_v62 = vld [vmem:[%s7478_s1 + $0x1ac] ss:$16 sps:$4 sm:$0xff]   ;;  %v4963_v63 = vld [vmem:[%s7478_s1 + $0x1a0] ss:$16 sps:$4 sm:$0xff]  }
  0x14   :  { %3218 = vmatprep.subr.bf16.mxu0 %v4911_v20  ;;  %3546 = vmatprep.subr.bf16.mxu1 %v4913_v21  ;;  %v579_v58 = vcombine.high %v571_v54, %v571_v54  ;;  %v4964_v0 = vld [vmem:[%s7478_s1 + $0x1a8] ss:$16 sps:$4 sm:$0xff]   ;;  %v4965_v1 = vld [vmem:[%s7478_s1 + $0x1c4] ss:$16 sps:$4 sm:$0xff]   ;;  %v4967_v2 = vld [vmem:[%s7478_s1 + $0x1cc] ss:$16 sps:$4 sm:$0xff]   ;;  %v5949_v12 = vrot.slane %v564_v7, %v5876_v49 }
  0x15   :  { %v4969_v3 = vld [vmem:[%s7478_s1 + $0x1c0] ss:$16 sps:$4 sm:$0xff]   ;;  %v4970_v4 = vld [vmem:[%s7478_s1 + $0x1c8] ss:$16 sps:$4 sm:$0xff]   ;;  %v4971_v5 = vld [vmem:[%s7478_s1 + $0x1e4] ss:$16 sps:$4 sm:$0xff]  }
  0x16   :  { %3240 = vmatprep.mubr.bf16.mxu0 %v579_v58  ;;  %3568 = vmatprep.mubr.bf16.mxu1 %v579_v58  ;;  %v4973_v6 = vld [vmem:[%s7478_s1 + $0x1ec] ss:$16 sps:$4 sm:$0xff]   ;;  %v4975_v8 = vld [vmem:[%s7478_s1 + $0x1e0] ss:$16 sps:$4 sm:$0xff]   ;;  %v4976_v9 = vld [vmem:[%s7478_s1 + $0x1e8] ss:$16 sps:$4 sm:$0xff]   ;;  %v580_v17 = vcombine.high %v5949_v12, %v5949_v12 }
  0x17   :  { %3219 = vmatpush1.bf16.msra.mxu0 %v4915_v22  ;;  %3547 = vmatpush1.bf16.msra.mxu1 %v4916_v23  ;;  %v4980_v10 = vld [vmem:[%s7478_s1 + $0x204] ss:$16 sps:$4 sm:$0xff]   ;;  %v4983_v11 = vld [vmem:[%s7478_s1 + $0x20c] ss:$16 sps:$4 sm:$0xff]   ;;  %v4978_v13 = vld [vmem:[%s7478_s1 + $0x200] ss:$16 sps:$4 sm:$0xff]  }
  0x18   :  { %3220 = vmatprep.subr.bf16.mxu0 %v4917_v24  ;;  %3548 = vmatprep.subr.bf16.mxu1 %v4919_v25  ;;  %v4981_v14 = vld [vmem:[%s7478_s1 + $0x208] ss:$16 sps:$4 sm:$0xff]   ;;  %v4986_v15 = vld [vmem:[%s7478_s1 + $0x224] ss:$16 sps:$4 sm:$0xff]   ;;  %v4989_v16 = vld [vmem:[%s7478_s1 + $0x22c] ss:$16 sps:$4 sm:$0xff]  }
  0x19   :  { %v4984_v18 = vld [vmem:[%s7478_s1 + $0x220] ss:$16 sps:$4 sm:$0xff]   ;;  %v4987_v19 = vld [vmem:[%s7478_s1 + $0x228] ss:$16 sps:$4 sm:$0xff]   ;;  %v4992_v20 = vld [vmem:[%s7478_s1 + $0x244] ss:$16 sps:$4 sm:$0xff]  }
  0x1a   :  { %v4995_v21 = vld [vmem:[%s7478_s1 + $0x24c] ss:$16 sps:$4 sm:$0xff]   ;;  %v4990_v22 = vld [vmem:[%s7478_s1 + $0x240] ss:$16 sps:$4 sm:$0xff]   ;;  %v4993_v23 = vld [vmem:[%s7478_s1 + $0x248] ss:$16 sps:$4 sm:$0xff]  }
  0x1b   :  { %3221 = vmatpush1.bf16.msra.mxu0 %v4921_v26  ;;  %3549 = vmatpush1.bf16.msra.mxu1 %v4922_v27  ;;  %v4998_v24 = vld [vmem:[%s7478_s1 + $0x264] ss:$16 sps:$4 sm:$0xff]   ;;  %v5001_v25 = vld [vmem:[%s7478_s1 + $0x26c] ss:$16 sps:$4 sm:$0xff]   ;;  %v4996_v26 = vld [vmem:[%s7478_s1 + $0x260] ss:$16 sps:$4 sm:$0xff]  }
  0x1c   :  { %3222 = vmatprep.subr.bf16.mxu0 %v4923_v28  ;;  %3550 = vmatprep.subr.bf16.mxu1 %v4925_v29  ;;  %v4999_v27 = vld [vmem:[%s7478_s1 + $0x268] ss:$16 sps:$4 sm:$0xff]   ;;  %v5004_v28 = vld [vmem:[%s7478_s1 + $0x284] ss:$16 sps:$4 sm:$0xff]   ;;  %v5007_v29 = vld [vmem:[%s7478_s1 + $0x28c] ss:$16 sps:$4 sm:$0xff]  }
  0x1d   :  { %v5016_v36 = vld [vmem:[%s7478_s1 + $0x2c4] ss:$16 sps:$4 sm:$0xff]   ;;  %v5019_v37 = vld [vmem:[%s7478_s1 + $0x2cc] ss:$16 sps:$4 sm:$0xff]   ;;  %v5014_v38 = vld [vmem:[%s7478_s1 + $0x2c0] ss:$16 sps:$4 sm:$0xff]  }
  0x1e   :  { %v5020_v43 = vld [vmem:[%s7478_s1 + $0x2e0] ss:$16 sps:$4 sm:$0xff]   ;;  %v5046_v58 = vld [vmem:[%s7478_s1 + $0x364] ss:$16 sps:$4 sm:$0xff]   ;;  %v5067_v7 = vld [vmem:[%s7478_s1 + $0x3cc] ss:$16 sps:$4 sm:$0xff]  }
  0x1f   :  { %3223 = vmatpush1.bf16.msra.mxu0 %v4927_v30  ;;  %3551 = vmatpush1.bf16.msra.mxu1 %v4928_v31  ;;  %v5002_v30 = vld [vmem:[%s7478_s1 + $0x280] ss:$16 sps:$4 sm:$0xff]   ;;  %v5005_v31 = vld [vmem:[%s7478_s1 + $0x288] ss:$16 sps:$4 sm:$0xff]  }
  0x20   :  { %3224 = vmatprep.subr.bf16.mxu0 %v4929_v32  ;;  %3552 = vmatprep.subr.bf16.mxu1 %v4931_v33  ;;  %v5010_v32 = vld [vmem:[%s7478_s1 + $0x2a4] ss:$16 sps:$4 sm:$0xff]   ;;  %v5013_v33 = vld [vmem:[%s7478_s1 + $0x2ac] ss:$16 sps:$4 sm:$0xff]   ;;  %v5032_v52 = vld [vmem:[%s7478_s1 + $0x320] ss:$16 sps:$4 sm:$0xff]  }
  0x23   :  { %3225 = vmatpush1.bf16.msra.mxu0 %v4933_v34  ;;  %3553 = vmatpush1.bf16.msra.mxu1 %v4934_v35  ;;  %v5008_v34 = vld [vmem:[%s7478_s1 + $0x2a0] ss:$16 sps:$4 sm:$0xff]   ;;  %v5011_v35 = vld [vmem:[%s7478_s1 + $0x2a8] ss:$16 sps:$4 sm:$0xff]  }
  0x24   :  { %3226 = vmatprep.subr.bf16.mxu0 %v4935_v39  ;;  %3554 = vmatprep.subr.bf16.mxu1 %v4937_v40  ;;  %v5017_v39 = vld [vmem:[%s7478_s1 + $0x2c8] ss:$16 sps:$4 sm:$0xff]   ;;  %v5022_v40 = vld [vmem:[%s7478_s1 + $0x2e4] ss:$16 sps:$4 sm:$0xff]  }
  0x27   :  { %3227 = vmatpush1.bf16.msra.mxu0 %v4939_v41  ;;  %3555 = vmatpush1.bf16.msra.mxu1 %v4940_v44  ;;  %v5025_v41 = vld [vmem:[%s7478_s1 + $0x2ec] ss:$16 sps:$4 sm:$0xff]   ;;  %v5023_v44 = vld [vmem:[%s7478_s1 + $0x2e8] ss:$16 sps:$4 sm:$0xff]  }
  0x28   :  { %3228 = vmatprep.subr.bf16.mxu0 %v4941_v45  ;;  %3556 = vmatprep.subr.bf16.mxu1 %v4943_v46  ;;  %v5028_v45 = vld [vmem:[%s7478_s1 + $0x304] ss:$16 sps:$4 sm:$0xff]   ;;  %v5031_v46 = vld [vmem:[%s7478_s1 + $0x30c] ss:$16 sps:$4 sm:$0xff]  }
  0x2b   :  { %3229 = vmatpush1.bf16.msra.mxu0 %v4945_v47  ;;  %3557 = vmatpush1.bf16.msra.mxu1 %v4946_v48  ;;  %v5026_v47 = vld [vmem:[%s7478_s1 + $0x300] ss:$16 sps:$4 sm:$0xff]   ;;  %v5029_v48 = vld [vmem:[%s7478_s1 + $0x308] ss:$16 sps:$4 sm:$0xff]  }
  0x2c   :  { %3230 = vmatprep.subr.bf16.mxu0 %v4947_v50  ;;  %3558 = vmatprep.subr.bf16.mxu1 %v4949_v51  ;;  %v5034_v50 = vld [vmem:[%s7478_s1 + $0x324] ss:$16 sps:$4 sm:$0xff]   ;;  %v5037_v51 = vld [vmem:[%s7478_s1 + $0x32c] ss:$16 sps:$4 sm:$0xff]  }
  0x2f   :  { %3231 = vmatpush1.bf16.msra.mxu0 %v4951_v53  ;;  %3559 = vmatpush1.bf16.msra.mxu1 %v4952_v55  ;;  %v5035_v53 = vld [vmem:[%s7478_s1 + $0x328] ss:$16 sps:$4 sm:$0xff]   ;;  %v5043_v55 = vld [vmem:[%s7478_s1 + $0x34c] ss:$16 sps:$4 sm:$0xff]  }
  0x30   :  { %3232 = vmatprep.subr.bf16.mxu0 %v4953_v56  ;;  %3560 = vmatprep.subr.bf16.mxu1 %v4955_v57  ;;  %v5038_v56 = vld [vmem:[%s7478_s1 + $0x340] ss:$16 sps:$4 sm:$0xff]   ;;  %v5041_v57 = vld [vmem:[%s7478_s1 + $0x348] ss:$16 sps:$4 sm:$0xff]  }
  0x33   :  { %3233 = vmatpush1.bf16.msra.mxu0 %v4957_v59  ;;  %3561 = vmatpush1.bf16.msra.mxu1 %v4958_v60  ;;  %v5049_v59 = vld [vmem:[%s7478_s1 + $0x36c] ss:$16 sps:$4 sm:$0xff]   ;;  %v5044_v60 = vld [vmem:[%s7478_s1 + $0x360] ss:$16 sps:$4 sm:$0xff]  }
  0x34   :  { %3234 = vmatprep.subr.bf16.mxu0 %v4959_v61  ;;  %3562 = vmatprep.subr.bf16.mxu1 %v4961_v62  ;;  %v5047_v61 = vld [vmem:[%s7478_s1 + $0x368] ss:$16 sps:$4 sm:$0xff]   ;;  %v5052_v62 = vld [vmem:[%s7478_s1 + $0x384] ss:$16 sps:$4 sm:$0xff]  }
  0x37   :  { %3235 = vmatpush1.bf16.msra.mxu0 %v4963_v63  ;;  %3563 = vmatpush1.bf16.msra.mxu1 %v4964_v0  ;;  %v5055_v63 = vld [vmem:[%s7478_s1 + $0x38c] ss:$16 sps:$4 sm:$0xff]   ;;  %v5050_v0 = vld [vmem:[%s7478_s1 + $0x380] ss:$16 sps:$4 sm:$0xff]  }
  0x38   :  { %3236 = vmatprep.subr.bf16.mxu0 %v4965_v1  ;;  %3564 = vmatprep.subr.bf16.mxu1 %v4967_v2  ;;  %v5053_v1 = vld [vmem:[%s7478_s1 + $0x388] ss:$16 sps:$4 sm:$0xff]   ;;  %v5058_v2 = vld [vmem:[%s7478_s1 + $0x3a4] ss:$16 sps:$4 sm:$0xff]  }
  0x3b   :  { %3237 = vmatpush1.bf16.msra.mxu0 %v4969_v3  ;;  %3565 = vmatpush1.bf16.msra.mxu1 %v4970_v4  ;;  %v5061_v3 = vld [vmem:[%s7478_s1 + $0x3ac] ss:$16 sps:$4 sm:$0xff]   ;;  %v5056_v4 = vld [vmem:[%s7478_s1 + $0x3a0] ss:$16 sps:$4 sm:$0xff]  }
  0x3c   :  { %3238 = vmatprep.subr.bf16.mxu0 %v4971_v5  ;;  %3566 = vmatprep.subr.bf16.mxu1 %v4973_v6  ;;  %v5059_v5 = vld [vmem:[%s7478_s1 + $0x3a8] ss:$16 sps:$4 sm:$0xff]   ;;  %v5064_v6 = vld [vmem:[%s7478_s1 + $0x3c4] ss:$16 sps:$4 sm:$0xff]  }
  0x3f   :  { %3239 = vmatpush1.bf16.msra.mxu0 %v4975_v8  ;;  %3567 = vmatpush1.bf16.msra.mxu1 %v4976_v9  ;;  %v5062_v8 = vld [vmem:[%s7478_s1 + $0x3c0] ss:$16 sps:$4 sm:$0xff]   ;;  %v5065_v9 = vld [vmem:[%s7478_s1 + $0x3c8] ss:$16 sps:$4 sm:$0xff]  }
  0x40   :  { %3249 = vmatprep.subr.bf16.mxu0 %v4980_v10  ;;  %3577 = vmatprep.subr.bf16.mxu1 %v4983_v11  ;;  %v5070_v10 = vld [vmem:[%s7478_s1 + $0x3e4] ss:$16 sps:$4 sm:$0xff]   ;;  %v5073_v11 = vld [vmem:[%s7478_s1 + $0x3ec] ss:$16 sps:$4 sm:$0xff]  }
  0x42   :  { %3241 = vmatmul.mubr.bf16.vlgmr.msra.gmra.mrb[0].mxu0 %v571_v54  ;;  %3569 = vmatmul.mubr.bf16.vlgmr.msra.gmra.mrb[0].mxu1 %v571_v54  ;;  %v5040_v54 = vld [vmem:[%s7478_s1 + $0x344] ss:$16 sps:$4 sm:$0xff]  }
  0x43   :  { %3250 = vmatpush1.bf16.msra.mxu0 %v4978_v13  ;;  %3578 = vmatpush1.bf16.msra.mxu1 %v4981_v14  ;;  %v5068_v13 = vld [vmem:[%s7478_s1 + $0x3e0] ss:$16 sps:$4 sm:$0xff]   ;;  %v5071_v14 = vld [vmem:[%s7478_s1 + $0x3e8] ss:$16 sps:$4 sm:$0xff]  }
  0x44   :  { %3251 = vmatprep.subr.bf16.mxu0 %v4986_v15  ;;  %3579 = vmatprep.subr.bf16.mxu1 %v4989_v16  ;;  %v5076_v15 = vld [vmem:[%s7478_s1 + $0x404] ss:$16 sps:$4 sm:$0xff]   ;;  %v5079_v16 = vld [vmem:[%s7478_s1 + $0x40c] ss:$16 sps:$4 sm:$0xff]  }
  0x45   :  { %3281 = vmatprep.mubr.bf16.mxu0 %v580_v17  ;;  %3609 = vmatprep.mubr.bf16.mxu1 %v580_v17  ;;  %v5074_v17 = vld [vmem:[%s7478_s1 + $0x400] ss:$16 sps:$4 sm:$0xff]  }
  0x47   :  { %3252 = vmatpush1.bf16.msra.mxu0 %v4984_v18  ;;  %3580 = vmatpush1.bf16.msra.mxu1 %v4987_v19  ;;  %v5077_v18 = vld [vmem:[%s7478_s1 + $0x408] ss:$16 sps:$4 sm:$0xff]  }
  0x48   :  { %3253 = vmatprep.subr.bf16.mxu0 %v4992_v20  ;;  %3581 = vmatprep.subr.bf16.mxu1 %v4995_v21  ;;  %v6154_v19 = vld [vmem:[%s7477_s0 + $0x8] sm:$0xff]  ;;  %v5082_v20 = vld [vmem:[%s7478_s1 + $0x424] ss:$16 sps:$4 sm:$0xff]  }
  0x49   :  { %v5085_v21 = vld [vmem:[%s7478_s1 + $0x42c] ss:$16 sps:$4 sm:$0xff]  }
  0x4b   :  { %3254 = vmatpush1.bf16.msra.mxu0 %v4990_v22  ;;  %3582 = vmatpush1.bf16.msra.mxu1 %v4993_v23  ;;  %v6164_v22 = vrot.slane %v6154_v19, %v5876_v49 }
  0x4c   :  { %3255 = vmatprep.subr.bf16.mxu0 %v4998_v24  ;;  %3583 = vmatprep.subr.bf16.mxu1 %v5001_v25  ;;  %v5080_v24 = vld [vmem:[%s7478_s1 + $0x420] ss:$16 sps:$4 sm:$0xff]   ;;  %v5083_v25 = vld [vmem:[%s7478_s1 + $0x428] ss:$16 sps:$4 sm:$0xff]  }
  0x4d   :  { %v596_v23 = vcombine.high %v6164_v22, %v6164_v22 }
  0x4f   :  { %3256 = vmatpush1.bf16.msra.mxu0 %v4996_v26  ;;  %3584 = vmatpush1.bf16.msra.mxu1 %v4999_v27  ;;  %v5088_v26 = vld [vmem:[%s7478_s1 + $0x444] ss:$16 sps:$4 sm:$0xff]   ;;  %v5086_v27 = vld [vmem:[%s7478_s1 + $0x440] ss:$16 sps:$4 sm:$0xff]  }
  0x50   :  { %3257 = vmatprep.subr.bf16.mxu0 %v5004_v28  ;;  %3585 = vmatprep.subr.bf16.mxu1 %v5007_v29  ;;  %v5089_v28 = vld [vmem:[%s7478_s1 + $0x448] ss:$16 sps:$4 sm:$0xff]   ;;  %v5094_v29 = vld [vmem:[%s7478_s1 + $0x464] ss:$16 sps:$4 sm:$0xff]  }
  0x53   :  { %3258 = vmatpush1.bf16.msra.mxu0 %v5002_v30  ;;  %3586 = vmatpush1.bf16.msra.mxu1 %v5005_v31  ;;  %v5097_v30 = vld [vmem:[%s7478_s1 + $0x46c] ss:$16 sps:$4 sm:$0xff]   ;;  %v5092_v31 = vld [vmem:[%s7478_s1 + $0x460] ss:$16 sps:$4 sm:$0xff]  }
  0x54   :  { %3259 = vmatprep.subr.bf16.mxu0 %v5010_v32  ;;  %3587 = vmatprep.subr.bf16.mxu1 %v5013_v33  ;;  %v5095_v32 = vld [vmem:[%s7478_s1 + $0x468] ss:$16 sps:$4 sm:$0xff]   ;;  %v5100_v33 = vld [vmem:[%s7478_s1 + $0x484] ss:$16 sps:$4 sm:$0xff]  }
  0x57   :  { %3260 = vmatpush1.bf16.msra.mxu0 %v5008_v34  ;;  %3588 = vmatpush1.bf16.msra.mxu1 %v5011_v35  ;;  %v5103_v34 = vld [vmem:[%s7478_s1 + $0x48c] ss:$16 sps:$4 sm:$0xff]   ;;  %v5098_v35 = vld [vmem:[%s7478_s1 + $0x480] ss:$16 sps:$4 sm:$0xff]  }
  0x58   :  { %3261 = vmatprep.subr.bf16.mxu0 %v5016_v36  ;;  %3589 = vmatprep.subr.bf16.mxu1 %v5019_v37  ;;  %v5101_v36 = vld [vmem:[%s7478_s1 + $0x488] ss:$16 sps:$4 sm:$0xff]   ;;  %v5106_v37 = vld [vmem:[%s7478_s1 + $0x4a4] ss:$16 sps:$4 sm:$0xff]  }
  0x5b   :  { %3262 = vmatpush1.bf16.msra.mxu0 %v5014_v38  ;;  %3590 = vmatpush1.bf16.msra.mxu1 %v5017_v39  ;;  %v5109_v38 = vld [vmem:[%s7478_s1 + $0x4ac] ss:$16 sps:$4 sm:$0xff]   ;;  %v5104_v39 = vld [vmem:[%s7478_s1 + $0x4a0] ss:$16 sps:$4 sm:$0xff]  }
  0x5c   :  { %3263 = vmatprep.subr.bf16.mxu0 %v5022_v40  ;;  %3591 = vmatprep.subr.bf16.mxu1 %v5025_v41  ;;  %v5107_v40 = vld [vmem:[%s7478_s1 + $0x4a8] ss:$16 sps:$4 sm:$0xff]   ;;  %v5112_v41 = vld [vmem:[%s7478_s1 + $0x4c4] ss:$16 sps:$4 sm:$0xff]  }
  0x5f   :  { %3264 = vmatpush1.bf16.msra.mxu0 %v5020_v43  ;;  %3592 = vmatpush1.bf16.msra.mxu1 %v5023_v44  ;;  %v5115_v43 = vld [vmem:[%s7478_s1 + $0x4cc] ss:$16 sps:$4 sm:$0xff]   ;;  %v5110_v44 = vld [vmem:[%s7478_s1 + $0x4c0] ss:$16 sps:$4 sm:$0xff]  }
  0x60   :  { %3265 = vmatprep.subr.bf16.mxu0 %v5028_v45  ;;  %3593 = vmatprep.subr.bf16.mxu1 %v5031_v46  ;;  %v5113_v45 = vld [vmem:[%s7478_s1 + $0x4c8] ss:$16 sps:$4 sm:$0xff]   ;;  %v5118_v46 = vld [vmem:[%s7478_s1 + $0x4e4] ss:$16 sps:$4 sm:$0xff]  }
  0x63   :  { %3266 = vmatpush1.bf16.msra.mxu0 %v5026_v47  ;;  %3594 = vmatpush1.bf16.msra.mxu1 %v5029_v48  ;;  %v5121_v47 = vld [vmem:[%s7478_s1 + $0x4ec] ss:$16 sps:$4 sm:$0xff]   ;;  %v5116_v48 = vld [vmem:[%s7478_s1 + $0x4e0] ss:$16 sps:$4 sm:$0xff]  }
  0x64   :  { %3267 = vmatprep.subr.bf16.mxu0 %v5034_v50  ;;  %3595 = vmatprep.subr.bf16.mxu1 %v5037_v51  ;;  %v5119_v50 = vld [vmem:[%s7478_s1 + $0x4e8] ss:$16 sps:$4 sm:$0xff]   ;;  %v5124_v51 = vld [vmem:[%s7478_s1 + $0x504] ss:$16 sps:$4 sm:$0xff]  }
  0x67   :  { %3268 = vmatpush1.bf16.msra.mxu0 %v5032_v52  ;;  %3596 = vmatpush1.bf16.msra.mxu1 %v5035_v53  ;;  %v5127_v52 = vld [vmem:[%s7478_s1 + $0x50c] ss:$16 sps:$4 sm:$0xff]   ;;  %v5122_v53 = vld [vmem:[%s7478_s1 + $0x500] ss:$16 sps:$4 sm:$0xff]  }
  0x68   :  { %3269 = vmatprep.subr.bf16.mxu0 %v5040_v54  ;;  %3597 = vmatprep.subr.bf16.mxu1 %v5043_v55  ;;  %v5125_v54 = vld [vmem:[%s7478_s1 + $0x508] ss:$16 sps:$4 sm:$0xff]   ;;  %v5130_v55 = vld [vmem:[%s7478_s1 + $0x524] ss:$16 sps:$4 sm:$0xff]  }
  0x6b   :  { %3270 = vmatpush1.bf16.msra.mxu0 %v5038_v56  ;;  %3598 = vmatpush1.bf16.msra.mxu1 %v5041_v57  ;;  %v5133_v56 = vld [vmem:[%s7478_s1 + $0x52c] ss:$16 sps:$4 sm:$0xff]   ;;  %v5128_v57 = vld [vmem:[%s7478_s1 + $0x520] ss:$16 sps:$4 sm:$0xff]  }
  0x6c   :  { %3271 = vmatprep.subr.bf16.mxu0 %v5046_v58  ;;  %3599 = vmatprep.subr.bf16.mxu1 %v5049_v59  ;;  %v5131_v58 = vld [vmem:[%s7478_s1 + $0x528] ss:$16 sps:$4 sm:$0xff]   ;;  %v5136_v59 = vld [vmem:[%s7478_s1 + $0x544] ss:$16 sps:$4 sm:$0xff]  }
  0x6f   :  { %3272 = vmatpush1.bf16.msra.mxu0 %v5044_v60  ;;  %3600 = vmatpush1.bf16.msra.mxu1 %v5047_v61  ;;  %v5139_v60 = vld [vmem:[%s7478_s1 + $0x54c] ss:$16 sps:$4 sm:$0xff]   ;;  %v5134_v61 = vld [vmem:[%s7478_s1 + $0x540] ss:$16 sps:$4 sm:$0xff]  }
  0x70   :  { %3273 = vmatprep.subr.bf16.mxu0 %v5052_v62  ;;  %3601 = vmatprep.subr.bf16.mxu1 %v5055_v63  ;;  %v5137_v62 = vld [vmem:[%s7478_s1 + $0x548] ss:$16 sps:$4 sm:$0xff]   ;;  %v5142_v63 = vld [vmem:[%s7478_s1 + $0x564] ss:$16 sps:$4 sm:$0xff]  }
  0x73   :  { %3274 = vmatpush1.bf16.msra.mxu0 %v5050_v0  ;;  %3602 = vmatpush1.bf16.msra.mxu1 %v5053_v1  ;;  %v5145_v0 = vld [vmem:[%s7478_s1 + $0x56c] ss:$16 sps:$4 sm:$0xff]   ;;  %v5140_v1 = vld [vmem:[%s7478_s1 + $0x560] ss:$16 sps:$4 sm:$0xff]  }
  0x74   :  { %3275 = vmatprep.subr.bf16.mxu0 %v5058_v2  ;;  %3603 = vmatprep.subr.bf16.mxu1 %v5061_v3  ;;  %v5143_v2 = vld [vmem:[%s7478_s1 + $0x568] ss:$16 sps:$4 sm:$0xff]   ;;  %v5148_v3 = vld [vmem:[%s7478_s1 + $0x584] ss:$16 sps:$4 sm:$0xff]  }
  0x77   :  { %3276 = vmatpush1.bf16.msra.mxu0 %v5056_v4  ;;  %3604 = vmatpush1.bf16.msra.mxu1 %v5059_v5  ;;  %v5151_v4 = vld [vmem:[%s7478_s1 + $0x58c] ss:$16 sps:$4 sm:$0xff]   ;;  %v5146_v5 = vld [vmem:[%s7478_s1 + $0x580] ss:$16 sps:$4 sm:$0xff]  }
  0x78   :  { %3277 = vmatprep.subr.bf16.mxu0 %v5064_v6  ;;  %3605 = vmatprep.subr.bf16.mxu1 %v5067_v7  ;;  %v5149_v6 = vld [vmem:[%s7478_s1 + $0x588] ss:$16 sps:$4 sm:$0xff]   ;;  %v5154_v7 = vld [vmem:[%s7478_s1 + $0x5a4] ss:$16 sps:$4 sm:$0xff]  }
  0x7b   :  { %3278 = vmatpush1.bf16.msra.mxu0 %v5062_v8  ;;  %3606 = vmatpush1.bf16.msra.mxu1 %v5065_v9  ;;  %v5157_v8 = vld [vmem:[%s7478_s1 + $0x5ac] ss:$16 sps:$4 sm:$0xff]   ;;  %v5152_v9 = vld [vmem:[%s7478_s1 + $0x5a0] ss:$16 sps:$4 sm:$0xff]  }
  0x7c   :  { %3279 = vmatprep.subr.bf16.mxu0 %v5070_v10  ;;  %3607 = vmatprep.subr.bf16.mxu1 %v5073_v11  ;;  %v5155_v10 = vld [vmem:[%s7478_s1 + $0x5a8] ss:$16 sps:$4 sm:$0xff]   ;;  %v5160_v11 = vld [vmem:[%s7478_s1 + $0x5c4] ss:$16 sps:$4 sm:$0xff]  }
  0x7f   :  { %3280 = vmatpush1.bf16.msra.mxu0 %v5068_v13  ;;  %3608 = vmatpush1.bf16.msra.mxu1 %v5071_v14  ;;  %v5163_v13 = vld [vmem:[%s7478_s1 + $0x5cc] ss:$16 sps:$4 sm:$0xff]   ;;  %v5158_v14 = vld [vmem:[%s7478_s1 + $0x5c0] ss:$16 sps:$4 sm:$0xff]  }
  0x80   :  { %3290 = vmatprep.subr.bf16.mxu0 %v5076_v15  ;;  %3618 = vmatprep.subr.bf16.mxu1 %v5079_v16  ;;  %v5161_v15 = vld [vmem:[%s7478_s1 + $0x5c8] ss:$16 sps:$4 sm:$0xff]   ;;  %v5166_v16 = vld [vmem:[%s7478_s1 + $0x5e4] ss:$16 sps:$4 sm:$0xff]  }
  0x82   :  { %3282 = vmatmul.mubr.bf16.vlgmr.msra.gmra.mrb[0].mxu0 %v5949_v12  ;;  %3610 = vmatmul.mubr.bf16.vlgmr.msra.gmra.mrb[0].mxu1 %v5949_v12  ;;  %v5091_v12 = vld [vmem:[%s7478_s1 + $0x44c] ss:$16 sps:$4 sm:$0xff]  }
  0x83   :  { %3291 = vmatpush1.bf16.msra.mxu0 %v5074_v17  ;;  %3619 = vmatpush1.bf16.msra.mxu1 %v5077_v18  ;;  %v5169_v17 = vld [vmem:[%s7478_s1 + $0x5ec] ss:$16 sps:$4 sm:$0xff]   ;;  %v581_v18 = vcombine.high %v6154_v19, %v6154_v19 }
  0x84   :  { %3292 = vmatprep.subr.bf16.mxu0 %v5082_v20  ;;  %3620 = vmatprep.subr.bf16.mxu1 %v5085_v21  ;;  %v5164_v20 = vld [vmem:[%s7478_s1 + $0x5e0] ss:$16 sps:$4 sm:$0xff]   ;;  %v5167_v21 = vld [vmem:[%s7478_s1 + $0x5e8] ss:$16 sps:$4 sm:$0xff]   ;;  %v5175_v19 = vld [vmem:[%s7478_s1 + $0x60c] ss:$16 sps:$4 sm:$0xff]  }
  0x85   :  { %3322 = vmatprep.mubr.bf16.mxu0 %v596_v23  ;;  %3650 = vmatprep.mubr.bf16.mxu1 %v596_v23  ;;  %v5172_v23 = vld [vmem:[%s7478_s1 + $0x604] ss:$16 sps:$4 sm:$0xff]  }
  0x87   :  { %3293 = vmatpush1.bf16.msra.mxu0 %v5080_v24  ;;  %3621 = vmatpush1.bf16.msra.mxu1 %v5083_v25  ;;  %v6353_v24 = vrot.slane %v581_v18, %v5876_v49  ;;  %v5170_v25 = vld [vmem:[%s7478_s1 + $0x600] ss:$16 sps:$4 sm:$0xff]   ;;  %v5259_v18 = vld [vmem:[%s7478_s1 + $0x7cc] ss:$16 sps:$4 sm:$0xff]  }
  0x88   :  { %3294 = vmatprep.subr.bf16.mxu0 %v5088_v26  ;;  %3622 = vmatprep.subr.bf16.mxu1 %v5091_v12  ;;  %v5173_v26 = vld [vmem:[%s7478_s1 + $0x608] ss:$16 sps:$4 sm:$0xff]   ;;  %v5178_v12 = vld [vmem:[%s7478_s1 + $0x624] ss:$16 sps:$4 sm:$0xff]  }
  0x8b   :  { %3295 = vmatpush1.bf16.msra.mxu0 %v5086_v27  ;;  %3623 = vmatpush1.bf16.msra.mxu1 %v5089_v28  ;;  %v5181_v27 = vld [vmem:[%s7478_s1 + $0x62c] ss:$16 sps:$4 sm:$0xff]   ;;  %v597_v28 = vcombine.high %v6353_v24, %v6353_v24 }
  0x8c   :  { %3296 = vmatprep.subr.bf16.mxu0 %v5094_v29  ;;  %3624 = vmatprep.subr.bf16.mxu1 %v5097_v30  ;;  %v5176_v29 = vld [vmem:[%s7478_s1 + $0x620] ss:$16 sps:$4 sm:$0xff]   ;;  %v5179_v30 = vld [vmem:[%s7478_s1 + $0x628] ss:$16 sps:$4 sm:$0xff]  }
  0x8f   :  { %3297 = vmatpush1.bf16.msra.mxu0 %v5092_v31  ;;  %3625 = vmatpush1.bf16.msra.mxu1 %v5095_v32  ;;  %v5184_v31 = vld [vmem:[%s7478_s1 + $0x644] ss:$16 sps:$4 sm:$0xff]   ;;  %v5182_v32 = vld [vmem:[%s7478_s1 + $0x640] ss:$16 sps:$4 sm:$0xff]  }
  0x90   :  { %3298 = vmatprep.subr.bf16.mxu0 %v5100_v33  ;;  %3626 = vmatprep.subr.bf16.mxu1 %v5103_v34  ;;  %v5185_v33 = vld [vmem:[%s7478_s1 + $0x648] ss:$16 sps:$4 sm:$0xff]   ;;  %v5190_v34 = vld [vmem:[%s7478_s1 + $0x664] ss:$16 sps:$4 sm:$0xff]  }
  0x93   :  { %3299 = vmatpush1.bf16.msra.mxu0 %v5098_v35  ;;  %3627 = vmatpush1.bf16.msra.mxu1 %v5101_v36  ;;  %v5193_v35 = vld [vmem:[%s7478_s1 + $0x66c] ss:$16 sps:$4 sm:$0xff]   ;;  %v5188_v36 = vld [vmem:[%s7478_s1 + $0x660] ss:$16 sps:$4 sm:$0xff]  }
  0x94   :  { %3300 = vmatprep.subr.bf16.mxu0 %v5106_v37  ;;  %3628 = vmatprep.subr.bf16.mxu1 %v5109_v38  ;;  %v5191_v37 = vld [vmem:[%s7478_s1 + $0x668] ss:$16 sps:$4 sm:$0xff]   ;;  %v5196_v38 = vld [vmem:[%s7478_s1 + $0x684] ss:$16 sps:$4 sm:$0xff]  }
  0x97   :  { %3301 = vmatpush1.bf16.msra.mxu0 %v5104_v39  ;;  %3629 = vmatpush1.bf16.msra.mxu1 %v5107_v40  ;;  %v5199_v39 = vld [vmem:[%s7478_s1 + $0x68c] ss:$16 sps:$4 sm:$0xff]   ;;  %v5194_v40 = vld [vmem:[%s7478_s1 + $0x680] ss:$16 sps:$4 sm:$0xff]  }
  0x98   :  { %3302 = vmatprep.subr.bf16.mxu0 %v5112_v41  ;;  %3630 = vmatprep.subr.bf16.mxu1 %v5115_v43  ;;  %v5197_v41 = vld [vmem:[%s7478_s1 + $0x688] ss:$16 sps:$4 sm:$0xff]   ;;  %v5202_v43 = vld [vmem:[%s7478_s1 + $0x6a4] ss:$16 sps:$4 sm:$0xff]  }
  0x9b   :  { %3303 = vmatpush1.bf16.msra.mxu0 %v5110_v44  ;;  %3631 = vmatpush1.bf16.msra.mxu1 %v5113_v45  ;;  %v5205_v44 = vld [vmem:[%s7478_s1 + $0x6ac] ss:$16 sps:$4 sm:$0xff]   ;;  %v5200_v45 = vld [vmem:[%s7478_s1 + $0x6a0] ss:$16 sps:$4 sm:$0xff]  }
  0x9c   :  { %3304 = vmatprep.subr.bf16.mxu0 %v5118_v46  ;;  %3632 = vmatprep.subr.bf16.mxu1 %v5121_v47  ;;  %v5203_v46 = vld [vmem:[%s7478_s1 + $0x6a8] ss:$16 sps:$4 sm:$0xff]   ;;  %v5208_v47 = vld [vmem:[%s7478_s1 + $0x6c4] ss:$16 sps:$4 sm:$0xff]  }
  0x9f   :  { %3305 = vmatpush1.bf16.msra.mxu0 %v5116_v48  ;;  %3633 = vmatpush1.bf16.msra.mxu1 %v5119_v50  ;;  %v5211_v48 = vld [vmem:[%s7478_s1 + $0x6cc] ss:$16 sps:$4 sm:$0xff]   ;;  %v5206_v50 = vld [vmem:[%s7478_s1 + $0x6c0] ss:$16 sps:$4 sm:$0xff]  }
  0xa0   :  { %3306 = vmatprep.subr.bf16.mxu0 %v5124_v51  ;;  %3634 = vmatprep.subr.bf16.mxu1 %v5127_v52  ;;  %v5209_v51 = vld [vmem:[%s7478_s1 + $0x6c8] ss:$16 sps:$4 sm:$0xff]   ;;  %v5214_v52 = vld [vmem:[%s7478_s1 + $0x6e4] ss:$16 sps:$4 sm:$0xff]  }
  0xa3   :  { %3307 = vmatpush1.bf16.msra.mxu0 %v5122_v53  ;;  %3635 = vmatpush1.bf16.msra.mxu1 %v5125_v54  ;;  %v5217_v53 = vld [vmem:[%s7478_s1 + $0x6ec] ss:$16 sps:$4 sm:$0xff]   ;;  %v5212_v54 = vld [vmem:[%s7478_s1 + $0x6e0] ss:$16 sps:$4 sm:$0xff]  }
  0xa4   :  { %3308 = vmatprep.subr.bf16.mxu0 %v5130_v55  ;;  %3636 = vmatprep.subr.bf16.mxu1 %v5133_v56  ;;  %v5215_v55 = vld [vmem:[%s7478_s1 + $0x6e8] ss:$16 sps:$4 sm:$0xff]   ;;  %v5220_v56 = vld [vmem:[%s7478_s1 + $0x704] ss:$16 sps:$4 sm:$0xff]  }
  0xa7   :  { %3309 = vmatpush1.bf16.msra.mxu0 %v5128_v57  ;;  %3637 = vmatpush1.bf16.msra.mxu1 %v5131_v58  ;;  %v5223_v57 = vld [vmem:[%s7478_s1 + $0x70c] ss:$16 sps:$4 sm:$0xff]   ;;  %v5218_v58 = vld [vmem:[%s7478_s1 + $0x700] ss:$16 sps:$4 sm:$0xff]  }
  0xa8   :  { %3310 = vmatprep.subr.bf16.mxu0 %v5136_v59  ;;  %3638 = vmatprep.subr.bf16.mxu1 %v5139_v60  ;;  %v5221_v59 = vld [vmem:[%s7478_s1 + $0x708] ss:$16 sps:$4 sm:$0xff]   ;;  %v5226_v60 = vld [vmem:[%s7478_s1 + $0x724] ss:$16 sps:$4 sm:$0xff]  }
  0xab   :  { %3311 = vmatpush1.bf16.msra.mxu0 %v5134_v61  ;;  %3639 = vmatpush1.bf16.msra.mxu1 %v5137_v62  ;;  %v5229_v61 = vld [vmem:[%s7478_s1 + $0x72c] ss:$16 sps:$4 sm:$0xff]   ;;  %v5224_v62 = vld [vmem:[%s7478_s1 + $0x720] ss:$16 sps:$4 sm:$0xff]  }
  0xac   :  { %3312 = vmatprep.subr.bf16.mxu0 %v5142_v63  ;;  %3640 = vmatprep.subr.bf16.mxu1 %v5145_v0  ;;  %v5227_v63 = vld [vmem:[%s7478_s1 + $0x728] ss:$16 sps:$4 sm:$0xff]   ;;  %v5232_v0 = vld [vmem:[%s7478_s1 + $0x744] ss:$16 sps:$4 sm:$0xff]  }
  0xaf   :  { %3313 = vmatpush1.bf16.msra.mxu0 %v5140_v1  ;;  %3641 = vmatpush1.bf16.msra.mxu1 %v5143_v2  ;;  %v5235_v1 = vld [vmem:[%s7478_s1 + $0x74c] ss:$16 sps:$4 sm:$0xff]   ;;  %v5230_v2 = vld [vmem:[%s7478_s1 + $0x740] ss:$16 sps:$4 sm:$0xff]  }
  0xb0   :  { %3314 = vmatprep.subr.bf16.mxu0 %v5148_v3  ;;  %3642 = vmatprep.subr.bf16.mxu1 %v5151_v4  ;;  %v5233_v3 = vld [vmem:[%s7478_s1 + $0x748] ss:$16 sps:$4 sm:$0xff]   ;;  %v5238_v4 = vld [vmem:[%s7478_s1 + $0x764] ss:$16 sps:$4 sm:$0xff]  }
  0xb3   :  { %3315 = vmatpush1.bf16.msra.mxu0 %v5146_v5  ;;  %3643 = vmatpush1.bf16.msra.mxu1 %v5149_v6  ;;  %v5241_v5 = vld [vmem:[%s7478_s1 + $0x76c] ss:$16 sps:$4 sm:$0xff]   ;;  %v5236_v6 = vld [vmem:[%s7478_s1 + $0x760] ss:$16 sps:$4 sm:$0xff]  }
  0xb4   :  { %3316 = vmatprep.subr.bf16.mxu0 %v5154_v7  ;;  %3644 = vmatprep.subr.bf16.mxu1 %v5157_v8  ;;  %v5239_v7 = vld [vmem:[%s7478_s1 + $0x768] ss:$16 sps:$4 sm:$0xff]   ;;  %v5244_v8 = vld [vmem:[%s7478_s1 + $0x784] ss:$16 sps:$4 sm:$0xff]  }
  0xb7   :  { %3317 = vmatpush1.bf16.msra.mxu0 %v5152_v9  ;;  %3645 = vmatpush1.bf16.msra.mxu1 %v5155_v10  ;;  %v5247_v9 = vld [vmem:[%s7478_s1 + $0x78c] ss:$16 sps:$4 sm:$0xff]   ;;  %v5242_v10 = vld [vmem:[%s7478_s1 + $0x780] ss:$16 sps:$4 sm:$0xff]  }
  0xb8   :  { %3318 = vmatprep.subr.bf16.mxu0 %v5160_v11  ;;  %3646 = vmatprep.subr.bf16.mxu1 %v5163_v13  ;;  %v5245_v11 = vld [vmem:[%s7478_s1 + $0x788] ss:$16 sps:$4 sm:$0xff]   ;;  %v5250_v13 = vld [vmem:[%s7478_s1 + $0x7a4] ss:$16 sps:$4 sm:$0xff]  }
  0xbb   :  { %3319 = vmatpush1.bf16.msra.mxu0 %v5158_v14  ;;  %3647 = vmatpush1.bf16.msra.mxu1 %v5161_v15  ;;  %v5253_v14 = vld [vmem:[%s7478_s1 + $0x7ac] ss:$16 sps:$4 sm:$0xff]   ;;  %v5248_v15 = vld [vmem:[%s7478_s1 + $0x7a0] ss:$16 sps:$4 sm:$0xff]  }
  0xbc   :  { %3320 = vmatprep.subr.bf16.mxu0 %v5166_v16  ;;  %3648 = vmatprep.subr.bf16.mxu1 %v5169_v17  ;;  %v5251_v16 = vld [vmem:[%s7478_s1 + $0x7a8] ss:$16 sps:$4 sm:$0xff]   ;;  %v5256_v17 = vld [vmem:[%s7478_s1 + $0x7c4] ss:$16 sps:$4 sm:$0xff]  }
  0xbf   :  { %3321 = vmatpush1.bf16.msra.mxu0 %v5164_v20  ;;  %3649 = vmatpush1.bf16.msra.mxu1 %v5167_v21  ;;  %v5254_v20 = vld [vmem:[%s7478_s1 + $0x7c0] ss:$16 sps:$4 sm:$0xff]   ;;  %v5257_v21 = vld [vmem:[%s7478_s1 + $0x7c8] ss:$16 sps:$4 sm:$0xff]  }
  0xc0   :  { %3331 = vmatprep.subr.bf16.mxu0 %v5172_v23  ;;  %3659 = vmatprep.subr.bf16.mxu1 %v5175_v19  ;;  %v5262_v23 = vld [vmem:[%s7478_s1 + $0x7e4] ss:$16 sps:$4 sm:$0xff]   ;;  %v5265_v19 = vld [vmem:[%s7478_s1 + $0x7ec] ss:$16 sps:$4 sm:$0xff]  }
  0xc2   :  { %3323 = vmatmul.mubr.bf16.vlgmr.msra.gmra.mrb[0].mxu0 %v6164_v22  ;;  %3651 = vmatmul.mubr.bf16.vlgmr.msra.gmra.mrb[0].mxu1 %v6164_v22  ;;  %v5187_v22 = vld [vmem:[%s7478_s1 + $0x64c] ss:$16 sps:$4 sm:$0xff]  }
  0xc3   :  { %3332 = vmatpush1.bf16.msra.mxu0 %v5170_v25  ;;  %3660 = vmatpush1.bf16.msra.mxu1 %v5173_v26  ;;  %v5260_v25 = vld [vmem:[%s7478_s1 + $0x7e0] ss:$16 sps:$4 sm:$0xff]  }
  0xc4   :  { %3333 = vmatprep.subr.bf16.mxu0 %v5178_v12  ;;  %3661 = vmatprep.subr.bf16.mxu1 %v5181_v27  ;;  %v6545_v26 = vld [vmem:[%s7477_s0 + $0x10] sm:$0xff]  ;;  %v5263_v12 = vld [vmem:[%s7478_s1 + $0x7e8] ss:$16 sps:$4 sm:$0xff]  }
  0xc5   :  { %3363 = vmatprep.mubr.bf16.mxu0 %v597_v28  ;;  %3691 = vmatprep.mubr.bf16.mxu1 %v597_v28  ;;  %v5269_v27 = vld [vmem:[%s7478_s1 + $0x804] ss:$16 sps:$4 sm:$0xff]   ;;  %v5272_v28 = vld [vmem:[%s7478_s1 + $0x80c] ss:$16 sps:$4 sm:$0xff]  }
  0xc7   :  { %3334 = vmatpush1.bf16.msra.mxu0 %v5176_v29  ;;  %3662 = vmatpush1.bf16.msra.mxu1 %v5179_v30  ;;  %v6558_v29 = vrot.slane %v6545_v26, %v5876_v49  ;;  %v5267_v30 = vld [vmem:[%s7478_s1 + $0x800] ss:$16 sps:$4 sm:$0xff]  }
  0xc8   :  { %3335 = vmatprep.subr.bf16.mxu0 %v5184_v31  ;;  %3663 = vmatprep.subr.bf16.mxu1 %v5187_v22  ;;  %v5270_v31 = vld [vmem:[%s7478_s1 + $0x808] ss:$16 sps:$4 sm:$0xff]   ;;  %v5275_v22 = vld [vmem:[%s7478_s1 + $0x824] ss:$16 sps:$4 sm:$0xff]  }
  0xcb   :  { %3336 = vmatpush1.bf16.msra.mxu0 %v5182_v32  ;;  %3664 = vmatpush1.bf16.msra.mxu1 %v5185_v33  ;;  %v5278_v32 = vld [vmem:[%s7478_s1 + $0x82c] ss:$16 sps:$4 sm:$0xff]   ;;  %v613_v33 = vcombine.high %v6558_v29, %v6558_v29 }
  0xcc   :  { %3337 = vmatprep.subr.bf16.mxu0 %v5190_v34  ;;  %3665 = vmatprep.subr.bf16.mxu1 %v5193_v35  ;;  %v5273_v34 = vld [vmem:[%s7478_s1 + $0x820] ss:$16 sps:$4 sm:$0xff]   ;;  %v5276_v35 = vld [vmem:[%s7478_s1 + $0x828] ss:$16 sps:$4 sm:$0xff]  }
  0xcf   :  { %3338 = vmatpush1.bf16.msra.mxu0 %v5188_v36  ;;  %3666 = vmatpush1.bf16.msra.mxu1 %v5191_v37  ;;  %v5281_v36 = vld [vmem:[%s7478_s1 + $0x844] ss:$16 sps:$4 sm:$0xff]   ;;  %v5279_v37 = vld [vmem:[%s7478_s1 + $0x840] ss:$16 sps:$4 sm:$0xff]  }
  0xd0   :  { %3339 = vmatprep.subr.bf16.mxu0 %v5196_v38  ;;  %3667 = vmatprep.subr.bf16.mxu1 %v5199_v39  ;;  %v5282_v38 = vld [vmem:[%s7478_s1 + $0x848] ss:$16 sps:$4 sm:$0xff]   ;;  %v5287_v39 = vld [vmem:[%s7478_s1 + $0x864] ss:$16 sps:$4 sm:$0xff]  }
  0xd3   :  { %3340 = vmatpush1.bf16.msra.mxu0 %v5194_v40  ;;  %3668 = vmatpush1.bf16.msra.mxu1 %v5197_v41  ;;  %v5290_v40 = vld [vmem:[%s7478_s1 + $0x86c] ss:$16 sps:$4 sm:$0xff]   ;;  %v5285_v41 = vld [vmem:[%s7478_s1 + $0x860] ss:$16 sps:$4 sm:$0xff]  }
  0xd4   :  { %3341 = vmatprep.subr.bf16.mxu0 %v5202_v43  ;;  %3669 = vmatprep.subr.bf16.mxu1 %v5205_v44  ;;  %v5288_v43 = vld [vmem:[%s7478_s1 + $0x868] ss:$16 sps:$4 sm:$0xff]   ;;  %v5293_v44 = vld [vmem:[%s7478_s1 + $0x884] ss:$16 sps:$4 sm:$0xff]  }
  0xd7   :  { %3342 = vmatpush1.bf16.msra.mxu0 %v5200_v45  ;;  %3670 = vmatpush1.bf16.msra.mxu1 %v5203_v46  ;;  %v5296_v45 = vld [vmem:[%s7478_s1 + $0x88c] ss:$16 sps:$4 sm:$0xff]   ;;  %v5291_v46 = vld [vmem:[%s7478_s1 + $0x880] ss:$16 sps:$4 sm:$0xff]  }
  0xd8   :  { %3343 = vmatprep.subr.bf16.mxu0 %v5208_v47  ;;  %3671 = vmatprep.subr.bf16.mxu1 %v5211_v48  ;;  %v5294_v47 = vld [vmem:[%s7478_s1 + $0x888] ss:$16 sps:$4 sm:$0xff]   ;;  %v5299_v48 = vld [vmem:[%s7478_s1 + $0x8a4] ss:$16 sps:$4 sm:$0xff]  }
  0xdb   :  { %3344 = vmatpush1.bf16.msra.mxu0 %v5206_v50  ;;  %3672 = vmatpush1.bf16.msra.mxu1 %v5209_v51  ;;  %v5302_v50 = vld [vmem:[%s7478_s1 + $0x8ac] ss:$16 sps:$4 sm:$0xff]   ;;  %v5297_v51 = vld [vmem:[%s7478_s1 + $0x8a0] ss:$16 sps:$4 sm:$0xff]  }
  0xdc   :  { %3345 = vmatprep.subr.bf16.mxu0 %v5214_v52  ;;  %3673 = vmatprep.subr.bf16.mxu1 %v5217_v53  ;;  %v5300_v52 = vld [vmem:[%s7478_s1 + $0x8a8] ss:$16 sps:$4 sm:$0xff]   ;;  %v5305_v53 = vld [vmem:[%s7478_s1 + $0x8c4] ss:$16 sps:$4 sm:$0xff]  }
  0xdf   :  { %3346 = vmatpush1.bf16.msra.mxu0 %v5212_v54  ;;  %3674 = vmatpush1.bf16.msra.mxu1 %v5215_v55  ;;  %v5308_v54 = vld [vmem:[%s7478_s1 + $0x8cc] ss:$16 sps:$4 sm:$0xff]   ;;  %v5303_v55 = vld [vmem:[%s7478_s1 + $0x8c0] ss:$16 sps:$4 sm:$0xff]  }
  0xe0   :  { %3347 = vmatprep.subr.bf16.mxu0 %v5220_v56  ;;  %3675 = vmatprep.subr.bf16.mxu1 %v5223_v57  ;;  %v5306_v56 = vld [vmem:[%s7478_s1 + $0x8c8] ss:$16 sps:$4 sm:$0xff]   ;;  %v5311_v57 = vld [vmem:[%s7478_s1 + $0x8e4] ss:$16 sps:$4 sm:$0xff]  }
  0xe3   :  { %3348 = vmatpush1.bf16.msra.mxu0 %v5218_v58  ;;  %3676 = vmatpush1.bf16.msra.mxu1 %v5221_v59  ;;  %v5314_v58 = vld [vmem:[%s7478_s1 + $0x8ec] ss:$16 sps:$4 sm:$0xff]   ;;  %v5309_v59 = vld [vmem:[%s7478_s1 + $0x8e0] ss:$16 sps:$4 sm:$0xff]  }
  0xe4   :  { %3349 = vmatprep.subr.bf16.mxu0 %v5226_v60  ;;  %3677 = vmatprep.subr.bf16.mxu1 %v5229_v61  ;;  %v5312_v60 = vld [vmem:[%s7478_s1 + $0x8e8] ss:$16 sps:$4 sm:$0xff]   ;;  %v5317_v61 = vld [vmem:[%s7478_s1 + $0x904] ss:$16 sps:$4 sm:$0xff]  }
  0xe7   :  { %3350 = vmatpush1.bf16.msra.mxu0 %v5224_v62  ;;  %3678 = vmatpush1.bf16.msra.mxu1 %v5227_v63  ;;  %v5320_v62 = vld [vmem:[%s7478_s1 + $0x90c] ss:$16 sps:$4 sm:$0xff]   ;;  %v5315_v63 = vld [vmem:[%s7478_s1 + $0x900] ss:$16 sps:$4 sm:$0xff]  }
  0xe8   :  { %3351 = vmatprep.subr.bf16.mxu0 %v5232_v0  ;;  %3679 = vmatprep.subr.bf16.mxu1 %v5235_v1  ;;  %v5318_v0 = vld [vmem:[%s7478_s1 + $0x908] ss:$16 sps:$4 sm:$0xff]   ;;  %v5323_v1 = vld [vmem:[%s7478_s1 + $0x924] ss:$16 sps:$4 sm:$0xff]  }
  0xeb   :  { %3352 = vmatpush1.bf16.msra.mxu0 %v5230_v2  ;;  %3680 = vmatpush1.bf16.msra.mxu1 %v5233_v3  ;;  %v5326_v2 = vld [vmem:[%s7478_s1 + $0x92c] ss:$16 sps:$4 sm:$0xff]   ;;  %v5321_v3 = vld [vmem:[%s7478_s1 + $0x920] ss:$16 sps:$4 sm:$0xff]  }
  0xec   :  { %3353 = vmatprep.subr.bf16.mxu0 %v5238_v4  ;;  %3681 = vmatprep.subr.bf16.mxu1 %v5241_v5  ;;  %v5324_v4 = vld [vmem:[%s7478_s1 + $0x928] ss:$16 sps:$4 sm:$0xff]   ;;  %v5329_v5 = vld [vmem:[%s7478_s1 + $0x944] ss:$16 sps:$4 sm:$0xff]  }
  0xef   :  { %3354 = vmatpush1.bf16.msra.mxu0 %v5236_v6  ;;  %3682 = vmatpush1.bf16.msra.mxu1 %v5239_v7  ;;  %v5332_v6 = vld [vmem:[%s7478_s1 + $0x94c] ss:$16 sps:$4 sm:$0xff]   ;;  %v5327_v7 = vld [vmem:[%s7478_s1 + $0x940] ss:$16 sps:$4 sm:$0xff]  }
  0xf0   :  { %3355 = vmatprep.subr.bf16.mxu0 %v5244_v8  ;;  %3683 = vmatprep.subr.bf16.mxu1 %v5247_v9  ;;  %v5330_v8 = vld [vmem:[%s7478_s1 + $0x948] ss:$16 sps:$4 sm:$0xff]   ;;  %v5335_v9 = vld [vmem:[%s7478_s1 + $0x964] ss:$16 sps:$4 sm:$0xff]  }
  0xf3   :  { %3356 = vmatpush1.bf16.msra.mxu0 %v5242_v10  ;;  %3684 = vmatpush1.bf16.msra.mxu1 %v5245_v11  ;;  %v5338_v10 = vld [vmem:[%s7478_s1 + $0x96c] ss:$16 sps:$4 sm:$0xff]   ;;  %v5333_v11 = vld [vmem:[%s7478_s1 + $0x960] ss:$16 sps:$4 sm:$0xff]  }
  0xf4   :  { %3357 = vmatprep.subr.bf16.mxu0 %v5250_v13  ;;  %3685 = vmatprep.subr.bf16.mxu1 %v5253_v14  ;;  %v5336_v13 = vld [vmem:[%s7478_s1 + $0x968] ss:$16 sps:$4 sm:$0xff]   ;;  %v5341_v14 = vld [vmem:[%s7478_s1 + $0x984] ss:$16 sps:$4 sm:$0xff]  }
  0xf7   :  { %3358 = vmatpush1.bf16.msra.mxu0 %v5248_v15  ;;  %3686 = vmatpush1.bf16.msra.mxu1 %v5251_v16  ;;  %v5344_v15 = vld [vmem:[%s7478_s1 + $0x98c] ss:$16 sps:$4 sm:$0xff]   ;;  %v5339_v16 = vld [vmem:[%s7478_s1 + $0x980] ss:$16 sps:$4 sm:$0xff]  }
  0xf8   :  { %3359 = vmatprep.subr.bf16.mxu0 %v5256_v17  ;;  %3687 = vmatprep.subr.bf16.mxu1 %v5259_v18  ;;  %v5342_v17 = vld [vmem:[%s7478_s1 + $0x988] ss:$16 sps:$4 sm:$0xff]   ;;  %v5347_v18 = vld [vmem:[%s7478_s1 + $0x9a4] ss:$16 sps:$4 sm:$0xff]  }
  0xfb   :  { %3360 = vmatpush1.bf16.msra.mxu0 %v5254_v20  ;;  %3688 = vmatpush1.bf16.msra.mxu1 %v5257_v21  ;;  %v5350_v20 = vld [vmem:[%s7478_s1 + $0x9ac] ss:$16 sps:$4 sm:$0xff]   ;;  %v5345_v21 = vld [vmem:[%s7478_s1 + $0x9a0] ss:$16 sps:$4 sm:$0xff]  }
  0xfc   :  { %3361 = vmatprep.subr.bf16.mxu0 %v5262_v23  ;;  %3689 = vmatprep.subr.bf16.mxu1 %v5265_v19  ;;  %v5348_v23 = vld [vmem:[%s7478_s1 + $0x9a8] ss:$16 sps:$4 sm:$0xff]   ;;  %v5353_v19 = vld [vmem:[%s7478_s1 + $0x9c4] ss:$16 sps:$4 sm:$0xff]  }
  0xff   :  { %3362 = vmatpush1.bf16.msra.mxu0 %v5260_v25  ;;  %3690 = vmatpush1.bf16.msra.mxu1 %v5263_v12  ;;  %v5356_v25 = vld [vmem:[%s7478_s1 + $0x9cc] ss:$16 sps:$4 sm:$0xff]   ;;  %v5351_v12 = vld [vmem:[%s7478_s1 + $0x9c0] ss:$16 sps:$4 sm:$0xff]  }
 0x100   :  { %3372 = vmatprep.subr.bf16.mxu0 %v5269_v27  ;;  %3700 = vmatprep.subr.bf16.mxu1 %v5272_v28  ;;  %v5354_v27 = vld [vmem:[%s7478_s1 + $0x9c8] ss:$16 sps:$4 sm:$0xff]   ;;  %v5359_v28 = vld [vmem:[%s7478_s1 + $0x9e4] ss:$16 sps:$4 sm:$0xff]  }
 0x102   :  { %3364 = vmatmul.mubr.bf16.vlgmr.msra.gmra.mrb[0].mxu0 %v6353_v24  ;;  %3692 = vmatmul.mubr.bf16.vlgmr.msra.gmra.mrb[0].mxu1 %v6353_v24  ;;  %v5284_v24 = vld [vmem:[%s7478_s1 + $0x84c] ss:$16 sps:$4 sm:$0xff]  }
 0x103   :  { %3373 = vmatpush1.bf16.msra.mxu0 %v5267_v30  ;;  %3701 = vmatpush1.bf16.msra.mxu1 %v5270_v31  ;;  %v5362_v30 = vld [vmem:[%s7478_s1 + $0x9ec] ss:$16 sps:$4 sm:$0xff]   ;;  %v598_v31 = vcombine.high %v6545_v26, %v6545_v26 }
 0x104   :  { %3374 = vmatprep.subr.bf16.mxu0 %v5275_v22  ;;  %3702 = vmatprep.subr.bf16.mxu1 %v5278_v32  ;;  %v5357_v22 = vld [vmem:[%s7478_s1 + $0x9e0] ss:$16 sps:$4 sm:$0xff]   ;;  %v5360_v32 = vld [vmem:[%s7478_s1 + $0x9e8] ss:$16 sps:$4 sm:$0xff]   ;;  %v5368_v26 = vld [vmem:[%s7478_s1 + $0xa0c] ss:$16 sps:$4 sm:$0xff]  }
 0x105   :  { %3404 = vmatprep.mubr.bf16.mxu0 %v613_v33  ;;  %3732 = vmatprep.mubr.bf16.mxu1 %v613_v33  ;;  %v5365_v33 = vld [vmem:[%s7478_s1 + $0xa04] ss:$16 sps:$4 sm:$0xff]  }
 0x107   :  { %3375 = vmatpush1.bf16.msra.mxu0 %v5273_v34  ;;  %3703 = vmatpush1.bf16.msra.mxu1 %v5276_v35  ;;  %v6759_v34 = vrot.slane %v598_v31, %v5876_v49  ;;  %v5363_v35 = vld [vmem:[%s7478_s1 + $0xa00] ss:$16 sps:$4 sm:$0xff]  }
 0x108   :  { %3376 = vmatprep.subr.bf16.mxu0 %v5281_v36  ;;  %3704 = vmatprep.subr.bf16.mxu1 %v5284_v24  ;;  %v5366_v36 = vld [vmem:[%s7478_s1 + $0xa08] ss:$16 sps:$4 sm:$0xff]   ;;  %v5371_v24 = vld [vmem:[%s7478_s1 + $0xa24] ss:$16 sps:$4 sm:$0xff]  }
 0x10b   :  { %3377 = vmatpush1.bf16.msra.mxu0 %v5279_v37  ;;  %3705 = vmatpush1.bf16.msra.mxu1 %v5282_v38  ;;  %v5374_v37 = vld [vmem:[%s7478_s1 + $0xa2c] ss:$16 sps:$4 sm:$0xff]   ;;  %v614_v38 = vcombine.high %v6759_v34, %v6759_v34 }
 0x10c   :  { %3378 = vmatprep.subr.bf16.mxu0 %v5287_v39  ;;  %3706 = vmatprep.subr.bf16.mxu1 %v5290_v40  ;;  %v5369_v39 = vld [vmem:[%s7478_s1 + $0xa20] ss:$16 sps:$4 sm:$0xff]   ;;  %v5372_v40 = vld [vmem:[%s7478_s1 + $0xa28] ss:$16 sps:$4 sm:$0xff]  }
 0x10f   :  { %3379 = vmatpush1.bf16.msra.mxu0 %v5285_v41  ;;  %3707 = vmatpush1.bf16.msra.mxu1 %v5288_v43  ;;  %v5377_v41 = vld [vmem:[%s7478_s1 + $0xa44] ss:$16 sps:$4 sm:$0xff]   ;;  %v5375_v43 = vld [vmem:[%s7478_s1 + $0xa40] ss:$16 sps:$4 sm:$0xff]  }
 0x110   :  { %3380 = vmatprep.subr.bf16.mxu0 %v5293_v44  ;;  %3708 = vmatprep.subr.bf16.mxu1 %v5296_v45  ;;  %v5378_v44 = vld [vmem:[%s7478_s1 + $0xa48] ss:$16 sps:$4 sm:$0xff]   ;;  %v5383_v45 = vld [vmem:[%s7478_s1 + $0xa64] ss:$16 sps:$4 sm:$0xff]  }
 0x113   :  { %3381 = vmatpush1.bf16.msra.mxu0 %v5291_v46  ;;  %3709 = vmatpush1.bf16.msra.mxu1 %v5294_v47  ;;  %v5386_v46 = vld [vmem:[%s7478_s1 + $0xa6c] ss:$16 sps:$4 sm:$0xff]   ;;  %v5381_v47 = vld [vmem:[%s7478_s1 + $0xa60] ss:$16 sps:$4 sm:$0xff]  }
 0x114   :  { %3382 = vmatprep.subr.bf16.mxu0 %v5299_v48  ;;  %3710 = vmatprep.subr.bf16.mxu1 %v5302_v50  ;;  %v5384_v48 = vld [vmem:[%s7478_s1 + $0xa68] ss:$16 sps:$4 sm:$0xff]   ;;  %v5389_v50 = vld [vmem:[%s7478_s1 + $0xa84] ss:$16 sps:$4 sm:$0xff]  }
 0x117   :  { %3383 = vmatpush1.bf16.msra.mxu0 %v5297_v51  ;;  %3711 = vmatpush1.bf16.msra.mxu1 %v5300_v52  ;;  %v5392_v51 = vld [vmem:[%s7478_s1 + $0xa8c] ss:$16 sps:$4 sm:$0xff]   ;;  %v5387_v52 = vld [vmem:[%s7478_s1 + $0xa80] ss:$16 sps:$4 sm:$0xff]  }
 0x118   :  { %3384 = vmatprep.subr.bf16.mxu0 %v5305_v53  ;;  %3712 = vmatprep.subr.bf16.mxu1 %v5308_v54  ;;  %v5390_v53 = vld [vmem:[%s7478_s1 + $0xa88] ss:$16 sps:$4 sm:$0xff]   ;;  %v5395_v54 = vld [vmem:[%s7478_s1 + $0xaa4] ss:$16 sps:$4 sm:$0xff]  }
 0x11b   :  { %3385 = vmatpush1.bf16.msra.mxu0 %v5303_v55  ;;  %3713 = vmatpush1.bf16.msra.mxu1 %v5306_v56  ;;  %v5398_v55 = vld [vmem:[%s7478_s1 + $0xaac] ss:$16 sps:$4 sm:$0xff]   ;;  %v5393_v56 = vld [vmem:[%s7478_s1 + $0xaa0] ss:$16 sps:$4 sm:$0xff]  }
 0x11c   :  { %3386 = vmatprep.subr.bf16.mxu0 %v5311_v57  ;;  %3714 = vmatprep.subr.bf16.mxu1 %v5314_v58  ;;  %v5396_v57 = vld [vmem:[%s7478_s1 + $0xaa8] ss:$16 sps:$4 sm:$0xff]   ;;  %v5401_v58 = vld [vmem:[%s7478_s1 + $0xac4] ss:$16 sps:$4 sm:$0xff]  }
 0x11f   :  { %3387 = vmatpush1.bf16.msra.mxu0 %v5309_v59  ;;  %3715 = vmatpush1.bf16.msra.mxu1 %v5312_v60  ;;  %v5404_v59 = vld [vmem:[%s7478_s1 + $0xacc] ss:$16 sps:$4 sm:$0xff]   ;;  %v5399_v60 = vld [vmem:[%s7478_s1 + $0xac0] ss:$16 sps:$4 sm:$0xff]  }
 0x120   :  { %3388 = vmatprep.subr.bf16.mxu0 %v5317_v61  ;;  %3716 = vmatprep.subr.bf16.mxu1 %v5320_v62  ;;  %v5402_v61 = vld [vmem:[%s7478_s1 + $0xac8] ss:$16 sps:$4 sm:$0xff]   ;;  %v5407_v62 = vld [vmem:[%s7478_s1 + $0xae4] ss:$16 sps:$4 sm:$0xff]  }
 0x123   :  { %3389 = vmatpush1.bf16.msra.mxu0 %v5315_v63  ;;  %3717 = vmatpush1.bf16.msra.mxu1 %v5318_v0  ;;  %v5410_v63 = vld [vmem:[%s7478_s1 + $0xaec] ss:$16 sps:$4 sm:$0xff]   ;;  %v5405_v0 = vld [vmem:[%s7478_s1 + $0xae0] ss:$16 sps:$4 sm:$0xff]  }
 0x124   :  { %3390 = vmatprep.subr.bf16.mxu0 %v5323_v1  ;;  %3718 = vmatprep.subr.bf16.mxu1 %v5326_v2  ;;  %v5408_v1 = vld [vmem:[%s7478_s1 + $0xae8] ss:$16 sps:$4 sm:$0xff]   ;;  %v5413_v2 = vld [vmem:[%s7478_s1 + $0xb04] ss:$16 sps:$4 sm:$0xff]  }
 0x127   :  { %3391 = vmatpush1.bf16.msra.mxu0 %v5321_v3  ;;  %3719 = vmatpush1.bf16.msra.mxu1 %v5324_v4  ;;  %v5416_v3 = vld [vmem:[%s7478_s1 + $0xb0c] ss:$16 sps:$4 sm:$0xff]   ;;  %v5411_v4 = vld [vmem:[%s7478_s1 + $0xb00] ss:$16 sps:$4 sm:$0xff]  }
 0x128   :  { %3392 = vmatprep.subr.bf16.mxu0 %v5329_v5  ;;  %3720 = vmatprep.subr.bf16.mxu1 %v5332_v6  ;;  %v5414_v5 = vld [vmem:[%s7478_s1 + $0xb08] ss:$16 sps:$4 sm:$0xff]   ;;  %v5419_v6 = vld [vmem:[%s7478_s1 + $0xb24] ss:$16 sps:$4 sm:$0xff]  }
 0x12b   :  { %3393 = vmatpush1.bf16.msra.mxu0 %v5327_v7  ;;  %3721 = vmatpush1.bf16.msra.mxu1 %v5330_v8  ;;  %v5422_v7 = vld [vmem:[%s7478_s1 + $0xb2c] ss:$16 sps:$4 sm:$0xff]  }
 0x12c   :  { %3394 = vmatprep.subr.bf16.mxu0 %v5335_v9  ;;  %3722 = vmatprep.subr.bf16.mxu1 %v5338_v10 }
 0x12f   :  { %3395 = vmatpush1.bf16.msra.mxu0 %v5333_v11  ;;  %3723 = vmatpush1.bf16.msra.mxu1 %v5336_v13 }
 0x130   :  { %3396 = vmatprep.subr.bf16.mxu0 %v5341_v14  ;;  %3724 = vmatprep.subr.bf16.mxu1 %v5344_v15 }
 0x133   :  { %3397 = vmatpush1.bf16.msra.mxu0 %v5339_v16  ;;  %3725 = vmatpush1.bf16.msra.mxu1 %v5342_v17 }
 0x134   :  { %3398 = vmatprep.subr.bf16.mxu0 %v5347_v18  ;;  %3726 = vmatprep.subr.bf16.mxu1 %v5350_v20 }
 0x137   :  { %3399 = vmatpush1.bf16.msra.mxu0 %v5345_v21  ;;  %3727 = vmatpush1.bf16.msra.mxu1 %v5348_v23 }
 0x138   :  { %3400 = vmatprep.subr.bf16.mxu0 %v5353_v19  ;;  %3728 = vmatprep.subr.bf16.mxu1 %v5356_v25 }
 0x13b   :  { %3401 = vmatpush1.bf16.msra.mxu0 %v5351_v12  ;;  %3729 = vmatpush1.bf16.msra.mxu1 %v5354_v27 }
 0x13c   :  { %3402 = vmatprep.subr.bf16.mxu0 %v5359_v28  ;;  %3730 = vmatprep.subr.bf16.mxu1 %v5362_v30 }
 0x13f   :  { %3403 = vmatpush1.bf16.msra.mxu0 %v5357_v22  ;;  %3731 = vmatpush1.bf16.msra.mxu1 %v5360_v32 }
 0x140   :  { %3413 = vmatprep.subr.bf16.mxu0 %v5365_v33  ;;  %3741 = vmatprep.subr.bf16.mxu1 %v5368_v26 }
 0x142   :  { %3405 = vmatmul.mubr.bf16.vlgmr.msra.gmra.mrb[0].mxu0 %v6558_v29  ;;  %3733 = vmatmul.mubr.bf16.vlgmr.msra.gmra.mrb[0].mxu1 %v6558_v29  ;;  %v5380_v29 = vld [vmem:[%s7478_s1 + $0xa4c] ss:$16 sps:$4 sm:$0xff]  }
 0x143   :  { %3414 = vmatpush1.bf16.msra.mxu0 %v5363_v35  ;;  %3742 = vmatpush1.bf16.msra.mxu1 %v5366_v36 }
 0x144   :  { %3415 = vmatprep.subr.bf16.mxu0 %v5371_v24  ;;  %3743 = vmatprep.subr.bf16.mxu1 %v5374_v37 }
 0x145   :  { %3445 = vmatprep.mubr.bf16.mxu0 %v614_v38  ;;  %3773 = vmatprep.mubr.bf16.mxu1 %v614_v38 }
 0x147   :  { %3416 = vmatpush1.bf16.msra.mxu0 %v5369_v39  ;;  %3744 = vmatpush1.bf16.msra.mxu1 %v5372_v40 }
 0x148   :  { %3417 = vmatprep.subr.bf16.mxu0 %v5377_v41  ;;  %3745 = vmatprep.subr.bf16.mxu1 %v5380_v29 }
 0x14b   :  { %3418 = vmatpush1.bf16.msra.mxu0 %v5375_v43  ;;  %3746 = vmatpush1.bf16.msra.mxu1 %v5378_v44 }
 0x14c   :  { %3419 = vmatprep.subr.bf16.mxu0 %v5383_v45  ;;  %3747 = vmatprep.subr.bf16.mxu1 %v5386_v46 }
 0x14f   :  { %3420 = vmatpush1.bf16.msra.mxu0 %v5381_v47  ;;  %3748 = vmatpush1.bf16.msra.mxu1 %v5384_v48 }
 0x150   :  { %3421 = vmatprep.subr.bf16.mxu0 %v5389_v50  ;;  %3749 = vmatprep.subr.bf16.mxu1 %v5392_v51 }
 0x153   :  { %3422 = vmatpush1.bf16.msra.mxu0 %v5387_v52  ;;  %3750 = vmatpush1.bf16.msra.mxu1 %v5390_v53 }
 0x154   :  { %3423 = vmatprep.subr.bf16.mxu0 %v5395_v54  ;;  %3751 = vmatprep.subr.bf16.mxu1 %v5398_v55 }
 0x157   :  { %3424 = vmatpush1.bf16.msra.mxu0 %v5393_v56  ;;  %3752 = vmatpush1.bf16.msra.mxu1 %v5396_v57 }
 0x158   :  { %3425 = vmatprep.subr.bf16.mxu0 %v5401_v58  ;;  %3753 = vmatprep.subr.bf16.mxu1 %v5404_v59 }
 0x15b   :  { %3426 = vmatpush1.bf16.msra.mxu0 %v5399_v60  ;;  %3754 = vmatpush1.bf16.msra.mxu1 %v5402_v61 }
 0x15c   :  { %3427 = vmatprep.subr.bf16.mxu0 %v5407_v62  ;;  %3755 = vmatprep.subr.bf16.mxu1 %v5410_v63 }
 0x15f   :  { %3428 = vmatpush1.bf16.msra.mxu0 %v5405_v0  ;;  %3756 = vmatpush1.bf16.msra.mxu1 %v5408_v1 }
 0x160   :  { %3429 = vmatprep.subr.bf16.mxu0 %v5413_v2  ;;  %3757 = vmatprep.subr.bf16.mxu1 %v5416_v3 }
 0x161   :  { %10 = vsyncpa [#allocation3], 0  ;;  %v5417_v8 = vld [vmem:[%s7478_s1 + $0xb20] ss:$16 sps:$4 sm:$0xff]   ;;  %v5420_v9 = vld [vmem:[%s7478_s1 + $0xb28] ss:$16 sps:$4 sm:$0xff]  }
 0x162   :  { %v5425_v10 = vld [vmem:[%s7478_s1 + $0xb44] ss:$16 sps:$4 sm:$0xff]   ;;  %v5428_v11 = vld [vmem:[%s7478_s1 + $0xb4c] ss:$16 sps:$4 sm:$0xff]   ;;  %v5423_v13 = vld [vmem:[%s7478_s1 + $0xb40] ss:$16 sps:$4 sm:$0xff]  }
 0x163   :  { %3430 = vmatpush1.bf16.msra.mxu0 %v5411_v4  ;;  %3758 = vmatpush1.bf16.msra.mxu1 %v5414_v5  ;;  %v5426_v14 = vld [vmem:[%s7478_s1 + $0xb48] ss:$16 sps:$4 sm:$0xff]   ;;  %v5431_v15 = vld [vmem:[%s7478_s1 + $0xb64] ss:$16 sps:$4 sm:$0xff]   ;;  %v5434_v16 = vld [vmem:[%s7478_s1 + $0xb6c] ss:$16 sps:$4 sm:$0xff]  }
 0x164   :  { %3431 = vmatprep.subr.bf16.mxu0 %v5419_v6  ;;  %3759 = vmatprep.subr.bf16.mxu1 %v5422_v7  ;;  %v5429_v17 = vld [vmem:[%s7478_s1 + $0xb60] ss:$16 sps:$4 sm:$0xff]   ;;  %v5432_v18 = vld [vmem:[%s7478_s1 + $0xb68] ss:$16 sps:$4 sm:$0xff]   ;;  %v5437_v20 = vld [vmem:[%s7478_s1 + $0xb84] ss:$16 sps:$4 sm:$0xff]  }
 0x165   :  { %v5440_v21 = vld [vmem:[%s7478_s1 + $0xb8c] ss:$16 sps:$4 sm:$0xff]   ;;  %v5435_v23 = vld [vmem:[%s7478_s1 + $0xb80] ss:$16 sps:$4 sm:$0xff]   ;;  %v5438_v19 = vld [vmem:[%s7478_s1 + $0xb88] ss:$16 sps:$4 sm:$0xff]  }
 0x166   :  { %v5443_v25 = vld [vmem:[%s7478_s1 + $0xba4] ss:$16 sps:$4 sm:$0xff]   ;;  %v5446_v12 = vld [vmem:[%s7478_s1 + $0xbac] ss:$16 sps:$4 sm:$0xff]   ;;  %v5441_v27 = vld [vmem:[%s7478_s1 + $0xba0] ss:$16 sps:$4 sm:$0xff]  }
 0x167   :  { %3432 = vmatpush1.bf16.msra.mxu0 %v5417_v8  ;;  %3760 = vmatpush1.bf16.msra.mxu1 %v5420_v9  ;;  %v5444_v28 = vld [vmem:[%s7478_s1 + $0xba8] ss:$16 sps:$4 sm:$0xff]   ;;  %v5449_v30 = vld [vmem:[%s7478_s1 + $0xbc4] ss:$16 sps:$4 sm:$0xff]   ;;  %v5452_v31 = vld [vmem:[%s7478_s1 + $0xbcc] ss:$16 sps:$4 sm:$0xff]  }
 0x168   :  { %3433 = vmatprep.subr.bf16.mxu0 %v5425_v10  ;;  %3761 = vmatprep.subr.bf16.mxu1 %v5428_v11  ;;  %v5447_v22 = vld [vmem:[%s7478_s1 + $0xbc0] ss:$16 sps:$4 sm:$0xff]   ;;  %v5450_v32 = vld [vmem:[%s7478_s1 + $0xbc8] ss:$16 sps:$4 sm:$0xff]   ;;  %v5455_v33 = vld [vmem:[%s7478_s1 + $0xbe4] ss:$16 sps:$4 sm:$0xff]  }
 0x169   :  { %v5458_v26 = vld [vmem:[%s7478_s1 + $0xbec] ss:$16 sps:$4 sm:$0xff]   ;;  %v5453_v36 = vld [vmem:[%s7478_s1 + $0xbe0] ss:$16 sps:$4 sm:$0xff]   ;;  %v5456_v24 = vld [vmem:[%s7478_s1 + $0xbe8] ss:$16 sps:$4 sm:$0xff]  }
 0x16a   :  { %v6948_v35 = vld [vmem:[%s7477_s0 + $0x18] sm:$0xff]  ;;  %v5462_v37 = vld [vmem:[%s7478_s1 + $0xc04] ss:$16 sps:$4 sm:$0xff]   ;;  %v5460_v40 = vld [vmem:[%s7478_s1 + $0xc00] ss:$16 sps:$4 sm:$0xff]   ;;  %s5710_s25 = smov [#allocation2]  }
 0x16b   :  { %3434 = vmatpush1.bf16.msra.mxu0 %v5423_v13  ;;  %3762 = vmatpush1.bf16.msra.mxu1 %v5426_v14  ;;  %v5465_v38 = vld [vmem:[%s7478_s1 + $0xc0c] ss:$16 sps:$4 sm:$0xff]   ;;  %v6964_v39 = vrot.slane %v6948_v35, %v5876_v49  ;;  %v5463_v41 = vld [vmem:[%s7478_s1 + $0xc08] ss:$16 sps:$4 sm:$0xff]   ;;  %v5468_v29 = vld [vmem:[%s7478_s1 + $0xc24] ss:$16 sps:$4 sm:$0xff]  }
 0x16c   :  { %3435 = vmatprep.subr.bf16.mxu0 %v5431_v15  ;;  %3763 = vmatprep.subr.bf16.mxu1 %v5434_v16  ;;  %v5471_v43 = vld [vmem:[%s7478_s1 + $0xc2c] ss:$16 sps:$4 sm:$0xff]   ;;  %v5466_v45 = vld [vmem:[%s7478_s1 + $0xc20] ss:$16 sps:$4 sm:$0xff]   ;;  %v5469_v46 = vld [vmem:[%s7478_s1 + $0xc28] ss:$16 sps:$4 sm:$0xff]  }
 0x16d   :  { %v630_v44 = vcombine.high %v6964_v39, %v6964_v39  ;;  %v5474_v47 = vld [vmem:[%s7478_s1 + $0xc44] ss:$16 sps:$4 sm:$0xff]   ;;  %v5472_v48 = vld [vmem:[%s7478_s1 + $0xc40] ss:$16 sps:$4 sm:$0xff]   ;;  %v5475_v50 = vld [vmem:[%s7478_s1 + $0xc48] ss:$16 sps:$4 sm:$0xff]  }
 0x16e   :  { %v5480_v51 = vld [vmem:[%s7478_s1 + $0xc64] ss:$16 sps:$4 sm:$0xff]   ;;  %v5483_v52 = vld [vmem:[%s7478_s1 + $0xc6c] ss:$16 sps:$4 sm:$0xff]   ;;  %v5478_v53 = vld [vmem:[%s7478_s1 + $0xc60] ss:$16 sps:$4 sm:$0xff]  }
 0x16f   :  { %3436 = vmatpush1.bf16.msra.mxu0 %v5429_v17  ;;  %3764 = vmatpush1.bf16.msra.mxu1 %v5432_v18  ;;  %v5481_v54 = vld [vmem:[%s7478_s1 + $0xc68] ss:$16 sps:$4 sm:$0xff]   ;;  %v5486_v55 = vld [vmem:[%s7478_s1 + $0xc84] ss:$16 sps:$4 sm:$0xff]   ;;  %v5489_v56 = vld [vmem:[%s7478_s1 + $0xc8c] ss:$16 sps:$4 sm:$0xff]  }
 0x170   :  { %3437 = vmatprep.subr.bf16.mxu0 %v5437_v20  ;;  %3765 = vmatprep.subr.bf16.mxu1 %v5440_v21  ;;  %v5484_v57 = vld [vmem:[%s7478_s1 + $0xc80] ss:$16 sps:$4 sm:$0xff]   ;;  %v5487_v58 = vld [vmem:[%s7478_s1 + $0xc88] ss:$16 sps:$4 sm:$0xff]   ;;  %v5492_v59 = vld [vmem:[%s7478_s1 + $0xca4] ss:$16 sps:$4 sm:$0xff]  }
 0x171   :  { %v5495_v60 = vld [vmem:[%s7478_s1 + $0xcac] ss:$16 sps:$4 sm:$0xff]   ;;  %v5490_v61 = vld [vmem:[%s7478_s1 + $0xca0] ss:$16 sps:$4 sm:$0xff]   ;;  %v5493_v62 = vld [vmem:[%s7478_s1 + $0xca8] ss:$16 sps:$4 sm:$0xff]  }
 0x172   :  { %v5498_v63 = vld [vmem:[%s7478_s1 + $0xcc4] ss:$16 sps:$4 sm:$0xff]   ;;  %v5501_v0 = vld [vmem:[%s7478_s1 + $0xccc] ss:$16 sps:$4 sm:$0xff]   ;;  %v5496_v1 = vld [vmem:[%s7478_s1 + $0xcc0] ss:$16 sps:$4 sm:$0xff]  }
 0x173   :  { %3438 = vmatpush1.bf16.msra.mxu0 %v5435_v23  ;;  %3766 = vmatpush1.bf16.msra.mxu1 %v5438_v19  ;;  %v5499_v2 = vld [vmem:[%s7478_s1 + $0xcc8] ss:$16 sps:$4 sm:$0xff]   ;;  %v5504_v3 = vld [vmem:[%s7478_s1 + $0xce4] ss:$16 sps:$4 sm:$0xff]   ;;  %v5507_v4 = vld [vmem:[%s7478_s1 + $0xcec] ss:$16 sps:$4 sm:$0xff]  }
 0x174   :  { %3439 = vmatprep.subr.bf16.mxu0 %v5443_v25  ;;  %3767 = vmatprep.subr.bf16.mxu1 %v5446_v12  ;;  %v5502_v5 = vld [vmem:[%s7478_s1 + $0xce0] ss:$16 sps:$4 sm:$0xff]   ;;  %v5505_v6 = vld [vmem:[%s7478_s1 + $0xce8] ss:$16 sps:$4 sm:$0xff]   ;;  %v5510_v7 = vld [vmem:[%s7478_s1 + $0xd04] ss:$16 sps:$4 sm:$0xff]  }
 0x175   :  { %v5513_v8 = vld [vmem:[%s7478_s1 + $0xd0c] ss:$16 sps:$4 sm:$0xff]   ;;  %v5508_v9 = vld [vmem:[%s7478_s1 + $0xd00] ss:$16 sps:$4 sm:$0xff]   ;;  %v5511_v10 = vld [vmem:[%s7478_s1 + $0xd08] ss:$16 sps:$4 sm:$0xff]  }
 0x176   :  { %v5516_v11 = vld [vmem:[%s7478_s1 + $0xd24] ss:$16 sps:$4 sm:$0xff]   ;;  %v5519_v13 = vld [vmem:[%s7478_s1 + $0xd2c] ss:$16 sps:$4 sm:$0xff]   ;;  %v5514_v14 = vld [vmem:[%s7478_s1 + $0xd20] ss:$16 sps:$4 sm:$0xff]  }
 0x177   :  { %3440 = vmatpush1.bf16.msra.mxu0 %v5441_v27  ;;  %3768 = vmatpush1.bf16.msra.mxu1 %v5444_v28  ;;  %v5517_v15 = vld [vmem:[%s7478_s1 + $0xd28] ss:$16 sps:$4 sm:$0xff]   ;;  %v5522_v16 = vld [vmem:[%s7478_s1 + $0xd44] ss:$16 sps:$4 sm:$0xff]   ;;  %v5525_v17 = vld [vmem:[%s7478_s1 + $0xd4c] ss:$16 sps:$4 sm:$0xff]  }
 0x178   :  { %3441 = vmatprep.subr.bf16.mxu0 %v5449_v30  ;;  %3769 = vmatprep.subr.bf16.mxu1 %v5452_v31  ;;  %v5520_v18 = vld [vmem:[%s7478_s1 + $0xd40] ss:$16 sps:$4 sm:$0xff]   ;;  %v5523_v20 = vld [vmem:[%s7478_s1 + $0xd48] ss:$16 sps:$4 sm:$0xff]   ;;  %v5528_v21 = vld [vmem:[%s7478_s1 + $0xd64] ss:$16 sps:$4 sm:$0xff]  }
 0x179   :  { %v5531_v23 = vld [vmem:[%s7478_s1 + $0xd6c] ss:$16 sps:$4 sm:$0xff]   ;;  %v5526_v19 = vld [vmem:[%s7478_s1 + $0xd60] ss:$16 sps:$4 sm:$0xff]   ;;  %v5529_v25 = vld [vmem:[%s7478_s1 + $0xd68] ss:$16 sps:$4 sm:$0xff]  }
 0x17a   :  { %v5534_v12 = vld [vmem:[%s7478_s1 + $0xd84] ss:$16 sps:$4 sm:$0xff]   ;;  %v5537_v27 = vld [vmem:[%s7478_s1 + $0xd8c] ss:$16 sps:$4 sm:$0xff]   ;;  %v5532_v28 = vld [vmem:[%s7478_s1 + $0xd80] ss:$16 sps:$4 sm:$0xff]  }
 0x17b   :  { %3442 = vmatpush1.bf16.msra.mxu0 %v5447_v22  ;;  %3770 = vmatpush1.bf16.msra.mxu1 %v5450_v32  ;;  %v5535_v30 = vld [vmem:[%s7478_s1 + $0xd88] ss:$16 sps:$4 sm:$0xff]   ;;  %v5540_v31 = vld [vmem:[%s7478_s1 + $0xda4] ss:$16 sps:$4 sm:$0xff]   ;;  %v5543_v22 = vld [vmem:[%s7478_s1 + $0xdac] ss:$16 sps:$4 sm:$0xff]  }
 0x17c   :  { %3443 = vmatprep.subr.bf16.mxu0 %v5455_v33  ;;  %3771 = vmatprep.subr.bf16.mxu1 %v5458_v26  ;;  %v5538_v32 = vld [vmem:[%s7478_s1 + $0xda0] ss:$16 sps:$4 sm:$0xff]   ;;  %v5541_v33 = vld [vmem:[%s7478_s1 + $0xda8] ss:$16 sps:$4 sm:$0xff]   ;;  %v5546_v26 = vld [vmem:[%s7478_s1 + $0xdc4] ss:$16 sps:$4 sm:$0xff]  }
 0x17d   :  { %s4222_s26 = sshll.u32 %s5710_s25, 4  ;;  %s4223_s26 = int_to_ptr.vmem [resolvable:$true] %s4222_s26 }
 0x17e   :  { %s5685_s27 = scalar_lea.vmem %s4223_s26, 64  ;;  %p5690_p1 = scmp.lt.s32.totalorder %s4223_s26, %s4223_s26 }
 0x17f   :  { %3444 = vmatpush1.bf16.msra.mxu0 %v5453_v36  ;;  %3772 = vmatpush1.bf16.msra.mxu1 %v5456_v24  ;;  %v5549_v36 = vld [vmem:[%s7478_s1 + $0xdcc] ss:$16 sps:$4 sm:$0xff]   ;;  %v5544_v24 = vld [vmem:[%s7478_s1 + $0xdc0] ss:$16 sps:$4 sm:$0xff]   ;;  %p5686_p0 = scmp.ne.s32.totalorder %s4223_s26, %s5685_s27  ;;  %p5691_p2 = scmp.lt.s32.totalorder %s5685_s27, %s5685_s27 }
 0x180   :  { %3454 = vmatprep.subr.bf16.mxu0 %v5462_v37  ;;  %3782 = vmatprep.subr.bf16.mxu1 %v5465_v38  ;;  %v5547_v37 = vld [vmem:[%s7478_s1 + $0xdc8] ss:$16 sps:$4 sm:$0xff]   ;;  %v5552_v38 = vld [vmem:[%s7478_s1 + $0xde4] ss:$16 sps:$4 sm:$0xff]  }
 0x181   :  { %p5692_p3 = por %p5691_p2, %p5690_p1 }
 0x182   :  { %3446 = vmatmul.mubr.bf16.vlgmr.msra.gmra.mrb[0].mxu0 %v6759_v34  ;;  %3774 = vmatmul.mubr.bf16.vlgmr.msra.gmra.mrb[0].mxu1 %v6759_v34  ;;  %v5477_v34 = vld [vmem:[%s7478_s1 + $0xc4c] ss:$16 sps:$4 sm:$0xff]  }
 0x183   :  { %3455 = vmatpush1.bf16.msra.mxu0 %v5460_v40  ;;  %3783 = vmatpush1.bf16.msra.mxu1 %v5463_v41  ;;  %v5555_v40 = vld [vmem:[%s7478_s1 + $0xdec] ss:$16 sps:$4 sm:$0xff]   ;;  %v615_v41 = vcombine.high %v6948_v35, %v6948_v35  ;;  %p5693_p4 = pnand %p5692_p3, %p5686_p0 }
 0x184   :  { %3456 = vmatprep.subr.bf16.mxu0 %v5468_v29  ;;  %3784 = vmatprep.subr.bf16.mxu1 %v5471_v43  ;;  %v5550_v29 = vld [vmem:[%s7478_s1 + $0xde0] ss:$16 sps:$4 sm:$0xff]   ;;  %v5553_v43 = vld [vmem:[%s7478_s1 + $0xde8] ss:$16 sps:$4 sm:$0xff]   ;;  %v5561_v35 = vld [vmem:[%s7478_s1 + $0xe0c] ss:$16 sps:$4 sm:$0xff]  }
 0x185   :  { %3486 = vmatprep.mubr.bf16.mxu0 %v630_v44  ;;  %3814 = vmatprep.mubr.bf16.mxu1 %v630_v44  ;;  %v5558_v44 = vld [vmem:[%s7478_s1 + $0xe04] ss:$16 sps:$4 sm:$0xff]  }
 0x187   :  { %3457 = vmatpush1.bf16.msra.mxu0 %v5466_v45  ;;  %3785 = vmatpush1.bf16.msra.mxu1 %v5469_v46  ;;  %v7165_v45 = vrot.slane %v615_v41, %v5876_v49  ;;  %v5556_v46 = vld [vmem:[%s7478_s1 + $0xe00] ss:$16 sps:$4 sm:$0xff]   ;;  %v5567_v49 = vld [vmem:[%s7478_s1 + $0xe2c] ss:$16 sps:$4 sm:$0xff]  }
 0x188   :  { %3458 = vmatprep.subr.bf16.mxu0 %v5474_v47  ;;  %3786 = vmatprep.subr.bf16.mxu1 %v5477_v34  ;;  %v5559_v47 = vld [vmem:[%s7478_s1 + $0xe08] ss:$16 sps:$4 sm:$0xff]   ;;  %v5564_v34 = vld [vmem:[%s7478_s1 + $0xe24] ss:$16 sps:$4 sm:$0xff]   ;;  %v5640_v41 = vld [vmem:[%s7478_s1 + $0xfc0] ss:$16 sps:$4 sm:$0xff]  }
 0x18b   :  { %3459 = vmatpush1.bf16.msra.mxu0 %v5472_v48  ;;  %3787 = vmatpush1.bf16.msra.mxu1 %v5475_v50  ;;  %v631_v48 = vcombine.high %v7165_v45, %v7165_v45  ;;  %v5562_v50 = vld [vmem:[%s7478_s1 + $0xe20] ss:$16 sps:$4 sm:$0xff]  }
 0x18c   :  { %3460 = vmatprep.subr.bf16.mxu0 %v5480_v51  ;;  %3788 = vmatprep.subr.bf16.mxu1 %v5483_v52  ;;  %v5565_v51 = vld [vmem:[%s7478_s1 + $0xe28] ss:$16 sps:$4 sm:$0xff]   ;;  %v5570_v52 = vld [vmem:[%s7478_s1 + $0xe44] ss:$16 sps:$4 sm:$0xff]  }
 0x18f   :  { %3461 = vmatpush1.bf16.msra.mxu0 %v5478_v53  ;;  %3789 = vmatpush1.bf16.msra.mxu1 %v5481_v54  ;;  %v5568_v53 = vld [vmem:[%s7478_s1 + $0xe40] ss:$16 sps:$4 sm:$0xff]   ;;  %v5571_v54 = vld [vmem:[%s7478_s1 + $0xe48] ss:$16 sps:$4 sm:$0xff]  }
 0x190   :  { %3462 = vmatprep.subr.bf16.mxu0 %v5486_v55  ;;  %3790 = vmatprep.subr.bf16.mxu1 %v5489_v56  ;;  %v5576_v55 = vld [vmem:[%s7478_s1 + $0xe64] ss:$16 sps:$4 sm:$0xff]   ;;  %v5579_v56 = vld [vmem:[%s7478_s1 + $0xe6c] ss:$16 sps:$4 sm:$0xff]  }
 0x193   :  { %3463 = vmatpush1.bf16.msra.mxu0 %v5484_v57  ;;  %3791 = vmatpush1.bf16.msra.mxu1 %v5487_v58  ;;  %v5574_v57 = vld [vmem:[%s7478_s1 + $0xe60] ss:$16 sps:$4 sm:$0xff]   ;;  %v5577_v58 = vld [vmem:[%s7478_s1 + $0xe68] ss:$16 sps:$4 sm:$0xff]  }
 0x194   :  { %3464 = vmatprep.subr.bf16.mxu0 %v5492_v59  ;;  %3792 = vmatprep.subr.bf16.mxu1 %v5495_v60  ;;  %v5582_v59 = vld [vmem:[%s7478_s1 + $0xe84] ss:$16 sps:$4 sm:$0xff]   ;;  %v5585_v60 = vld [vmem:[%s7478_s1 + $0xe8c] ss:$16 sps:$4 sm:$0xff]  }
 0x197   :  { %3465 = vmatpush1.bf16.msra.mxu0 %v5490_v61  ;;  %3793 = vmatpush1.bf16.msra.mxu1 %v5493_v62  ;;  %v5580_v61 = vld [vmem:[%s7478_s1 + $0xe80] ss:$16 sps:$4 sm:$0xff]   ;;  %v5583_v62 = vld [vmem:[%s7478_s1 + $0xe88] ss:$16 sps:$4 sm:$0xff]  }
 0x198   :  { %3466 = vmatprep.subr.bf16.mxu0 %v5498_v63  ;;  %3794 = vmatprep.subr.bf16.mxu1 %v5501_v0  ;;  %v5588_v63 = vld [vmem:[%s7478_s1 + $0xea4] ss:$16 sps:$4 sm:$0xff]   ;;  %v5591_v0 = vld [vmem:[%s7478_s1 + $0xeac] ss:$16 sps:$4 sm:$0xff]  }
 0x19b   :  { %3467 = vmatpush1.bf16.msra.mxu0 %v5496_v1  ;;  %3795 = vmatpush1.bf16.msra.mxu1 %v5499_v2  ;;  %v5586_v1 = vld [vmem:[%s7478_s1 + $0xea0] ss:$16 sps:$4 sm:$0xff]   ;;  %v5589_v2 = vld [vmem:[%s7478_s1 + $0xea8] ss:$16 sps:$4 sm:$0xff]  }
 0x19c   :  { %3468 = vmatprep.subr.bf16.mxu0 %v5504_v3  ;;  %3796 = vmatprep.subr.bf16.mxu1 %v5507_v4  ;;  %v5594_v3 = vld [vmem:[%s7478_s1 + $0xec4] ss:$16 sps:$4 sm:$0xff]   ;;  %v5597_v4 = vld [vmem:[%s7478_s1 + $0xecc] ss:$16 sps:$4 sm:$0xff]  }
 0x19f   :  { %3469 = vmatpush1.bf16.msra.mxu0 %v5502_v5  ;;  %3797 = vmatpush1.bf16.msra.mxu1 %v5505_v6  ;;  %v5592_v5 = vld [vmem:[%s7478_s1 + $0xec0] ss:$16 sps:$4 sm:$0xff]   ;;  %v5595_v6 = vld [vmem:[%s7478_s1 + $0xec8] ss:$16 sps:$4 sm:$0xff]  }
 0x1a0   :  { %3470 = vmatprep.subr.bf16.mxu0 %v5510_v7  ;;  %3798 = vmatprep.subr.bf16.mxu1 %v5513_v8  ;;  %v5600_v7 = vld [vmem:[%s7478_s1 + $0xee4] ss:$16 sps:$4 sm:$0xff]   ;;  %v5603_v8 = vld [vmem:[%s7478_s1 + $0xeec] ss:$16 sps:$4 sm:$0xff]  }
 0x1a3   :  { %3471 = vmatpush1.bf16.msra.mxu0 %v5508_v9  ;;  %3799 = vmatpush1.bf16.msra.mxu1 %v5511_v10  ;;  %v5598_v9 = vld [vmem:[%s7478_s1 + $0xee0] ss:$16 sps:$4 sm:$0xff]   ;;  %v5601_v10 = vld [vmem:[%s7478_s1 + $0xee8] ss:$16 sps:$4 sm:$0xff]  }
 0x1a4   :  { %3472 = vmatprep.subr.bf16.mxu0 %v5516_v11  ;;  %3800 = vmatprep.subr.bf16.mxu1 %v5519_v13  ;;  %v5606_v11 = vld [vmem:[%s7478_s1 + $0xf04] ss:$16 sps:$4 sm:$0xff]   ;;  %v5609_v13 = vld [vmem:[%s7478_s1 + $0xf0c] ss:$16 sps:$4 sm:$0xff]  }
 0x1a7   :  { %3473 = vmatpush1.bf16.msra.mxu0 %v5514_v14  ;;  %3801 = vmatpush1.bf16.msra.mxu1 %v5517_v15  ;;  %v5604_v14 = vld [vmem:[%s7478_s1 + $0xf00] ss:$16 sps:$4 sm:$0xff]   ;;  %v5607_v15 = vld [vmem:[%s7478_s1 + $0xf08] ss:$16 sps:$4 sm:$0xff]  }
 0x1a8   :  { %3474 = vmatprep.subr.bf16.mxu0 %v5522_v16  ;;  %3802 = vmatprep.subr.bf16.mxu1 %v5525_v17  ;;  %v5612_v16 = vld [vmem:[%s7478_s1 + $0xf24] ss:$16 sps:$4 sm:$0xff]   ;;  %v5615_v17 = vld [vmem:[%s7478_s1 + $0xf2c] ss:$16 sps:$4 sm:$0xff]  }
 0x1ab   :  { %3475 = vmatpush1.bf16.msra.mxu0 %v5520_v18  ;;  %3803 = vmatpush1.bf16.msra.mxu1 %v5523_v20  ;;  %v5610_v18 = vld [vmem:[%s7478_s1 + $0xf20] ss:$16 sps:$4 sm:$0xff]   ;;  %v5613_v20 = vld [vmem:[%s7478_s1 + $0xf28] ss:$16 sps:$4 sm:$0xff]  }
 0x1ac   :  { %3476 = vmatprep.subr.bf16.mxu0 %v5528_v21  ;;  %3804 = vmatprep.subr.bf16.mxu1 %v5531_v23  ;;  %v5618_v21 = vld [vmem:[%s7478_s1 + $0xf44] ss:$16 sps:$4 sm:$0xff]   ;;  %v5621_v23 = vld [vmem:[%s7478_s1 + $0xf4c] ss:$16 sps:$4 sm:$0xff]  }
 0x1af   :  { %3477 = vmatpush1.bf16.msra.mxu0 %v5526_v19  ;;  %3805 = vmatpush1.bf16.msra.mxu1 %v5529_v25  ;;  %v5616_v19 = vld [vmem:[%s7478_s1 + $0xf40] ss:$16 sps:$4 sm:$0xff]   ;;  %v5619_v25 = vld [vmem:[%s7478_s1 + $0xf48] ss:$16 sps:$4 sm:$0xff]  }
 0x1b0   :  { %3478 = vmatprep.subr.bf16.mxu0 %v5534_v12  ;;  %3806 = vmatprep.subr.bf16.mxu1 %v5537_v27  ;;  %v5624_v12 = vld [vmem:[%s7478_s1 + $0xf64] ss:$16 sps:$4 sm:$0xff]   ;;  %v5627_v27 = vld [vmem:[%s7478_s1 + $0xf6c] ss:$16 sps:$4 sm:$0xff]  }
 0x1b3   :  { %3479 = vmatpush1.bf16.msra.mxu0 %v5532_v28  ;;  %3807 = vmatpush1.bf16.msra.mxu1 %v5535_v30  ;;  %v5622_v28 = vld [vmem:[%s7478_s1 + $0xf60] ss:$16 sps:$4 sm:$0xff]   ;;  %v5625_v30 = vld [vmem:[%s7478_s1 + $0xf68] ss:$16 sps:$4 sm:$0xff]  }
 0x1b4   :  { %3480 = vmatprep.subr.bf16.mxu0 %v5540_v31  ;;  %3808 = vmatprep.subr.bf16.mxu1 %v5543_v22  ;;  %v5630_v31 = vld [vmem:[%s7478_s1 + $0xf84] ss:$16 sps:$4 sm:$0xff]   ;;  %v5633_v22 = vld [vmem:[%s7478_s1 + $0xf8c] ss:$16 sps:$4 sm:$0xff]  }
 0x1b7   :  { %3481 = vmatpush1.bf16.msra.mxu0 %v5538_v32  ;;  %3809 = vmatpush1.bf16.msra.mxu1 %v5541_v33  ;;  %v5628_v32 = vld [vmem:[%s7478_s1 + $0xf80] ss:$16 sps:$4 sm:$0xff]   ;;  %v5631_v33 = vld [vmem:[%s7478_s1 + $0xf88] ss:$16 sps:$4 sm:$0xff]  }
 0x1b8   :  { %3482 = vmatprep.subr.bf16.mxu0 %v5546_v26  ;;  %3810 = vmatprep.subr.bf16.mxu1 %v5549_v36  ;;  %v5636_v26 = vld [vmem:[%s7478_s1 + $0xfa4] ss:$16 sps:$4 sm:$0xff]   ;;  %v5639_v36 = vld [vmem:[%s7478_s1 + $0xfac] ss:$16 sps:$4 sm:$0xff]  }
 0x1bb   :  { %3483 = vmatpush1.bf16.msra.mxu0 %v5544_v24  ;;  %3811 = vmatpush1.bf16.msra.mxu1 %v5547_v37  ;;  %v5634_v24 = vld [vmem:[%s7478_s1 + $0xfa0] ss:$16 sps:$4 sm:$0xff]   ;;  %v5637_v37 = vld [vmem:[%s7478_s1 + $0xfa8] ss:$16 sps:$4 sm:$0xff]  }
 0x1bc   :  { %3484 = vmatprep.subr.bf16.mxu0 %v5552_v38  ;;  %3812 = vmatprep.subr.bf16.mxu1 %v5555_v40  ;;  %v5642_v38 = vld [vmem:[%s7478_s1 + $0xfc4] ss:$16 sps:$4 sm:$0xff]   ;;  %v5645_v40 = vld [vmem:[%s7478_s1 + $0xfcc] ss:$16 sps:$4 sm:$0xff]  }
 0x1bf   :  { %3485 = vmatpush1.bf16.msra.mxu0 %v5550_v29  ;;  %3813 = vmatpush1.bf16.msra.mxu1 %v5553_v43  ;;  %v5643_v29 = vld [vmem:[%s7478_s1 + $0xfc8] ss:$16 sps:$4 sm:$0xff]   ;;  %v5648_v43 = vld [vmem:[%s7478_s1 + $0xfe4] ss:$16 sps:$4 sm:$0xff]  }
 0x1c0   :  { %3495 = vmatprep.subr.bf16.mxu0 %v5558_v44  ;;  %3823 = vmatprep.subr.bf16.mxu1 %v5561_v35  ;;  %v5651_v44 = vld [vmem:[%s7478_s1 + $0xfec] ss:$16 sps:$4 sm:$0xff]   ;;  %v5646_v35 = vld [vmem:[%s7478_s1 + $0xfe0] ss:$16 sps:$4 sm:$0xff]  }
 0x1c2   :  { %3487 = vmatmul.mubr.bf16.vlgmr.msra.gmra.mrb[0].mxu0 %v6964_v39  ;;  %3815 = vmatmul.mubr.bf16.vlgmr.msra.gmra.mrb[0].mxu1 %v6964_v39  ;;  %v5573_v39 = vld [vmem:[%s7478_s1 + $0xe4c] ss:$16 sps:$4 sm:$0xff]  }
 0x1c3   :  { %3496 = vmatpush1.bf16.msra.mxu0 %v5556_v46  ;;  %3824 = vmatpush1.bf16.msra.mxu1 %v5559_v47  ;;  %v5649_v46 = vld [vmem:[%s7478_s1 + $0xfe8] ss:$16 sps:$4 sm:$0xff]   ;;  %v5653_v47 = vld [vmem:[%s7480_s3 + $0x40] sm:$0xff]  }
 0x1c4   :  { %3497 = vmatprep.subr.bf16.mxu0 %v5564_v34  ;;  %3825 = vmatprep.subr.bf16.mxu1 %v5567_v49  ;;  %v5654_v34 = vld [vmem:[%s7480_s3 + $0xc0] sm:$0xff]  }
 0x1c5   :  { %3527 = vmatprep.mubr.bf16.mxu0 %v631_v48  ;;  %3855 = vmatprep.mubr.bf16.mxu1 %v631_v48  ;;  %v5655_v49 = vld [vmem:[%s7480_s3] sm:$0xff]  }
 0x1c6   :  { %v5656_v48 = vld [vmem:[%s7480_s3 + $0x80] sm:$0xff]  }
 0x1c7   :  { %3498 = vmatpush1.bf16.msra.mxu0 %v5562_v50  ;;  %3826 = vmatpush1.bf16.msra.mxu1 %v5565_v51  ;;  %v5657_v50 = vld [vmem:[%s7480_s3 + $0x48] sm:$0xff]  }
 0x1c8   :  { %3499 = vmatprep.subr.bf16.mxu0 %v5570_v52  ;;  %3827 = vmatprep.subr.bf16.mxu1 %v5573_v39  ;;  %v5658_v51 = vld [vmem:[%s7480_s3 + $0xc8] sm:$0xff]  }
 0x1c9   :  { %v5659_v52 = vld [vmem:[%s7480_s3 + $0x8] sm:$0xff]  }
 0x1ca   :  { %v5660_v39 = vld [vmem:[%s7480_s3 + $0x88] sm:$0xff]  }
 0x1cb   :  { %3500 = vmatpush1.bf16.msra.mxu0 %v5568_v53  ;;  %3828 = vmatpush1.bf16.msra.mxu1 %v5571_v54  ;;  %v5661_v53 = vld [vmem:[%s7480_s3 + $0x50] sm:$0xff]  }
 0x1cc   :  { %3501 = vmatprep.subr.bf16.mxu0 %v5576_v55  ;;  %3829 = vmatprep.subr.bf16.mxu1 %v5579_v56  ;;  %v5663_v54 = vld [vmem:[%s7480_s3 + $0x10] sm:$0xff]   ;;  %v5665_v56 = vld [vmem:[%s7480_s3 + $0x58] sm:$0xff]  }
 0x1cd   :  { %v5664_v55 = vld [vmem:[%s7480_s3 + $0x90] sm:$0xff]  }
 0x1cf   :  { %3502 = vmatpush1.bf16.msra.mxu0 %v5574_v57  ;;  %3830 = vmatpush1.bf16.msra.mxu1 %v5577_v58  ;;  %v5666_v57 = vld [vmem:[%s7480_s3 + $0xd8] sm:$0xff]  }
 0x1d0   :  { %3503 = vmatprep.subr.bf16.mxu0 %v5582_v59  ;;  %3831 = vmatprep.subr.bf16.mxu1 %v5585_v60  ;;  %v5667_v58 = vld [vmem:[%s7480_s3 + $0x18] sm:$0xff]   ;;  %v5669_v60 = vld [vmem:[%s7480_s3 + $0x60] sm:$0xff]  }
 0x1d1   :  { %v5668_v59 = vld [vmem:[%s7480_s3 + $0x98] sm:$0xff]  }
 0x1d3   :  { %3504 = vmatpush1.bf16.msra.mxu0 %v5580_v61  ;;  %3832 = vmatpush1.bf16.msra.mxu1 %v5583_v62  ;;  %v5670_v61 = vld [vmem:[%s7480_s3 + $0xe0] sm:$0xff]  }
 0x1d4   :  { %3505 = vmatprep.subr.bf16.mxu0 %v5588_v63  ;;  %3833 = vmatprep.subr.bf16.mxu1 %v5591_v0  ;;  %v5671_v62 = vld [vmem:[%s7480_s3 + $0x20] sm:$0xff]   ;;  %v5673_v0 = vld [vmem:[%s7480_s3 + $0x68] sm:$0xff]  }
 0x1d5   :  { %v5672_v63 = vld [vmem:[%s7480_s3 + $0xa0] sm:$0xff]  }
 0x1d7   :  { %3506 = vmatpush1.bf16.msra.mxu0 %v5586_v1  ;;  %3834 = vmatpush1.bf16.msra.mxu1 %v5589_v2  ;;  %v5674_v1 = vld [vmem:[%s7480_s3 + $0xe8] sm:$0xff]  }
 0x1d8   :  { %3507 = vmatprep.subr.bf16.mxu0 %v5594_v3  ;;  %3835 = vmatprep.subr.bf16.mxu1 %v5597_v4  ;;  %v5675_v2 = vld [vmem:[%s7480_s3 + $0x28] sm:$0xff]   ;;  %v5677_v4 = vld [vmem:[%s7480_s3 + $0x70] sm:$0xff]  }
 0x1d9   :  { %v5676_v3 = vld [vmem:[%s7480_s3 + $0xa8] sm:$0xff]  }
 0x1db   :  { %3508 = vmatpush1.bf16.msra.mxu0 %v5592_v5  ;;  %3836 = vmatpush1.bf16.msra.mxu1 %v5595_v6  ;;  %v5678_v5 = vld [vmem:[%s7480_s3 + $0xf0] sm:$0xff]  }
 0x1dc   :  { %3509 = vmatprep.subr.bf16.mxu0 %v5600_v7  ;;  %3837 = vmatprep.subr.bf16.mxu1 %v5603_v8  ;;  %v5679_v6 = vld [vmem:[%s7480_s3 + $0x30] sm:$0xff]   ;;  %v5681_v8 = vld [vmem:[%s7480_s3 + $0x78] sm:$0xff]  }
 0x1dd   :  { %v5680_v7 = vld [vmem:[%s7480_s3 + $0xb0] sm:$0xff]  }
 0x1df   :  { %3510 = vmatpush1.bf16.msra.mxu0 %v5598_v9  ;;  %3838 = vmatpush1.bf16.msra.mxu1 %v5601_v10  ;;  %v5682_v9 = vld [vmem:[%s7480_s3 + $0xf8] sm:$0xff]  }
 0x1e0   :  { %3511 = vmatprep.subr.bf16.mxu0 %v5606_v11  ;;  %3839 = vmatprep.subr.bf16.mxu1 %v5609_v13  ;;  %v5683_v10 = vld [vmem:[%s7480_s3 + $0x38] sm:$0xff]   ;;  %v542_v13 = vsub.s32 0, %v5858_v42 }
 0x1e1   :  { %v5684_v11 = vld [vmem:[%s7480_s3 + $0xb8] sm:$0xff]  }
 0x1e3   :  { %3512 = vmatpush1.bf16.msra.mxu0 %v5604_v14  ;;  %3840 = vmatpush1.bf16.msra.mxu1 %v5607_v15  ;;  %v550_v14 = vsub.s32 2, %v5858_v42  ;;  %v538_v15 = vld [vmem:[%s7479_s2] sm:$0xf] }
 0x1e4   :  { %3513 = vmatprep.subr.bf16.mxu0 %v5612_v16  ;;  %3841 = vmatprep.subr.bf16.mxu1 %v5615_v17  ;;  %v546_v16 = vsub.s32 1, %v5858_v42  ;;  %v554_v17 = vsub.s32 3, %v5858_v42 }
 0x1e7   :  { %3514 = vmatpush1.bf16.msra.mxu0 %v5610_v18  ;;  %3842 = vmatpush1.bf16.msra.mxu1 %v5613_v20  ;;  %v543_v18 = vrot.slane %v538_v15, %v542_v13  ;;  %v551_v20 = vrot.slane %v538_v15, %v550_v14 }
 0x1e8   :  { %3515 = vmatprep.subr.bf16.mxu0 %v5618_v21  ;;  %3843 = vmatprep.subr.bf16.mxu1 %v5621_v23  ;;  %v547_v21 = vrot.slane %v538_v15, %v546_v16  ;;  %v555_v23 = vrot.slane %v538_v15, %v554_v17 }
 0x1eb   :  { %3516 = vmatpush1.bf16.msra.mxu0 %v5616_v19  ;;  %3844 = vmatpush1.bf16.msra.mxu1 %v5619_v25 }
 0x1ec   :  { %3517 = vmatprep.subr.bf16.mxu0 %v5624_v12  ;;  %3845 = vmatprep.subr.bf16.mxu1 %v5627_v27 }
 0x1ef   :  { %3518 = vmatpush1.bf16.msra.mxu0 %v5622_v28  ;;  %3846 = vmatpush1.bf16.msra.mxu1 %v5625_v30 }
 0x1f0   :  { %3519 = vmatprep.subr.bf16.mxu0 %v5630_v31  ;;  %3847 = vmatprep.subr.bf16.mxu1 %v5633_v22 }
 0x1f3   :  { %3520 = vmatpush1.bf16.msra.mxu0 %v5628_v32  ;;  %3848 = vmatpush1.bf16.msra.mxu1 %v5631_v33 }
 0x1f4   :  { %3521 = vmatprep.subr.bf16.mxu0 %v5636_v26  ;;  %3849 = vmatprep.subr.bf16.mxu1 %v5639_v36 }
 0x1f7   :  { %3522 = vmatpush1.bf16.msra.mxu0 %v5634_v24  ;;  %3850 = vmatpush1.bf16.msra.mxu1 %v5637_v37 }
 0x1f8   :  { %3523 = vmatprep.subr.bf16.mxu0 %v5642_v38  ;;  %3851 = vmatprep.subr.bf16.mxu1 %v5645_v40 }
 0x1fb   :  { %3524 = vmatpush1.bf16.msra.mxu0 %v5640_v41  ;;  %3852 = vmatpush1.bf16.msra.mxu1 %v5643_v29 }
 0x1fc   :  { %3525 = vmatprep.subr.bf16.mxu0 %v5648_v43  ;;  %3853 = vmatprep.subr.bf16.mxu1 %v5651_v44 }
 0x1ff   :  { %3526 = vmatpush1.bf16.msra.mxu0 %v5646_v35  ;;  %3854 = vmatpush1.bf16.msra.mxu1 %v5649_v46  ;;  %v4742_v46 = vld [vmem:[%s7481_s4] ss:$0 sm:$0xff] }
 0x200   :  { %4775 = vmatprep.subr.bf16.mxu0 %v5653_v47  ;;  %4797 = vmatprep.subr.bf16.mxu1 %v5654_v34 }
 0x202   :  { %3528 = vmatmul.mubr.bf16.vlgmr.msra.gmra.mrb[0].mxu0 %v7165_v45  ;;  %3856 = vmatmul.mubr.bf16.vlgmr.msra.gmra.mrb[0].mxu1 %v7165_v45  ;;  %v5662_v45 = vld [vmem:[%s7480_s3 + $0xd0] sm:$0xff]  }
 0x203   :  { %4776 = vmatpush3.bf16.msra.mxu0 %v5655_v49  ;;  %4798 = vmatpush3.bf16.msra.mxu1 %v5656_v48 }
 0x204   :  { %4777 = vmatprep.subr.bf16.mxu0 %v5657_v50  ;;  %4799 = vmatprep.subr.bf16.mxu1 %v5658_v51 }
 0x207   :  { %4778 = vmatpush3.bf16.msra.mxu0 %v5659_v52  ;;  %4800 = vmatpush3.bf16.msra.mxu1 %v5660_v39 }
 0x208   :  { %4779 = vmatprep.subr.bf16.mxu0 %v5661_v53  ;;  %4801 = vmatprep.subr.bf16.mxu1 %v5662_v45 }
 0x20b   :  { %4780 = vmatpush3.bf16.msra.mxu0 %v5663_v54  ;;  %4802 = vmatpush3.bf16.msra.mxu1 %v5664_v55 }
 0x20c   :  { %4781 = vmatprep.subr.bf16.mxu0 %v5665_v56  ;;  %4803 = vmatprep.subr.bf16.mxu1 %v5666_v57 }
 0x20f   :  { %4782 = vmatpush3.bf16.msra.mxu0 %v5667_v58  ;;  %4804 = vmatpush3.bf16.msra.mxu1 %v5668_v59 }
 0x210   :  { %4783 = vmatprep.subr.bf16.mxu0 %v5669_v60  ;;  %4805 = vmatprep.subr.bf16.mxu1 %v5670_v61 }
 0x213   :  { %4784 = vmatpush3.bf16.msra.mxu0 %v5671_v62  ;;  %4806 = vmatpush3.bf16.msra.mxu1 %v5672_v63 }
 0x214   :  { %4785 = vmatprep.subr.bf16.mxu0 %v5673_v0  ;;  %4807 = vmatprep.subr.bf16.mxu1 %v5674_v1 }
 0x217   :  { %4786 = vmatpush3.bf16.msra.mxu0 %v5675_v2  ;;  %4808 = vmatpush3.bf16.msra.mxu1 %v5676_v3 }
 0x218   :  { %4787 = vmatprep.subr.bf16.mxu0 %v5677_v4  ;;  %4809 = vmatprep.subr.bf16.mxu1 %v5678_v5 }
 0x21b   :  { %4788 = vmatpush3.bf16.msra.mxu0 %v5679_v6  ;;  %4810 = vmatpush3.bf16.msra.mxu1 %v5680_v7 }
 0x21c   :  { %4789 = vmatprep.subr.bf16.mxu0 %v5681_v8  ;;  %4811 = vmatprep.subr.bf16.mxu1 %v5682_v9 }
 0x21f   :  { %4790 = vmatpush3.bf16.msra.mxu0 %v5683_v10  ;;  %4812 = vmatpush3.bf16.msra.mxu1 %v5684_v11 }
 0x2d5   :  { %v3529_v19 = vpop.f32.mrb[0].mxu0  ;;  %v3857_v25 = vpop.f32.mrb[0].mxu1 }
 0x2d6   :  { %v4819_v12 = vadd.f32 %v3529_v19, %v543_v18  ;;  %v4821_v27 = vadd.f32 %v3857_v25, %v551_v20  ;;  %v3531_v28 = vpop.f32.mrb[1].mxu0  ;;  %v3859_v30 = vpop.f32.mrb[1].mxu1 }
 0x2d7   :  { %v4820_v31 = vadd.f32 %v3531_v28, %v547_v21  ;;  %v4822_v22 = vadd.f32 %v3859_v30, %v555_v23  ;;  %v3533_v32 = vpop.f32.mrb[2].mxu0  ;;  %v3861_v33 = vpop.f32.mrb[2].mxu1 }
 0x2d8   :  { %v3864_v26 = vmax.f32 %v4819_v12, 0.0  ;;  %v3866_v36 = vmax.f32 %v4821_v27, 0.0  ;;  %v3534_v24 = vpop.f32.mrb[3].mxu0  ;;  %v3862_v37 = vpop.f32.mrb[3].mxu1 }
 0x2d9   :  { %v3865_v38 = vmax.f32 %v4820_v31, 0.0  ;;  %v3867_v42 = vmax.f32 %v4822_v22, 0.0 }
 0x2da   :  { %v3868_v29 = vpack.c.bf16 %v3864_v26, %v3864_v26  ;;  %v3870_v43 = vpack.c.bf16 %v3866_v36, %v3866_v36 }
 0x2db   :  { %v3869_v40 = vpack.c.bf16 %v3865_v38, %v3865_v38  ;;  %v3871_v41 = vpack.c.bf16 %v3867_v42, %v3867_v42 }
 0x2dd   :  { %4167 = vmatprep.mubr.bf16.mxu0 %v3869_v40  ;;  %4207 = vmatprep.mubr.bf16.mxu1 %v3871_v41 }
 0x2de   :  { %4168 = vmatmul.mubr.bf16.vlgmr.msra.gmra.mrb[4].mxu0 %v3868_v29  ;;  %4208 = vmatmul.mubr.bf16.vlgmr.msra.gmra.mrb[4].mxu1 %v3870_v43 }
 0x3b1   :  { %v4791_v44 = vpop.f32.mrb[4].mxu0  ;;  %v4813_v35 = vpop.f32.mrb[4].mxu1 }
 0x3b2   :  { %v4792_v47 = vpop.f32.mrb[5].mxu0  ;;  %v4814_v34 = vpop.f32.mrb[5].mxu1 }
 0x3b3   :  { %v4793_v49 = vadd.f32 %v4792_v47, %v4791_v44  ;;  %v4815_v48 = vadd.f32 %v4814_v34, %v4813_v35  ;;  %v4794_v50 = vpop.f32.mrb[6].mxu0  ;;  %v4816_v51 = vpop.f32.mrb[6].mxu1 }
 0x3b4   :  { %v4795_v52 = vpop.f32.mrb[7].mxu0  ;;  %v4817_v39 = vpop.f32.mrb[7].mxu1 }
 0x3b5   :  { %v4170_v53 = vadd.f32 %v4793_v49, %v4742_v46 }
 0x3b7   :  { %v4210_v45 = vadd.f32 %v4815_v48, %v4170_v53 }
 0x3b9   :  { %4215 = vst [vmem:[#allocation2] sm:$0xf] %v4210_v45 }
 0x3ba   :  { %5696 = shalt.err (!%p5693_p4)
}
 0x3bb   :  { %s5697_s29 = scalar_lea.hbm %s7482_s5, 64 }
 0x3bc   :  { %p5698_p5 = scmp.ne.s32.totalorder %s7482_s5, %s5697_s29  ;;  %p5701_p6 = scmp.lt.u32.totalorder %s5697_s29, %s7482_s5 }
 0x3be   :  { %p5703_p7 = pnand %p5701_p6, %p5698_p5 }
 0x3c0   :  { %5706 = shalt.err (!%p5703_p7)
}
 0x3c1   :  { %4225 = dma.vmem_to_hbm [thread:$0]  %s4223_s26, 64, %s7482_s5, [#allocation3]  }
 0x3c2   :  { %5707 = dma.done.wait [#allocation3], 64  }
 0x3c3   :  { %5708 = vsyncadd [#allocation3], 4294967232 }
 0x3c4   :  { %4229 = vsyncpa [#allocation3], 1 }

</bundles_post_ra>
